<compile_context>
chip_gen: v6e
topology: v6e:2x2x1
jax: 0.10.0
libtpu: 0.0.40
codegen_flags: <defaults>
</compile_context>

<pallas_src>
import functools

import jax
import jax.numpy as jnp
from jax.experimental import pallas as pl
from jax.experimental.pallas import tpu as pltpu

NUM_JOINTS = 34
JOINTS_PER_GROUP = 4                       # 4 joints * 32 ch = 128 lanes = 1 vreg
NUM_GROUPS = 9                             # ceil(34 / 4); joints padded to 36
J_PAD = NUM_GROUPS * JOINTS_PER_GROUP      # 36


# ----------------------------------------------------------------------------
# Fused Pallas kernel
# ----------------------------------------------------------------------------
def _mlp3(z, w1_ref, b1_ref, w2_ref, b2_ref, w3_ref, b3_ref):
    z = jnp.maximum(
        jnp.dot(z, w1_ref[...], preferred_element_type=jnp.float32) + b1_ref[...], 0.0)
    z = jnp.maximum(
        jnp.dot(z, w2_ref[...], preferred_element_type=jnp.float32) + b2_ref[...], 0.0)
    return jnp.dot(z, w3_ref[...], preferred_element_type=jnp.float32) + b3_ref[...]


def _disc_kernel(with_bone, *refs):
    if with_bone:
        (x_ref, w1_ref, b1_ref, w2_ref, b2_ref, wh_ref, bh_ref,
         bt_ref, wb1_ref, bb1_ref, wb2_ref, bb2_ref, wb3_ref, bb3_ref,
         wa1_ref, ba1_ref, wa2_ref, ba2_ref, wa3_ref, ba3_ref,
         bn_ref, wn1_ref, bn1_ref, wn2_ref, bn2_ref, wn3_ref, bn3_ref,
         out_ref, feat_ref) = refs
    else:
        (x_ref, w1_ref, b1_ref, w2_ref, b2_ref, wh_ref, bh_ref,
         bt_ref, wb1_ref, bb1_ref, wb2_ref, bb2_ref, wb3_ref, bb3_ref,
         wa1_ref, ba1_ref, wa2_ref, ba2_ref, wa3_ref, ba3_ref,
         out_ref, feat_ref) = refs

    J = NUM_JOINTS
    B = out_ref.shape[0]          # real batch
    BP = feat_ref.shape[0]        # batch rows padded to a multiple of 8

    # --- 1x1 "convs" as block-diagonal matmuls over 4-joint lane groups ------
    # x: (NUM_GROUPS*BP, 36) f32  ->  h2: (NUM_GROUPS*BP, 128) f32
    x = x_ref[...]
    h1 = jnp.maximum(
        jnp.dot(x, w1_ref[...], preferred_element_type=jnp.float32) + b1_ref[...], 0.0)
    h2 = jnp.maximum(
        jnp.dot(h1, w2_ref[...], preferred_element_type=jnp.float32) + b2_ref[...], 0.0)

    # --- assemble the all-joints feature: 9 aligned, unmasked 128-lane stores.
    # h2 row block g (rows g*BP..g*BP+BP) holds joints 4g..4g+3 in its 128
    # lanes, so it lands verbatim at feat columns [g*128, (g+1)*128).
    for g in range(NUM_GROUPS):
        feat_ref[:, g * 128:(g + 1) * 128] = h2[g * BP:(g + 1) * BP, :]

    feat = feat_ref[:, :J * 32]                      # (BP, 1088) f32, drops 2 pad joints

    # --- 34 per-joint Linear(32->1) heads: one matmul vs the block-structured
    # (1088, 34) head weight, then a single lane-dense store of all scores.
    scores = jnp.dot(feat, wh_ref[...], preferred_element_type=jnp.float32) + bh_ref[...]
    out_ref[:, 0:J] = scores[:B, :]

    # --- betas branch: 41 -> 10 -> 5 -> 1 (f32, tiny) ------------------------
    out_ref[:, J:J + 1] = _mlp3(bt_ref[...], wb1_ref, bb1_ref,
                                wb2_ref, bb2_ref, wb3_ref, bb3_ref)

    # --- all-joints branch: 1088 -> 1024 -> 1024 -> 1 ------------------------
    # bf16 weights/activations on the MXU, f32 accumulation; bias/ReLU in f32.
    fb = feat.astype(jnp.bfloat16)
    a1 = jnp.maximum(
        jnp.dot(fb, wa1_ref[...], preferred_element_type=jnp.float32) + ba1_ref[...], 0.0)
    a2 = jnp.maximum(
        jnp.dot(a1.astype(jnp.bfloat16), wa2_ref[...],
                preferred_element_type=jnp.float32) + ba2_ref[...], 0.0)
    # Final 1024 -> 1 as a VPU multiply + lane reduce (avoids an N=1 f32 MXU op).
    all_out = jnp.sum(a2 * wa3_ref[...], axis=1, keepdims=True) + ba3_ref[...]
    out_ref[:, J + 1:J + 2] = all_out[:B, :]

    # --- bone branch: 24 -> 10 -> 5 -> 1 (f32, tiny) -------------------------
    if with_bone:
        out_ref[:, J + 2:J + 3] = _mlp3(bn_ref[...], wn1_ref, bn1_ref,
                                        wn2_ref, bn2_ref, wn3_ref, bn3_ref)


def discriminator_forward(kparams, poses, betas, bone=None):
    B = poses.shape[0]
    J = NUM_JOINTS
    with_bone = bone is not None
    BP = ((B + 7) // 8) * 8        # pad batch rows to a sublane multiple

    # Joint-group layout: row = g*BP + b, columns = 4 joints x 9 channels.
    # Padded joints (34,35) and padded batch rows are zero; their garbage
    # outputs are sliced away in the kernel.
    x = poses.reshape(B, J, 9).astype(jnp.float32)
    x = jnp.pad(x, ((0, BP - B), (0, J_PAD - J), (0, 0)))          # (BP, 36, 9)
    x = x.reshape(BP, NUM_GROUPS, JOINTS_PER_GROUP * 9)
    x = x.transpose(1, 0, 2).reshape(NUM_GROUPS * BP, JOINTS_PER_GROUP * 9)

    args = [x,
            kparams["w1_blk"], kparams["b1_blk"],
            kparams["w2_blk"], kparams["b2_blk"],
            kparams["w_head"], kparams["b_head"],
            betas.astype(jnp.float32),
            kparams["w_bfc1"], kparams["b_bfc1"],
            kparams["w_bfc2"], kparams["b_bfc2"],
            kparams["w_bout"], kparams["b_bout"],
            kparams["w_afc1"], kparams["b_afc1"],
            kparams["w_afc2"], kparams["b_afc2"],
            kparams["w_aout"], kparams["b_aout"]]
    if with_bone:
        args += [bone.astype(jnp.float32),
                 kparams["w_nfc1"], kparams["b_nfc1"],
                 kparams["w_nfc2"], kparams["b_nfc2"],
                 kparams["w_nout"], kparams["b_nout"]]

    n_out = J + 3 if with_bone else J + 2
    return pl.pallas_call(
        functools.partial(_disc_kernel, with_bone),
        out_shape=jax.ShapeDtypeStruct((B, n_out), jnp.float32),
        in_specs=[pl.BlockSpec(memory_space=pltpu.MemorySpace.VMEM)] * len(args),
        out_specs=pl.BlockSpec(memory_space=pltpu.MemorySpace.VMEM),
        scratch_shapes=[pltpu.VMEM((BP, NUM_GROUPS * 128), jnp.float32)],
    )(*args)


# ----------------------------------------------------------------------------
# Parameter init (deterministic, xavier-uniform like the PyTorch module)
# ----------------------------------------------------------------------------
def _xavier(key, fan_in, fan_out, shape):
    a = (6.0 / (fan_in + fan_out)) ** 0.5
    return jax.random.uniform(key, shape, jnp.float32, -a, a)


def init_params(key):
    """Base parameters; weights stored (in, out)."""
    ks = jax.random.split(key, 12)
    p = {}
    p["w_conv1"] = _xavier(ks[0], 9, 32, (9, 32));    p["b_conv1"] = jnp.zeros((32,), jnp.float32)
    p["w_conv2"] = _xavier(ks[1], 32, 32, (32, 32));  p["b_conv2"] = jnp.zeros((32,), jnp.float32)
    p["wp"] = _xavier(ks[2], 32, 1, (NUM_JOINTS, 32)); p["bp"] = jnp.zeros((NUM_JOINTS,), jnp.float32)
    p["w_bfc1"] = _xavier(ks[3], 41, 10, (41, 10));   p["b_bfc1"] = jnp.zeros((10,), jnp.float32)
    p["w_bfc2"] = _xavier(ks[4], 10, 5, (10, 5));     p["b_bfc2"] = jnp.zeros((5,), jnp.float32)
    p["w_bout"] = _xavier(ks[5], 5, 1, (5, 1));       p["b_bout"] = jnp.zeros((1,), jnp.float32)
    p["w_nfc1"] = _xavier(ks[6], 24, 10, (24, 10));   p["b_nfc1"] = jnp.zeros((10,), jnp.float32)
    p["w_nfc2"] = _xavier(ks[7], 10, 5, (10, 5));     p["b_nfc2"] = jnp.zeros((5,), jnp.float32)
    p["w_nout"] = _xavier(ks[8], 5, 1, (5, 1));       p["b_nout"] = jnp.zeros((1,), jnp.float32)
    # All-joints FC: rows of w_afc1 are in joint-major order (row = j*32 + c).
    # To import PyTorch weights apply the one-time row permutation
    #   w_afc1[j*32 + c, :] = W_pt.T[c*34 + j, :]  (PyTorch flattens channel-major).
    din = 32 * NUM_JOINTS
    p["w_afc1"] = _xavier(ks[9], din, 1024, (din, 1024));   p["b_afc1"] = jnp.zeros((1024,), jnp.float32)
    p["w_afc2"] = _xavier(ks[10], 1024, 1024, (1024, 1024)); p["b_afc2"] = jnp.zeros((1024,), jnp.float32)
    p["w_aout"] = _xavier(ks[11], 1024, 1, (1024, 1));       p["b_aout"] = jnp.zeros((1,), jnp.float32)
    return p


def prepare_kernel_params(p):
    """One-time repacking of base params into the kernel layout (free at runtime)."""
    J = NUM_JOINTS

    def blkdiag4(w):
        kin, kout = w.shape
        out = jnp.zeros((4 * kin, 4 * kout), w.dtype)
        for k in range(4):
            out = out.at[k * kin:(k + 1) * kin, k * kout:(k + 1) * kout].set(w)
        return out

    kp = {}
    # conv1/conv2 replicated block-diagonally over 4-joint lane groups.
    kp["w1_blk"] = blkdiag4(p["w_conv1"])                           # (36, 128)
    kp["b1_blk"] = jnp.tile(p["b_conv1"].reshape(1, 32), (1, 4))    # (1, 128)
    kp["w2_blk"] = blkdiag4(p["w_conv2"])                           # (128, 128)
    kp["b2_blk"] = jnp.tile(p["b_conv2"].reshape(1, 32), (1, 4))    # (1, 128)
    # 34 per-joint heads as one block-structured (1088, 34) weight.
    wh = jnp.zeros((J * 32, J), jnp.float32)
    rows = jnp.arange(J * 32)
    wh = wh.at[rows, rows // 32].set(p["wp"].reshape(-1))
    kp["w_head"] = wh
    kp["b_head"] = p["bp"].reshape(1, J)
    # Small MLP branches (row-vector biases).
    for name in ("bfc1", "bfc2", "bout", "nfc1", "nfc2", "nout"):
        kp["w_" + name] = p["w_" + name]
        kp["b_" + name] = p["b_" + name].reshape(1, -1)
    # Big all-joints FC weights streamed as bf16 (halves HBM weight traffic).
    # TODO(synk): int8 (v5e/v6e) / fp8 (v7x) weight-only quantization here.
    kp["w_afc1"] = p["w_afc1"].astype(jnp.bfloat16)
    kp["b_afc1"] = p["b_afc1"].reshape(1, -1)
    kp["w_afc2"] = p["w_afc2"].astype(jnp.bfloat16)
    kp["b_afc2"] = p["b_afc2"].reshape(1, -1)
    kp["w_aout"] = p["w_aout"].reshape(1, -1)                       # (1, 1024) for mul+reduce
    kp["b_aout"] = p["b_aout"].reshape(1, 1)
    return kp


# ----------------------------------------------------------------------------
# Pure-JAX reference (for correctness check)
# ----------------------------------------------------------------------------
def discriminator_reference(p, poses, betas, bone=None):
    B = poses.shape[0]
    J = NUM_JOINTS
    x = poses.reshape(B, J, 9).astype(jnp.float32)
    h1 = jnp.maximum(jnp.einsum('bjc,cd->bjd', x, p["w_conv1"]) + p["b_conv1"], 0.0)
    h2 = jnp.maximum(jnp.einsum('bjc,cd->bjd', h1, p["w_conv2"]) + p["b_conv2"], 0.0)
    poses_out = jnp.einsum('bjd,jd->bj', h2, p["wp"]) + p["bp"]          # (B, 34)

    def mlp3(z, w1, b1, w2, b2, w3, b3):
        z = jnp.maximum(z @ w1 + b1, 0.0)
        z = jnp.maximum(z @ w2 + b2, 0.0)
        return z @ w3 + b3

    betas_out = mlp3(betas.astype(jnp.float32), p["w_bfc1"], p["b_bfc1"],
                     p["w_bfc2"], p["b_bfc2"], p["w_bout"], p["b_bout"])

    feat = h2.reshape(B, J * 32)                   # joint-major flatten (j*32 + c)
    a1 = jnp.maximum(jnp.dot(feat.astype(jnp.bfloat16), p["w_afc1"].astype(jnp.bfloat16),
                             preferred_element_type=jnp.float32) + p["b_afc1"], 0.0)
    a2 = jnp.maximum(jnp.dot(a1.astype(jnp.bfloat16), p["w_afc2"].astype(jnp.bfloat16),
                             preferred_element_type=jnp.float32) + p["b_afc2"], 0.0)
    all_out = jnp.dot(a2, p["w_aout"]) + p["b_aout"]

    outs = [poses_out, betas_out, all_out]
    if bone is not None:
        outs.append(mlp3(bone.astype(jnp.float32), p["w_nfc1"], p["b_nfc1"],
                         p["w_nfc2"], p["b_nfc2"], p["w_nout"], p["b_nout"]))
    return jnp.concatenate(outs, axis=1)


# ----------------------------------------------------------------------------
# Main
# ----------------------------------------------------------------------------
if __name__ == "__main__":
    key = jax.random.PRNGKey(0)
    k_param, k_pose, k_beta, k_bone = jax.random.split(key, 4)

    base_params = init_params(k_param)
    kernel_params = prepare_kernel_params(base_params)

    B = 2
    poses = jax.random.normal(k_pose, (B, NUM_JOINTS, 3, 3), jnp.float32)
    betas = jax.random.normal(k_beta, (B, 41), jnp.float32)
    bone = jax.random.normal(k_bone, (B, 24), jnp.float32)

    # With bone: output (B, 37); without bone: output (B, 36).
    out_with_bone = jax.block_until_ready(discriminator_forward(kernel_params, poses, betas, bone))
    out_no_bone = jax.block_until_ready(discriminator_forward(kernel_params, poses, betas, None))

    ref_with_bone = discriminator_reference(base_params, poses, betas, bone)
    ref_no_bone = discriminator_reference(base_params, poses, betas, None)

    assert out_with_bone.shape == (B, NUM_JOINTS + 3)
    assert out_no_bone.shape == (B, NUM_JOINTS + 2)
    assert jnp.allclose(out_with_bone, ref_with_bone, rtol=1e-2, atol=1e-2)
    assert jnp.allclose(out_no_bone, ref_no_bone, rtol=1e-2, atol=1e-2)

    print("KERNEL_OK")
</pallas_src>

<mosaic_0001>
module attributes {stable_mosaic.version = 11 : i64} {
  func.func @_disc_kernel(%arg0: memref<72x36xf32, #tpu.memory_space<vmem>>, %arg1: memref<36x128xf32, #tpu.memory_space<vmem>>, %arg2: memref<1x128xf32, #tpu.memory_space<vmem>>, %arg3: memref<128x128xf32, #tpu.memory_space<vmem>>, %arg4: memref<1x128xf32, #tpu.memory_space<vmem>>, %arg5: memref<1088x34xf32, #tpu.memory_space<vmem>>, %arg6: memref<1x34xf32, #tpu.memory_space<vmem>>, %arg7: memref<2x41xf32, #tpu.memory_space<vmem>>, %arg8: memref<41x10xf32, #tpu.memory_space<vmem>>, %arg9: memref<1x10xf32, #tpu.memory_space<vmem>>, %arg10: memref<10x5xf32, #tpu.memory_space<vmem>>, %arg11: memref<1x5xf32, #tpu.memory_space<vmem>>, %arg12: memref<5x1xf32, #tpu.memory_space<vmem>>, %arg13: memref<1x1xf32, #tpu.memory_space<vmem>>, %arg14: memref<1088x1024xbf16, #tpu.memory_space<vmem>>, %arg15: memref<1x1024xf32, #tpu.memory_space<vmem>>, %arg16: memref<1024x1024xbf16, #tpu.memory_space<vmem>>, %arg17: memref<1x1024xf32, #tpu.memory_space<vmem>>, %arg18: memref<1x1024xf32, #tpu.memory_space<vmem>>, %arg19: memref<1x1xf32, #tpu.memory_space<vmem>>, %arg20: memref<2x24xf32, #tpu.memory_space<vmem>>, %arg21: memref<24x10xf32, #tpu.memory_space<vmem>>, %arg22: memref<1x10xf32, #tpu.memory_space<vmem>>, %arg23: memref<10x5xf32, #tpu.memory_space<vmem>>, %arg24: memref<1x5xf32, #tpu.memory_space<vmem>>, %arg25: memref<5x1xf32, #tpu.memory_space<vmem>>, %arg26: memref<1x1xf32, #tpu.memory_space<vmem>>, %arg27: memref<2x37xf32, #tpu.memory_space<vmem>>, %arg28: memref<8x1152xf32, #tpu.memory_space<vmem>>) attributes {dimension_semantics = [], scalar_prefetch = 0 : i64, scratch_operands = 1 : i64, tpu.core_type = #tpu.core_type<tc>} {
    %c0 = arith.constant 0 : index
    %c0_0 = arith.constant 0 : index
    %0 = vector.load %arg0[%c0, %c0_0] : memref<72x36xf32, #tpu.memory_space<vmem>>, vector<72x36xf32>
    %c0_1 = arith.constant 0 : index
    %c0_2 = arith.constant 0 : index
    %1 = vector.load %arg1[%c0_1, %c0_2] : memref<36x128xf32, #tpu.memory_space<vmem>>, vector<36x128xf32>
    %cst = arith.constant dense<0.000000e+00> : vector<72x128xf32>
    %2 = tpu.matmul %0, %1, %cst {dimension_numbers = #tpu.dot_dimension_numbers<[1], [0], [0], [1], [0, 0, 1, 1], [], []>} : vector<72x36xf32>, vector<36x128xf32>, vector<72x128xf32> -> vector<72x128xf32>
    %c0_3 = arith.constant 0 : index
    %c0_4 = arith.constant 0 : index
    %3 = vector.load %arg2[%c0_3, %c0_4] : memref<1x128xf32, #tpu.memory_space<vmem>>, vector<1x128xf32>
    %4 = vector.broadcast %3 : vector<1x128xf32> to vector<72x128xf32>
    %5 = arith.addf %2, %4 : vector<72x128xf32>
    %cst_5 = arith.constant 0.000000e+00 : f32
    %6 = vector.broadcast %cst_5 : f32 to vector<72x128xf32>
    %7 = arith.maximumf %5, %6 : vector<72x128xf32>
    %c0_6 = arith.constant 0 : index
    %c0_7 = arith.constant 0 : index
    %8 = vector.load %arg3[%c0_6, %c0_7] : memref<128x128xf32, #tpu.memory_space<vmem>>, vector<128x128xf32>
    %cst_8 = arith.constant dense<0.000000e+00> : vector<72x128xf32>
    %9 = tpu.matmul %7, %8, %cst_8 {dimension_numbers = #tpu.dot_dimension_numbers<[1], [0], [0], [1], [0, 0, 1, 1], [], []>} : vector<72x128xf32>, vector<128x128xf32>, vector<72x128xf32> -> vector<72x128xf32>
    %c0_9 = arith.constant 0 : index
    %c0_10 = arith.constant 0 : index
    %10 = vector.load %arg4[%c0_9, %c0_10] : memref<1x128xf32, #tpu.memory_space<vmem>>, vector<1x128xf32>
    %11 = vector.broadcast %10 : vector<1x128xf32> to vector<72x128xf32>
    %12 = arith.addf %9, %11 : vector<72x128xf32>
    %cst_11 = arith.constant 0.000000e+00 : f32
    %13 = vector.broadcast %cst_11 : f32 to vector<72x128xf32>
    %14 = arith.maximumf %12, %13 : vector<72x128xf32>
    %15 = vector.extract_strided_slice %14 {offsets = [0, 0], sizes = [8, 128], strides = [1, 1]} : vector<72x128xf32> to vector<8x128xf32>
    %c0_12 = arith.constant 0 : index
    %c0_13 = arith.constant 0 : index
    %16 = vector.load %arg28[%c0_12, %c0_13] : memref<8x1152xf32, #tpu.memory_space<vmem>>, vector<8x128xf32>
    tpu.vector_store %arg28[%c0_12, %c0_13], %15 {strides = array<i32>} : memref<8x1152xf32, #tpu.memory_space<vmem>>, vector<8x128xf32>,
    %17 = vector.extract_strided_slice %14 {offsets = [8, 0], sizes = [8, 128], strides = [1, 1]} : vector<72x128xf32> to vector<8x128xf32>
    %c0_14 = arith.constant 0 : index
    %c128 = arith.constant 128 : index
    %18 = vector.load %arg28[%c0_14, %c128] : memref<8x1152xf32, #tpu.memory_space<vmem>>, vector<8x128xf32>
    tpu.vector_store %arg28[%c0_14, %c128], %17 {strides = array<i32>} : memref<8x1152xf32, #tpu.memory_space<vmem>>, vector<8x128xf32>,
    %19 = vector.extract_strided_slice %14 {offsets = [16, 0], sizes = [8, 128], strides = [1, 1]} : vector<72x128xf32> to vector<8x128xf32>
    %c0_15 = arith.constant 0 : index
    %c256 = arith.constant 256 : index
    %20 = vector.load %arg28[%c0_15, %c256] : memref<8x1152xf32, #tpu.memory_space<vmem>>, vector<8x128xf32>
    tpu.vector_store %arg28[%c0_15, %c256], %19 {strides = array<i32>} : memref<8x1152xf32, #tpu.memory_space<vmem>>, vector<8x128xf32>,
    %21 = vector.extract_strided_slice %14 {offsets = [24, 0], sizes = [8, 128], strides = [1, 1]} : vector<72x128xf32> to vector<8x128xf32>
    %c0_16 = arith.constant 0 : index
    %c384 = arith.constant 384 : index
    %22 = vector.load %arg28[%c0_16, %c384] : memref<8x1152xf32, #tpu.memory_space<vmem>>, vector<8x128xf32>
    tpu.vector_store %arg28[%c0_16, %c384], %21 {strides = array<i32>} : memref<8x1152xf32, #tpu.memory_space<vmem>>, vector<8x128xf32>,
    %23 = vector.extract_strided_slice %14 {offsets = [32, 0], sizes = [8, 128], strides = [1, 1]} : vector<72x128xf32> to vector<8x128xf32>
    %c0_17 = arith.constant 0 : index
    %c512 = arith.constant 512 : index
    %24 = vector.load %arg28[%c0_17, %c512] : memref<8x1152xf32, #tpu.memory_space<vmem>>, vector<8x128xf32>
    tpu.vector_store %arg28[%c0_17, %c512], %23 {strides = array<i32>} : memref<8x1152xf32, #tpu.memory_space<vmem>>, vector<8x128xf32>,
    %25 = vector.extract_strided_slice %14 {offsets = [40, 0], sizes = [8, 128], strides = [1, 1]} : vector<72x128xf32> to vector<8x128xf32>
    %c0_18 = arith.constant 0 : index
    %c640 = arith.constant 640 : index
    %26 = vector.load %arg28[%c0_18, %c640] : memref<8x1152xf32, #tpu.memory_space<vmem>>, vector<8x128xf32>
    tpu.vector_store %arg28[%c0_18, %c640], %25 {strides = array<i32>} : memref<8x1152xf32, #tpu.memory_space<vmem>>, vector<8x128xf32>,
    %27 = vector.extract_strided_slice %14 {offsets = [48, 0], sizes = [8, 128], strides = [1, 1]} : vector<72x128xf32> to vector<8x128xf32>
    %c0_19 = arith.constant 0 : index
    %c768 = arith.constant 768 : index
    %28 = vector.load %arg28[%c0_19, %c768] : memref<8x1152xf32, #tpu.memory_space<vmem>>, vector<8x128xf32>
    tpu.vector_store %arg28[%c0_19, %c768], %27 {strides = array<i32>} : memref<8x1152xf32, #tpu.memory_space<vmem>>, vector<8x128xf32>,
    %29 = vector.extract_strided_slice %14 {offsets = [56, 0], sizes = [8, 128], strides = [1, 1]} : vector<72x128xf32> to vector<8x128xf32>
    %c0_20 = arith.constant 0 : index
    %c896 = arith.constant 896 : index
    %30 = vector.load %arg28[%c0_20, %c896] : memref<8x1152xf32, #tpu.memory_space<vmem>>, vector<8x128xf32>
    tpu.vector_store %arg28[%c0_20, %c896], %29 {strides = array<i32>} : memref<8x1152xf32, #tpu.memory_space<vmem>>, vector<8x128xf32>,
    %31 = vector.extract_strided_slice %14 {offsets = [64, 0], sizes = [8, 128], strides = [1, 1]} : vector<72x128xf32> to vector<8x128xf32>
    %c0_21 = arith.constant 0 : index
    %c1024 = arith.constant 1024 : index
    %32 = vector.load %arg28[%c0_21, %c1024] : memref<8x1152xf32, #tpu.memory_space<vmem>>, vector<8x128xf32>
    tpu.vector_store %arg28[%c0_21, %c1024], %31 {strides = array<i32>} : memref<8x1152xf32, #tpu.memory_space<vmem>>, vector<8x128xf32>,
    %c0_22 = arith.constant 0 : index
    %c0_23 = arith.constant 0 : index
    %33 = vector.load %arg28[%c0_22, %c0_23] : memref<8x1152xf32, #tpu.memory_space<vmem>>, vector<8x1088xf32>
    %c0_24 = arith.constant 0 : index
    %c0_25 = arith.constant 0 : index
    %34 = vector.load %arg5[%c0_24, %c0_25] : memref<1088x34xf32, #tpu.memory_space<vmem>>, vector<1088x34xf32>
    %cst_26 = arith.constant dense<0.000000e+00> : vector<8x34xf32>
    %35 = tpu.matmul %33, %34, %cst_26 {dimension_numbers = #tpu.dot_dimension_numbers<[1], [0], [0], [1], [0, 0, 1, 1], [], []>} : vector<8x1088xf32>, vector<1088x34xf32>, vector<8x34xf32> -> vector<8x34xf32>
    %c0_27 = arith.constant 0 : index
    %c0_28 = arith.constant 0 : index
    %36 = vector.load %arg6[%c0_27, %c0_28] : memref<1x34xf32, #tpu.memory_space<vmem>>, vector<1x34xf32>
    %37 = vector.broadcast %36 : vector<1x34xf32> to vector<8x34xf32>
    %38 = arith.addf %35, %37 : vector<8x34xf32>
    %39 = vector.extract_strided_slice %38 {offsets = [0, 0], sizes = [2, 34], strides = [1, 1]} : vector<8x34xf32> to vector<2x34xf32>
    %c0_29 = arith.constant 0 : index
    %c0_30 = arith.constant 0 : index
    %40 = vector.load %arg27[%c0_29, %c0_30] : memref<2x37xf32, #tpu.memory_space<vmem>>, vector<2x34xf32>
    tpu.vector_store %arg27[%c0_29, %c0_30], %39 {strides = array<i32>} : memref<2x37xf32, #tpu.memory_space<vmem>>, vector<2x34xf32>,
    %c0_31 = arith.constant 0 : index
    %c0_32 = arith.constant 0 : index
    %41 = vector.load %arg7[%c0_31, %c0_32] : memref<2x41xf32, #tpu.memory_space<vmem>>, vector<2x41xf32>
    %c0_33 = arith.constant 0 : index
    %c0_34 = arith.constant 0 : index
    %42 = vector.load %arg8[%c0_33, %c0_34] : memref<41x10xf32, #tpu.memory_space<vmem>>, vector<41x10xf32>
    %cst_35 = arith.constant dense<0.000000e+00> : vector<2x10xf32>
    %43 = tpu.matmul %41, %42, %cst_35 {dimension_numbers = #tpu.dot_dimension_numbers<[1], [0], [0], [1], [0, 0, 1, 1], [], []>} : vector<2x41xf32>, vector<41x10xf32>, vector<2x10xf32> -> vector<2x10xf32>
    %c0_36 = arith.constant 0 : index
    %c0_37 = arith.constant 0 : index
    %44 = vector.load %arg9[%c0_36, %c0_37] : memref<1x10xf32, #tpu.memory_space<vmem>>, vector<1x10xf32>
    %45 = vector.broadcast %44 : vector<1x10xf32> to vector<2x10xf32>
    %46 = arith.addf %43, %45 : vector<2x10xf32>
    %cst_38 = arith.constant 0.000000e+00 : f32
    %47 = vector.broadcast %cst_38 : f32 to vector<2x10xf32>
    %48 = arith.maximumf %46, %47 : vector<2x10xf32>
    %c0_39 = arith.constant 0 : index
    %c0_40 = arith.constant 0 : index
    %49 = vector.load %arg10[%c0_39, %c0_40] : memref<10x5xf32, #tpu.memory_space<vmem>>, vector<10x5xf32>
    %cst_41 = arith.constant dense<0.000000e+00> : vector<2x5xf32>
    %50 = tpu.matmul %48, %49, %cst_41 {dimension_numbers = #tpu.dot_dimension_numbers<[1], [0], [0], [1], [0, 0, 1, 1], [], []>} : vector<2x10xf32>, vector<10x5xf32>, vector<2x5xf32> -> vector<2x5xf32>
    %c0_42 = arith.constant 0 : index
    %c0_43 = arith.constant 0 : index
    %51 = vector.load %arg11[%c0_42, %c0_43] : memref<1x5xf32, #tpu.memory_space<vmem>>, vector<1x5xf32>
    %52 = vector.broadcast %51 : vector<1x5xf32> to vector<2x5xf32>
    %53 = arith.addf %50, %52 : vector<2x5xf32>
    %cst_44 = arith.constant 0.000000e+00 : f32
    %54 = vector.broadcast %cst_44 : f32 to vector<2x5xf32>
    %55 = arith.maximumf %53, %54 : vector<2x5xf32>
    %c0_45 = arith.constant 0 : index
    %c0_46 = arith.constant 0 : index
    %56 = vector.load %arg12[%c0_45, %c0_46] : memref<5x1xf32, #tpu.memory_space<vmem>>, vector<5x1xf32>
    %cst_47 = arith.constant dense<0.000000e+00> : vector<2x1xf32>
    %57 = tpu.matmul %55, %56, %cst_47 {dimension_numbers = #tpu.dot_dimension_numbers<[1], [0], [0], [1], [0, 0, 1, 1], [], []>} : vector<2x5xf32>, vector<5x1xf32>, vector<2x1xf32> -> vector<2x1xf32>
    %c0_48 = arith.constant 0 : index
    %c0_49 = arith.constant 0 : index
    %58 = vector.load %arg13[%c0_48, %c0_49] : memref<1x1xf32, #tpu.memory_space<vmem>>, vector<1x1xf32>
    %59 = vector.broadcast %58 : vector<1x1xf32> to vector<2x1xf32>
    %60 = arith.addf %57, %59 : vector<2x1xf32>
    %c0_50 = arith.constant 0 : index
    %c34 = arith.constant 34 : index
    %61 = vector.load %arg27[%c0_50, %c34] : memref<2x37xf32, #tpu.memory_space<vmem>>, vector<2x1xf32>
    tpu.vector_store %arg27[%c0_50, %c34], %60 {strides = array<i32>} : memref<2x37xf32, #tpu.memory_space<vmem>>, vector<2x1xf32>,
    %62 = arith.truncf %33 : vector<8x1088xf32> to vector<8x1088xbf16>
    %c0_51 = arith.constant 0 : index
    %c0_52 = arith.constant 0 : index
    %63 = vector.load %arg14[%c0_51, %c0_52] : memref<1088x1024xbf16, #tpu.memory_space<vmem>>, vector<1088x1024xbf16>
    %cst_53 = arith.constant dense<0.000000e+00> : vector<8x1024xf32>
    %64 = tpu.matmul %62, %63, %cst_53 {dimension_numbers = #tpu.dot_dimension_numbers<[1], [0], [0], [1], [0, 0, 1, 1], [], []>} : vector<8x1088xbf16>, vector<1088x1024xbf16>, vector<8x1024xf32> -> vector<8x1024xf32>
    %c0_54 = arith.constant 0 : index
    %c0_55 = arith.constant 0 : index
    %65 = vector.load %arg15[%c0_54, %c0_55] : memref<1x1024xf32, #tpu.memory_space<vmem>>, vector<1x1024xf32>
    %66 = vector.broadcast %65 : vector<1x1024xf32> to vector<8x1024xf32>
    %67 = arith.addf %64, %66 : vector<8x1024xf32>
    %cst_56 = arith.constant 0.000000e+00 : f32
    %68 = vector.broadcast %cst_56 : f32 to vector<8x1024xf32>
    %69 = arith.maximumf %67, %68 : vector<8x1024xf32>
    %70 = arith.truncf %69 : vector<8x1024xf32> to vector<8x1024xbf16>
    %c0_57 = arith.constant 0 : index
    %c0_58 = arith.constant 0 : index
    %71 = vector.load %arg16[%c0_57, %c0_58] : memref<1024x1024xbf16, #tpu.memory_space<vmem>>, vector<1024x1024xbf16>
    %cst_59 = arith.constant dense<0.000000e+00> : vector<8x1024xf32>
    %72 = tpu.matmul %70, %71, %cst_59 {dimension_numbers = #tpu.dot_dimension_numbers<[1], [0], [0], [1], [0, 0, 1, 1], [], []>} : vector<8x1024xbf16>, vector<1024x1024xbf16>, vector<8x1024xf32> -> vector<8x1024xf32>
    %c0_60 = arith.constant 0 : index
    %c0_61 = arith.constant 0 : index
    %73 = vector.load %arg17[%c0_60, %c0_61] : memref<1x1024xf32, #tpu.memory_space<vmem>>, vector<1x1024xf32>
    %74 = vector.broadcast %73 : vector<1x1024xf32> to vector<8x1024xf32>
    %75 = arith.addf %72, %74 : vector<8x1024xf32>
    %cst_62 = arith.constant 0.000000e+00 : f32
    %76 = vector.broadcast %cst_62 : f32 to vector<8x1024xf32>
    %77 = arith.maximumf %75, %76 : vector<8x1024xf32>
    %c0_63 = arith.constant 0 : index
    %c0_64 = arith.constant 0 : index
    %78 = vector.load %arg18[%c0_63, %c0_64] : memref<1x1024xf32, #tpu.memory_space<vmem>>, vector<1x1024xf32>
    %79 = vector.broadcast %78 : vector<1x1024xf32> to vector<8x1024xf32>
    %80 = arith.mulf %77, %79 : vector<8x1024xf32>
    %cst_65 = arith.constant dense<0.000000e+00> : vector<8xf32>
    %81 = vector.multi_reduction <add>, %80, %cst_65 [1] : vector<8x1024xf32> to vector<8xf32>
    %82 = vector.shape_cast %81 : vector<8xf32> to vector<8x1xf32>
    %c0_66 = arith.constant 0 : index
    %c0_67 = arith.constant 0 : index
    %83 = vector.load %arg19[%c0_66, %c0_67] : memref<1x1xf32, #tpu.memory_space<vmem>>, vector<1x1xf32>
    %84 = vector.broadcast %83 : vector<1x1xf32> to vector<8x1xf32>
    %85 = arith.addf %82, %84 : vector<8x1xf32>
    %86 = vector.extract_strided_slice %85 {offsets = [0, 0], sizes = [2, 1], strides = [1, 1]} : vector<8x1xf32> to vector<2x1xf32>
    %c0_68 = arith.constant 0 : index
    %c35 = arith.constant 35 : index
    %87 = vector.load %arg27[%c0_68, %c35] : memref<2x37xf32, #tpu.memory_space<vmem>>, vector<2x1xf32>
    tpu.vector_store %arg27[%c0_68, %c35], %86 {strides = array<i32>} : memref<2x37xf32, #tpu.memory_space<vmem>>, vector<2x1xf32>,
    %c0_69 = arith.constant 0 : index
    %c0_70 = arith.constant 0 : index
    %88 = vector.load %arg20[%c0_69, %c0_70] : memref<2x24xf32, #tpu.memory_space<vmem>>, vector<2x24xf32>
    %c0_71 = arith.constant 0 : index
    %c0_72 = arith.constant 0 : index
    %89 = vector.load %arg21[%c0_71, %c0_72] : memref<24x10xf32, #tpu.memory_space<vmem>>, vector<24x10xf32>
    %cst_73 = arith.constant dense<0.000000e+00> : vector<2x10xf32>
    %90 = tpu.matmul %88, %89, %cst_73 {dimension_numbers = #tpu.dot_dimension_numbers<[1], [0], [0], [1], [0, 0, 1, 1], [], []>} : vector<2x24xf32>, vector<24x10xf32>, vector<2x10xf32> -> vector<2x10xf32>
    %c0_74 = arith.constant 0 : index
    %c0_75 = arith.constant 0 : index
    %91 = vector.load %arg22[%c0_74, %c0_75] : memref<1x10xf32, #tpu.memory_space<vmem>>, vector<1x10xf32>
    %92 = vector.broadcast %91 : vector<1x10xf32> to vector<2x10xf32>
    %93 = arith.addf %90, %92 : vector<2x10xf32>
    %cst_76 = arith.constant 0.000000e+00 : f32
    %94 = vector.broadcast %cst_76 : f32 to vector<2x10xf32>
    %95 = arith.maximumf %93, %94 : vector<2x10xf32>
    %c0_77 = arith.constant 0 : index
    %c0_78 = arith.constant 0 : index
    %96 = vector.load %arg23[%c0_77, %c0_78] : memref<10x5xf32, #tpu.memory_space<vmem>>, vector<10x5xf32>
    %cst_79 = arith.constant dense<0.000000e+00> : vector<2x5xf32>
    %97 = tpu.matmul %95, %96, %cst_79 {dimension_numbers = #tpu.dot_dimension_numbers<[1], [0], [0], [1], [0, 0, 1, 1], [], []>} : vector<2x10xf32>, vector<10x5xf32>, vector<2x5xf32> -> vector<2x5xf32>
    %c0_80 = arith.constant 0 : index
    %c0_81 = arith.constant 0 : index
    %98 = vector.load %arg24[%c0_80, %c0_81] : memref<1x5xf32, #tpu.memory_space<vmem>>, vector<1x5xf32>
    %99 = vector.broadcast %98 : vector<1x5xf32> to vector<2x5xf32>
    %100 = arith.addf %97, %99 : vector<2x5xf32>
    %cst_82 = arith.constant 0.000000e+00 : f32
    %101 = vector.broadcast %cst_82 : f32 to vector<2x5xf32>
    %102 = arith.maximumf %100, %101 : vector<2x5xf32>
    %c0_83 = arith.constant 0 : index
    %c0_84 = arith.constant 0 : index
    %103 = vector.load %arg25[%c0_83, %c0_84] : memref<5x1xf32, #tpu.memory_space<vmem>>, vector<5x1xf32>
    %cst_85 = arith.constant dense<0.000000e+00> : vector<2x1xf32>
    %104 = tpu.matmul %102, %103, %cst_85 {dimension_numbers = #tpu.dot_dimension_numbers<[1], [0], [0], [1], [0, 0, 1, 1], [], []>} : vector<2x5xf32>, vector<5x1xf32>, vector<2x1xf32> -> vector<2x1xf32>
    %c0_86 = arith.constant 0 : index
    %c0_87 = arith.constant 0 : index
    %105 = vector.load %arg26[%c0_86, %c0_87] : memref<1x1xf32, #tpu.memory_space<vmem>>, vector<1x1xf32>
    %106 = vector.broadcast %105 : vector<1x1xf32> to vector<2x1xf32>
    %107 = arith.addf %104, %106 : vector<2x1xf32>
    %c0_88 = arith.constant 0 : index
    %c36 = arith.constant 36 : index
    %108 = vector.load %arg27[%c0_88, %c36] : memref<2x37xf32, #tpu.memory_space<vmem>>, vector<2x1xf32>
    tpu.vector_store %arg27[%c0_88, %c36], %107 {strides = array<i32>} : memref<2x37xf32, #tpu.memory_space<vmem>>, vector<2x1xf32>,
    return
  }
}

</mosaic_0001>

<bundles_post_ra>
// kernel: tpu_custom_call.1
= control target key start
LH: loop header
LB: loop body
LE: loop exit
PB: predicated region body
PF: predicated region fallthrough
CT: control target
= control target key end

     0   :  { %s12799_s0 = inlined_call_operand.vmem [shape: f32[72,36], index: 0, kind: input, shape index: {}]   ;;  %s12800_s1 = inlined_call_operand.hbm [shape: f32[36,128], index: 1, kind: input, shape index: {}]   ;;  %s12801_s2 = inlined_call_operand.hbm [shape: f32[1,128], index: 2, kind: input, shape index: {}]   ;;  %s12802_s3 = inlined_call_operand.hbm [shape: f32[128,128], index: 3, kind: input, shape index: {}]   ;;  %s12803_s4 = inlined_call_operand.hbm [shape: f32[1,128], index: 4, kind: input, shape index: {}]   ;;  %s12804_s5 = inlined_call_operand.vmem [shape: f32[1088,34], index: 5, kind: input, shape index: {}]   ;;  %s12805_s6 = inlined_call_operand.hbm [shape: f32[1,34], index: 6, kind: input, shape index: {}]   ;;  %s12806_s7 = inlined_call_operand.hbm [shape: f32[2,41], index: 7, kind: input, shape index: {}]   ;;  %s12807_s8 = inlined_call_operand.vmem [shape: f32[41,10], index: 8, kind: input, shape index: {}]   ;;  %s12808_s9 = inlined_call_operand.hbm [shape: f32[1,10], index: 9, kind: input, shape index: {}]   ;;  %s12809_s10 = inlined_call_operand.vmem [shape: f32[10,5], index: 10, kind: input, shape index: {}]   ;;  %s12810_s11 = inlined_call_operand.hbm [shape: f32[1,5], index: 11, kind: input, shape index: {}]   ;;  %s12811_s12 = inlined_call_operand.vmem [shape: f32[5,1], index: 12, kind: input, shape index: {}]   ;;  %s12812_s13 = inlined_call_operand.<no memory space> [shape: f32[1,1], index: 13, kind: input, shape index: {}]   ;;  %s12813_s14 = inlined_call_operand.hbm [shape: bf16[1088,1024], index: 14, kind: input, shape index: {}]   ;;  %s12814_s15 = inlined_call_operand.hbm [shape: f32[1,1024], index: 15, kind: input, shape index: {}]   ;;  %s12815_s16 = inlined_call_operand.hbm [shape: bf16[1024,1024], index: 16, kind: input, shape index: {}]   ;;  %s12816_s17 = inlined_call_operand.hbm [shape: f32[1,1024], index: 17, kind: input, shape index: {}]   ;;  %s12817_s18 = inlined_call_operand.hbm [shape: f32[1,1024], index: 18, kind: input, shape index: {}]   ;;  %s12818_s20 = inlined_call_operand.hbm [shape: f32[2,24], index: 20, kind: input, shape index: {}]   ;;  %s12819_s21 = inlined_call_operand.vmem [shape: f32[24,10], index: 21, kind: input, shape index: {}]   ;;  %s12820_s22 = inlined_call_operand.hbm [shape: f32[1,10], index: 22, kind: input, shape index: {}]   ;;  %s12821_s23 = inlined_call_operand.vmem [shape: f32[10,5], index: 23, kind: input, shape index: {}]   ;;  %s12822_s24 = inlined_call_operand.hbm [shape: f32[1,5], index: 24, kind: input, shape index: {}]   ;;  %s12823_s25 = inlined_call_operand.vmem [shape: f32[5,1], index: 25, kind: input, shape index: {}]   ;;  %s12824_s27 = inlined_call_operand.hbm [shape: f32[2,37], index: 27, kind: output, shape index: {}]   ;;  %s12825_s19 = inlined_call_operand.<no memory space> [shape: f32[1,1], index: 19, kind: input, shape index: {}]   ;;  %s12826_s26 = inlined_call_operand.<no memory space> [shape: f32[1,1], index: 26, kind: input, shape index: {}]  }
   0x1   :  { %12831 = sst [smem:[#allocation43_spill]] %s12799_s0  ;;  %v32_v0 = vstv %s12812_s13  ;;  %v34_v1 = vstv %s12825_s19  ;;  %v36_v2 = vstv %s12826_s26 }
   0x2   :  { %12832 = sst [smem:[#allocation44_spill]] %s12800_s1  ;;  %33 = vst [vmem:[#allocation3] sm:$0x1] %v32_v0  ;;  %35 = vst [vmem:[#allocation4] sm:$0x1] %v34_v1 }
   0x3   :  { %12833 = sst [smem:[#allocation45_spill]] %s12801_s2  ;;  %37 = vst [vmem:[#allocation5] sm:$0x1] %v36_v2 }
   0x4   :  { %12834 = sst [smem:[#allocation46_spill]] %s12802_s3 }
   0x5   :  { %12835 = sst [smem:[#allocation47_spill]] %s12803_s4 }
   0x6   :  { %12836 = sst [smem:[#allocation48_spill]] %s12804_s5 }
   0x7   :  { %12837 = sst [smem:[#allocation49_spill]] %s12805_s6 }
   0x8   :  { %12838 = sst [smem:[#allocation50_spill]] %s12806_s7 }
   0x9   :  { %12839 = sst [smem:[#allocation51_spill]] %s12807_s8 }
   0xa   :  { %12840 = sst [smem:[#allocation52_spill]] %s12808_s9 }
   0xb   :  { %12841 = sst [smem:[#allocation53_spill]] %s12809_s10 }
   0xc   :  { %12842 = sst [smem:[#allocation54_spill]] %s12810_s11 }
   0xd   :  { %38 = vsyncpa [#allocation7], 0 }
   0xe   :  { %39 = vsyncpa [#allocation10], 0 }
   0xf   :  { %40 = vsyncpa [#allocation13], 0 }
  0x10   :  { %41 = vsyncpa [#allocation16], 0 }
  0x11   :  { %42 = vsyncpa [#allocation19], 0 }
  0x12   :  { %43 = vsyncpa [#allocation22], 0 }
  0x13   :  { %44 = vsyncpa [#allocation25], 0 }
  0x14   :  { %45 = vsyncpa [#allocation28], 0 }
  0x15   :  { %46 = vsyncpa [#allocation31], 0 }
  0x16   :  { %47 = vsyncpa [#allocation8], 0  ;;  %s11534_s13 = smov [#allocation9]   ;;  %s11535_s19 = smov [#allocation12]  }
  0x17   :  { %s68_s28 = sshll.u32 %s11534_s13, 4  ;;  %s90_s0 = sshll.u32 %s11535_s19, 4  ;;  %s69_s28 = int_to_ptr.vmem [resolvable:$true] %s68_s28  ;;  %s91_s0 = int_to_ptr.vmem [resolvable:$true] %s90_s0 }
  0x18   :  { %s11182_s26 = scalar_lea.vmem %s69_s28, 16  ;;  %s11186_s10 = scalar_lea.vmem %s69_s28, 32 }
  0x19   :  { %p11183_p0 = scmp.ne.s32.totalorder %s69_s28, %s11182_s26  ;;  %p11187_p1 = scmp.lt.s32.totalorder %s69_s28, %s69_s28 }
  0x1a   :  { %p11188_p2 = scmp.lt.s32.totalorder %s11186_s10, %s11182_s26 }
  0x1c   :  { %p11189_p3 = por %p11188_p2, %p11187_p1 }
  0x1e   :  { %p11190_p4 = pnand %p11189_p3, %p11183_p0 }
  0x20   :  { %11193 = shalt.err (!%p11190_p4)
}
  0x21   :  { %s12843_s6 = sld [smem:[#allocation45_spill]]  ;;  %s11202_s11 = scalar_lea.vmem %s91_s0, 16 }
  0x22   :  { %p11203_p5 = scmp.ne.s32.totalorder %s91_s0, %s11202_s11  ;;  %s11206_s2 = scalar_lea.vmem %s91_s0, 32 }
  0x23   :  { %p11207_p6 = scmp.lt.s32.totalorder %s91_s0, %s91_s0  ;;  %p11208_p7 = scmp.lt.s32.totalorder %s11206_s2, %s11202_s11 }
  0x25   :  { %p11209_p8 = por %p11208_p7, %p11207_p6 }
  0x27   :  { %71 = dma.hbm_to_vmem [thread:$0]  %s12843_s6, 16, %s69_s28, [#allocation10]  }
  0x28   :  { %p11210_p9 = pnand %p11209_p8, %p11203_p5 }
  0x2a   :  { %11213 = shalt.err (!%p11210_p9)
}
  0x2b   :  { %s12844_s4 = sld [smem:[#allocation47_spill]]  ;;  %s11536_s8 = smov [#allocation15]  }
  0x2c   :  { %s112_s30 = sshll.u32 %s11536_s8, 4  ;;  %s11537_s9 = smov [#allocation18]   ;;  %s113_s30 = int_to_ptr.vmem [resolvable:$true] %s112_s30 }
  0x2d   :  { %s136_s5 = sshll.u32 %s11537_s9, 4  ;;  %s11222_s13 = scalar_lea.vmem %s113_s30, 32  ;;  %s137_s5 = int_to_ptr.vmem [resolvable:$true] %s136_s5 }
  0x2e   :  { %p11223_p10 = scmp.ne.s32.totalorder %s113_s30, %s11222_s13  ;;  %p11227_p11 = scmp.lt.s32.totalorder %s113_s30, %s113_s30 }
  0x2f   :  { %p11228_p12 = scmp.lt.s32.totalorder %s11222_s13, %s11222_s13 }
  0x31   :  { %93 = dma.hbm_to_vmem [thread:$0]  %s12844_s4, 16, %s91_s0, [#allocation13]  }
  0x32   :  { %p11229_p13 = por %p11228_p12, %p11227_p11 }
  0x34   :  { %p11230_p0 = pnand %p11229_p13, %p11223_p10 }
  0x36   :  { %11233 = shalt.err (!%p11230_p0)
}
  0x37   :  { %s12845_s26 = sld [smem:[#allocation50_spill]]  ;;  %s11242_s10 = scalar_lea.vmem %s137_s5, 16 }
  0x38   :  { %p11243_p1 = scmp.ne.s32.totalorder %s137_s5, %s11242_s10  ;;  %s11246_s0 = scalar_lea.vmem %s137_s5, 32 }
  0x39   :  { %p11247_p2 = scmp.lt.s32.totalorder %s137_s5, %s137_s5  ;;  %p11248_p3 = scmp.lt.s32.totalorder %s11246_s0, %s11242_s10 }
  0x3b   :  { %p11249_p4 = por %p11248_p3, %p11247_p2 }
  0x3d   :  { %115 = dma.hbm_to_vmem [thread:$0]  %s12845_s26, 32, %s113_s30, [#allocation16]  }
  0x3e   :  { %p11250_p5 = pnand %p11249_p4, %p11243_p1 }
  0x40   :  { %11253 = shalt.err (!%p11250_p5)
}
  0x41   :  { %s12846_s6 = sld [smem:[#allocation54_spill]]  ;;  %s11538_s11 = smov [#allocation21]  }
  0x42   :  { %s162_s2 = sshll.u32 %s11538_s11, 4  ;;  %s11539_s3 = smov [#allocation24]   ;;  %s163_s2 = int_to_ptr.vmem [resolvable:$true] %s162_s2 }
  0x43   :  { %s184_s7 = sshll.u32 %s11539_s3, 4  ;;  %s11262_s4 = scalar_lea.vmem %s163_s2, 128  ;;  %s185_s7 = int_to_ptr.vmem [resolvable:$true] %s184_s7 }
  0x44   :  { %p11263_p6 = scmp.ne.s32.totalorder %s163_s2, %s11262_s4  ;;  %p11267_p7 = scmp.lt.s32.totalorder %s163_s2, %s163_s2 }
  0x45   :  { %p11268_p8 = scmp.lt.s32.totalorder %s11262_s4, %s11262_s4 }
  0x47   :  { %139 = dma.hbm_to_vmem [thread:$0]  %s12846_s6, 16, %s137_s5, [#allocation19]  }
  0x48   :  { %p11269_p9 = por %p11268_p8, %p11267_p7 }
  0x4a   :  { %p11270_p10 = pnand %p11269_p9, %p11263_p6 }
  0x4c   :  { %11273 = shalt.err (!%p11270_p10)
}
  0x4d   :  { %165 = dma.hbm_to_vmem [thread:$0]  %s12814_s15, 128, %s163_s2, [#allocation22]  }
  0x4e   :  { %s11282_s9 = scalar_lea.vmem %s185_s7, 128  ;;  %p11287_p12 = scmp.lt.s32.totalorder %s185_s7, %s185_s7 }
  0x4f   :  { %p11283_p11 = scmp.ne.s32.totalorder %s185_s7, %s11282_s9  ;;  %p11288_p13 = scmp.lt.s32.totalorder %s11282_s9, %s11282_s9 }
  0x51   :  { %p11289_p0 = por %p11288_p13, %p11287_p12 }
  0x53   :  { %p11290_p1 = pnand %p11289_p0, %p11283_p11 }
  0x55   :  { %11293 = shalt.err (!%p11290_p1)
}
  0x56   :  { %187 = dma.hbm_to_vmem [thread:$0]  %s12816_s17, 128, %s185_s7, [#allocation25]  }
  0x57   :  { %s11540_s28 = smov [#allocation27]   ;;  %s11541_s26 = smov [#allocation6]  }
  0x58   :  { %s206_s19 = sshll.u32 %s11540_s28, 4  ;;  %s55_s10 = sshll.u32 %s11541_s26, 4  ;;  %s207_s19 = int_to_ptr.vmem [resolvable:$true] %s206_s19  ;;  %s56_s10 = int_to_ptr.vmem [resolvable:$true] %s55_s10 }
  0x59   :  { %s11302_s0 = scalar_lea.vmem %s207_s19, 32  ;;  %p11307_p3 = scmp.lt.s32.totalorder %s207_s19, %s207_s19 }
  0x5a   :  { %p11303_p2 = scmp.ne.s32.totalorder %s207_s19, %s11302_s0  ;;  %p11308_p4 = scmp.lt.s32.totalorder %s11302_s0, %s11302_s0 }
  0x5c   :  { %p11309_p5 = por %p11308_p4, %p11307_p3 }
  0x5e   :  { %p11310_p6 = pnand %p11309_p5, %p11303_p2 }
  0x60   :  { %11313 = shalt.err (!%p11310_p6)
}
  0x61   :  { %209 = dma.hbm_to_vmem [thread:$0]  %s12818_s20, 32, %s207_s19, [#allocation28]  }
  0x62   :  { %s11322_s1 = scalar_lea.vmem %s56_s10, 640  ;;  %p11327_p8 = scmp.lt.s32.totalorder %s56_s10, %s56_s10 }
  0x63   :  { %p11323_p7 = scmp.ne.s32.totalorder %s56_s10, %s11322_s1  ;;  %p11328_p9 = scmp.lt.s32.totalorder %s11322_s1, %s11322_s1 }
  0x65   :  { %p11329_p10 = por %p11328_p9, %p11327_p8 }
  0x67   :  { %p11330_p11 = pnand %p11329_p10, %p11323_p7 }
  0x69   :  { %11333 = shalt.err (!%p11330_p11)
}
  0x6a   :  { %s11542_s17 = smov 128   ;;  %s11543_s6 = smov 8  }
  0x6b   :  { %s12847_s3 = sld [smem:[#allocation44_spill]]  ;;  %s11544_s7 = smov [#allocation11]  }
  0x6c   :  { %s77_s4 = sshll.u32 %s11544_s7, 4  ;;  %s11545_s8 = smov [#allocation14]   ;;  %s78_s4 = int_to_ptr.vmem [resolvable:$true] %s77_s4 }
  0x6d   :  { %s102_s30 = sshll.u32 %s11545_s8, 4  ;;  %s11342_s20 = scalar_lea.vmem %s78_s4, 2048  ;;  %s103_s30 = int_to_ptr.vmem [resolvable:$true] %s102_s30 }
  0x6e   :  { %p11343_p12 = scmp.ne.s32.totalorder %s78_s4, %s11342_s20  ;;  %p11347_p13 = scmp.lt.s32.totalorder %s78_s4, %s78_s4 }
  0x6f   :  { %p11348_p0 = scmp.lt.s32.totalorder %s11342_s20, %s11342_s20 }
  0x71   :  { %61 = dma.hbm_to_vmem [thread:$0]  %s12847_s3, 640, %s56_s10, [#allocation7], %s11542_s17, %s11542_s17, %s11543_s6  }
  0x72   :  { %p11349_p1 = por %p11348_p0, %p11347_p13 }
  0x74   :  { %p11350_p2 = pnand %p11349_p1, %p11343_p12 }
  0x76   :  { %11353 = shalt.err (!%p11350_p2)
}
  0x77   :  { %s12848_s13 = sld [smem:[#allocation46_spill]]  ;;  %s11362_s28 = scalar_lea.vmem %s103_s30, 16 }
  0x78   :  { %p11363_p3 = scmp.ne.s32.totalorder %s103_s30, %s11362_s28  ;;  %s11366_s19 = scalar_lea.vmem %s103_s30, 32 }
  0x79   :  { %p11367_p4 = scmp.lt.s32.totalorder %s103_s30, %s103_s30  ;;  %p11368_p5 = scmp.lt.s32.totalorder %s11366_s19, %s11362_s28 }
  0x7b   :  { %p11369_p6 = por %p11368_p5, %p11367_p4 }
  0x7d   :  { %83 = dma.hbm_to_vmem [thread:$0]  %s12848_s13, 2048, %s78_s4, [#allocation10], %s11542_s17, %s11542_s17, %s11543_s6  }
  0x7e   :  { %p11370_p7 = pnand %p11369_p6, %p11363_p3 }
  0x80   :  { %11373 = shalt.err (!%p11370_p7)
}
  0x81   :  { %s12849_s0 = sld [smem:[#allocation49_spill]]  ;;  %s11546_s15 = smov [#allocation17]  }
  0x82   :  { %s124_s29 = sshll.u32 %s11546_s15, 4  ;;  %s11547_s1 = smov [#allocation20]   ;;  %s125_s29 = int_to_ptr.vmem [resolvable:$true] %s124_s29 }
  0x83   :  { %s149_s11 = sshll.u32 %s11547_s1, 4  ;;  %s11382_s2 = scalar_lea.vmem %s125_s29, 16  ;;  %s150_s11 = int_to_ptr.vmem [resolvable:$true] %s149_s11 }
  0x84   :  { %p11383_p8 = scmp.ne.s32.totalorder %s125_s29, %s11382_s2  ;;  %s11386_s17 = scalar_lea.vmem %s125_s29, 32 }
  0x85   :  { %p11387_p9 = scmp.lt.s32.totalorder %s125_s29, %s125_s29  ;;  %p11388_p10 = scmp.lt.s32.totalorder %s11386_s17, %s11382_s2 }
  0x87   :  { %105 = dma.hbm_to_vmem [thread:$0]  %s12849_s0, 16, %s103_s30, [#allocation13]  }
  0x88   :  { %p11389_p11 = por %p11388_p10, %p11387_p9 }
  0x8a   :  { %p11390_p12 = pnand %p11389_p11, %p11383_p8 }
  0x8c   :  { %11393 = shalt.err (!%p11390_p12)
}
  0x8d   :  { %s12850_s7 = sld [smem:[#allocation52_spill]]  ;;  %s11402_s4 = scalar_lea.vmem %s150_s11, 69632 }
  0x8e   :  { %p11403_p13 = scmp.ne.s32.totalorder %s150_s11, %s11402_s4  ;;  %p11407_p0 = scmp.lt.s32.totalorder %s150_s11, %s150_s11 }
  0x8f   :  { %p11408_p1 = scmp.lt.s32.totalorder %s11402_s4, %s11402_s4 }
  0x91   :  { %p11409_p2 = por %p11408_p1, %p11407_p0 }
  0x93   :  { %127 = dma.hbm_to_vmem [thread:$0]  %s12850_s7, 16, %s125_s29, [#allocation16]  }
  0x94   :  { %p11410_p3 = pnand %p11409_p2, %p11403_p13 }
  0x96   :  { %11413 = shalt.err (!%p11410_p3)
}
  0x97   :  { %s11548_s8 = smov 512   ;;  %s11549_s30 = smov 32  }
  0x98   :  { %155 = dma.hbm_to_vmem [thread:$0]  %s12813_s14, 69632, %s150_s11, [#allocation19], %s11548_s8, %s11548_s8, %s11549_s30  }
  0x99   :  { %s11550_s5 = smov [#allocation23]   ;;  %s11551_s28 = smov [#allocation26]  }
  0x9a   :  { %s171_s13 = sshll.u32 %s11550_s5, 4  ;;  %s194_s19 = sshll.u32 %s11551_s28, 4  ;;  %s172_s13 = int_to_ptr.vmem [resolvable:$true] %s171_s13  ;;  %s195_s19 = int_to_ptr.vmem [resolvable:$true] %s194_s19 }
  0x9b   :  { %s11422_s26 = scalar_lea.vmem %s172_s13, 65536  ;;  %p11427_p5 = scmp.lt.s32.totalorder %s172_s13, %s172_s13 }
  0x9c   :  { %p11423_p4 = scmp.ne.s32.totalorder %s172_s13, %s11422_s26  ;;  %p11428_p6 = scmp.lt.s32.totalorder %s11422_s26, %s11422_s26 }
  0x9e   :  { %p11429_p7 = por %p11428_p6, %p11427_p5 }
  0xa0   :  { %p11430_p8 = pnand %p11429_p7, %p11423_p4 }
  0xa2   :  { %11433 = shalt.err (!%p11430_p8)
}
  0xa3   :  { %177 = dma.hbm_to_vmem [thread:$0]  %s12815_s16, 65536, %s172_s13, [#allocation22], %s11548_s8, %s11548_s8, %s11549_s30  }
  0xa4   :  { %s11442_s15 = scalar_lea.vmem %s195_s19, 128  ;;  %p11447_p10 = scmp.lt.s32.totalorder %s195_s19, %s195_s19 }
  0xa5   :  { %p11443_p9 = scmp.ne.s32.totalorder %s195_s19, %s11442_s15  ;;  %p11448_p11 = scmp.lt.s32.totalorder %s11442_s15, %s11442_s15 }
  0xa7   :  { %p11449_p12 = por %p11448_p11, %p11447_p10 }
  0xa9   :  { %p11450_p13 = pnand %p11449_p12, %p11443_p9 }
  0xab   :  { %11453 = shalt.err (!%p11450_p13)
}
  0xac   :  { %197 = dma.hbm_to_vmem [thread:$0]  %s12817_s18, 128, %s195_s19, [#allocation25]  }
  0xad   :  { %s11552_s1 = smov [#allocation29]   ;;  %s11553_s2 = smov [#allocation30]  }
  0xae   :  { %s218_s11 = sshll.u32 %s11552_s1, 4  ;;  %s230_s17 = sshll.u32 %s11553_s2, 4  ;;  %s219_s11 = int_to_ptr.vmem [resolvable:$true] %s218_s11  ;;  %s231_s17 = int_to_ptr.vmem [resolvable:$true] %s230_s17 }
  0xaf   :  { %s11462_s6 = scalar_lea.vmem %s219_s11, 16  ;;  %s11466_s16 = scalar_lea.vmem %s219_s11, 32 }
  0xb0   :  { %p11463_p0 = scmp.ne.s32.totalorder %s219_s11, %s11462_s6  ;;  %p11467_p1 = scmp.lt.s32.totalorder %s219_s11, %s219_s11 }
  0xb1   :  { %p11468_p2 = scmp.lt.s32.totalorder %s11466_s16, %s11462_s6 }
  0xb3   :  { %p11469_p3 = por %p11468_p2, %p11467_p1 }
  0xb5   :  { %p11470_p4 = pnand %p11469_p3, %p11463_p0 }
  0xb7   :  { %11473 = shalt.err (!%p11470_p4)
}
  0xb8   :  { %221 = dma.hbm_to_vmem [thread:$0]  %s12820_s22, 16, %s219_s11, [#allocation28]  }
  0xb9   :  { %s11482_s4 = scalar_lea.vmem %s231_s17, 16  ;;  %s11486_s18 = scalar_lea.vmem %s231_s17, 32 }
  0xba   :  { %p11483_p5 = scmp.ne.s32.totalorder %s231_s17, %s11482_s4  ;;  %p11487_p6 = scmp.lt.s32.totalorder %s231_s17, %s231_s17 }
  0xbb   :  { %p11488_p7 = scmp.lt.s32.totalorder %s11486_s18, %s11482_s4 }
  0xbd   :  { %p11489_p8 = por %p11488_p7, %p11487_p6 }
  0xbf   :  { %p11490_p9 = pnand %p11489_p8, %p11483_p5 }
  0xc1   :  { %11493 = shalt.err (!%p11490_p9)
}
  0xc2   :  { %233 = dma.hbm_to_vmem [thread:$0]  %s12822_s24, 16, %s231_s17, [#allocation31]  }
  0xc3   :  { %11514 = dma.done.wait [#allocation7], 640  }
  0xc4   :  { %11515 = vsyncadd [#allocation7], 4294966656 }
  0xc5   :  { %11516 = dma.done.wait [#allocation10], 2064  }
  0xc6   :  { %11517 = vsyncadd [#allocation10], 4294965232 }
  0xc7   :  { %11518 = dma.done.wait [#allocation13], 32  }
  0xc8   :  { %11519 = vsyncadd [#allocation13], 4294967264 }
  0xc9   :  { %11520 = dma.done.wait [#allocation16], 48  }
  0xca   :  { %11521 = vsyncadd [#allocation16], 4294967248 }
  0xcb   :  { %11522 = dma.done.wait [#allocation19], 69648  }
  0xcc   :  { %11523 = vsyncadd [#allocation19], 4294897648 }
  0xcd   :  { %11524 = dma.done.wait [#allocation22], 65664  }
  0xce   :  { %11525 = vsyncadd [#allocation22], 4294901632 }
  0xcf   :  { %11526 = dma.done.wait [#allocation25], 256  }
  0xd0   :  { %11527 = vsyncadd [#allocation25], 4294967040 }
  0xd1   :  { %11528 = dma.done.wait [#allocation28], 48  }
  0xd2   :  { %11529 = vsyncadd [#allocation28], 4294967248 }
  0xd3   :  { %11530 = dma.done.wait [#allocation31], 16  }
  0xd4   :  { %11531 = vsyncadd [#allocation31], 4294967280  ;;  %v11554_v3 = vmov 0.0   ;;  %vm11555_vm0 = vmmov 0   ;;  %vm336_vm1 = vcmask 1043456   ;;  %v299_v5 = vld [vmem:[#allocation6 + $0x18] sm:$0xff] }
  0xd5   :  { %10982 = vmatprep.subr.mxu0 %v11554_v3  ;;  %10992 = vmatprep.mubr.msk.f32.mxu0 %vm11555_vm0, %v11554_v3  ;;  %v300_v4 = vld [vmem:[#allocation6 + $0x20] sm:$0xf]  ;;  %v298_v6 = vld [vmem:[#allocation6 + $0x10] sm:$0xff]  ;;  %v297_v7 = vld [vmem:[#allocation6 + $0x8] sm:$0xff]  ;;  %s12851_s20 = sld [smem:[#allocation43_spill]]  ;;  %vm308_vm2 = vcmask 293888  }
  0xd6   :  { %11019 = vmatprep.subr.mxu1 %v11554_v3  ;;  %11051 = vmatprep.mubr.msk.f32.mxu1 %vm11555_vm0, %v11554_v3  ;;  %v474_v8 = vld [vmem:[#allocation11 + $0x78] sm:$0xff]  ;;  %v473_v9 = vld [vmem:[#allocation11 + $0x70] sm:$0xff]  ;;  %v472_v11 = vld [vmem:[#allocation11 + $0x68] sm:$0xff]  ;;  %s12852_s7 = sld [smem:[#allocation48_spill]]  ;;  %vm762_vm3 = vcmask 523264   ;;  %vm1136_vm4 = vcmask 1040384  }
  0xd7   :  { %10983 = vmatpush3.msk.msra.mxu0 %vm336_vm1, %v300_v4  ;;  %11020 = vmatpush3.msra.mxu1 %v474_v8  ;;  %v296_v10 = vld [vmem:[#allocation6] sm:$0xff]  ;;  %v471_v13 = vld [vmem:[#allocation11 + $0x60] sm:$0xff]  ;;  %v468_v17 = vld [vmem:[#allocation11 + $0x48] sm:$0xff]  ;;  %s12853_s6 = sld [smem:[#allocation51_spill]]  ;;  %vm1132_vm5 = vcmask 334848   ;;  %vm1224_vm6 = vcmask 1041408  }
  0xd8   :  { %10984 = vmatprep.subr.mxu0 %v11554_v3  ;;  %11021 = vmatprep.subr.mxu1 %v11554_v3  ;;  %v470_v14 = vld [vmem:[#allocation11 + $0x58] sm:$0xff]  ;;  %v469_v16 = vld [vmem:[#allocation11 + $0x50] sm:$0xff]  ;;  %v467_v19 = vld [vmem:[#allocation11 + $0x40] sm:$0xff]  ;;  %s12854_s13 = sld [smem:[#allocation53_spill]]  ;;  %vm1116_vm7 = vcmask 271360   ;;  %vm1220_vm8 = vcmask 80896  }
  0xd9   :  { %10985 = vmatpush3.msra.mxu0 %v299_v5  ;;  %11022 = vmatpush3.msra.mxu1 %v473_v9  ;;  %v466_v20 = vld [vmem:[#allocation11 + $0x38] sm:$0xff]  ;;  %v465_v22 = vld [vmem:[#allocation11 + $0x30] sm:$0xff]  ;;  %v464_v23 = vld [vmem:[#allocation11 + $0x28] sm:$0xff]  ;;  %vm1311_vm9 = vcmask 1044480   ;;  %vm1307_vm10 = vcmask 39936   ;;  %vm9407_vm11 = vcmask 195584  }
  0xda   :  { %10986 = vmatprep.subr.mxu0 %v11554_v3  ;;  %11023 = vmatprep.subr.mxu1 %v11554_v3  ;;  %v463_v25 = vld [vmem:[#allocation11 + $0x20] sm:$0xff]  ;;  %v462_v26 = vld [vmem:[#allocation11 + $0x18] sm:$0xff]  ;;  %v461_v31 = vld [vmem:[#allocation11 + $0x10] sm:$0xff]  ;;  %vm1389_vm12 = vcmask 279824   ;;  %s11558_s16 = smov 35   ;;  %s11559_s3 = smov 36  }
  0xdb   :  { %10987 = vmatpush3.msra.mxu0 %v298_v6  ;;  %v287_v12 = vld [vmem:[%s12851_s20] sm:$0xff]  ;;  %11024 = vmatpush3.msra.mxu1 %v472_v11  ;;  %v288_v15 = vld [vmem:[%s12851_s20 + $0x8] sm:$0xff]  ;;  %v289_v18 = vld [vmem:[%s12851_s20 + $0x10] sm:$0xff]  ;;  %vm9394_vm13 = vcmask 288024   ;;  %vm9656_vm14 = vcmask 296224  }
  0xdc   :  { %10988 = vmatprep.subr.mxu0 %v11554_v3  ;;  %11025 = vmatprep.subr.mxu1 %v11554_v3  ;;  %v290_v21 = vld [vmem:[%s12851_s20 + $0x18] sm:$0xff]  ;;  %v291_v24 = vld [vmem:[%s12851_s20 + $0x20] sm:$0xff]  ;;  %v292_v27 = vld [vmem:[%s12851_s20 + $0x28] sm:$0xff] }
  0xdd   :  { %10989 = vmatpush3.msra.mxu0 %v297_v7  ;;  %11026 = vmatpush3.msra.mxu1 %v471_v13  ;;  %v293_v28 = vld [vmem:[%s12851_s20 + $0x30] sm:$0xff]  ;;  %v294_v29 = vld [vmem:[%s12851_s20 + $0x38] sm:$0xff]  ;;  %v295_v30 = vld [vmem:[%s12851_s20 + $0x40] sm:$0xff] }
  0xde   :  { %10990 = vmatprep.subr.mxu0 %v11554_v3  ;;  %11027 = vmatprep.subr.mxu1 %v11554_v3  ;;  %v460_v32 = vld [vmem:[#allocation11 + $0x8] sm:$0xff]  ;;  %v459_v33 = vld [vmem:[#allocation11] sm:$0xff]  ;;  %v647_v41 = vld [vmem:[%s12852_s7 + $0xe0] sm:$0xff] }
  0xdf   :  { %10991 = vmatpush3.msra.mxu0 %v296_v10  ;;  %11028 = vmatpush3.msra.mxu1 %v470_v14  ;;  %v650_v34 = vld [vmem:[%s12852_s7 + $0xf8] sm:$0xff]  ;;  %v649_v36 = vld [vmem:[%s12852_s7 + $0xf0] sm:$0xff]  ;;  %v648_v38 = vld [vmem:[%s12852_s7 + $0xe8] sm:$0xff] }
  0xe0   :  { %10993 = vmatmul.mubr.msk.f32.vlgmr.msra.gmra.mxu0 %vm308_vm2, %v287_v12  ;;  %11029 = vmatprep.subr.mxu1 %v11554_v3  ;;  %v634_v35 = vld [vmem:[%s12852_s7 + $0x78] sm:$0xff]  ;;  %v633_v37 = vld [vmem:[%s12852_s7 + $0x70] sm:$0xff]  ;;  %v632_v39 = vld [vmem:[%s12852_s7 + $0x68] sm:$0xff] }
  0xe1   :  { %10995 = vmatprep.mubr.msk.f32.mxu0 %vm11555_vm0, %v11554_v3  ;;  %11030 = vmatpush3.msra.mxu1 %v469_v16  ;;  %v682_v40 = vld [vmem:[%s12852_s7 + $0x1f8] sm:$0xff]  ;;  %v631_v42 = vld [vmem:[%s12852_s7 + $0x60] sm:$0xff]  ;;  %v645_v45 = vld [vmem:[%s12852_s7 + $0xd0] sm:$0xff] }
  0xe2   :  { %11031 = vmatprep.subr.mxu1 %v11554_v3  ;;  %10812 = vmatprep.subr.mxu0 %v650_v34  ;;  %v646_v43 = vld [vmem:[%s12852_s7 + $0xd8] sm:$0xff]  ;;  %v629_v46 = vld [vmem:[%s12852_s7 + $0x50] sm:$0xff]  ;;  %v644_v47 = vld [vmem:[%s12852_s7 + $0xc8] sm:$0xff] }
  0xe3   :  { %11032 = vmatpush3.msra.mxu1 %v468_v17  ;;  %10813 = vmatpush3.msra.mxu0 %v634_v35  ;;  %v630_v44 = vld [vmem:[%s12852_s7 + $0x58] sm:$0xff]  ;;  %v628_v48 = vld [vmem:[%s12852_s7 + $0x48] sm:$0xff]  ;;  %v643_v49 = vld [vmem:[%s12852_s7 + $0xc0] sm:$0xff] }
  0xe4   :  { %10996 = vmatmul.mubr.msk.f32.gmra.mxu0 %vm308_vm2, %v288_v15  ;;  %11033 = vmatprep.subr.mxu1 %v11554_v3  ;;  %v627_v50 = vld [vmem:[%s12852_s7 + $0x40] sm:$0xff]  ;;  %v642_v51 = vld [vmem:[%s12852_s7 + $0xb8] sm:$0xff]  ;;  %v641_v53 = vld [vmem:[%s12852_s7 + $0xb0] sm:$0xff] }
  0xe5   :  { %10998 = vmatprep.mubr.msk.f32.mxu0 %vm11555_vm0, %v11554_v3  ;;  %11034 = vmatpush3.msra.mxu1 %v467_v19  ;;  %v626_v52 = vld [vmem:[%s12852_s7 + $0x38] sm:$0xff]  ;;  %v625_v54 = vld [vmem:[%s12852_s7 + $0x30] sm:$0xff]  ;;  %v640_v55 = vld [vmem:[%s12852_s7 + $0xa8] sm:$0xff] }
  0xe6   :  { %11035 = vmatprep.subr.mxu1 %v11554_v3  ;;  %10814 = vmatprep.subr.mxu0 %v649_v36  ;;  %v624_v56 = vld [vmem:[%s12852_s7 + $0x28] sm:$0xff]  ;;  %v639_v57 = vld [vmem:[%s12852_s7 + $0xa0] sm:$0xff]  ;;  %v666_v63 = vld [vmem:[%s12852_s7 + $0x178] sm:$0xff] }
  0xe7   :  { %11036 = vmatpush3.msra.mxu1 %v466_v20  ;;  %10815 = vmatpush3.msra.mxu0 %v633_v37  ;;  %v11907_v58 = vld [vmem:[#allocation9] ss:$0 sm:$0xff]  ;;  %v681_v1 = vld [vmem:[%s12852_s7 + $0x1f0] sm:$0xff]  ;;  %v679_v10 = vld [vmem:[%s12852_s7 + $0x1e0] sm:$0xff] }
  0xe8   :  { %10999 = vmatmul.mubr.msk.f32.gmra.mxu0 %vm308_vm2, %v289_v18  ;;  %11037 = vmatprep.subr.mxu1 %v11554_v3  ;;  %v665_v4 = vld [vmem:[%s12852_s7 + $0x170] sm:$0xff]  ;;  %v680_v6 = vld [vmem:[%s12852_s7 + $0x1e8] sm:$0xff]  ;;  %v663_v12 = vld [vmem:[%s12852_s7 + $0x160] sm:$0xff] }
  0xe9   :  { %11001 = vmatprep.mubr.msk.f32.mxu0 %vm11555_vm0, %v11554_v3  ;;  %11038 = vmatpush3.msra.mxu1 %v465_v22  ;;  %v664_v8 = vld [vmem:[%s12852_s7 + $0x168] sm:$0xff]  ;;  %v678_v14 = vld [vmem:[%s12852_s7 + $0x1d8] sm:$0xff]  ;;  %v677_v18 = vld [vmem:[%s12852_s7 + $0x1d0] sm:$0xff] }
  0xea   :  { %11039 = vmatprep.subr.mxu1 %v11554_v3  ;;  %10816 = vmatprep.subr.mxu0 %v648_v38  ;;  %v662_v16 = vld [vmem:[%s12852_s7 + $0x158] sm:$0xff]  ;;  %v661_v20 = vld [vmem:[%s12852_s7 + $0x150] sm:$0xff]  ;;  %v676_v22 = vld [vmem:[%s12852_s7 + $0x1c8] sm:$0xff] }
  0xeb   :  { %11040 = vmatpush3.msra.mxu1 %v464_v23  ;;  %10817 = vmatpush3.msra.mxu0 %v632_v39 }
  0xec   :  { %11002 = vmatmul.mubr.msk.f32.gmra.mxu0 %vm308_vm2, %v290_v21  ;;  %11041 = vmatprep.subr.mxu1 %v11554_v3 }
  0xed   :  { %11004 = vmatprep.mubr.msk.f32.mxu0 %vm11555_vm0, %v11554_v3  ;;  %11042 = vmatpush3.msra.mxu1 %v463_v25 }
  0xee   :  { %11043 = vmatprep.subr.mxu1 %v11554_v3  ;;  %10818 = vmatprep.subr.mxu0 %v647_v41 }
  0xef   :  { %11044 = vmatpush3.msra.mxu1 %v462_v26  ;;  %10819 = vmatpush3.msra.mxu0 %v631_v42  ;;  %v675_v26 = vld [vmem:[%s12852_s7 + $0x1c0] sm:$0xff] }
  0xf0   :  { %11005 = vmatmul.mubr.msk.f32.gmra.mxu0 %vm308_vm2, %v291_v24  ;;  %11045 = vmatprep.subr.mxu1 %v11554_v3  ;;  %v660_v24 = vld [vmem:[%s12852_s7 + $0x148] sm:$0xff] }
  0xf1   :  { %11007 = vmatprep.mubr.msk.f32.mxu0 %vm11555_vm0, %v11554_v3  ;;  %11046 = vmatpush3.msra.mxu1 %v461_v31 }
  0xf2   :  { %11047 = vmatprep.subr.mxu1 %v11554_v3  ;;  %10820 = vmatprep.subr.mxu0 %v646_v43 }
  0xf3   :  { %11048 = vmatpush3.msra.mxu1 %v460_v32  ;;  %10821 = vmatpush3.msra.mxu0 %v630_v44 }
  0xf4   :  { %11008 = vmatmul.mubr.msk.f32.gmra.mxu0 %vm308_vm2, %v292_v27  ;;  %11049 = vmatprep.subr.mxu1 %v11554_v3 }
  0xf5   :  { %11010 = vmatprep.mubr.msk.f32.mxu0 %vm11555_vm0, %v11554_v3  ;;  %11050 = vmatpush3.msra.mxu1 %v459_v33 }
  0xf6   :  { %10847 = vmatprep.subr.mxu1 %v682_v40  ;;  %10822 = vmatprep.subr.mxu0 %v645_v45 }
  0xf7   :  { %10823 = vmatpush3.msra.mxu0 %v629_v46  ;;  %v623_v46 = vld [vmem:[%s12852_s7 + $0x20] sm:$0xff] }
  0xf8   :  { %11011 = vmatmul.mubr.msk.f32.gmra.mxu0 %vm308_vm2, %v293_v28  ;;  %10824 = vmatprep.subr.mxu0 %v644_v47  ;;  %v659_v47 = vld [vmem:[%s12852_s7 + $0x140] sm:$0xff] }
  0xf9   :  { %11013 = vmatprep.mubr.msk.f32.mxu0 %vm11555_vm0, %v11554_v3  ;;  %10825 = vmatpush3.msra.mxu0 %v628_v48  ;;  %v638_v48 = vld [vmem:[%s12852_s7 + $0x98] sm:$0xff] }
  0xfa   :  { %10826 = vmatprep.subr.mxu0 %v643_v49  ;;  %v674_v49 = vld [vmem:[%s12852_s7 + $0x1b8] sm:$0xff] }
  0xfb   :  { %10827 = vmatpush3.msra.mxu0 %v627_v50  ;;  %v622_v50 = vld [vmem:[%s12852_s7 + $0x18] sm:$0xff] }
  0xfc   :  { %11014 = vmatmul.mubr.msk.f32.gmra.mxu0 %vm308_vm2, %v294_v29  ;;  %10828 = vmatprep.subr.mxu0 %v642_v51  ;;  %v658_v51 = vld [vmem:[%s12852_s7 + $0x138] sm:$0xff] }
  0xfd   :  { %11016 = vmatprep.mubr.msk.f32.mxu0 %vm11555_vm0, %v11554_v3  ;;  %10829 = vmatpush3.msra.mxu0 %v626_v52  ;;  %v637_v52 = vld [vmem:[%s12852_s7 + $0x90] sm:$0xff] }
  0xfe   :  { %10830 = vmatprep.subr.mxu0 %v641_v53  ;;  %v673_v53 = vld [vmem:[%s12852_s7 + $0x1b0] sm:$0xff] }
  0xff   :  { %10831 = vmatpush3.msra.mxu0 %v625_v54  ;;  %v621_v54 = vld [vmem:[%s12852_s7 + $0x10] sm:$0xff] }
 0x100   :  { %11017 = vmatmul.mubr.msk.f32.gmra.mxu0 %vm308_vm2, %v295_v30  ;;  %10832 = vmatprep.subr.mxu0 %v640_v55  ;;  %v657_v55 = vld [vmem:[%s12852_s7 + $0x130] sm:$0xff] }
 0x101   :  { %10833 = vmatpush3.msra.mxu0 %v624_v56  ;;  %v636_v56 = vld [vmem:[%s12852_s7 + $0x88] sm:$0xff] }
 0x102   :  { %10834 = vmatprep.subr.mxu0 %v639_v57  ;;  %v672_v57 = vld [vmem:[%s12852_s7 + $0x1a8] sm:$0xff] }
 0x103   :  { %10835 = vmatpush3.msra.mxu0 %v623_v46  ;;  %v692_v46 = vld [vmem:[%s12852_s7 + $0x248] sm:$0xff] }
 0x104   :  { %10836 = vmatprep.subr.mxu0 %v638_v48 }
 0x105   :  { %10837 = vmatpush3.msra.mxu0 %v622_v50  ;;  %v743_v50 = vld [vmem:[%s12852_s7 + $0x3e0] sm:$0xff] }
 0x106   :  { %10838 = vmatprep.subr.mxu0 %v637_v52  ;;  %v727_v52 = vld [vmem:[%s12852_s7 + $0x360] sm:$0xff] }
 0x107   :  { %10839 = vmatpush3.msra.mxu0 %v621_v54  ;;  %v706_v54 = vld [vmem:[%s12852_s7 + $0x2b8] sm:$0xff] }
 0x108   :  { %10840 = vmatprep.subr.mxu0 %v636_v56  ;;  %v690_v56 = vld [vmem:[%s12852_s7 + $0x238] sm:$0xff] }
 0x1a0   :  { %v406_v59 = vpop.f32.mrf.mxu0 }
 0x1a1   :  { %v407_v60 = vadd.f32 %v11907_v58, %v406_v59  ;;  %v656_v59 = vld [vmem:[%s12852_s7 + $0x128] sm:$0xff] }
 0x1a2   :  { %v10994_v61 = vpop.f32.mrf.mxu0 }
 0x1a3   :  { %v450_v62 = vmax.f32 %v407_v60, 0.0  ;;  %v635_v60 = vld [vmem:[%s12852_s7 + $0x80] sm:$0xff] }
 0x1a4   :  { %v411_v0 = vpop.f32.mrf.mxu0  ;;  %v671_v61 = vld [vmem:[%s12852_s7 + $0x1a0] sm:$0xff] }
 0x1a5   :  { %v412_v2 = vadd.f32 %v11907_v58, %v411_v0  ;;  %11052 = vmatmul.mubr.f32.vlgmr.msra.gmra.mxu1 %v450_v62  ;;  %v619_v62 = vld [vmem:[%s12852_s7] sm:$0xff]  ;;  %v670_v0 = vld [vmem:[%s12852_s7 + $0x198] sm:$0xff] }
 0x1a6   :  { %v10997_v5 = vpop.f32.mrf.mxu0  ;;  %11054 = vmatprep.mubr.msk.f32.mxu1 %vm11555_vm0, %v11554_v3  ;;  %10848 = vmatpush3.msra.mxu1 %v666_v63  ;;  %v655_v63 = vld [vmem:[%s12852_s7 + $0x120] sm:$0xff] }
 0x1a7   :  { %v451_v7 = vmax.f32 %v412_v2, 0.0  ;;  %10849 = vmatprep.subr.mxu1 %v681_v1  ;;  %v714_v1 = vld [vmem:[%s12852_s7 + $0x2f8] sm:$0xff]  ;;  %v653_v5 = vld [vmem:[%s12852_s7 + $0x110] sm:$0xff] }
 0x1a8   :  { %v416_v9 = vpop.f32.mrf.mxu0  ;;  %10850 = vmatpush3.msra.mxu1 %v665_v4  ;;  %v654_v2 = vld [vmem:[%s12852_s7 + $0x118] sm:$0xff]  ;;  %v669_v4 = vld [vmem:[%s12852_s7 + $0x190] sm:$0xff] }
 0x1a9   :  { %v417_v11 = vadd.f32 %v11907_v58, %v416_v9  ;;  %11055 = vmatmul.mubr.f32.gmra.mxu1 %v451_v7  ;;  %10851 = vmatprep.subr.mxu1 %v680_v6  ;;  %v668_v6 = vld [vmem:[%s12852_s7 + $0x188] sm:$0xff]  ;;  %v651_v9 = vld [vmem:[%s12852_s7 + $0x100] sm:$0xff] }
 0x1aa   :  { %v11000_v13 = vpop.f32.mrf.mxu0  ;;  %11057 = vmatprep.mubr.msk.f32.mxu1 %vm11555_vm0, %v11554_v3  ;;  %10852 = vmatpush3.msra.mxu1 %v664_v8  ;;  %v652_v7 = vld [vmem:[%s12852_s7 + $0x108] sm:$0xff]  ;;  %v667_v8 = vld [vmem:[%s12852_s7 + $0x180] sm:$0xff] }
 0x1ab   :  { %v452_v15 = vmax.f32 %v417_v11, 0.0  ;;  %10853 = vmatprep.subr.mxu1 %v679_v10  ;;  %v746_v10 = vld [vmem:[%s12852_s7 + $0x3f8] sm:$0xff] }
 0x1ac   :  { %v421_v17 = vpop.f32.mrf.mxu0  ;;  %10854 = vmatpush3.msra.mxu1 %v663_v12  ;;  %v12060_v12 = vld [vmem:[#allocation12] ss:$0 sm:$0xff] }
 0x1ad   :  { %v422_v19 = vadd.f32 %v11907_v58, %v421_v17  ;;  %11058 = vmatmul.mubr.f32.gmra.mxu1 %v452_v15  ;;  %10855 = vmatprep.subr.mxu1 %v678_v14 }
 0x1ae   :  { %11060 = vmatprep.mubr.msk.f32.mxu1 %vm11555_vm0, %v11554_v3  ;;  %v11003_v21 = vpop.f32.mrf.mxu0  ;;  %10856 = vmatpush3.msra.mxu1 %v662_v16 }
 0x1af   :  { %v453_v23 = vmax.f32 %v422_v19, 0.0  ;;  %10857 = vmatprep.subr.mxu1 %v677_v18  ;;  %v698_v21 = vld [vmem:[%s12852_s7 + $0x278] sm:$0xff] }
 0x1b0   :  { %v426_v25 = vpop.f32.mrf.mxu0  ;;  %10858 = vmatpush3.msra.mxu1 %v661_v20 }
 0x1b1   :  { %11061 = vmatmul.mubr.f32.gmra.mxu1 %v453_v23  ;;  %v427_v27 = vadd.f32 %v11907_v58, %v426_v25  ;;  %10859 = vmatprep.subr.mxu1 %v676_v22  ;;  %v713_v22 = vld [vmem:[%s12852_s7 + $0x2f0] sm:$0xff] }
 0x1b2   :  { %v11006_v28 = vpop.f32.mrf.mxu0  ;;  %11063 = vmatprep.mubr.msk.f32.mxu1 %vm11555_vm0, %v11554_v3  ;;  %10860 = vmatpush3.msra.mxu1 %v660_v24  ;;  %v697_v25 = vld [vmem:[%s12852_s7 + $0x270] sm:$0xff] }
 0x1b3   :  { %v454_v29 = vmax.f32 %v427_v27, 0.0  ;;  %10861 = vmatprep.subr.mxu1 %v675_v26  ;;  %v712_v26 = vld [vmem:[%s12852_s7 + $0x2e8] sm:$0xff] }
 0x1b4   :  { %v431_v30 = vpop.f32.mrf.mxu0  ;;  %10862 = vmatpush3.msra.mxu1 %v659_v47  ;;  %v696_v28 = vld [vmem:[%s12852_s7 + $0x268] sm:$0xff] }
 0x1b5   :  { %v432_v31 = vadd.f32 %v11907_v58, %v431_v30  ;;  %11064 = vmatmul.mubr.f32.gmra.mxu1 %v454_v29  ;;  %10863 = vmatprep.subr.mxu1 %v674_v49  ;;  %v711_v30 = vld [vmem:[%s12852_s7 + $0x2e0] sm:$0xff]  ;;  %v728_v47 = vld [vmem:[%s12852_s7 + $0x368] sm:$0xff] }
 0x1b6   :  { %v11009_v32 = vpop.f32.mrf.mxu0  ;;  %11066 = vmatprep.mubr.msk.f32.mxu1 %vm11555_vm0, %v11554_v3  ;;  %10864 = vmatpush3.msra.mxu1 %v658_v51  ;;  %v707_v49 = vld [vmem:[%s12852_s7 + $0x2c0] sm:$0xff] }
 0x1b7   :  { %v455_v33 = vmax.f32 %v432_v31, 0.0  ;;  %10865 = vmatprep.subr.mxu1 %v673_v53  ;;  %v695_v32 = vld [vmem:[%s12852_s7 + $0x260] sm:$0xff] }
 0x1b8   :  { %v436_v34 = vpop.f32.mrf.mxu0  ;;  %10866 = vmatpush3.msra.mxu1 %v657_v55  ;;  %v691_v51 = vld [vmem:[%s12852_s7 + $0x240] sm:$0xff]  ;;  %v742_v55 = vld [vmem:[%s12852_s7 + $0x3d8] sm:$0xff] }
 0x1b9   :  { %v437_v35 = vadd.f32 %v11907_v58, %v436_v34  ;;  %11067 = vmatmul.mubr.f32.gmra.mxu1 %v455_v33  ;;  %10867 = vmatprep.subr.mxu1 %v672_v57  ;;  %v726_v57 = vld [vmem:[%s12852_s7 + $0x358] sm:$0xff] }
 0x1ba   :  { %v11012_v36 = vpop.f32.mrf.mxu0  ;;  %11069 = vmatprep.mubr.msk.f32.mxu1 %vm11555_vm0, %v11554_v3  ;;  %10868 = vmatpush3.msra.mxu1 %v656_v59  ;;  %v705_v59 = vld [vmem:[%s12852_s7 + $0x2b0] sm:$0xff] }
 0x1bb   :  { %v456_v37 = vmax.f32 %v437_v35, 0.0  ;;  %10869 = vmatprep.subr.mxu1 %v671_v61  ;;  %v710_v35 = vld [vmem:[%s12852_s7 + $0x2d8] sm:$0xff]  ;;  %v689_v61 = vld [vmem:[%s12852_s7 + $0x230] sm:$0xff] }
 0x1bc   :  { %v441_v38 = vpop.f32.mrf.mxu0  ;;  %10870 = vmatpush3.msra.mxu1 %v655_v63  ;;  %v694_v36 = vld [vmem:[%s12852_s7 + $0x258] sm:$0xff] }
 0x1bd   :  { %v442_v39 = vadd.f32 %v11907_v58, %v441_v38  ;;  %11070 = vmatmul.mubr.f32.gmra.mxu1 %v456_v37  ;;  %10871 = vmatprep.subr.mxu1 %v670_v0  ;;  %v730_v37 = vld [vmem:[%s12852_s7 + $0x378] sm:$0xff]  ;;  %v704_v0 = vld [vmem:[%s12852_s7 + $0x2a8] sm:$0xff] }
 0x1be   :  { %11072 = vmatprep.mubr.msk.f32.mxu1 %vm11555_vm0, %v11554_v3  ;;  %v11015_v40 = vpop.f32.mrf.mxu0  ;;  %10872 = vmatpush3.msra.mxu1 %v654_v2  ;;  %v688_v2 = vld [vmem:[%s12852_s7 + $0x228] sm:$0xff] }
 0x1bf   :  { %v457_v41 = vmax.f32 %v442_v39, 0.0  ;;  %10873 = vmatprep.subr.mxu1 %v669_v4  ;;  %v709_v39 = vld [vmem:[%s12852_s7 + $0x2d0] sm:$0xff]  ;;  %v724_v4 = vld [vmem:[%s12852_s7 + $0x348] sm:$0xff] }
 0x1c0   :  { %v446_v42 = vpop.f32.mrf.mxu0  ;;  %10874 = vmatpush3.msra.mxu1 %v653_v5  ;;  %v745_v40 = vld [vmem:[%s12852_s7 + $0x3f0] sm:$0xff] }
 0x1c1   :  { %11073 = vmatmul.mubr.f32.gmra.mxu1 %v457_v41  ;;  %v447_v43 = vadd.f32 %v11907_v58, %v446_v42  ;;  %v620_v58 = vld [vmem:[%s12852_s7 + $0x8] sm:$0xff]  ;;  %10875 = vmatprep.subr.mxu1 %v668_v6  ;;  %v693_v41 = vld [vmem:[%s12852_s7 + $0x250] sm:$0xff]  ;;  %v703_v6 = vld [vmem:[%s12852_s7 + $0x2a0] sm:$0xff] }
 0x1c2   :  { %v11018_v44 = vpop.f32.mrf.mxu0  ;;  %11075 = vmatprep.mubr.msk.f32.mxu1 %vm11555_vm0, %v11554_v3  ;;  %10841 = vmatpush3.msra.mxu0 %v620_v58  ;;  %v729_v42 = vld [vmem:[%s12852_s7 + $0x370] sm:$0xff] }
 0x1c3   :  { %v458_v45 = vmax.f32 %v447_v43, 0.0  ;;  %10842 = vmatprep.subr.mxu0 %v635_v60  ;;  %10876 = vmatpush3.msra.mxu1 %v652_v7  ;;  %v708_v44 = vld [vmem:[%s12852_s7 + $0x2c8] sm:$0xff]  ;;  %v741_v60 = vld [vmem:[%s12852_s7 + $0x3d0] sm:$0xff]  ;;  %v739_v7 = vld [vmem:[%s12852_s7 + $0x3c0] sm:$0xff] }
 0x1c4   :  { %10843 = vmatpush3.msra.mxu0 %v619_v62  ;;  %10877 = vmatprep.subr.mxu1 %v667_v8  ;;  %v725_v62 = vld [vmem:[%s12852_s7 + $0x350] sm:$0xff]  ;;  %v687_v8 = vld [vmem:[%s12852_s7 + $0x220] sm:$0xff] }
 0x1c5   :  { %11076 = vmatmul.mubr.f32.gmra.mxu1 %v458_v45  ;;  %10882 = vmatprep.subr.mxu0 %v714_v1  ;;  %v744_v45 = vld [vmem:[%s12852_s7 + $0x3e8] sm:$0xff] }
 0x1c6   :  { %10878 = vmatpush3.msra.mxu1 %v651_v9  ;;  %v740_v1 = vld [vmem:[%s12852_s7 + $0x3c8] sm:$0xff]  ;;  %v723_v9 = vld [vmem:[%s12852_s7 + $0x340] sm:$0xff] }
 0x1c7   :  { %10917 = vmatprep.subr.mxu1 %v746_v10 }
 0x265   :  { %v548_v11 = vpop.f32.mrf.mxu1 }
 0x266   :  { %v549_v14 = vadd.f32 %v12060_v12, %v548_v11  ;;  %v702_v11 = vld [vmem:[%s12852_s7 + $0x298] sm:$0xff] }
 0x267   :  { %v11053_v13 = vpop.f32.mrf.mxu1 }
 0x268   :  { %v12066_v19 = vmax.f32 %v549_v14, 0.0  ;;  %v738_v13 = vld [vmem:[%s12852_s7 + $0x3b8] sm:$0xff] }
 0x269   :  { %v553_v15 = vpop.f32.mrf.mxu1  ;;  %v686_v14 = vld [vmem:[%s12852_s7 + $0x218] sm:$0xff] }
 0x26a   :  { %v554_v16 = vadd.f32 %v12060_v12, %v553_v15  ;;  %v722_v15 = vld [vmem:[%s12852_s7 + $0x338] sm:$0xff] }
 0x26b   :  { %v11056_v17 = vpop.f32.mrf.mxu1 }
 0x26c   :  { %v12064_v18 = vmax.f32 %v554_v16, 0.0 }
 0x26d   :  { %v558_v20 = vpop.f32.mrf.mxu1 }
 0x26e   :  { %830 = vmatprep.mubr.f32.mxu0 %v12064_v18  ;;  %v559_v23 = vadd.f32 %v12060_v12, %v558_v20  ;;  %v701_v20 = vld [vmem:[%s12852_s7 + $0x290] sm:$0xff] }
 0x26f   :  { %v11059_v24 = vpop.f32.mrf.mxu1  ;;  %831 = vmatmul.mubr.f32.vlgmr.msra.gmra.mxu0 %v12066_v19 }
 0x270   :  { %10883 = vmatpush3.msra.mxu0 %v698_v21  ;;  %v12090_v31 = vmax.f32 %v559_v23, 0.0  ;;  %v737_v21 = vld [vmem:[%s12852_s7 + $0x3b0] sm:$0xff] }
 0x271   :  { %10884 = vmatprep.subr.mxu0 %v713_v22  ;;  %v563_v27 = vpop.f32.mrf.mxu1  ;;  %v685_v22 = vld [vmem:[%s12852_s7 + $0x210] sm:$0xff] }
 0x272   :  { %v564_v29 = vadd.f32 %v12060_v12, %v563_v27  ;;  %10885 = vmatpush3.msra.mxu0 %v697_v25  ;;  %v721_v23 = vld [vmem:[%s12852_s7 + $0x330] sm:$0xff]  ;;  %v700_v25 = vld [vmem:[%s12852_s7 + $0x288] sm:$0xff] }
 0x273   :  { %10886 = vmatprep.subr.mxu0 %v712_v26  ;;  %v11062_v33 = vpop.f32.mrf.mxu1  ;;  %v736_v26 = vld [vmem:[%s12852_s7 + $0x3a8] sm:$0xff] }
 0x274   :  { %v12095_v34 = vmax.f32 %v564_v29, 0.0  ;;  %10887 = vmatpush3.msra.mxu0 %v696_v28  ;;  %v684_v28 = vld [vmem:[%s12852_s7 + $0x208] sm:$0xff]  ;;  %v735_v33 = vld [vmem:[%s12852_s7 + $0x3a0] sm:$0xff] }
 0x275   :  { %10888 = vmatprep.subr.mxu0 %v711_v30  ;;  %v12106_v38 = vpop.f32.mrf.mxu1  ;;  %v720_v29 = vld [vmem:[%s12852_s7 + $0x328] sm:$0xff] }
 0x276   :  { %10889 = vmatpush3.msra.mxu0 %v695_v32  ;;  %900 = vmatprep.mubr.f32.mxu1 %v12095_v34  ;;  %v569_v27 = vadd.f32 %v12060_v12, %v12106_v38  ;;  %v699_v32 = vld [vmem:[%s12852_s7 + $0x280] sm:$0xff]  ;;  %v734_v38 = vld [vmem:[%s12852_s7 + $0x398] sm:$0xff] }
 0x277   :  { %10890 = vmatprep.subr.mxu0 %v710_v35  ;;  %901 = vmatmul.mubr.f32.vlgmr.msra.gmra.mxu1 %v12090_v31  ;;  %v11065_v43 = vpop.f32.mrf.mxu1  ;;  %v683_v35 = vld [vmem:[%s12852_s7 + $0x200] sm:$0xff] }
 0x278   :  { %10891 = vmatpush3.msra.mxu0 %v694_v36  ;;  %10918 = vmatpush3.msra.mxu1 %v730_v37  ;;  %v719_v36 = vld [vmem:[%s12852_s7 + $0x320] sm:$0xff]  ;;  %v12251_v37 = vmax.f32 %v569_v27, 0.0 }
 0x279   :  { %10892 = vmatprep.subr.mxu0 %v709_v39  ;;  %10919 = vmatprep.subr.mxu1 %v745_v40  ;;  %v573_v48 = vpop.f32.mrf.mxu1  ;;  %v718_v39 = vld [vmem:[%s12852_s7 + $0x318] sm:$0xff] }
 0x27a   :  { %10893 = vmatpush3.msra.mxu0 %v693_v41  ;;  %10920 = vmatpush3.msra.mxu1 %v729_v42  ;;  %v574_v17 = vadd.f32 %v12060_v12, %v573_v48  ;;  %v754_v40 = vld [vmem:[%s12852_s7 + $0x438] sm:$0xff]  ;;  %v733_v42 = vld [vmem:[%s12852_s7 + $0x390] sm:$0xff]  ;;  %v752_v48 = vld [vmem:[%s12852_s7 + $0x428] sm:$0xff] }
 0x27b   :  { %10894 = vmatprep.subr.mxu0 %v708_v44  ;;  %10921 = vmatprep.subr.mxu1 %v744_v45  ;;  %v11068_v53 = vpop.f32.mrf.mxu1  ;;  %v717_v44 = vld [vmem:[%s12852_s7 + $0x310] sm:$0xff] }
 0x27c   :  { %10895 = vmatpush3.msra.mxu0 %v692_v46  ;;  %10922 = vmatpush3.msra.mxu1 %v728_v47  ;;  %v12237_v30 = vmax.f32 %v574_v17, 0.0  ;;  %v753_v45 = vld [vmem:[%s12852_s7 + $0x430] sm:$0xff]  ;;  %v732_v46 = vld [vmem:[%s12852_s7 + $0x388] sm:$0xff]  ;;  %v751_v53 = vld [vmem:[%s12852_s7 + $0x420] sm:$0xff] }
 0x27d   :  { %10896 = vmatprep.subr.mxu0 %v707_v49  ;;  %10923 = vmatprep.subr.mxu1 %v743_v50  ;;  %v12158_v58 = vpop.f32.mrf.mxu1  ;;  %v716_v47 = vld [vmem:[%s12852_s7 + $0x308] sm:$0xff]  ;;  %v731_v50 = vld [vmem:[%s12852_s7 + $0x380] sm:$0xff]  ;;  %v1436_v17 = vld [vmem:[#allocation20 + $0x120] sm:$0xff] }
 0x27e   :  { %10897 = vmatpush3.msra.mxu0 %v691_v51  ;;  %10924 = vmatpush3.msra.mxu1 %v727_v52  ;;  %v579_v43 = vadd.f32 %v12060_v12, %v12158_v58  ;;  %v715_v52 = vld [vmem:[%s12852_s7 + $0x300] sm:$0xff] }
 0x27f   :  { %10898 = vmatprep.subr.mxu0 %v706_v54  ;;  %10925 = vmatprep.subr.mxu1 %v742_v55  ;;  %v11071_v63 = vpop.f32.mrf.mxu1  ;;  %v750_v54 = vld [vmem:[%s12852_s7 + $0x418] sm:$0xff]  ;;  %v747_v58 = vld [vmem:[%s12852_s7 + $0x400] sm:$0xff] }
 0x280   :  { %10899 = vmatpush3.msra.mxu0 %v690_v56  ;;  %10926 = vmatpush3.msra.mxu1 %v726_v57  ;;  %v12292_v51 = vmax.f32 %v579_v43, 0.0  ;;  %v749_v56 = vld [vmem:[%s12852_s7 + $0x410] sm:$0xff]  ;;  %v748_v57 = vld [vmem:[%s12852_s7 + $0x408] sm:$0xff]  ;;  %s11560_s7 = smov [#allocation32]  }
 0x281   :  { %10900 = vmatprep.subr.mxu0 %v705_v59  ;;  %10927 = vmatprep.subr.mxu1 %v741_v60  ;;  %v583_v5 = vpop.f32.mrf.mxu1  ;;  %v1124_v59 = vld [vmem:[%s12853_s6 + $0x28] sm:$0x1]  ;;  %v1123_v60 = vld [vmem:[%s12853_s6 + $0x20] sm:$0xff]  ;;  %v1456_v63 = vld [vmem:[#allocation20 + $0x1c0] sm:$0xff]  ;;  %s9664_s4 = sshll.u32 %s11560_s7, 4  ;;  %s9665_s4 = int_to_ptr.vmem [resolvable:$true] %s9664_s4 }
 0x282   :  { %10901 = vmatpush3.msra.mxu0 %v689_v61  ;;  %10928 = vmatpush3.msra.mxu1 %v725_v62  ;;  %v584_v41 = vadd.f32 %v12060_v12, %v583_v5  ;;  %v1122_v61 = vld [vmem:[%s12853_s6 + $0x18] sm:$0xff]  ;;  %v1121_v62 = vld [vmem:[%s12853_s6 + $0x10] sm:$0xff]  ;;  %v1119_v5 = vld [vmem:[%s12853_s6] sm:$0xff]  ;;  %s11494_s18 = scalar_lea.vmem %s9665_s4, 32  ;;  %p11499_p11 = scmp.lt.s32.totalorder %s9665_s4, %s9665_s4 }
 0x283   :  { %10902 = vmatprep.subr.mxu0 %v704_v0  ;;  %10929 = vmatprep.subr.mxu1 %v740_v1  ;;  %v11074_v10 = vpop.f32.mrf.mxu1  ;;  %v1460_v0 = vld [vmem:[#allocation20 + $0x1e0] sm:$0xff]  ;;  %v1120_v1 = vld [vmem:[%s12853_s6 + $0x8] sm:$0xff]  ;;  %p11495_p10 = scmp.ne.s32.totalorder %s9665_s4, %s11494_s18  ;;  %p11500_p12 = scmp.lt.s32.totalorder %s11494_s18, %s11494_s18 }
 0x284   :  { %10903 = vmatpush3.msra.mxu0 %v688_v2  ;;  %10930 = vmatpush3.msra.mxu1 %v724_v4  ;;  %v12287_v49 = vmax.f32 %v584_v41, 0.0  ;;  %v1448_v2 = vld [vmem:[#allocation20 + $0x180] sm:$0xff]  ;;  %v12359_v10 = vpack.c.bf16 %v12064_v18, %v12064_v18 }
 0x285   :  { %10904 = vmatprep.subr.mxu0 %v703_v6  ;;  %10931 = vmatprep.subr.mxu1 %v739_v7  ;;  %v12208_v16 = vpop.f32.mrf.mxu1  ;;  %v1452_v4 = vld [vmem:[#allocation20 + $0x1a0] sm:$0xff]  ;;  %v9761_v6 = vcombine.high %v1456_v63, %v1460_v0  ;;  %v1118_v7 = vld [vmem:[#allocation15] sm:$0x3]  ;;  %p11501_p13 = por %p11500_p12, %p11499_p11 }
 0x286   :  { %10905 = vmatpush3.msra.mxu0 %v687_v8  ;;  %10932 = vmatpush3.msra.mxu1 %v723_v9  ;;  %v589_v55 = vadd.f32 %v12060_v12, %v12208_v16  ;;  %v9760_v8 = vcombine.low %v1456_v63, %v1460_v0  ;;  %v9753_v9 = vcombine.high %v1448_v2, %v1452_v4  ;;  %v1432_v16 = vld [vmem:[#allocation20 + $0x100] sm:$0xff] }
 0x287   :  { %10906 = vmatprep.subr.mxu0 %v702_v11  ;;  %10933 = vmatprep.subr.mxu1 %v738_v13  ;;  %v11077_v24 = vpop.f32.mrf.mxu1  ;;  %v1440_v11 = vld [vmem:[#allocation20 + $0x140] sm:$0xff]  ;;  %p11502_p0 = pnand %p11501_p13, %p11495_p10 }
 0x288   :  { %10907 = vmatpush3.msra.mxu0 %v686_v14  ;;  %10934 = vmatpush3.msra.mxu1 %v722_v15  ;;  %v12322_v12 = vmax.f32 %v589_v55, 0.0  ;;  %v1444_v13 = vld [vmem:[#allocation20 + $0x160] sm:$0xff]  ;;  %v9752_v14 = vcombine.low %v1448_v2, %v1452_v4 }
 0x289   :  { %10908 = vmatprep.subr.mxu0 %v701_v20  ;;  %10935 = vmatprep.subr.mxu1 %v737_v21  ;;  %v9745_v15 = vcombine.high %v1440_v11, %v1444_v13  ;;  %v9744_v20 = vcombine.low %v1440_v11, %v1444_v13  ;;  %v9737_v21 = vcombine.high %v1432_v16, %v1436_v17  ;;  %v1428_v18 = vld [vmem:[#allocation20 + $0xe0] sm:$0xff] }
 0x28a   :  { %10909 = vmatpush3.msra.mxu0 %v685_v22  ;;  %10936 = vmatpush3.msra.mxu1 %v721_v23  ;;  %v1424_v22 = vld [vmem:[#allocation20 + $0xc0] sm:$0xff]  ;;  %v9736_v23 = vcombine.low %v1432_v16, %v1436_v17 }
 0x28b   :  { %10910 = vmatprep.subr.mxu0 %v700_v25  ;;  %10937 = vmatprep.subr.mxu1 %v736_v26  ;;  %v9729_v24 = vcombine.high %v1424_v22, %v1428_v18  ;;  %v1416_v25 = vld [vmem:[#allocation20 + $0x80] sm:$0xff]  ;;  %v9728_v27 = vcombine.low %v1424_v22, %v1428_v18  ;;  %v12364_v18 = vpack.c.bf16 %v12066_v19, %v12066_v19 }
 0x28c   :  { %10911 = vmatpush3.msra.mxu0 %v684_v28  ;;  %10938 = vmatpush3.msra.mxu1 %v720_v29  ;;  %v1420_v26 = vld [vmem:[#allocation20 + $0xa0] sm:$0xff] }
 0x28d   :  { %10912 = vmatprep.subr.mxu0 %v699_v32  ;;  %10939 = vmatprep.subr.mxu1 %v735_v33  ;;  %v9721_v28 = vcombine.high %v1416_v25, %v1420_v26  ;;  %v1408_v29 = vld [vmem:[#allocation20 + $0x40] sm:$0xff]  ;;  %v9720_v33 = vcombine.low %v1416_v25, %v1420_v26 }
 0x28e   :  { %10913 = vmatpush3.msra.mxu0 %v683_v35  ;;  %970 = vmatprep.mubr.f32.mxu0 %v12237_v30  ;;  %v1412_v32 = vld [vmem:[#allocation20 + $0x60] sm:$0xff] }
 0x28f   :  { %10940 = vmatpush3.msra.mxu1 %v719_v36  ;;  %971 = vmatmul.mubr.f32.vlgmr.msra.gmra.mxu0 %v12251_v37  ;;  %v9713_v35 = vcombine.high %v1408_v29, %v1412_v32  ;;  %v1400_v36 = vld [vmem:[#allocation20] sm:$0xff] }
 0x290   :  { %10941 = vmatprep.subr.mxu1 %v734_v38  ;;  %11078 = vmatprep.subr.mxu0 %v11554_v3  ;;  %v1404_v38 = vld [vmem:[#allocation20 + $0x20] sm:$0xff] }
 0x291   :  { %10942 = vmatpush3.msra.mxu1 %v718_v39  ;;  %11079 = vmatpush3.msra.mxu0 %v754_v40  ;;  %v9712_v39 = vcombine.low %v1408_v29, %v1412_v32  ;;  %v9705_v40 = vcombine.high %v1400_v36, %v1404_v38  ;;  %v1520_v41 = vld [vmem:[#allocation20 + $0x3c0] sm:$0xff]  ;;  %v9704_v43 = vcombine.low %v1400_v36, %v1404_v38  ;;  %v1211_v32 = vld [vmem:[%s12854_s13] sm:$0xff] }
 0x292   :  { %10943 = vmatprep.subr.mxu1 %v733_v42  ;;  %11080 = vmatprep.subr.mxu0 %v11554_v3  ;;  %v1524_v42 = vld [vmem:[#allocation20 + $0x3e0] sm:$0xff] }
 0x293   :  { %10944 = vmatpush3.msra.mxu1 %v717_v44  ;;  %11081 = vmatpush3.msra.mxu0 %v753_v45  ;;  %v9825_v44 = vcombine.high %v1520_v41, %v1524_v42  ;;  %v1512_v45 = vld [vmem:[#allocation20 + $0x380] sm:$0xff] }
 0x294   :  { %10945 = vmatprep.subr.mxu1 %v732_v46  ;;  %11082 = vmatprep.subr.mxu0 %v11554_v3  ;;  %v1516_v46 = vld [vmem:[#allocation20 + $0x3a0] sm:$0xff] }
 0x295   :  { %10946 = vmatpush3.msra.mxu1 %v716_v47  ;;  %11083 = vmatpush3.msra.mxu0 %v752_v48  ;;  %v9824_v47 = vcombine.low %v1520_v41, %v1524_v42  ;;  %v9817_v48 = vcombine.high %v1512_v45, %v1516_v46  ;;  %v1496_v55 = vld [vmem:[#allocation20 + $0x300] sm:$0xff] }
 0x296   :  { %10947 = vmatprep.subr.mxu1 %v731_v50  ;;  %11084 = vmatprep.subr.mxu0 %v11554_v3  ;;  %v1504_v50 = vld [vmem:[#allocation20 + $0x340] sm:$0xff] }
 0x297   :  { %10948 = vmatpush3.msra.mxu1 %v715_v52  ;;  %1040 = vmatprep.mubr.f32.mxu1 %v12287_v49  ;;  %v1508_v52 = vld [vmem:[#allocation20 + $0x360] sm:$0xff] }
 0x298   :  { %11085 = vmatpush3.msra.mxu0 %v751_v53  ;;  %1041 = vmatmul.mubr.f32.vlgmr.msra.gmra.mxu1 %v12292_v51  ;;  %v9816_v53 = vcombine.low %v1512_v45, %v1516_v46  ;;  %v1480_v63 = vld [vmem:[#allocation20 + $0x280] sm:$0xff] }
 0x299   :  { %11086 = vmatprep.subr.mxu0 %v11554_v3  ;;  %11094 = vmatprep.mubr.msk.f32.mxu0 %vm11555_vm0, %v11554_v3  ;;  %v1484_v0 = vld [vmem:[#allocation20 + $0x2a0] sm:$0xff] }
 0x29a   :  { %11087 = vmatpush3.msra.mxu0 %v750_v54  ;;  %11112 = vmatprep.subr.mxu1 %v11554_v3  ;;  %v9809_v54 = vcombine.high %v1504_v50, %v1508_v52  ;;  %v9785_v2 = vcombine.high %v1480_v63, %v1484_v0  ;;  %v1472_v4 = vld [vmem:[#allocation20 + $0x240] sm:$0xff] }
 0x29b   :  { %11088 = vmatprep.subr.mxu0 %v11554_v3  ;;  %11116 = vmatprep.mubr.msk.f32.mxu1 %vm11555_vm0, %v11554_v3  ;;  %v1696_v25 = vld [vmem:[#allocation20 + $0x940] sm:$0xff] }
 0x29c   :  { %11089 = vmatpush3.msra.mxu0 %v749_v56  ;;  %v1500_v56 = vld [vmem:[#allocation20 + $0x320] sm:$0xff] }
 0x29d   :  { %11090 = vmatprep.subr.mxu0 %v11554_v3  ;;  %v1700_v26 = vld [vmem:[#allocation20 + $0x960] sm:$0xff] }
 0x29e   :  { %11091 = vmatpush3.msra.mxu0 %v748_v57  ;;  %v9808_v57 = vcombine.low %v1504_v50, %v1508_v52  ;;  %v10001_v19 = vcombine.high %v1696_v25, %v1700_v26  ;;  %v1688_v29 = vld [vmem:[#allocation20 + $0x900] sm:$0xff] }
 0x29f   :  { %11092 = vmatprep.subr.mxu0 %v11554_v3  ;;  %v1680_v36 = vld [vmem:[#allocation20 + $0x8c0] sm:$0xff] }
 0x2a0   :  { %11093 = vmatpush3.msra.mxu0 %v747_v58  ;;  %v9801_v58 = vcombine.high %v1496_v55, %v1500_v56  ;;  %v1684_v38 = vld [vmem:[#allocation20 + $0x8e0] sm:$0xff] }
 0x2a1   :  { %11095 = vmatmul.mubr.msk.f32.vlgmr.msra.gmra.mxu0 %vm762_vm3, %v12322_v12  ;;  %11097 = vmatprep.subr.mxu0 %v11554_v3  ;;  %v1672_v41 = vld [vmem:[#allocation20 + $0x880] sm:$0xff] }
 0x2a2   :  { %11098 = vmatpush3.msk.msra.mxu0 %vm1136_vm4, %v1124_v59  ;;  %11109 = vmatprep.mubr.msk.f32.mxu0 %vm11555_vm0, %v11554_v3  ;;  %v1488_v59 = vld [vmem:[#allocation20 + $0x2c0] sm:$0xff] }
 0x2a3   :  { %11099 = vmatprep.subr.mxu0 %v11554_v3  ;;  %v1676_v42 = vld [vmem:[#allocation20 + $0x8a0] sm:$0xff] }
 0x2a4   :  { %11100 = vmatpush3.msra.mxu0 %v1123_v60  ;;  %v1492_v60 = vld [vmem:[#allocation20 + $0x2e0] sm:$0xff] }
 0x2a5   :  { %11101 = vmatprep.subr.mxu0 %v11554_v3  ;;  %v1664_v45 = vld [vmem:[#allocation20 + $0x840] sm:$0xff] }
 0x2a6   :  { %11102 = vmatpush3.msra.mxu0 %v1122_v61  ;;  %v9800_v61 = vcombine.low %v1496_v55, %v1500_v56  ;;  %v1668_v46 = vld [vmem:[#allocation20 + $0x860] sm:$0xff] }
 0x2a7   :  { %11103 = vmatprep.subr.mxu0 %v11554_v3  ;;  %v1656_v50 = vld [vmem:[#allocation20 + $0x800] sm:$0xff] }
 0x2a8   :  { %11104 = vmatpush3.msra.mxu0 %v1121_v62  ;;  %v9793_v62 = vcombine.high %v1488_v59, %v1492_v60  ;;  %v1660_v52 = vld [vmem:[#allocation20 + $0x820] sm:$0xff] }
 0x2a9   :  { %11105 = vmatprep.subr.mxu0 %v11554_v3  ;;  %v1776_v55 = vld [vmem:[#allocation20 + $0xbc0] sm:$0xff] }
 0x2aa   :  { %11106 = vmatpush3.msra.mxu0 %v1120_v1  ;;  %v9792_v1 = vcombine.low %v1488_v59, %v1492_v60  ;;  %v1780_v56 = vld [vmem:[#allocation20 + $0xbe0] sm:$0xff] }
 0x2ab   :  { %11107 = vmatprep.subr.mxu0 %v11554_v3  ;;  %v1768_v59 = vld [vmem:[#allocation20 + $0xb80] sm:$0xff] }
 0x2ac   :  { %11108 = vmatpush3.msra.mxu0 %v1119_v5  ;;  %v1476_v5 = vld [vmem:[#allocation20 + $0x260] sm:$0xff] }
 0x2ad   :  { %11110 = vmatmul.mubr.msk.f32.vlgmr.msra.gmra.mxu0 %vm1132_vm5, %v1118_v7  ;;  %4709 = vmatprep.subr.bf16.mxu0 %v9761_v6  ;;  %v9784_v6 = vcombine.low %v1480_v63, %v1484_v0  ;;  %v9777_v7 = vcombine.high %v1472_v4, %v1476_v5  ;;  %v9776_v11 = vcombine.low %v1472_v4, %v1476_v5  ;;  %v1772_v60 = vld [vmem:[#allocation20 + $0xba0] sm:$0xff] }
 0x2ae   :  { %4710 = vmatpush1.bf16.msra.mxu0 %v9760_v8  ;;  %4741 = vmatprep.mubr.bf16.mxu0 %v12359_v10  ;;  %v1464_v8 = vld [vmem:[#allocation20 + $0x200] sm:$0xff] }
 0x2af   :  { %4711 = vmatprep.subr.bf16.mxu0 %v9753_v9  ;;  %v1468_v9 = vld [vmem:[#allocation20 + $0x220] sm:$0xff] }
 0x2b0   :  { %v9769_v13 = vcombine.high %v1464_v8, %v1468_v9  ;;  %v9768_v16 = vcombine.low %v1464_v8, %v1468_v9  ;;  %v1760_v63 = vld [vmem:[#allocation20 + $0xb40] sm:$0xff] }
 0x2b1   :  { %v1764_v0 = vld [vmem:[#allocation20 + $0xb60] sm:$0xff] }
 0x2b2   :  { %4712 = vmatpush1.bf16.msra.mxu0 %v9752_v14  ;;  %v1712_v14 = vld [vmem:[#allocation20 + $0x9c0] sm:$0xff] }
 0x2b3   :  { %4713 = vmatprep.subr.bf16.mxu0 %v9745_v15  ;;  %v1716_v15 = vld [vmem:[#allocation20 + $0x9e0] sm:$0xff] }
 0x2b4   :  { %v10017_v17 = vcombine.high %v1712_v14, %v1716_v15  ;;  %v10016_v22 = vcombine.low %v1712_v14, %v1716_v15  ;;  %v1752_v4 = vld [vmem:[#allocation20 + $0xb00] sm:$0xff] }
 0x2b5   :  { %v1756_v5 = vld [vmem:[#allocation20 + $0xb20] sm:$0xff] }
 0x2b6   :  { %4714 = vmatpush1.bf16.msra.mxu0 %v9744_v20  ;;  %v1704_v20 = vld [vmem:[#allocation20 + $0x980] sm:$0xff] }
 0x2b7   :  { %4715 = vmatprep.subr.bf16.mxu0 %v9737_v21  ;;  %v1708_v21 = vld [vmem:[#allocation20 + $0x9a0] sm:$0xff] }
 0x2b8   :  { %v1744_v8 = vld [vmem:[#allocation20 + $0xac0] sm:$0xff] }
 0x2b9   :  { %v1748_v9 = vld [vmem:[#allocation20 + $0xae0] sm:$0xff] }
 0x2ba   :  { %4716 = vmatpush1.bf16.msra.mxu0 %v9736_v23  ;;  %v10009_v23 = vcombine.high %v1704_v20, %v1708_v21  ;;  %v1736_v14 = vld [vmem:[#allocation20 + $0xa80] sm:$0xff] }
 0x2bb   :  { %4717 = vmatprep.subr.bf16.mxu0 %v9729_v24  ;;  %v12368_v24 = vpack.c.bf16 %v12237_v30, %v12237_v30  ;;  %v1692_v30 = vld [vmem:[#allocation20 + $0x920] sm:$0xff] }
 0x2bc   :  { %v1740_v15 = vld [vmem:[#allocation20 + $0xaa0] sm:$0xff] }
 0x2be   :  { %4718 = vmatpush1.bf16.msra.mxu0 %v9728_v27  ;;  %v10008_v27 = vcombine.low %v1704_v20, %v1708_v21  ;;  %v1728_v20 = vld [vmem:[#allocation20 + $0xa40] sm:$0xff] }
 0x2bf   :  { %4719 = vmatprep.subr.bf16.mxu0 %v9721_v28  ;;  %v1212_v28 = vld [vmem:[%s12854_s13 + $0x8] sm:$0x3]  ;;  %v1732_v21 = vld [vmem:[#allocation20 + $0xa60] sm:$0xff] }
 0x2c0   :  { %11113 = vmatpush3.msk.msra.mxu1 %vm1224_vm6, %v1212_v28 }
 0x2c1   :  { %11114 = vmatprep.subr.mxu1 %v11554_v3 }
 0x2c2   :  { %4720 = vmatpush1.bf16.msra.mxu0 %v9720_v33  ;;  %11115 = vmatpush3.msra.mxu1 %v1211_v32  ;;  %v10000_v33 = vcombine.low %v1696_v25, %v1700_v26  ;;  %v1720_v25 = vld [vmem:[#allocation20 + $0xa00] sm:$0xff] }
 0x2c3   :  { %4721 = vmatprep.subr.bf16.mxu0 %v9713_v35  ;;  %11119 = vmatprep.subr.mxu1 %v11554_v3  ;;  %v9993_v35 = vcombine.high %v1688_v29, %v1692_v30  ;;  %v1724_v26 = vld [vmem:[#allocation20 + $0xa20] sm:$0xff] }
 0x2c4   :  { %v10025_v28 = vcombine.high %v1720_v25, %v1724_v26 }
 0x2c6   :  { %4722 = vmatpush1.bf16.msra.mxu0 %v9712_v39  ;;  %v9992_v39 = vcombine.low %v1688_v29, %v1692_v30  ;;  %v1940_v29 = vld [vmem:[#allocation20 + $0x10e0] sm:$0xff]  ;;  %v10024_v30 = vcombine.low %v1720_v25, %v1724_v26 }
 0x2c7   :  { %4723 = vmatprep.subr.bf16.mxu0 %v9705_v40  ;;  %v9985_v40 = vcombine.high %v1680_v36, %v1684_v38 }
 0x2ca   :  { %4724 = vmatpush1.bf16.msra.mxu0 %v9704_v43  ;;  %v9984_v43 = vcombine.low %v1680_v36, %v1684_v38  ;;  %v12383_v38 = vpack.c.bf16 %v12251_v37, %v12251_v37 }
 0x2cb   :  { %4725 = vmatprep.subr.bf16.mxu0 %v9825_v44  ;;  %v9977_v44 = vcombine.high %v1672_v41, %v1676_v42 }
 0x2ce   :  { %4726 = vmatpush2.bf16.msra.mxu0 %v9824_v47  ;;  %v9976_v47 = vcombine.low %v1672_v41, %v1676_v42  ;;  %v1924_v41 = vld [vmem:[#allocation20 + $0x1060] sm:$0xff] }
 0x2cf   :  { %4727 = vmatprep.subr.bf16.mxu0 %v9817_v48  ;;  %v9969_v48 = vcombine.high %v1664_v45, %v1668_v46 }
 0x2d2   :  { %4728 = vmatpush2.bf16.msra.mxu0 %v9816_v53  ;;  %v9968_v53 = vcombine.low %v1664_v45, %v1668_v46  ;;  %v1912_v45 = vld [vmem:[#allocation20 + $0x1000] sm:$0xff] }
 0x2d3   :  { %4729 = vmatprep.subr.bf16.mxu0 %v9809_v54  ;;  %v9961_v54 = vcombine.high %v1656_v50, %v1660_v52  ;;  %v1916_v46 = vld [vmem:[#allocation20 + $0x1020] sm:$0xff] }
 0x2d4   :  { %v10217_v37 = vcombine.high %v1912_v45, %v1916_v46 }
 0x2d6   :  { %4730 = vmatpush2.bf16.msra.mxu0 %v9808_v57  ;;  %v9960_v57 = vcombine.low %v1656_v50, %v1660_v52  ;;  %v1589_v50 = vld [vmem:[#allocation20 + $0x5e8] sm:$0xff]  ;;  %v10216_v52 = vcombine.low %v1912_v45, %v1916_v46 }
 0x2d7   :  { %4731 = vmatprep.subr.bf16.mxu0 %v9801_v58  ;;  %v10081_v58 = vcombine.high %v1776_v55, %v1780_v56 }
 0x2da   :  { %4732 = vmatpush2.bf16.msra.mxu0 %v9800_v61  ;;  %v10080_v61 = vcombine.low %v1776_v55, %v1780_v56  ;;  %v1581_v55 = vld [vmem:[#allocation20 + $0x5a8] sm:$0xff] }
 0x2db   :  { %4733 = vmatprep.subr.bf16.mxu0 %v9793_v62  ;;  %v10073_v62 = vcombine.high %v1768_v59, %v1772_v60 }
 0x2de   :  { %4734 = vmatpush2.bf16.msra.mxu0 %v9792_v1  ;;  %v10072_v1 = vcombine.low %v1768_v59, %v1772_v60  ;;  %v12393_v59 = vpack.c.bf16 %v12095_v34, %v12095_v34  ;;  %v1569_v60 = vld [vmem:[#allocation20 + $0x548] sm:$0xff] }
 0x2df   :  { %4735 = vmatprep.subr.bf16.mxu0 %v9785_v2  ;;  %v10065_v2 = vcombine.high %v1760_v63, %v1764_v0  ;;  %v1557_v34 = vld [vmem:[#allocation20 + $0x4e8] sm:$0xff] }
 0x2e2   :  { %4736 = vmatpush2.bf16.msra.mxu0 %v9784_v6  ;;  %v10064_v6 = vcombine.low %v1760_v63, %v1764_v0  ;;  %v1561_v0 = vld [vmem:[#allocation20 + $0x508] sm:$0xff] }
 0x2e3   :  { %4737 = vmatprep.subr.bf16.mxu0 %v9777_v7  ;;  %v10057_v7 = vcombine.high %v1752_v4, %v1756_v5 }
 0x2e6   :  { %4738 = vmatpush2.bf16.msra.mxu0 %v9776_v11  ;;  %v10056_v11 = vcombine.low %v1752_v4, %v1756_v5  ;;  %v1553_v4 = vld [vmem:[#allocation20 + $0x4c8] sm:$0xff] }
 0x2e7   :  { %4739 = vmatprep.subr.bf16.mxu0 %v9769_v13  ;;  %v10049_v13 = vcombine.high %v1744_v8, %v1748_v9 }
 0x2ea   :  { %4740 = vmatpush2.bf16.msra.mxu0 %v9768_v16  ;;  %v10048_v16 = vcombine.low %v1744_v8, %v1748_v9  ;;  %v1549_v8 = vld [vmem:[#allocation20 + $0x4a8] sm:$0xff]  ;;  %v9858_v9 = vcombine.low %v1553_v4, %v1557_v34 }
 0x2eb   :  { %4791 = vmatprep.subr.bf16.mxu0 %v10017_v17  ;;  %v10041_v17 = vcombine.high %v1736_v14, %v1740_v15 }
 0x2ed   :  { %4742 = vmatmul.mubr.bf16.vlgmr.msra.gmra.mxu0 %v12364_v18 }
 0x2ee   :  { %4792 = vmatpush1.bf16.msra.mxu0 %v10016_v22  ;;  %4823 = vmatprep.mubr.bf16.mxu0 %v12368_v24  ;;  %v10040_v22 = vcombine.low %v1736_v14, %v1740_v15  ;;  %v1541_v14 = vld [vmem:[#allocation20 + $0x468] sm:$0xff] }
 0x2ef   :  { %4793 = vmatprep.subr.bf16.mxu0 %v10009_v23  ;;  %v10033_v23 = vcombine.high %v1728_v20, %v1732_v21 }
 0x2f2   :  { %4794 = vmatpush1.bf16.msra.mxu0 %v10008_v27  ;;  %v10032_v27 = vcombine.low %v1728_v20, %v1732_v21  ;;  %v1529_v20 = vld [vmem:[#allocation20 + $0x408] sm:$0xff] }
 0x2f3   :  { %4795 = vmatprep.subr.bf16.mxu0 %v10001_v19  ;;  %v1936_v19 = vld [vmem:[#allocation20 + $0x10c0] sm:$0xff]  ;;  %v1533_v21 = vld [vmem:[#allocation20 + $0x428] sm:$0xff] }
 0x2f4   :  { %v10241_v32 = vcombine.high %v1936_v19, %v1940_v29  ;;  %v10240_v36 = vcombine.low %v1936_v19, %v1940_v29  ;;  %v1653_v19 = vld [vmem:[#allocation20 + $0x7e8] sm:$0xff] }
 0x2f6   :  { %4796 = vmatpush1.bf16.msra.mxu0 %v10000_v33  ;;  %v1928_v33 = vld [vmem:[#allocation20 + $0x1080] sm:$0xff] }
 0x2f7   :  { %4797 = vmatprep.subr.bf16.mxu0 %v9993_v35  ;;  %v1932_v35 = vld [vmem:[#allocation20 + $0x10a0] sm:$0xff] }
 0x2f8   :  { %v10232_v42 = vcombine.low %v1928_v33, %v1932_v35 }
 0x2fa   :  { %4798 = vmatpush1.bf16.msra.mxu0 %v9992_v39  ;;  %v10233_v39 = vcombine.high %v1928_v33, %v1932_v35  ;;  %v9693_v33 = vld [vmem:[#allocation14] ss:$0 sm:$0xff] }
 0x2fb   :  { %4799 = vmatprep.subr.bf16.mxu0 %v9985_v40  ;;  %v1920_v40 = vld [vmem:[#allocation20 + $0x1040] sm:$0xff] }
 0x2fe   :  { %4800 = vmatpush1.bf16.msra.mxu0 %v9984_v43  ;;  %v11556_v43 = vmov 0  }
 0x2ff   :  { %4801 = vmatprep.subr.bf16.mxu0 %v9977_v44  ;;  %v10225_v44 = vcombine.high %v1920_v40, %v1924_v41 }
 0x302   :  { %4802 = vmatpush1.bf16.msra.mxu0 %v9976_v47  ;;  %v10224_v47 = vcombine.low %v1920_v40, %v1924_v41  ;;  %v1641_v41 = vld [vmem:[#allocation20 + $0x788] sm:$0xff] }
 0x303   :  { %4803 = vmatprep.subr.bf16.mxu0 %v9969_v48  ;;  %v1585_v48 = vld [vmem:[#allocation20 + $0x5c8] sm:$0xff] }
 0x304   :  { %v9890_v56 = vcombine.low %v1585_v48, %v1589_v50 }
 0x306   :  { %4804 = vmatpush1.bf16.msra.mxu0 %v9968_v53  ;;  %v9891_v53 = vcombine.high %v1585_v48, %v1589_v50 }
 0x307   :  { %4805 = vmatprep.subr.bf16.mxu0 %v9961_v54  ;;  %v1577_v54 = vld [vmem:[#allocation20 + $0x588] sm:$0xff] }
 0x30a   :  { %4806 = vmatpush1.bf16.msra.mxu0 %v9960_v57  ;;  %v12389_v57 = vpack.c.bf16 %v12322_v12, %v12322_v12  ;;  %v1565_v12 = vld [vmem:[#allocation20 + $0x528] sm:$0xff] }
 0x30b   :  { %4807 = vmatprep.subr.bf16.mxu0 %v10081_v58  ;;  %v9883_v58 = vcombine.high %v1577_v54, %v1581_v55  ;;  %v9866_v5 = vcombine.low %v1561_v0, %v1565_v12 }
 0x30e   :  { %4808 = vmatpush2.bf16.msra.mxu0 %v10080_v61  ;;  %v1573_v61 = vld [vmem:[#allocation20 + $0x568] sm:$0xff] }
 0x30f   :  { %4809 = vmatprep.subr.bf16.mxu0 %v10073_v62  ;;  %v9882_v62 = vcombine.low %v1577_v54, %v1581_v55  ;;  %v9875_v63 = vcombine.high %v1569_v60, %v1573_v61 }
 0x312   :  { %4810 = vmatpush2.bf16.msra.mxu0 %v10072_v1  ;;  %v9874_v1 = vcombine.low %v1569_v60, %v1573_v61  ;;  %v1625_v60 = vld [vmem:[#allocation20 + $0x708] sm:$0xff] }
 0x313   :  { %4811 = vmatprep.subr.bf16.mxu0 %v10065_v2  ;;  %v9867_v2 = vcombine.high %v1561_v0, %v1565_v12  ;;  %v1629_v61 = vld [vmem:[#allocation20 + $0x728] sm:$0xff] }
 0x316   :  { %4812 = vmatpush2.bf16.msra.mxu0 %v10064_v6  ;;  %v9859_v6 = vcombine.high %v1553_v4, %v1557_v34  ;;  %v1621_v4 = vld [vmem:[#allocation20 + $0x6e8] sm:$0xff]  ;;  %v9930_v34 = vcombine.low %v1625_v60, %v1629_v61 }
 0x317   :  { %4813 = vmatprep.subr.bf16.mxu0 %v10057_v7  ;;  %v1545_v7 = vld [vmem:[#allocation20 + $0x488] sm:$0xff] }
 0x31a   :  { %4814 = vmatpush2.bf16.msra.mxu0 %v10056_v11  ;;  %v9851_v11 = vcombine.high %v1545_v7, %v1549_v8 }
 0x31b   :  { %4815 = vmatprep.subr.bf16.mxu0 %v10049_v13  ;;  %v1537_v13 = vld [vmem:[#allocation20 + $0x448] sm:$0xff] }
 0x31c   :  { %v9842_v25 = vcombine.low %v1537_v13, %v1541_v14 }
 0x31e   :  { %4816 = vmatpush2.bf16.msra.mxu0 %v10048_v16  ;;  %v9850_v16 = vcombine.low %v1545_v7, %v1549_v8  ;;  %v1613_v7 = vld [vmem:[#allocation20 + $0x6a8] sm:$0xff] }
 0x31f   :  { %4817 = vmatprep.subr.bf16.mxu0 %v10041_v17  ;;  %v9843_v17 = vcombine.high %v1537_v13, %v1541_v14  ;;  %v1601_v13 = vld [vmem:[#allocation20 + $0x648] sm:$0xff] }
 0x320   :  { %v1605_v14 = vld [vmem:[#allocation20 + $0x668] sm:$0xff] }
 0x322   :  { %4818 = vmatpush2.bf16.msra.mxu0 %v10040_v22 }
 0x323   :  { %4819 = vmatprep.subr.bf16.mxu0 %v10033_v23 }
 0x326   :  { %4820 = vmatpush2.bf16.msra.mxu0 %v10032_v27  ;;  %v9835_v27 = vcombine.high %v1529_v20, %v1533_v21 }
 0x327   :  { %4821 = vmatprep.subr.bf16.mxu0 %v10025_v28  ;;  %v1649_v28 = vld [vmem:[#allocation20 + $0x7c8] sm:$0xff] }
 0x32a   :  { %4822 = vmatpush2.bf16.msra.mxu0 %v10024_v30 }
 0x32b   :  { %4881 = vmatprep.subr.bf16.mxu0 %v10241_v32  ;;  %v9834_v32 = vcombine.low %v1529_v20, %v1533_v21  ;;  %v9907_v21 = vcombine.high %v1601_v13, %v1605_v14 }
 0x32d   :  { %4824 = vmatmul.mubr.bf16.vlgmr.msra.gmra.mxu0 %v12383_v38 }
 0x32e   :  { %4882 = vmatpush1.bf16.msra.mxu0 %v10240_v36  ;;  %4905 = vmatprep.mubr.bf16.mxu0 %v11556_v43  ;;  %v9955_v36 = vcombine.high %v1649_v28, %v1653_v19 }
 0x32f   :  { %4883 = vmatprep.subr.bf16.mxu0 %v10233_v39  ;;  %v10844_v15 = vpop.f32.mrf.mxu0 }
 0x331   :  { %v10845_v22 = vpop.f32.mrf.mxu0 }
 0x332   :  { %4884 = vmatpush1.bf16.msra.mxu0 %v10232_v42  ;;  %v10846_v30 = vadd.f32 %v10845_v22, %v10844_v15  ;;  %v1645_v42 = vld [vmem:[#allocation20 + $0x7a8] sm:$0xff] }
 0x333   :  { %4885 = vmatprep.subr.bf16.mxu0 %v10225_v44  ;;  %v9946_v55 = vcombine.low %v1641_v41, %v1645_v42 }
 0x334   :  { %v833_v44 = vadd.f32 %v10846_v30, %v9693_v33  ;;  %v1837_v33 = vld [vmem:[#allocation20 + $0xda8] sm:$0xff] }
 0x336   :  { %4886 = vmatpush1.bf16.msra.mxu0 %v10224_v47  ;;  %v9954_v47 = vcombine.low %v1649_v28, %v1653_v19  ;;  %v1841_v28 = vld [vmem:[#allocation20 + $0xdc8] sm:$0xff] }
 0x337   :  { %4887 = vmatprep.subr.bf16.mxu0 %v10217_v37  ;;  %v10879_v23 = vpop.f32.mrf.mxu1  ;;  %v9947_v37 = vcombine.high %v1641_v41, %v1645_v42  ;;  %v1845_v19 = vld [vmem:[#allocation20 + $0xde8] sm:$0xff] }
 0x338   :  { %v10147_v30 = vcombine.high %v1841_v28, %v1845_v19  ;;  %v1825_v41 = vld [vmem:[#allocation20 + $0xd48] sm:$0xff] }
 0x339   :  { %v10880_v29 = vpop.f32.mrf.mxu1  ;;  %v1829_v42 = vld [vmem:[#allocation20 + $0xd68] sm:$0xff] }
 0x33a   :  { %4888 = vmatpush1.bf16.msra.mxu0 %v10216_v52  ;;  %v10881_v39 = vadd.f32 %v10880_v29, %v10879_v23  ;;  %v1633_v52 = vld [vmem:[#allocation20 + $0x748] sm:$0xff] }
 0x33b   :  { %4955 = vmatprep.subr.bf16.mxu0 %v9891_v53  ;;  %v1637_v53 = vld [vmem:[#allocation20 + $0x768] sm:$0xff] }
 0x33c   :  { %v903_v48 = vadd.f32 %v10881_v39, %v833_v44  ;;  %v9938_v0 = vcombine.low %v1633_v52, %v1637_v53  ;;  %v1593_v23 = vld [vmem:[#allocation20 + $0x608] sm:$0xff] }
 0x33d   :  { %10248 = vmatmul.mubr.msk.bf16.vlgmr.msra.gmra.mxu0 %vm762_vm3, %v12389_v57 }
 0x33e   :  { %4956 = vmatpush1.bf16.msra.mxu0 %v9890_v56  ;;  %4987 = vmatprep.mubr.bf16.mxu0 %v12393_v59  ;;  %v9939_v56 = vcombine.high %v1633_v52, %v1637_v53  ;;  %v1801_v53 = vld [vmem:[#allocation20 + $0xc88] sm:$0xff] }
 0x33f   :  { %4957 = vmatprep.subr.bf16.mxu0 %v9883_v58 }
 0x342   :  { %4958 = vmatpush1.bf16.msra.mxu0 %v9882_v62 }
 0x343   :  { %4959 = vmatprep.subr.bf16.mxu0 %v9875_v63 }
 0x346   :  { %4960 = vmatpush1.bf16.msra.mxu0 %v9874_v1  ;;  %v9931_v1 = vcombine.high %v1625_v60, %v1629_v61  ;;  %v1797_v60 = vld [vmem:[#allocation20 + $0xc68] sm:$0xff] }
 0x347   :  { %4961 = vmatprep.subr.bf16.mxu0 %v9867_v2  ;;  %v1617_v2 = vld [vmem:[#allocation20 + $0x6c8] sm:$0xff] }
 0x348   :  { %v9922_v8 = vcombine.low %v1617_v2, %v1621_v4 }
 0x34a   :  { %4962 = vmatpush1.bf16.msra.mxu0 %v9866_v5  ;;  %v9923_v5 = vcombine.high %v1617_v2, %v1621_v4  ;;  %v1905_v2 = vld [vmem:[#allocation20 + $0xfc8] sm:$0xff] }
 0x34b   :  { %4963 = vmatprep.subr.bf16.mxu0 %v9859_v6  ;;  %v1609_v6 = vld [vmem:[#allocation20 + $0x688] sm:$0xff] }
 0x34c   :  { %v1909_v4 = vld [vmem:[#allocation20 + $0xfe8] sm:$0xff] }
 0x34e   :  { %4964 = vmatpush1.bf16.msra.mxu0 %v9858_v9  ;;  %v9695_v9 = vld [vmem:[#allocation17] ss:$0 sm:$0xff] }
 0x34f   :  { %4965 = vmatprep.subr.bf16.mxu0 %v9851_v11  ;;  %v10914_v26 = vpop.f32.mrf.mxu0  ;;  %v9915_v11 = vcombine.high %v1609_v6, %v1613_v7 }
 0x351   :  { %v10915_v35 = vpop.f32.mrf.mxu0 }
 0x352   :  { %4966 = vmatpush1.bf16.msra.mxu0 %v9850_v16  ;;  %v10916_v45 = vadd.f32 %v10915_v35, %v10914_v26  ;;  %v9906_v26 = vcombine.low %v1601_v13, %v1605_v14  ;;  %v10146_v35 = vcombine.low %v1841_v28, %v1845_v19  ;;  %v1893_v13 = vld [vmem:[#allocation20 + $0xf68] sm:$0xff] }
 0x353   :  { %4967 = vmatprep.subr.bf16.mxu0 %v9843_v17  ;;  %v9914_v17 = vcombine.low %v1609_v6, %v1613_v7  ;;  %v1897_v6 = vld [vmem:[#allocation20 + $0xf88] sm:$0xff] }
 0x354   :  { %v973_v54 = vadd.f32 %v10916_v45, %v903_v48  ;;  %v10131_v45 = vcombine.high %v1825_v41, %v1829_v42  ;;  %v1809_v48 = vld [vmem:[#allocation20 + $0xcc8] sm:$0xff] }
 0x355   :  { %v1901_v7 = vld [vmem:[#allocation20 + $0xfa8] sm:$0xff] }
 0x356   :  { %4968 = vmatpush1.bf16.msra.mxu0 %v9842_v25  ;;  %v1597_v25 = vld [vmem:[#allocation20 + $0x628] sm:$0xff]  ;;  %v10202_v14 = vcombine.low %v1897_v6, %v1901_v7 }
 0x357   :  { %4969 = vmatprep.subr.bf16.mxu0 %v9835_v27  ;;  %v9899_v27 = vcombine.high %v1593_v23, %v1597_v25  ;;  %v9898_v29 = vcombine.low %v1593_v23, %v1597_v25  ;;  %v1877_v23 = vld [vmem:[#allocation20 + $0xee8] sm:$0xff] }
 0x358   :  { %v10949_v40 = vpop.f32.mrf.mxu1  ;;  %v1869_v28 = vld [vmem:[#allocation20 + $0xea8] sm:$0xff] }
 0x35a   :  { %4970 = vmatpush1.bf16.msra.mxu0 %v9834_v32  ;;  %v10950_v46 = vpop.f32.mrf.mxu1  ;;  %v1833_v32 = vld [vmem:[#allocation20 + $0xd88] sm:$0xff] }
 0x35b   :  { %4971 = vmatprep.subr.bf16.mxu0 %v9955_v36  ;;  %v10951_v50 = vadd.f32 %v10950_v46, %v10949_v40  ;;  %v12403_v36 = vpack.c.bf16 %v12090_v31, %v12090_v31  ;;  %v10139_v39 = vcombine.high %v1833_v32, %v1837_v33  ;;  %v12407_v40 = vpack.c.bf16 %v12287_v49, %v12287_v49  ;;  %v1817_v46 = vld [vmem:[#allocation20 + $0xd08] sm:$0xff] }
 0x35c   :  { %v10138_v44 = vcombine.low %v1833_v32, %v1837_v33  ;;  %v10130_v31 = vcombine.low %v1825_v41, %v1829_v42  ;;  %v1861_v32 = vld [vmem:[#allocation20 + $0xe68] sm:$0xff] }
 0x35d   :  { %v1043_v58 = vadd.f32 %v10951_v50, %v973_v54  ;;  %v1813_v50 = vld [vmem:[#allocation20 + $0xce8] sm:$0xff] }
 0x35e   :  { %4972 = vmatpush2.bf16.msra.mxu0 %v9954_v47  ;;  %v1821_v47 = vld [vmem:[#allocation20 + $0xd28] sm:$0xff]  ;;  %v10115_v52 = vcombine.high %v1809_v48, %v1813_v50 }
 0x35f   :  { %4973 = vmatprep.subr.bf16.mxu0 %v9947_v37  ;;  %v10123_v37 = vcombine.high %v1817_v46, %v1821_v47  ;;  %v10122_v49 = vcombine.low %v1817_v46, %v1821_v47  ;;  %v1805_v54 = vld [vmem:[#allocation20 + $0xca8] sm:$0xff] }
 0x360   :  { %v10106_v61 = vcombine.low %v1801_v53, %v1805_v54  ;;  %v1849_v42 = vld [vmem:[#allocation20 + $0xe08] sm:$0xff] }
 0x361   :  { %v1112_v62 = vpop.f32.mrf.mxu0 }
 0x362   :  { %v1113_v63 = vadd.f32 %v1112_v62, %v1043_v58  ;;  %4974 = vmatpush2.bf16.msra.mxu0 %v9946_v55  ;;  %v10114_v55 = vcombine.low %v1809_v48, %v1813_v50  ;;  %v1793_v58 = vld [vmem:[#allocation20 + $0xc48] sm:$0xff]  ;;  %v12417_v48 = vld [vmem:[#allocation20 + $0x5e0] sm:$0xff]  ;;  %v1458_v50 = vld [vmem:[#allocation20 + $0x1d0] sm:$0xff] }
 0x363   :  { %v11096_v12 = vpop.f32.mrf.mxu0  ;;  %4975 = vmatprep.subr.bf16.mxu0 %v9939_v56  ;;  %v10107_v56 = vcombine.high %v1801_v53, %v1805_v54  ;;  %v10099_v62 = vcombine.high %v1793_v58, %v1797_v60 }
 0x364   :  { %1117 = vst.msk [vmem:[#allocation32] sm:$0x3] %vm1116_vm7, %v1113_v63  ;;  %v1785_v63 = vld [vmem:[#allocation20 + $0xc08] sm:$0xff]  ;;  %v10098_v12 = vcombine.low %v1793_v58, %v1797_v60  ;;  %v1450_v58 = vld [vmem:[#allocation20 + $0x190] sm:$0xff] }
 0x365   :  { %v1454_v60 = vld [vmem:[#allocation20 + $0x1b0] sm:$0xff] }
 0x366   :  { %4976 = vmatpush2.bf16.msra.mxu0 %v9938_v0  ;;  %v1789_v0 = vld [vmem:[#allocation20 + $0xc28] sm:$0xff] }
 0x367   :  { %4977 = vmatprep.subr.bf16.mxu0 %v9931_v1  ;;  %v10091_v1 = vcombine.high %v1785_v63, %v1789_v0 }
 0x36a   :  { %4978 = vmatpush2.bf16.msra.mxu0 %v9930_v34  ;;  %v10090_v34 = vcombine.low %v1785_v63, %v1789_v0  ;;  %v9757_v63 = vcombine.high %v1450_v58, %v1454_v60  ;;  %v1442_v0 = vld [vmem:[#allocation20 + $0x150] sm:$0xff] }
 0x36b   :  { %4979 = vmatprep.subr.bf16.mxu0 %v9923_v5  ;;  %v10211_v5 = vcombine.high %v1905_v2, %v1909_v4 }
 0x36d   :  { %v1206_v15 = vpop.f32.mrf.mxu0 }
 0x36e   :  { %v1207_v16 = vadd.f32 %v9695_v9, %v1206_v15  ;;  %4980 = vmatpush2.bf16.msra.mxu0 %v9922_v8  ;;  %v10210_v8 = vcombine.low %v1905_v2, %v1909_v4  ;;  %v10203_v9 = vcombine.high %v1897_v6, %v1901_v7  ;;  %v1434_v4 = vld [vmem:[#allocation20 + $0x110] sm:$0xff] }
 0x36f   :  { %v11111_v20 = vpop.f32.mrf.mxu0  ;;  %4981 = vmatprep.subr.bf16.mxu0 %v9915_v11  ;;  %v1889_v11 = vld [vmem:[#allocation20 + $0xf48] sm:$0xff]  ;;  %v1430_v7 = vld [vmem:[#allocation20 + $0xf0] sm:$0xff] }
 0x370   :  { %v1210_v22 = vmax.f32 %v1207_v16, 0.0  ;;  %v10195_v15 = vcombine.high %v1889_v11, %v1893_v13  ;;  %v1881_v16 = vld [vmem:[#allocation20 + $0xf08] sm:$0xff]  ;;  %v10194_v20 = vcombine.low %v1889_v11, %v1893_v13  ;;  %v1418_v11 = vld [vmem:[#allocation20 + $0x90] sm:$0xff] }
 0x371   :  { %v1422_v13 = vld [vmem:[#allocation20 + $0xb0] sm:$0xff] }
 0x372   :  { %11117 = vmatmul.mubr.msk.f32.vlgmr.msra.gmra.mxu1 %vm1220_vm8, %v1210_v22  ;;  %4982 = vmatpush2.bf16.msra.mxu0 %v9914_v17  ;;  %v1885_v17 = vld [vmem:[#allocation20 + $0xf28] sm:$0xff] }
 0x373   :  { %4983 = vmatprep.subr.bf16.mxu0 %v9907_v21  ;;  %11121 = vmatprep.mubr.msk.f32.mxu1 %vm11555_vm0, %v11554_v3  ;;  %v10187_v21 = vcombine.high %v1881_v16, %v1885_v17  ;;  %v1873_v22 = vld [vmem:[#allocation20 + $0xec8] sm:$0xff]  ;;  %v10186_v25 = vcombine.low %v1881_v16, %v1885_v17  ;;  %v1410_v16 = vld [vmem:[#allocation20 + $0x50] sm:$0xff] }
 0x374   :  { %v10178_v19 = vcombine.low %v1873_v22, %v1877_v23  ;;  %v1414_v17 = vld [vmem:[#allocation20 + $0x70] sm:$0xff] }
 0x376   :  { %4984 = vmatpush2.bf16.msra.mxu0 %v9906_v26  ;;  %v10179_v26 = vcombine.high %v1873_v22, %v1877_v23  ;;  %v1402_v22 = vld [vmem:[#allocation20 + $0x10] sm:$0xff] }
 0x377   :  { %4985 = vmatprep.subr.bf16.mxu0 %v9899_v27  ;;  %v1865_v27 = vld [vmem:[#allocation20 + $0xe88] sm:$0xff]  ;;  %v1406_v23 = vld [vmem:[#allocation20 + $0x30] sm:$0xff] }
 0x37a   :  { %4986 = vmatpush2.bf16.msra.mxu0 %v9898_v29  ;;  %v10171_v29 = vcombine.high %v1865_v27, %v1869_v28 }
 0x37b   :  { %5037 = vmatprep.subr.bf16.mxu0 %v10147_v30  ;;  %v1857_v30 = vld [vmem:[#allocation20 + $0xe48] sm:$0xff] }
 0x37c   :  { %v10163_v41 = vcombine.high %v1857_v30, %v1861_v32  ;;  %v10162_v46 = vcombine.low %v1857_v30, %v1861_v32  ;;  %v1514_v30 = vld [vmem:[#allocation20 + $0x390] sm:$0xff] }
 0x37d   :  { %4988 = vmatmul.mubr.bf16.vlgmr.msra.gmra.mxu0 %v12403_v36  ;;  %v1518_v32 = vld [vmem:[#allocation20 + $0x3b0] sm:$0xff] }
 0x37e   :  { %5038 = vmatpush1.bf16.msra.mxu0 %v10146_v35  ;;  %5069 = vmatprep.mubr.bf16.mxu0 %v12407_v40  ;;  %v10170_v35 = vcombine.low %v1865_v27, %v1869_v28  ;;  %v1522_v27 = vld [vmem:[#allocation20 + $0x3d0] sm:$0xff] }
 0x37f   :  { %5039 = vmatprep.subr.bf16.mxu0 %v10139_v39  ;;  %v1526_v28 = vld [vmem:[#allocation20 + $0x3f0] sm:$0xff] }
 0x382   :  { %5040 = vmatpush1.bf16.msra.mxu0 %v10138_v44  ;;  %v1853_v44 = vld [vmem:[#allocation20 + $0xe28] sm:$0xff] }
 0x383   :  { %5041 = vmatprep.subr.bf16.mxu0 %v10131_v45 }
 0x386   :  { %5042 = vmatpush1.bf16.msra.mxu0 %v10130_v31  ;;  %v10155_v31 = vcombine.high %v1849_v42, %v1853_v44 }
 0x387   :  { %5043 = vmatprep.subr.bf16.mxu0 %v10123_v37  ;;  %v12415_v37 = vld [vmem:[#allocation20 + $0x5c0] sm:$0xff] }
 0x388   :  { %v9889_v53 = vcombine.high %v12415_v37, %v12417_v48  ;;  %v9888_v54 = vcombine.low %v12415_v37, %v12417_v48 }
 0x38a   :  { %5044 = vmatpush1.bf16.msra.mxu0 %v10122_v49  ;;  %v1462_v49 = vld [vmem:[#allocation20 + $0x1f0] sm:$0xff] }
 0x38b   :  { %5045 = vmatprep.subr.bf16.mxu0 %v10115_v52  ;;  %v1299_v52 = vld [vmem:[%s12811_s12] sm:$0x1f] }
 0x38c   :  { %11120 = vmatpush3.msk.msra.mxu1 %vm1311_vm9, %v1299_v52  ;;  %v1490_v52 = vld [vmem:[#allocation20 + $0x2d0] sm:$0xff] }
 0x38d   :  { %4750 = vmatprep.subr.bf16.mxu1 %v9889_v53  ;;  %v1494_v53 = vld [vmem:[#allocation20 + $0x2f0] sm:$0xff] }
 0x38e   :  { %5046 = vmatpush1.bf16.msra.mxu0 %v10114_v55  ;;  %v10154_v55 = vcombine.low %v1849_v42, %v1853_v44  ;;  %v1506_v42 = vld [vmem:[#allocation20 + $0x350] sm:$0xff] }
 0x38f   :  { %5047 = vmatprep.subr.bf16.mxu0 %v10107_v56  ;;  %v9765_v56 = vcombine.high %v1458_v50, %v1462_v49  ;;  %v1510_v44 = vld [vmem:[#allocation20 + $0x370] sm:$0xff] }
 0x392   :  { %5048 = vmatpush1.bf16.msra.mxu0 %v10106_v61  ;;  %v9764_v61 = vcombine.low %v1458_v50, %v1462_v49  ;;  %v9812_v50 = vcombine.low %v1506_v42, %v1510_v44 }
 0x393   :  { %5049 = vmatprep.subr.bf16.mxu0 %v10099_v62  ;;  %v12429_v62 = vpack.c.bf16 %v12292_v51, %v12292_v51  ;;  %v1426_v51 = vld [vmem:[#allocation20 + $0xd0] sm:$0xff] }
 0x396   :  { %5050 = vmatpush1.bf16.msra.mxu0 %v10098_v12  ;;  %v1446_v12 = vld [vmem:[#allocation20 + $0x170] sm:$0xff] }
 0x397   :  { %5051 = vmatprep.subr.bf16.mxu0 %v10091_v1  ;;  %v9756_v1 = vcombine.low %v1450_v58, %v1454_v60  ;;  %v9749_v2 = vcombine.high %v1442_v0, %v1446_v12  ;;  %v1482_v58 = vld [vmem:[#allocation20 + $0x290] sm:$0xff] }
 0x398   :  { %v1486_v60 = vld [vmem:[#allocation20 + $0x2b0] sm:$0xff] }
 0x39a   :  { %5052 = vmatpush1.bf16.msra.mxu0 %v10090_v34  ;;  %v1438_v34 = vld [vmem:[#allocation20 + $0x130] sm:$0xff] }
 0x39b   :  { %5053 = vmatprep.subr.bf16.mxu0 %v10211_v5  ;;  %v9748_v5 = vcombine.low %v1442_v0, %v1446_v12  ;;  %v9741_v6 = vcombine.high %v1434_v4, %v1438_v34  ;;  %v1474_v0 = vld [vmem:[#allocation20 + $0x250] sm:$0xff] }
 0x39c   :  { %v1478_v12 = vld [vmem:[#allocation20 + $0x270] sm:$0xff] }
 0x39e   :  { %5054 = vmatpush2.bf16.msra.mxu0 %v10210_v8  ;;  %v9740_v8 = vcombine.low %v1434_v4, %v1438_v34  ;;  %v9781_v34 = vcombine.high %v1474_v0, %v1478_v12 }
 0x39f   :  { %5055 = vmatprep.subr.bf16.mxu0 %v10203_v9  ;;  %v9733_v9 = vcombine.high %v1426_v51, %v1430_v7 }
 0x3a2   :  { %5056 = vmatpush2.bf16.msra.mxu0 %v10202_v14  ;;  %v9732_v14 = vcombine.low %v1426_v51, %v1430_v7  ;;  %v9780_v7 = vcombine.low %v1474_v0, %v1478_v12  ;;  %v1778_v0 = vld [vmem:[#allocation20 + $0xbd0] sm:$0xff] }
 0x3a3   :  { %5057 = vmatprep.subr.bf16.mxu0 %v10195_v15  ;;  %v9725_v15 = vcombine.high %v1418_v11, %v1422_v13  ;;  %v1782_v12 = vld [vmem:[#allocation20 + $0xbf0] sm:$0xff] }
 0x3a6   :  { %5058 = vmatpush2.bf16.msra.mxu0 %v10194_v20  ;;  %v9724_v20 = vcombine.low %v1418_v11, %v1422_v13  ;;  %v1714_v11 = vld [vmem:[#allocation20 + $0x9d0] sm:$0xff] }
 0x3a7   :  { %5059 = vmatprep.subr.bf16.mxu0 %v10187_v21  ;;  %v9717_v21 = vcombine.high %v1410_v16, %v1414_v17  ;;  %v1718_v13 = vld [vmem:[#allocation20 + $0x9f0] sm:$0xff] }
 0x3aa   :  { %5060 = vmatpush2.bf16.msra.mxu0 %v10186_v25  ;;  %v9716_v25 = vcombine.low %v1410_v16, %v1414_v17  ;;  %v1706_v16 = vld [vmem:[#allocation20 + $0x990] sm:$0xff] }
 0x3ab   :  { %5061 = vmatprep.subr.bf16.mxu0 %v10179_v26  ;;  %v9709_v26 = vcombine.high %v1402_v22, %v1406_v23  ;;  %v1710_v17 = vld [vmem:[#allocation20 + $0x9b0] sm:$0xff] }
 0x3ad   :  { %v12411_v33 = vpop.f32.mrf.mxu0 }
 0x3ae   :  { %5062 = vmatpush2.bf16.msra.mxu0 %v10178_v19  ;;  %v9708_v19 = vcombine.low %v1402_v22, %v1406_v23  ;;  %v1698_v22 = vld [vmem:[#allocation20 + $0x950] sm:$0xff] }
 0x3af   :  { %v12413_v39 = vpop.f32.mrf.mxu0  ;;  %5063 = vmatprep.subr.bf16.mxu0 %v10171_v29  ;;  %v9829_v29 = vcombine.high %v1522_v27, %v1526_v28  ;;  %v1702_v23 = vld [vmem:[#allocation20 + $0x970] sm:$0xff] }
 0x3b1   :  { %v4747_v45 = vpop.f32.mrf.mxu0 }
 0x3b2   :  { %5064 = vmatpush2.bf16.msra.mxu0 %v10170_v35  ;;  %v9828_v35 = vcombine.low %v1522_v27, %v1526_v28  ;;  %v9820_v45 = vcombine.low %v1514_v30, %v1518_v32  ;;  %v10005_v28 = vcombine.high %v1698_v22, %v1702_v23 }
 0x3b3   :  { %v4748_v47 = vpop.f32.mrf.mxu0  ;;  %5065 = vmatprep.subr.bf16.mxu0 %v10163_v41  ;;  %v9821_v41 = vcombine.high %v1514_v30, %v1518_v32  ;;  %v10004_v32 = vcombine.low %v1698_v22, %v1702_v23 }
 0x3b4   :  { %v1498_v47 = vld [vmem:[#allocation20 + $0x310] sm:$0xff] }
 0x3b6   :  { %5066 = vmatpush2.bf16.msra.mxu0 %v10162_v46  ;;  %v9813_v46 = vcombine.high %v1506_v42, %v1510_v44  ;;  %v1682_v42 = vld [vmem:[#allocation20 + $0x8d0] sm:$0xff] }
 0x3b7   :  { %5067 = vmatprep.subr.bf16.mxu0 %v10155_v31  ;;  %v1502_v31 = vld [vmem:[#allocation20 + $0x330] sm:$0xff] }
 0x3b8   :  { %v9805_v49 = vcombine.high %v1498_v47, %v1502_v31  ;;  %v1686_v44 = vld [vmem:[#allocation20 + $0x8f0] sm:$0xff] }
 0x3ba   :  { %5068 = vmatpush2.bf16.msra.mxu0 %v10154_v55  ;;  %v9804_v55 = vcombine.low %v1498_v47, %v1502_v31  ;;  %v1674_v47 = vld [vmem:[#allocation20 + $0x890] sm:$0xff] }
 0x3bb   :  { %5119 = vmatprep.subr.bf16.mxu0 %v9765_v56  ;;  %v9797_v56 = vcombine.high %v1490_v52, %v1494_v53  ;;  %v1678_v31 = vld [vmem:[#allocation20 + $0x8b0] sm:$0xff] }
 0x3bd   :  { %5070 = vmatmul.mubr.bf16.vlgmr.msra.gmra.mxu0 %v12429_v62 }
 0x3be   :  { %5120 = vmatpush1.bf16.msra.mxu0 %v9764_v61  ;;  %5151 = vmatprep.mubr.bf16.mxu0 %v12359_v10  ;;  %v9796_v61 = vcombine.low %v1490_v52, %v1494_v53  ;;  %v1666_v52 = vld [vmem:[#allocation20 + $0x850] sm:$0xff] }
 0x3bf   :  { %5121 = vmatprep.subr.bf16.mxu0 %v9757_v63  ;;  %v9789_v63 = vcombine.high %v1482_v58, %v1486_v60  ;;  %v1670_v53 = vld [vmem:[#allocation20 + $0x870] sm:$0xff] }
 0x3c2   :  { %5122 = vmatpush1.bf16.msra.mxu0 %v9756_v1 }
 0x3c3   :  { %5123 = vmatprep.subr.bf16.mxu0 %v9749_v2  ;;  %v9788_v2 = vcombine.low %v1482_v58, %v1486_v60  ;;  %v1658_v58 = vld [vmem:[#allocation20 + $0x810] sm:$0xff] }
 0x3c4   :  { %v1662_v60 = vld [vmem:[#allocation20 + $0x830] sm:$0xff] }
 0x3c6   :  { %5124 = vmatpush1.bf16.msra.mxu0 %v9748_v5  ;;  %v1466_v5 = vld [vmem:[#allocation20 + $0x210] sm:$0xff] }
 0x3c7   :  { %5125 = vmatprep.subr.bf16.mxu0 %v9741_v6  ;;  %v1470_v6 = vld [vmem:[#allocation20 + $0x230] sm:$0xff] }
 0x3ca   :  { %5126 = vmatpush1.bf16.msra.mxu0 %v9740_v8 }
 0x3cb   :  { %5127 = vmatprep.subr.bf16.mxu0 %v9733_v9  ;;  %v9773_v9 = vcombine.high %v1466_v5, %v1470_v6 }
 0x3ce   :  { %5128 = vmatpush1.bf16.msra.mxu0 %v9732_v14  ;;  %v9772_v14 = vcombine.low %v1466_v5, %v1470_v6  ;;  %v1770_v5 = vld [vmem:[#allocation20 + $0xb90] sm:$0xff] }
 0x3cf   :  { %5129 = vmatprep.subr.bf16.mxu0 %v9725_v15  ;;  %v10021_v15 = vcombine.high %v1714_v11, %v1718_v13  ;;  %v1774_v6 = vld [vmem:[#allocation20 + $0xbb0] sm:$0xff] }
 0x3d2   :  { %5130 = vmatpush1.bf16.msra.mxu0 %v9724_v20  ;;  %v10020_v20 = vcombine.low %v1714_v11, %v1718_v13  ;;  %v10076_v11 = vcombine.low %v1770_v5, %v1774_v6 }
 0x3d3   :  { %5131 = vmatprep.subr.bf16.mxu0 %v9717_v21  ;;  %v10013_v21 = vcombine.high %v1706_v16, %v1710_v17 }
 0x3d6   :  { %5132 = vmatpush1.bf16.msra.mxu0 %v9716_v25 }
 0x3d7   :  { %5133 = vmatprep.subr.bf16.mxu0 %v9709_v26  ;;  %v10012_v26 = vcombine.low %v1706_v16, %v1710_v17 }
 0x3da   :  { %5134 = vmatpush1.bf16.msra.mxu0 %v9708_v19  ;;  %v1690_v19 = vld [vmem:[#allocation20 + $0x910] sm:$0xff] }
 0x3db   :  { %5135 = vmatprep.subr.bf16.mxu0 %v9829_v29  ;;  %v1694_v29 = vld [vmem:[#allocation20 + $0x930] sm:$0xff] }
 0x3de   :  { %5136 = vmatpush2.bf16.msra.mxu0 %v9828_v35 }
 0x3df   :  { %5137 = vmatprep.subr.bf16.mxu0 %v9821_v41  ;;  %v9997_v41 = vcombine.high %v1690_v19, %v1694_v29 }
 0x3e2   :  { %5138 = vmatpush2.bf16.msra.mxu0 %v9820_v45  ;;  %v9996_v45 = vcombine.low %v1690_v19, %v1694_v29 }
 0x3e3   :  { %5139 = vmatprep.subr.bf16.mxu0 %v9813_v46  ;;  %v9989_v46 = vcombine.high %v1682_v42, %v1686_v44 }
 0x3e6   :  { %5140 = vmatpush2.bf16.msra.mxu0 %v9812_v50  ;;  %v9988_v50 = vcombine.low %v1682_v42, %v1686_v44  ;;  %v9698_v42 = vld [vmem:[#allocation18] ss:$0 sm:$0xff]  ;;  %v1722_v44 = vld [vmem:[#allocation20 + $0xa10] sm:$0xff] }
 0x3e7   :  { %5141 = vmatprep.subr.bf16.mxu0 %v9805_v49  ;;  %v9981_v49 = vcombine.high %v1674_v47, %v1678_v31 }
 0x3ea   :  { %5142 = vmatpush2.bf16.msra.mxu0 %v9804_v55  ;;  %v9980_v55 = vcombine.low %v1674_v47, %v1678_v31  ;;  %v1576_v31 = vld [vmem:[#allocation20 + $0x580] sm:$0xff] }
 0x3eb   :  { %5143 = vmatprep.subr.bf16.mxu0 %v9797_v56  ;;  %v9973_v56 = vcombine.high %v1666_v52, %v1670_v53 }
 0x3ed   :  { %v12433_v1 = vpop.f32.mrf.mxu0 }
 0x3ee   :  { %5144 = vmatpush2.bf16.msra.mxu0 %v9796_v61  ;;  %v9972_v61 = vcombine.low %v1666_v52, %v1670_v53 }
 0x3ef   :  { %v12435_v4 = vpop.f32.mrf.mxu0  ;;  %5145 = vmatprep.subr.bf16.mxu0 %v9789_v63  ;;  %v9965_v63 = vcombine.high %v1658_v58, %v1662_v60 }
 0x3f1   :  { %v4829_v51 = vpop.f32.mrf.mxu0 }
 0x3f2   :  { %5146 = vmatpush2.bf16.msra.mxu0 %v9788_v2  ;;  %v9964_v2 = vcombine.low %v1658_v58, %v1662_v60  ;;  %v10084_v51 = vcombine.low %v1778_v0, %v1782_v12 }
 0x3f3   :  { %v4830_v8 = vpop.f32.mrf.mxu0  ;;  %5147 = vmatprep.subr.bf16.mxu0 %v9781_v34  ;;  %v10085_v34 = vcombine.high %v1778_v0, %v1782_v12  ;;  %v1572_v0 = vld [vmem:[#allocation20 + $0x560] sm:$0xff] }
 0x3f4   :  { %v1762_v8 = vld [vmem:[#allocation20 + $0xb50] sm:$0xff] }
 0x3f6   :  { %5148 = vmatpush2.bf16.msra.mxu0 %v9780_v7  ;;  %v10077_v7 = vcombine.high %v1770_v5, %v1774_v6  ;;  %v1934_v5 = vld [vmem:[#allocation20 + $0x10b0] sm:$0xff] }
 0x3f7   :  { %5149 = vmatprep.subr.bf16.mxu0 %v9773_v9  ;;  %v1766_v9 = vld [vmem:[#allocation20 + $0xb70] sm:$0xff] }
 0x3f8   :  { %v10069_v13 = vcombine.high %v1762_v8, %v1766_v9  ;;  %v10068_v16 = vcombine.low %v1762_v8, %v1766_v9  ;;  %v1564_v8 = vld [vmem:[#allocation20 + $0x520] sm:$0xff] }
 0x3fa   :  { %5150 = vmatpush2.bf16.msra.mxu0 %v9772_v14  ;;  %v1754_v14 = vld [vmem:[#allocation20 + $0xb10] sm:$0xff] }
 0x3fb   :  { %5201 = vmatprep.subr.bf16.mxu0 %v10021_v15  ;;  %v1758_v15 = vld [vmem:[#allocation20 + $0xb30] sm:$0xff] }
 0x3fc   :  { %v10061_v17 = vcombine.high %v1754_v14, %v1758_v15  ;;  %v10060_v22 = vcombine.low %v1754_v14, %v1758_v15  ;;  %v1926_v14 = vld [vmem:[#allocation20 + $0x1070] sm:$0xff] }
 0x3fd   :  { %v12437_v25 = vpop.f32.mrf.mxu0  ;;  %5152 = vmatmul.mubr.bf16.vlgmr.msra.gmra.mxu0 %v12364_v18 }
 0x3fe   :  { %5202 = vmatpush1.bf16.msra.mxu0 %v10020_v20  ;;  %5233 = vmatprep.mubr.bf16.mxu0 %v12368_v24  ;;  %v1746_v20 = vld [vmem:[#allocation20 + $0xad0] sm:$0xff] }
 0x3ff   :  { %v12441_v27 = vpop.f32.mrf.mxu0  ;;  %5203 = vmatprep.subr.bf16.mxu0 %v10013_v21  ;;  %v1750_v21 = vld [vmem:[#allocation20 + $0xaf0] sm:$0xff] }
 0x400   :  { %v10053_v23 = vcombine.high %v1746_v20, %v1750_v21  ;;  %v10052_v19 = vcombine.low %v1746_v20, %v1750_v21 }
 0x401   :  { %v4911_v30 = vpop.f32.mrf.mxu0 }
 0x402   :  { %5204 = vmatpush1.bf16.msra.mxu0 %v10012_v26  ;;  %v1738_v26 = vld [vmem:[#allocation20 + $0xa90] sm:$0xff] }
 0x403   :  { %v4912_v35 = vpop.f32.mrf.mxu0  ;;  %5205 = vmatprep.subr.bf16.mxu0 %v10005_v28  ;;  %v1742_v28 = vld [vmem:[#allocation20 + $0xab0] sm:$0xff] }
 0x404   :  { %v10045_v29 = vcombine.high %v1738_v26, %v1742_v28  ;;  %v1730_v30 = vld [vmem:[#allocation20 + $0xa50] sm:$0xff]  ;;  %v10044_v35 = vcombine.low %v1738_v26, %v1742_v28 }
 0x406   :  { %5206 = vmatpush1.bf16.msra.mxu0 %v10004_v32  ;;  %v1734_v32 = vld [vmem:[#allocation20 + $0xa70] sm:$0xff] }
 0x407   :  { %5207 = vmatprep.subr.bf16.mxu0 %v9997_v41  ;;  %v10037_v41 = vcombine.high %v1730_v30, %v1734_v32  ;;  %v10036_v47 = vcombine.low %v1730_v30, %v1734_v32  ;;  %v1548_v30 = vld [vmem:[#allocation20 + $0x4a0] sm:$0xff] }
 0x40a   :  { %5208 = vmatpush1.bf16.msra.mxu0 %v9996_v45  ;;  %v1726_v45 = vld [vmem:[#allocation20 + $0xa30] sm:$0xff] }
 0x40b   :  { %5209 = vmatprep.subr.bf16.mxu0 %v9989_v46  ;;  %v10029_v52 = vcombine.high %v1722_v44, %v1726_v45 }
 0x40e   :  { %5210 = vmatpush1.bf16.msra.mxu0 %v9988_v50  ;;  %v1580_v50 = vld [vmem:[#allocation20 + $0x5a0] sm:$0xff] }
 0x40f   :  { %5211 = vmatprep.subr.bf16.mxu0 %v9981_v49  ;;  %v9881_v60 = vcombine.high %v1576_v31, %v1580_v50 }
 0x412   :  { %5212 = vmatpush1.bf16.msra.mxu0 %v9980_v55  ;;  %v1938_v55 = vld [vmem:[#allocation20 + $0x10d0] sm:$0xff] }
 0x413   :  { %5213 = vmatprep.subr.bf16.mxu0 %v9973_v56  ;;  %v1942_v56 = vld [vmem:[#allocation20 + $0x10f0] sm:$0xff] }
 0x414   :  { %v10245_v12 = vcombine.high %v1938_v55, %v1942_v56 }
 0x416   :  { %5214 = vmatpush1.bf16.msra.mxu0 %v9972_v61  ;;  %v10028_v61 = vcombine.low %v1722_v44, %v1726_v45  ;;  %v1591_v44 = vld [vmem:[#allocation20 + $0x5f8] sm:$0xff] }
 0x417   :  { %5215 = vmatprep.subr.bf16.mxu0 %v9965_v63  ;;  %v1568_v63 = vld [vmem:[#allocation20 + $0x540] sm:$0xff] }
 0x418   :  { %v9873_v6 = vcombine.high %v1568_v63, %v1572_v0 }
 0x41a   :  { %5216 = vmatpush1.bf16.msra.mxu0 %v9964_v2  ;;  %v9880_v2 = vcombine.low %v1576_v31, %v1580_v50  ;;  %v1540_v31 = vld [vmem:[#allocation20 + $0x460] sm:$0xff] }
 0x41b   :  { %5217 = vmatprep.subr.bf16.mxu0 %v10085_v34  ;;  %v1930_v34 = vld [vmem:[#allocation20 + $0x1090] sm:$0xff] }
 0x41c   :  { %v10237_v9 = vcombine.high %v1930_v34, %v1934_v5  ;;  %v10236_v48 = vcombine.low %v1930_v34, %v1934_v5  ;;  %v1648_v5 = vld [vmem:[#allocation20 + $0x7c0] sm:$0xff] }
 0x41e   :  { %5218 = vmatpush2.bf16.msra.mxu0 %v10084_v51  ;;  %v10244_v51 = vcombine.low %v1938_v55, %v1942_v56 }
 0x41f   :  { %5219 = vmatprep.subr.bf16.mxu0 %v10077_v7  ;;  %v1560_v7 = vld [vmem:[#allocation20 + $0x500] sm:$0xff] }
 0x420   :  { %v9865_v37 = vcombine.high %v1560_v7, %v1564_v8  ;;  %v9864_v21 = vcombine.low %v1560_v7, %v1564_v8  ;;  %v1563_v8 = vld [vmem:[#allocation20 + $0x518] sm:$0xff] }
 0x422   :  { %5220 = vmatpush2.bf16.msra.mxu0 %v10076_v11  ;;  %v9872_v11 = vcombine.low %v1568_v63, %v1572_v0  ;;  %v1571_v0 = vld [vmem:[#allocation20 + $0x558] sm:$0xff] }
 0x423   :  { %5221 = vmatprep.subr.bf16.mxu0 %v10069_v13  ;;  %v1922_v13 = vld [vmem:[#allocation20 + $0x1050] sm:$0xff] }
 0x424   :  { %v10229_v20 = vcombine.high %v1922_v13, %v1926_v14 }
 0x426   :  { %5222 = vmatpush2.bf16.msra.mxu0 %v10068_v16  ;;  %v1556_v16 = vld [vmem:[#allocation20 + $0x4e0] sm:$0xff] }
 0x427   :  { %5223 = vmatprep.subr.bf16.mxu0 %v10061_v17 }
 0x42a   :  { %5224 = vmatpush2.bf16.msra.mxu0 %v10060_v22  ;;  %v1914_v22 = vld [vmem:[#allocation20 + $0x1010] sm:$0xff] }
 0x42b   :  { %5225 = vmatprep.subr.bf16.mxu0 %v10053_v23  ;;  %v1918_v23 = vld [vmem:[#allocation20 + $0x1030] sm:$0xff] }
 0x42e   :  { %5226 = vmatpush2.bf16.msra.mxu0 %v10052_v19  ;;  %v10228_v19 = vcombine.low %v1922_v13, %v1926_v14  ;;  %v1640_v14 = vld [vmem:[#allocation20 + $0x780] sm:$0xff] }
 0x42f   :  { %5227 = vmatprep.subr.bf16.mxu0 %v10045_v29  ;;  %v1544_v29 = vld [vmem:[#allocation20 + $0x480] sm:$0xff] }
 0x430   :  { %v9849_v45 = vcombine.high %v1544_v29, %v1548_v30 }
 0x432   :  { %v1294_v46 = vpop.f32.mrf.mxu1  ;;  %5228 = vmatpush2.bf16.msra.mxu0 %v10044_v35  ;;  %v10221_v35 = vcombine.high %v1914_v22, %v1918_v23 }
 0x433   :  { %v1295_v49 = vadd.f32 %v9698_v42, %v1294_v46  ;;  %5229 = vmatprep.subr.bf16.mxu0 %v10037_v41  ;;  %v1587_v42 = vld [vmem:[#allocation20 + $0x5d8] sm:$0xff]  ;;  %v10220_v46 = vcombine.low %v1914_v22, %v1918_v23  ;;  %v1632_v23 = vld [vmem:[#allocation20 + $0x740] sm:$0xff] }
 0x434   :  { %v11118_v53 = vpop.f32.mrf.mxu1  ;;  %v9895_v50 = vcombine.high %v1587_v42, %v1591_v44  ;;  %v9894_v56 = vcombine.low %v1587_v42, %v1591_v44  ;;  %v1628_v42 = vld [vmem:[#allocation20 + $0x720] sm:$0xff] }
 0x435   :  { %v1298_v58 = vmax.f32 %v1295_v49, 0.0  ;;  %v9848_v49 = vcombine.low %v1544_v29, %v1548_v30  ;;  %v1583_v53 = vld [vmem:[#allocation20 + $0x5b8] sm:$0xff] }
 0x436   :  { %5230 = vmatpush2.bf16.msra.mxu0 %v10036_v47  ;;  %v1536_v47 = vld [vmem:[#allocation20 + $0x440] sm:$0xff]  ;;  %v1547_v29 = vld [vmem:[#allocation20 + $0x498] sm:$0xff] }
 0x437   :  { %11122 = vmatmul.mubr.msk.f32.vlgmr.msra.gmra.mxu1 %vm1307_vm10, %v1298_v58  ;;  %5231 = vmatprep.subr.bf16.mxu0 %v10029_v52  ;;  %v1579_v52 = vld [vmem:[#allocation20 + $0x598] sm:$0xff]  ;;  %v9841_v55 = vcombine.high %v1536_v47, %v1540_v31  ;;  %v1528_v58 = vld [vmem:[#allocation20 + $0x400] sm:$0xff]  ;;  %v9840_v63 = vcombine.low %v1536_v47, %v1540_v31 }
 0x438   :  { %4751 = vmatpush1.bf16.msra.mxu1 %v9888_v54  ;;  %4782 = vmatprep.mubr.bf16.mxu1 %v12393_v59  ;;  %v1552_v54 = vld [vmem:[#allocation20 + $0x4c0] sm:$0xff]  ;;  %v9886_v34 = vcombine.low %v1579_v52, %v1583_v53  ;;  %v1551_v30 = vld [vmem:[#allocation20 + $0x4b8] sm:$0xff] }
 0x439   :  { %4752 = vmatprep.subr.bf16.mxu1 %v9881_v60  ;;  %v9857_v28 = vcombine.high %v1552_v54, %v1556_v16  ;;  %v9856_v41 = vcombine.low %v1552_v54, %v1556_v16  ;;  %v1532_v60 = vld [vmem:[#allocation20 + $0x420] sm:$0xff]  ;;  %v1555_v16 = vld [vmem:[#allocation20 + $0x4d8] sm:$0xff]  ;;  %v9855_v44 = vcombine.high %v1547_v29, %v1551_v30 }
 0x43a   :  { %5232 = vmatpush2.bf16.msra.mxu0 %v10028_v61  ;;  %v9887_v61 = vcombine.high %v1579_v52, %v1583_v53  ;;  %v9832_v7 = vcombine.low %v1528_v58, %v1532_v60  ;;  %v1543_v47 = vld [vmem:[#allocation20 + $0x478] sm:$0xff]  ;;  %v1620_v52 = vld [vmem:[#allocation20 + $0x6e0] sm:$0xff] }
 0x43b   :  { %5291 = vmatprep.subr.bf16.mxu0 %v10245_v12  ;;  %v1575_v12 = vld [vmem:[#allocation20 + $0x578] sm:$0xff] }
 0x43c   :  { %4753 = vmatpush1.bf16.msra.mxu1 %v9880_v2  ;;  %v9833_v2 = vcombine.high %v1528_v58, %v1532_v60  ;;  %v9878_v13 = vcombine.low %v1571_v0, %v1575_v12  ;;  %v1535_v58 = vld [vmem:[#allocation20 + $0x438] sm:$0xff] }
 0x43d   :  { %v12448_v15 = vpop.f32.mrf.mxu0  ;;  %5234 = vmatmul.mubr.bf16.vlgmr.msra.gmra.mxu0 %v12383_v38  ;;  %4754 = vmatprep.subr.bf16.mxu1 %v9873_v6  ;;  %v1652_v6 = vld [vmem:[#allocation20 + $0x7e0] sm:$0xff] }
 0x43e   :  { %5292 = vmatpush1.bf16.msra.mxu0 %v10244_v51  ;;  %5315 = vmatprep.mubr.bf16.mxu0 %v11556_v43  ;;  %v9879_v51 = vcombine.high %v1571_v0, %v1575_v12  ;;  %v9952_v54 = vcombine.low %v1648_v5, %v1652_v6  ;;  %v1612_v0 = vld [vmem:[#allocation20 + $0x6a0] sm:$0xff] }
 0x43f   :  { %v12452_v17 = vpop.f32.mrf.mxu0  ;;  %5293 = vmatprep.subr.bf16.mxu0 %v10237_v9  ;;  %v1567_v9 = vld [vmem:[#allocation20 + $0x538] sm:$0xff] }
 0x440   :  { %4755 = vmatpush1.bf16.msra.mxu1 %v9872_v11  ;;  %v9953_v11 = vcombine.high %v1648_v5, %v1652_v6  ;;  %v9870_v22 = vcombine.low %v1563_v8, %v1567_v9  ;;  %v1655_v5 = vld [vmem:[#allocation20 + $0x7f8] sm:$0xff] }
 0x441   :  { %v4993_v26 = vpop.f32.mrf.mxu0  ;;  %4756 = vmatprep.subr.bf16.mxu1 %v9865_v37  ;;  %v1644_v37 = vld [vmem:[#allocation20 + $0x7a0] sm:$0xff] }
 0x442   :  { %5294 = vmatpush1.bf16.msra.mxu0 %v10236_v48  ;;  %v9871_v48 = vcombine.high %v1563_v8, %v1567_v9  ;;  %v1636_v26 = vld [vmem:[#allocation20 + $0x760] sm:$0xff] }
 0x443   :  { %v4994_v32 = vpop.f32.mrf.mxu0  ;;  %5295 = vmatprep.subr.bf16.mxu0 %v10229_v20  ;;  %v1559_v20 = vld [vmem:[#allocation20 + $0x4f8] sm:$0xff]  ;;  %v1604_v8 = vld [vmem:[#allocation20 + $0x660] sm:$0xff] }
 0x444   :  { %4757 = vmatpush1.bf16.msra.mxu1 %v9864_v21  ;;  %v9945_v21 = vcombine.high %v1640_v14, %v1644_v37  ;;  %v9937_v32 = vcombine.high %v1632_v23, %v1636_v26 }
 0x445   :  { %4758 = vmatprep.subr.bf16.mxu1 %v9857_v28  ;;  %v9863_v28 = vcombine.high %v1555_v16, %v1559_v20 }
 0x446   :  { %5296 = vmatpush1.bf16.msra.mxu0 %v10228_v19  ;;  %v9944_v19 = vcombine.low %v1640_v14, %v1644_v37  ;;  %v1647_v14 = vld [vmem:[#allocation20 + $0x7b8] sm:$0xff] }
 0x447   :  { %5297 = vmatprep.subr.bf16.mxu0 %v10221_v35  ;;  %v9862_v35 = vcombine.low %v1555_v16, %v1559_v20  ;;  %v1596_v16 = vld [vmem:[#allocation20 + $0x620] sm:$0xff] }
 0x448   :  { %4759 = vmatpush1.bf16.msra.mxu1 %v9856_v41  ;;  %v1624_v41 = vld [vmem:[#allocation20 + $0x700] sm:$0xff] }
 0x449   :  { %4760 = vmatprep.subr.bf16.mxu1 %v9849_v45  ;;  %v9936_v45 = vcombine.low %v1632_v23, %v1636_v26  ;;  %v9929_v31 = vcombine.high %v1624_v41, %v1628_v42  ;;  %v1639_v23 = vld [vmem:[#allocation20 + $0x778] sm:$0xff] }
 0x44a   :  { %5298 = vmatpush1.bf16.msra.mxu0 %v10220_v46  ;;  %v1539_v46 = vld [vmem:[#allocation20 + $0x458] sm:$0xff] }
 0x44b   :  { %5365 = vmatprep.subr.bf16.mxu0 %v9895_v50  ;;  %v9854_v50 = vcombine.low %v1547_v29, %v1551_v30  ;;  %v9847_v53 = vcombine.high %v1539_v46, %v1543_v47  ;;  %v1844_v29 = vld [vmem:[#allocation20 + $0xde0] sm:$0xff] }
 0x44c   :  { %4761 = vmatpush1.bf16.msra.mxu1 %v9848_v49  ;;  %v1616_v49 = vld [vmem:[#allocation20 + $0x6c0] sm:$0xff] }
 0x44d   :  { %10250 = vmatmul.mubr.msk.bf16.vlgmr.msra.gmra.mxu0 %vm762_vm3, %v12389_v57  ;;  %4762 = vmatprep.subr.bf16.mxu1 %v9841_v55  ;;  %v9928_v55 = vcombine.low %v1624_v41, %v1628_v42  ;;  %v9921_v60 = vcombine.high %v1616_v49, %v1620_v52  ;;  %v1631_v41 = vld [vmem:[#allocation20 + $0x738] sm:$0xff] }
 0x44e   :  { %5366 = vmatpush1.bf16.msra.mxu0 %v9894_v56  ;;  %5397 = vmatprep.mubr.bf16.mxu0 %v12393_v59  ;;  %v1531_v56 = vld [vmem:[#allocation20 + $0x418] sm:$0xff] }
 0x44f   :  { %5367 = vmatprep.subr.bf16.mxu0 %v9887_v61  ;;  %v9846_v61 = vcombine.low %v1539_v46, %v1543_v47  ;;  %v9839_v12 = vcombine.high %v1531_v56, %v1535_v58  ;;  %v1836_v46 = vld [vmem:[#allocation20 + $0xda0] sm:$0xff] }
 0x450   :  { %4763 = vmatpush1.bf16.msra.mxu1 %v9840_v63  ;;  %v1608_v63 = vld [vmem:[#allocation20 + $0x680] sm:$0xff] }
 0x451   :  { %4764 = vmatprep.subr.bf16.mxu1 %v9833_v2  ;;  %v9920_v2 = vcombine.low %v1616_v49, %v1620_v52  ;;  %v9913_v6 = vcombine.high %v1608_v63, %v1612_v0  ;;  %v1623_v49 = vld [vmem:[#allocation20 + $0x6f8] sm:$0xff] }
 0x452   :  { %5368 = vmatpush1.bf16.msra.mxu0 %v9886_v34  ;;  %v1651_v34 = vld [vmem:[#allocation20 + $0x7d8] sm:$0xff] }
 0x453   :  { %5369 = vmatprep.subr.bf16.mxu0 %v9879_v51  ;;  %v9838_v51 = vcombine.low %v1531_v56, %v1535_v58  ;;  %v9959_v9 = vcombine.high %v1651_v34, %v1655_v5  ;;  %v1828_v56 = vld [vmem:[#allocation20 + $0xd60] sm:$0xff] }
 0x454   :  { %4765 = vmatpush1.bf16.msra.mxu1 %v9832_v7  ;;  %v1600_v7 = vld [vmem:[#allocation20 + $0x640] sm:$0xff] }
 0x455   :  { %4766 = vmatprep.subr.bf16.mxu1 %v9953_v11  ;;  %v9912_v11 = vcombine.low %v1608_v63, %v1612_v0  ;;  %v9905_v37 = vcombine.high %v1600_v7, %v1604_v8  ;;  %v1615_v63 = vld [vmem:[#allocation20 + $0x6b8] sm:$0xff] }
 0x456   :  { %5370 = vmatpush1.bf16.msra.mxu0 %v9878_v13  ;;  %v1643_v13 = vld [vmem:[#allocation20 + $0x798] sm:$0xff] }
 0x457   :  { %5371 = vmatprep.subr.bf16.mxu0 %v9871_v48  ;;  %v9958_v48 = vcombine.low %v1651_v34, %v1655_v5  ;;  %v9951_v20 = vcombine.high %v1643_v13, %v1647_v14  ;;  %v1820_v34 = vld [vmem:[#allocation20 + $0xd20] sm:$0xff] }
 0x458   :  { %4767 = vmatpush2.bf16.msra.mxu1 %v9952_v54  ;;  %v1592_v54 = vld [vmem:[#allocation20 + $0x600] sm:$0xff] }
 0x459   :  { %4768 = vmatprep.subr.bf16.mxu1 %v9945_v21  ;;  %v9904_v21 = vcombine.low %v1600_v7, %v1604_v8  ;;  %v9897_v26 = vcombine.high %v1592_v54, %v1596_v16  ;;  %v1607_v7 = vld [vmem:[#allocation20 + $0x678] sm:$0xff] }
 0x45a   :  { %5372 = vmatpush1.bf16.msra.mxu0 %v9870_v22  ;;  %v1635_v22 = vld [vmem:[#allocation20 + $0x758] sm:$0xff] }
 0x45b   :  { %5373 = vmatprep.subr.bf16.mxu0 %v9863_v28  ;;  %v9950_v28 = vcombine.low %v1643_v13, %v1647_v14  ;;  %v9943_v30 = vcombine.high %v1635_v22, %v1639_v23  ;;  %v1808_v13 = vld [vmem:[#allocation20 + $0xcc0] sm:$0xff] }
 0x45c   :  { %4769 = vmatpush2.bf16.msra.mxu1 %v9944_v19  ;;  %v1840_v19 = vld [vmem:[#allocation20 + $0xdc0] sm:$0xff] }
 0x45d   :  { %4770 = vmatprep.subr.bf16.mxu1 %v9937_v32  ;;  %v9896_v32 = vcombine.low %v1592_v54, %v1596_v16  ;;  %v10145_v42 = vcombine.high %v1840_v19, %v1844_v29  ;;  %v1812_v14 = vld [vmem:[#allocation20 + $0xce0] sm:$0xff]  ;;  %v1595_v16 = vld [vmem:[#allocation20 + $0x618] sm:$0xff] }
 0x45e   :  { %5374 = vmatpush1.bf16.msra.mxu0 %v9862_v35  ;;  %v1627_v35 = vld [vmem:[#allocation20 + $0x718] sm:$0xff] }
 0x45f   :  { %5375 = vmatprep.subr.bf16.mxu0 %v9855_v44  ;;  %v9942_v44 = vcombine.low %v1635_v22, %v1639_v23  ;;  %v9935_v47 = vcombine.high %v1627_v35, %v1631_v41  ;;  %v10113_v22 = vcombine.high %v1808_v13, %v1812_v14 }
 0x460   :  { %4771 = vmatpush2.bf16.msra.mxu1 %v9936_v45  ;;  %v1832_v45 = vld [vmem:[#allocation20 + $0xd80] sm:$0xff] }
 0x461   :  { %4772 = vmatprep.subr.bf16.mxu1 %v9929_v31  ;;  %v10144_v31 = vcombine.low %v1840_v19, %v1844_v29  ;;  %v10137_v52 = vcombine.high %v1832_v45, %v1836_v46 }
 0x462   :  { %5376 = vmatpush1.bf16.msra.mxu0 %v9854_v50  ;;  %v1619_v50 = vld [vmem:[#allocation20 + $0x6d8] sm:$0xff] }
 0x463   :  { %5377 = vmatprep.subr.bf16.mxu0 %v9847_v53  ;;  %v9934_v53 = vcombine.low %v1627_v35, %v1631_v41  ;;  %v9927_v58 = vcombine.high %v1619_v50, %v1623_v49  ;;  %v1847_v35 = vld [vmem:[#allocation20 + $0xdf8] sm:$0xff] }
 0x464   :  { %4773 = vmatpush2.bf16.msra.mxu1 %v9928_v55  ;;  %v1824_v55 = vld [vmem:[#allocation20 + $0xd40] sm:$0xff] }
 0x465   :  { %4774 = vmatprep.subr.bf16.mxu1 %v9921_v60  ;;  %v10136_v60 = vcombine.low %v1832_v45, %v1836_v46  ;;  %v10129_v0 = vcombine.high %v1824_v55, %v1828_v56  ;;  %v1796_v45 = vld [vmem:[#allocation20 + $0xc60] sm:$0xff] }
 0x466   :  { %5378 = vmatpush1.bf16.msra.mxu0 %v9846_v61  ;;  %v1611_v61 = vld [vmem:[#allocation20 + $0x698] sm:$0xff] }
 0x467   :  { %5379 = vmatprep.subr.bf16.mxu0 %v9839_v12  ;;  %v9926_v12 = vcombine.low %v1619_v50, %v1623_v49  ;;  %v9919_v5 = vcombine.high %v1611_v61, %v1615_v63  ;;  %v1839_v50 = vld [vmem:[#allocation20 + $0xdb8] sm:$0xff] }
 0x468   :  { %4775 = vmatpush2.bf16.msra.mxu1 %v9920_v2  ;;  %v1816_v2 = vld [vmem:[#allocation20 + $0xd00] sm:$0xff] }
 0x469   :  { %4776 = vmatprep.subr.bf16.mxu1 %v9913_v6  ;;  %v10128_v6 = vcombine.low %v1824_v55, %v1828_v56  ;;  %v10120_v54 = vcombine.low %v1816_v2, %v1820_v34  ;;  %v1788_v55 = vld [vmem:[#allocation20 + $0xc20] sm:$0xff] }
 0x46a   :  { %5380 = vmatpush1.bf16.msra.mxu0 %v9838_v51  ;;  %v1603_v51 = vld [vmem:[#allocation20 + $0x658] sm:$0xff] }
 0x46b   :  { %5381 = vmatprep.subr.bf16.mxu0 %v9959_v9  ;;  %v10121_v9 = vcombine.high %v1816_v2, %v1820_v34  ;;  %v9910_v23 = vcombine.low %v1603_v51, %v1607_v7  ;;  %v1908_v2 = vld [vmem:[#allocation20 + $0xfe0] sm:$0xff] }
 0x46c   :  { %4777 = vmatpush2.bf16.msra.mxu1 %v9912_v11  ;;  %v9918_v11 = vcombine.low %v1611_v61, %v1615_v63  ;;  %v1831_v61 = vld [vmem:[#allocation20 + $0xd78] sm:$0xff] }
 0x46d   :  { %4778 = vmatprep.subr.bf16.mxu1 %v9905_v37 }
 0x46e   :  { %5382 = vmatpush2.bf16.msra.mxu0 %v9958_v48  ;;  %v9911_v48 = vcombine.high %v1603_v51, %v1607_v7  ;;  %v1823_v51 = vld [vmem:[#allocation20 + $0xd38] sm:$0xff] }
 0x46f   :  { %5383 = vmatprep.subr.bf16.mxu0 %v9951_v20  ;;  %v1599_v20 = vld [vmem:[#allocation20 + $0x638] sm:$0xff] }
 0x470   :  { %4779 = vmatpush2.bf16.msra.mxu1 %v9904_v21  ;;  %v9903_v29 = vcombine.high %v1595_v16, %v1599_v20 }
 0x471   :  { %4780 = vmatprep.subr.bf16.mxu1 %v9897_v26  ;;  %v1800_v26 = vld [vmem:[#allocation20 + $0xc80] sm:$0xff] }
 0x472   :  { %5384 = vmatpush2.bf16.msra.mxu0 %v9950_v28  ;;  %v1804_v28 = vld [vmem:[#allocation20 + $0xca0] sm:$0xff] }
 0x473   :  { %5385 = vmatprep.subr.bf16.mxu0 %v9943_v30  ;;  %v10112_v30 = vcombine.low %v1808_v13, %v1812_v14  ;;  %v10105_v41 = vcombine.high %v1800_v26, %v1804_v28  ;;  %v1900_v13 = vld [vmem:[#allocation20 + $0xfa0] sm:$0xff] }
 0x474   :  { %4781 = vmatpush2.bf16.msra.mxu1 %v9896_v32  ;;  %v1843_v32 = vld [vmem:[#allocation20 + $0xdd8] sm:$0xff] }
 0x475   :  { %4832 = vmatprep.subr.bf16.mxu1 %v10145_v42  ;;  %v9902_v42 = vcombine.low %v1595_v16, %v1599_v20  ;;  %v10151_v46 = vcombine.high %v1843_v32, %v1847_v35  ;;  %v1815_v16 = vld [vmem:[#allocation20 + $0xcf8] sm:$0xff] }
 0x476   :  { %5386 = vmatpush2.bf16.msra.mxu0 %v9942_v44  ;;  %v1792_v44 = vld [vmem:[#allocation20 + $0xc40] sm:$0xff] }
 0x477   :  { %4783 = vmatmul.mubr.bf16.vlgmr.msra.gmra.mxu1 %v12403_v36  ;;  %5387 = vmatprep.subr.bf16.mxu0 %v9935_v47  ;;  %v10104_v47 = vcombine.low %v1800_v26, %v1804_v28  ;;  %v10097_v49 = vcombine.high %v1792_v44, %v1796_v45 }
 0x478   :  { %4833 = vmatpush1.bf16.msra.mxu1 %v10144_v31  ;;  %4864 = vmatprep.mubr.bf16.mxu1 %v12407_v40  ;;  %v1835_v31 = vld [vmem:[#allocation20 + $0xd98] sm:$0xff] }
 0x479   :  { %4834 = vmatprep.subr.bf16.mxu1 %v10137_v52  ;;  %v10150_v52 = vcombine.low %v1843_v32, %v1847_v35  ;;  %v10143_v56 = vcombine.high %v1835_v31, %v1839_v50  ;;  %v1880_v35 = vld [vmem:[#allocation20 + $0xf00] sm:$0xff] }
 0x47a   :  { %5388 = vmatpush2.bf16.msra.mxu0 %v9934_v53  ;;  %v1784_v53 = vld [vmem:[#allocation20 + $0xc00] sm:$0xff] }
 0x47b   :  { %5389 = vmatprep.subr.bf16.mxu0 %v9927_v58  ;;  %v10096_v58 = vcombine.low %v1792_v44, %v1796_v45  ;;  %v10089_v63 = vcombine.high %v1784_v53, %v1788_v55  ;;  %v1795_v45 = vld [vmem:[#allocation20 + $0xc58] sm:$0xff] }
 0x47c   :  { %4835 = vmatpush1.bf16.msra.mxu1 %v10136_v60  ;;  %v1827_v60 = vld [vmem:[#allocation20 + $0xd58] sm:$0xff] }
 0x47d   :  { %v12459_v8 = vpop.f32.mrf.mxu0  ;;  %4836 = vmatprep.subr.bf16.mxu1 %v10129_v0  ;;  %v10142_v0 = vcombine.low %v1835_v31, %v1839_v50  ;;  %v10135_v34 = vcombine.high %v1827_v60, %v1831_v61  ;;  %v1872_v50 = vld [vmem:[#allocation20 + $0xec0] sm:$0xff] }
 0x47e   :  { %5390 = vmatpush2.bf16.msra.mxu0 %v9926_v12  ;;  %v1904_v12 = vld [vmem:[#allocation20 + $0xfc0] sm:$0xff] }
 0x47f   :  { %v12461_v37 = vpop.f32.mrf.mxu0  ;;  %5391 = vmatprep.subr.bf16.mxu0 %v9919_v5  ;;  %v10088_v5 = vcombine.low %v1784_v53, %v1788_v55  ;;  %v10209_v7 = vcombine.high %v1904_v12, %v1908_v2  ;;  %v1787_v55 = vld [vmem:[#allocation20 + $0xc18] sm:$0xff] }
 0x480   :  { %4837 = vmatpush1.bf16.msra.mxu1 %v10128_v6  ;;  %v1819_v6 = vld [vmem:[#allocation20 + $0xd18] sm:$0xff] }
 0x481   :  { %v5075_v21 = vpop.f32.mrf.mxu0  ;;  %4838 = vmatprep.subr.bf16.mxu1 %v10121_v9  ;;  %v10134_v9 = vcombine.low %v1827_v60, %v1831_v61  ;;  %v10127_v14 = vcombine.high %v1819_v6, %v1823_v51  ;;  %v1864_v61 = vld [vmem:[#allocation20 + $0xe80] sm:$0xff] }
 0x482   :  { %5392 = vmatpush2.bf16.msra.mxu0 %v9918_v11  ;;  %v1896_v11 = vld [vmem:[#allocation20 + $0xf80] sm:$0xff]  ;;  %v10126_v21 = vcombine.low %v1819_v6, %v1823_v51 }
 0x483   :  { %v5076_v19 = vpop.f32.mrf.mxu0  ;;  %5393 = vmatprep.subr.bf16.mxu0 %v9911_v48  ;;  %v10208_v48 = vcombine.low %v1904_v12, %v1908_v2  ;;  %v10201_v20 = vcombine.high %v1896_v11, %v1900_v13  ;;  %v10200_v28 = vcombine.low %v1896_v11, %v1900_v13  ;;  %v1907_v2 = vld [vmem:[#allocation20 + $0xfd8] sm:$0xff]  ;;  %v1856_v51 = vld [vmem:[#allocation20 + $0xe40] sm:$0xff] }
 0x484   :  { %4839 = vmatpush1.bf16.msra.mxu1 %v10120_v54  ;;  %v1811_v54 = vld [vmem:[#allocation20 + $0xcd8] sm:$0xff] }
 0x485   :  { %4840 = vmatprep.subr.bf16.mxu1 %v10113_v22  ;;  %v1888_v22 = vld [vmem:[#allocation20 + $0xf40] sm:$0xff]  ;;  %v10119_v26 = vcombine.high %v1811_v54, %v1815_v16  ;;  %v1803_v19 = vld [vmem:[#allocation20 + $0xc98] sm:$0xff]  ;;  %v10118_v32 = vcombine.low %v1811_v54, %v1815_v16 }
 0x486   :  { %5394 = vmatpush2.bf16.msra.mxu0 %v9910_v23  ;;  %v1892_v23 = vld [vmem:[#allocation20 + $0xf60] sm:$0xff]  ;;  %v1899_v13 = vld [vmem:[#allocation20 + $0xf98] sm:$0xff] }
 0x487   :  { %5395 = vmatprep.subr.bf16.mxu0 %v9903_v29  ;;  %v1807_v29 = vld [vmem:[#allocation20 + $0xcb8] sm:$0xff]  ;;  %v10192_v44 = vcombine.low %v1888_v22, %v1892_v23  ;;  %v1848_v16 = vld [vmem:[#allocation20 + $0xe00] sm:$0xff] }
 0x488   :  { %4841 = vmatpush1.bf16.msra.mxu1 %v10112_v30  ;;  %v10193_v30 = vcombine.high %v1888_v22, %v1892_v23  ;;  %v10110_v31 = vcombine.low %v1803_v19, %v1807_v29  ;;  %v1891_v23 = vld [vmem:[#allocation20 + $0xf58] sm:$0xff] }
 0x489   :  { %4842 = vmatprep.subr.bf16.mxu1 %v10105_v41  ;;  %v1884_v41 = vld [vmem:[#allocation20 + $0xf20] sm:$0xff] }
 0x48a   :  { %5396 = vmatpush2.bf16.msra.mxu0 %v9902_v42  ;;  %v10111_v42 = vcombine.high %v1803_v19, %v1807_v29  ;;  %v10184_v53 = vcombine.low %v1880_v35, %v1884_v41  ;;  %v1457_v29 = vld [vmem:[#allocation20 + $0x1c8] sm:$0xff] }
 0x48b   :  { %5447 = vmatprep.subr.bf16.mxu0 %v10151_v46  ;;  %v1799_v46 = vld [vmem:[#allocation20 + $0xc78] sm:$0xff] }
 0x48c   :  { %4843 = vmatpush1.bf16.msra.mxu1 %v10104_v47  ;;  %v10185_v47 = vcombine.high %v1880_v35, %v1884_v41  ;;  %v10102_v60 = vcombine.low %v1795_v45, %v1799_v46  ;;  %v1883_v41 = vld [vmem:[#allocation20 + $0xf18] sm:$0xff] }
 0x48d   :  { %5398 = vmatmul.mubr.bf16.vlgmr.msra.gmra.mxu0 %v12403_v36  ;;  %4844 = vmatprep.subr.bf16.mxu1 %v10097_v49  ;;  %v1876_v49 = vld [vmem:[#allocation20 + $0xee0] sm:$0xff] }
 0x48e   :  { %5448 = vmatpush1.bf16.msra.mxu0 %v10150_v52  ;;  %5479 = vmatprep.mubr.bf16.mxu0 %v12407_v40  ;;  %v10103_v52 = vcombine.high %v1795_v45, %v1799_v46  ;;  %v10176_v12 = vcombine.low %v1872_v50, %v1876_v49  ;;  %v1449_v46 = vld [vmem:[#allocation20 + $0x188] sm:$0xff] }
 0x48f   :  { %5449 = vmatprep.subr.bf16.mxu0 %v10143_v56  ;;  %v1791_v56 = vld [vmem:[#allocation20 + $0xc38] sm:$0xff] }
 0x490   :  { %4845 = vmatpush1.bf16.msra.mxu1 %v10096_v58  ;;  %v10177_v58 = vcombine.high %v1872_v50, %v1876_v49  ;;  %v10094_v6 = vcombine.low %v1787_v55, %v1791_v56  ;;  %v1875_v49 = vld [vmem:[#allocation20 + $0xed8] sm:$0xff] }
 0x491   :  { %4846 = vmatprep.subr.bf16.mxu1 %v10089_v63  ;;  %v1868_v63 = vld [vmem:[#allocation20 + $0xea0] sm:$0xff] }
 0x492   :  { %5450 = vmatpush1.bf16.msra.mxu0 %v10142_v0  ;;  %v10095_v0 = vcombine.high %v1787_v55, %v1791_v56  ;;  %v10168_v11 = vcombine.low %v1864_v61, %v1868_v63  ;;  %v1441_v56 = vld [vmem:[#allocation20 + $0x148] sm:$0xff] }
 0x493   :  { %5451 = vmatprep.subr.bf16.mxu0 %v10135_v34  ;;  %v1911_v34 = vld [vmem:[#allocation20 + $0xff8] sm:$0xff] }
 0x494   :  { %4847 = vmatpush1.bf16.msra.mxu1 %v10088_v5  ;;  %v10169_v5 = vcombine.high %v1864_v61, %v1868_v63  ;;  %v10214_v54 = vcombine.low %v1907_v2, %v1911_v34  ;;  %v1867_v63 = vld [vmem:[#allocation20 + $0xe98] sm:$0xff] }
 0x495   :  { %4848 = vmatprep.subr.bf16.mxu1 %v10209_v7  ;;  %v1860_v7 = vld [vmem:[#allocation20 + $0xe60] sm:$0xff] }
 0x496   :  { %5452 = vmatpush1.bf16.msra.mxu0 %v10134_v9  ;;  %v10215_v9 = vcombine.high %v1907_v2, %v1911_v34  ;;  %v10160_v22 = vcombine.low %v1856_v51, %v1860_v7  ;;  %v1433_v34 = vld [vmem:[#allocation20 + $0x108] sm:$0xff] }
 0x497   :  { %5453 = vmatprep.subr.bf16.mxu0 %v10127_v14  ;;  %v1903_v14 = vld [vmem:[#allocation20 + $0xfb8] sm:$0xff] }
 0x498   :  { %4849 = vmatpush2.bf16.msra.mxu1 %v10208_v48  ;;  %v10161_v48 = vcombine.high %v1856_v51, %v1860_v7  ;;  %v10206_v19 = vcombine.low %v1899_v13, %v1903_v14  ;;  %v1859_v7 = vld [vmem:[#allocation20 + $0xe58] sm:$0xff] }
 0x499   :  { %4850 = vmatprep.subr.bf16.mxu1 %v10201_v20  ;;  %v1852_v20 = vld [vmem:[#allocation20 + $0xe20] sm:$0xff] }
 0x49a   :  { %5454 = vmatpush1.bf16.msra.mxu0 %v10126_v21  ;;  %v10207_v21 = vcombine.high %v1899_v13, %v1903_v14  ;;  %v10152_v35 = vcombine.low %v1848_v16, %v1852_v20 }
 0x49b   :  { %5455 = vmatprep.subr.bf16.mxu0 %v10119_v26  ;;  %v1895_v26 = vld [vmem:[#allocation20 + $0xf78] sm:$0xff] }
 0x49c   :  { %4851 = vmatpush2.bf16.msra.mxu1 %v10200_v28  ;;  %v10153_v28 = vcombine.high %v1848_v16, %v1852_v20  ;;  %v10198_v45 = vcombine.low %v1891_v23, %v1895_v26 }
 0x49d   :  { %4852 = vmatprep.subr.bf16.mxu1 %v10193_v30  ;;  %v1461_v30 = vld [vmem:[#allocation20 + $0x1e8] sm:$0xff] }
 0x49e   :  { %5456 = vmatpush1.bf16.msra.mxu0 %v10118_v32  ;;  %v10199_v32 = vcombine.high %v1891_v23, %v1895_v26  ;;  %v9762_v50 = vcombine.low %v1457_v29, %v1461_v30  ;;  %v1855_v23 = vld [vmem:[#allocation20 + $0xe38] sm:$0xff] }
 0x49f   :  { %5457 = vmatprep.subr.bf16.mxu0 %v10111_v42  ;;  %v1887_v42 = vld [vmem:[#allocation20 + $0xf38] sm:$0xff] }
 0x4a0   :  { %4853 = vmatpush2.bf16.msra.mxu1 %v10192_v44  ;;  %v9763_v44 = vcombine.high %v1457_v29, %v1461_v30  ;;  %v10190_v55 = vcombine.low %v1883_v41, %v1887_v42  ;;  %v1417_v29 = vld [vmem:[#allocation20 + $0x88] sm:$0xff] }
 0x4a1   :  { %4854 = vmatprep.subr.bf16.mxu1 %v10185_v47  ;;  %v1453_v47 = vld [vmem:[#allocation20 + $0x1a8] sm:$0xff] }
 0x4a2   :  { %5458 = vmatpush1.bf16.msra.mxu0 %v10110_v31  ;;  %v10191_v31 = vcombine.high %v1883_v41, %v1887_v42  ;;  %v9754_v61 = vcombine.low %v1449_v46, %v1453_v47  ;;  %v1421_v30 = vld [vmem:[#allocation20 + $0xa8] sm:$0xff] }
 0x4a3   :  { %5459 = vmatprep.subr.bf16.mxu0 %v10103_v52  ;;  %v1879_v52 = vld [vmem:[#allocation20 + $0xef8] sm:$0xff]  ;;  %v5601_v42 = vld [vmem:[#allocation23 + $0x1c0] sm:$0xff] }
 0x4a4   :  { %4855 = vmatpush2.bf16.msra.mxu1 %v10184_v53  ;;  %v9755_v53 = vcombine.high %v1449_v46, %v1453_v47  ;;  %v10182_v2 = vcombine.low %v1875_v49, %v1879_v52  ;;  %v1409_v47 = vld [vmem:[#allocation20 + $0x48] sm:$0xff] }
 0x4a5   :  { %4856 = vmatprep.subr.bf16.mxu1 %v10177_v58  ;;  %v1445_v58 = vld [vmem:[#allocation20 + $0x168] sm:$0xff] }
 0x4a6   :  { %5460 = vmatpush1.bf16.msra.mxu0 %v10102_v60  ;;  %v10183_v60 = vcombine.high %v1875_v49, %v1879_v52  ;;  %v9746_v51 = vcombine.low %v1441_v56, %v1445_v58  ;;  %v9722_v49 = vcombine.low %v1417_v29, %v1421_v30  ;;  %v5593_v52 = vld [vmem:[#allocation23 + $0x180] sm:$0xff] }
 0x4a7   :  { %5461 = vmatprep.subr.bf16.mxu0 %v10095_v0  ;;  %v1871_v0 = vld [vmem:[#allocation20 + $0xeb8] sm:$0xff] }
 0x4a8   :  { %4857 = vmatpush2.bf16.msra.mxu1 %v10176_v12  ;;  %v9747_v12 = vcombine.high %v1441_v56, %v1445_v58  ;;  %v10174_v14 = vcombine.low %v1867_v63, %v1871_v0  ;;  %v1401_v56 = vld [vmem:[#allocation20 + $0x8] sm:$0xff] }
 0x4a9   :  { %4858 = vmatprep.subr.bf16.mxu1 %v10169_v5  ;;  %v1437_v5 = vld [vmem:[#allocation20 + $0x128] sm:$0xff] }
 0x4aa   :  { %5462 = vmatpush1.bf16.msra.mxu0 %v10094_v6  ;;  %v10175_v6 = vcombine.high %v1867_v63, %v1871_v0  ;;  %v9739_v13 = vcombine.high %v1433_v34, %v1437_v5  ;;  %v1405_v58 = vld [vmem:[#allocation20 + $0x28] sm:$0xff] }
 0x4ab   :  { %5463 = vmatprep.subr.bf16.mxu0 %v10215_v9  ;;  %v1863_v9 = vld [vmem:[#allocation20 + $0xe78] sm:$0xff]  ;;  %v5585_v0 = vld [vmem:[#allocation23 + $0x140] sm:$0xff] }
 0x4ac   :  { %4859 = vmatpush2.bf16.msra.mxu1 %v10168_v11  ;;  %v10167_v20 = vcombine.high %v1859_v7, %v1863_v9 }
 0x4ad   :  { %4860 = vmatprep.subr.bf16.mxu1 %v10161_v48  ;;  %v1425_v48 = vld [vmem:[#allocation20 + $0xc8] sm:$0xff] }
 0x4ae   :  { %5464 = vmatpush2.bf16.msra.mxu0 %v10214_v54  ;;  %v1429_v54 = vld [vmem:[#allocation20 + $0xe8] sm:$0xff] }
 0x4af   :  { %5465 = vmatprep.subr.bf16.mxu0 %v10207_v21  ;;  %v9738_v21 = vcombine.low %v1433_v34, %v1437_v5  ;;  %v9730_v41 = vcombine.low %v1425_v48, %v1429_v54  ;;  %v1521_v34 = vld [vmem:[#allocation20 + $0x3c8] sm:$0xff] }
 0x4b0   :  { %4861 = vmatpush2.bf16.msra.mxu1 %v10160_v22  ;;  %v1851_v22 = vld [vmem:[#allocation20 + $0xe18] sm:$0xff]  ;;  %v1525_v5 = vld [vmem:[#allocation20 + $0x3e8] sm:$0xff] }
 0x4b1   :  { %4862 = vmatprep.subr.bf16.mxu1 %v10153_v28  ;;  %v9731_v28 = vcombine.high %v1425_v48, %v1429_v54  ;;  %v10158_v46 = vcombine.low %v1851_v22, %v1855_v23  ;;  %v1513_v48 = vld [vmem:[#allocation20 + $0x388] sm:$0xff] }
 0x4b2   :  { %5466 = vmatpush2.bf16.msra.mxu0 %v10206_v19  ;;  %v10166_v19 = vcombine.low %v1859_v7, %v1863_v9  ;;  %v9706_v7 = vcombine.low %v1401_v56, %v1405_v58  ;;  %v5577_v9 = vld [vmem:[#allocation23 + $0x100] sm:$0xff] }
 0x4b3   :  { %5467 = vmatprep.subr.bf16.mxu0 %v10199_v32  ;;  %v1517_v54 = vld [vmem:[#allocation20 + $0x3a8] sm:$0xff] }
 0x4b4   :  { %4863 = vmatpush2.bf16.msra.mxu1 %v10152_v35  ;;  %v10159_v35 = vcombine.high %v1851_v22, %v1855_v23  ;;  %v9826_v22 = vcombine.low %v1521_v34, %v1525_v5  ;;  %v5569_v23 = vld [vmem:[#allocation23 + $0xc0] sm:$0xff] }
 0x4b5   :  { %4914 = vmatprep.subr.bf16.mxu1 %v9763_v44  ;;  %v5605_v44 = vld [vmem:[#allocation23 + $0x1e0] sm:$0xff] }
 0x4b6   :  { %5468 = vmatpush2.bf16.msra.mxu0 %v10198_v45  ;;  %v9723_v45 = vcombine.high %v1417_v29, %v1421_v30  ;;  %v1509_v29 = vld [vmem:[#allocation20 + $0x368] sm:$0xff] }
 0x4b7   :  { %4865 = vmatmul.mubr.bf16.vlgmr.msra.gmra.mxu1 %v12429_v62  ;;  %5469 = vmatprep.subr.bf16.mxu0 %v10191_v31  ;;  %v1413_v31 = vld [vmem:[#allocation20 + $0x68] sm:$0xff] }
 0x4b8   :  { %4915 = vmatpush1.bf16.msra.mxu1 %v9762_v50  ;;  %4946 = vmatprep.mubr.bf16.mxu1 %v12359_v10  ;;  %v10309_v50 = vcombine.high %v5601_v42, %v5605_v44  ;;  %v9714_v63 = vcombine.low %v1409_v47, %v1413_v31 }
 0x4b9   :  { %4916 = vmatprep.subr.bf16.mxu1 %v9755_v53  ;;  %v5597_v53 = vld [vmem:[#allocation23 + $0x1a0] sm:$0xff] }
 0x4ba   :  { %5470 = vmatpush2.bf16.msra.mxu0 %v10190_v55  ;;  %v9715_v55 = vcombine.high %v1409_v47, %v1413_v31 }
 0x4bb   :  { %5471 = vmatprep.subr.bf16.mxu0 %v10183_v60  ;;  %v10308_v60 = vcombine.low %v5601_v42, %v5605_v44  ;;  %v5565_v42 = vld [vmem:[#allocation23 + $0xa0] sm:$0xff] }
 0x4bc   :  { %4917 = vmatpush1.bf16.msra.mxu1 %v9754_v61  ;;  %v10301_v61 = vcombine.high %v5593_v52, %v5597_v53 }
 0x4bd   :  { %v12467_v11 = vpop.f32.mrf.mxu0  ;;  %4918 = vmatprep.subr.bf16.mxu1 %v9747_v12  ;;  %v5589_v12 = vld [vmem:[#allocation23 + $0x160] sm:$0xff] }
 0x4be   :  { %5472 = vmatpush2.bf16.msra.mxu0 %v10182_v2  ;;  %v9707_v2 = vcombine.high %v1401_v56, %v1405_v58  ;;  %v1493_v56 = vld [vmem:[#allocation20 + $0x2e8] sm:$0xff] }
 0x4bf   :  { %v12469_v16 = vpop.f32.mrf.mxu0  ;;  %5473 = vmatprep.subr.bf16.mxu0 %v10175_v6  ;;  %v10300_v6 = vcombine.low %v5593_v52, %v5597_v53  ;;  %v5557_v52 = vld [vmem:[#allocation23 + $0x60] sm:$0xff] }
 0x4c0   :  { %4919 = vmatpush1.bf16.msra.mxu1 %v9746_v51  ;;  %v10293_v51 = vcombine.high %v5585_v0, %v5589_v12 }
 0x4c1   :  { %v5157_v26 = vpop.f32.mrf.mxu0  ;;  %4920 = vmatprep.subr.bf16.mxu1 %v9739_v13  ;;  %v5581_v13 = vld [vmem:[#allocation23 + $0x120] sm:$0xff] }
 0x4c2   :  { %5474 = vmatpush2.bf16.msra.mxu0 %v10174_v14  ;;  %v9827_v14 = vcombine.high %v1521_v34, %v1525_v5  ;;  %v5573_v26 = vld [vmem:[#allocation23 + $0xe0] sm:$0xff]  ;;  %v10284_v30 = vcombine.low %v5577_v9, %v5581_v13 }
 0x4c3   :  { %v5158_v32 = vpop.f32.mrf.mxu0  ;;  %5475 = vmatprep.subr.bf16.mxu0 %v10167_v20  ;;  %v10292_v20 = vcombine.low %v5585_v0, %v5589_v12  ;;  %v10276_v47 = vcombine.low %v5569_v23, %v5573_v26  ;;  %v5549_v0 = vld [vmem:[#allocation23 + $0x20] sm:$0xff] }
 0x4c4   :  { %4921 = vmatpush1.bf16.msra.mxu1 %v9738_v21  ;;  %v10285_v21 = vcombine.high %v5577_v9, %v5581_v13  ;;  %v10277_v32 = vcombine.high %v5569_v23, %v5573_v26  ;;  %v1485_v34 = vld [vmem:[#allocation20 + $0x2a8] sm:$0xff] }
 0x4c5   :  { %4922 = vmatprep.subr.bf16.mxu1 %v9731_v28  ;;  %v9819_v28 = vcombine.high %v1513_v48, %v1517_v54  ;;  %v5669_v9 = vld [vmem:[#allocation23 + $0x3e0] sm:$0xff] }
 0x4c6   :  { %5476 = vmatpush2.bf16.msra.mxu0 %v10166_v19  ;;  %v1505_v19 = vld [vmem:[#allocation20 + $0x348] sm:$0xff] }
 0x4c7   :  { %5477 = vmatprep.subr.bf16.mxu0 %v10159_v35  ;;  %v9818_v35 = vcombine.low %v1513_v48, %v1517_v54  ;;  %v9811_v44 = vcombine.high %v1505_v19, %v1509_v29  ;;  %v1477_v48 = vld [vmem:[#allocation20 + $0x268] sm:$0xff] }
 0x4c8   :  { %4923 = vmatpush1.bf16.msra.mxu1 %v9730_v41  ;;  %v5561_v41 = vld [vmem:[#allocation23 + $0x80] sm:$0xff] }
 0x4c9   :  { %4924 = vmatprep.subr.bf16.mxu1 %v9723_v45  ;;  %v1497_v45 = vld [vmem:[#allocation20 + $0x308] sm:$0xff]  ;;  %v10269_v31 = vcombine.high %v5561_v41, %v5565_v42  ;;  %v10268_v58 = vcombine.low %v5561_v41, %v5565_v42 }
 0x4ca   :  { %5478 = vmatpush2.bf16.msra.mxu0 %v10158_v46  ;;  %v1501_v46 = vld [vmem:[#allocation20 + $0x328] sm:$0xff] }
 0x4cb   :  { %8659 = vmatprep.subr.bf16.mxu0 %v10309_v50  ;;  %v9810_v50 = vcombine.low %v1505_v19, %v1509_v29  ;;  %v9803_v53 = vcombine.high %v1497_v45, %v1501_v46  ;;  %v5661_v23 = vld [vmem:[#allocation23 + $0x3a0] sm:$0xff] }
 0x4cc   :  { %4925 = vmatpush1.bf16.msra.mxu1 %v9722_v49  ;;  %v5553_v49 = vld [vmem:[#allocation23 + $0x40] sm:$0xff] }
 0x4cd   :  { %5480 = vmatmul.mubr.bf16.vlgmr.msra.gmra.mxu0 %v12429_v62  ;;  %4926 = vmatprep.subr.bf16.mxu1 %v9715_v55  ;;  %v1489_v55 = vld [vmem:[#allocation20 + $0x2c8] sm:$0xff]  ;;  %v10260_v5 = vcombine.low %v5553_v49, %v5557_v52 }
 0x4ce   :  { %8660 = vmatpush1.bf16.msra.mxu0 %v10308_v60  ;;  %v10261_v60 = vcombine.high %v5553_v49, %v5557_v52  ;;  %v9795_v12 = vcombine.high %v1489_v55, %v1493_v56  ;;  %v1469_v19 = vld [vmem:[#allocation20 + $0x228] sm:$0xff] }
 0x4cf   :  { %8661 = vmatprep.subr.bf16.mxu0 %v10301_v61  ;;  %v9802_v61 = vcombine.low %v1497_v45, %v1501_v46  ;;  %v5653_v41 = vld [vmem:[#allocation23 + $0x360] sm:$0xff] }
 0x4d0   :  { %4927 = vmatpush1.bf16.msra.mxu1 %v9714_v63  ;;  %v5545_v63 = vld [vmem:[#allocation23] sm:$0xff] }
 0x4d1   :  { %4928 = vmatprep.subr.bf16.mxu1 %v9707_v2  ;;  %v1481_v2 = vld [vmem:[#allocation20 + $0x288] sm:$0xff]  ;;  %v10252_v54 = vcombine.low %v5545_v63, %v5549_v0 }
 0x4d2   :  { %8662 = vmatpush1.bf16.msra.mxu0 %v10300_v6  ;;  %v10253_v6 = vcombine.high %v5545_v63, %v5549_v0  ;;  %v9787_v13 = vcombine.high %v1481_v2, %v1485_v34  ;;  %v1717_v45 = vld [vmem:[#allocation20 + $0x9e8] sm:$0xff] }
 0x4d3   :  { %8663 = vmatprep.subr.bf16.mxu0 %v10293_v51  ;;  %v9794_v51 = vcombine.low %v1489_v55, %v1493_v56  ;;  %v5645_v49 = vld [vmem:[#allocation23 + $0x320] sm:$0xff] }
 0x4d4   :  { %4929 = vmatpush1.bf16.msra.mxu1 %v9706_v7  ;;  %v5665_v7 = vld [vmem:[#allocation23 + $0x3c0] sm:$0xff] }
 0x4d5   :  { %4930 = vmatprep.subr.bf16.mxu1 %v9827_v14  ;;  %v1473_v14 = vld [vmem:[#allocation20 + $0x248] sm:$0xff]  ;;  %v10372_v29 = vcombine.low %v5665_v7, %v5669_v9 }
 0x4d6   :  { %8664 = vmatpush1.bf16.msra.mxu0 %v10292_v20  ;;  %v10373_v20 = vcombine.high %v5665_v7, %v5669_v9  ;;  %v9779_v26 = vcombine.high %v1473_v14, %v1477_v48  ;;  %v1709_v55 = vld [vmem:[#allocation20 + $0x9a8] sm:$0xff] }
 0x4d7   :  { %8665 = vmatprep.subr.bf16.mxu0 %v10285_v21  ;;  %v9786_v21 = vcombine.low %v1481_v2, %v1485_v34  ;;  %v5637_v63 = vld [vmem:[#allocation23 + $0x2e0] sm:$0xff] }
 0x4d8   :  { %4931 = vmatpush2.bf16.msra.mxu1 %v9826_v22  ;;  %v5657_v22 = vld [vmem:[#allocation23 + $0x380] sm:$0xff] }
 0x4d9   :  { %4932 = vmatprep.subr.bf16.mxu1 %v9819_v28  ;;  %v1465_v28 = vld [vmem:[#allocation20 + $0x208] sm:$0xff]  ;;  %v10364_v46 = vcombine.low %v5657_v22, %v5661_v23 }
 0x4da   :  { %8666 = vmatpush1.bf16.msra.mxu0 %v10284_v30  ;;  %v10365_v30 = vcombine.high %v5657_v22, %v5661_v23  ;;  %v9771_v42 = vcombine.high %v1465_v28, %v1469_v19  ;;  %v1701_v2 = vld [vmem:[#allocation20 + $0x968] sm:$0xff] }
 0x4db   :  { %8667 = vmatprep.subr.bf16.mxu0 %v10277_v32  ;;  %v9778_v32 = vcombine.low %v1473_v14, %v1477_v48  ;;  %v5625_v7 = vld [vmem:[#allocation23 + $0x280] sm:$0xff] }
 0x4dc   :  { %4933 = vmatpush2.bf16.msra.mxu1 %v9818_v35  ;;  %v5649_v35 = vld [vmem:[#allocation23 + $0x340] sm:$0xff] }
 0x4dd   :  { %4934 = vmatprep.subr.bf16.mxu1 %v9811_v44  ;;  %v1713_v44 = vld [vmem:[#allocation20 + $0x9c8] sm:$0xff]  ;;  %v10356_v56 = vcombine.low %v5649_v35, %v5653_v41 }
 0x4de   :  { %8668 = vmatpush1.bf16.msra.mxu0 %v10276_v47  ;;  %v10357_v47 = vcombine.high %v5649_v35, %v5653_v41  ;;  %v10019_v52 = vcombine.high %v1713_v44, %v1717_v45  ;;  %v5629_v9 = vld [vmem:[#allocation23 + $0x2a0] sm:$0xff] }
 0x4df   :  { %8669 = vmatprep.subr.bf16.mxu0 %v10269_v31  ;;  %v9770_v31 = vcombine.low %v1465_v28, %v1469_v19  ;;  %v1689_v48 = vld [vmem:[#allocation20 + $0x908] sm:$0xff] }
 0x4e0   :  { %4935 = vmatpush2.bf16.msra.mxu1 %v9810_v50  ;;  %v5641_v50 = vld [vmem:[#allocation23 + $0x300] sm:$0xff] }
 0x4e1   :  { %4936 = vmatprep.subr.bf16.mxu1 %v9803_v53  ;;  %v1705_v53 = vld [vmem:[#allocation20 + $0x988] sm:$0xff]  ;;  %v10348_v34 = vcombine.low %v5641_v50, %v5645_v49 }
 0x4e2   :  { %8670 = vmatpush1.bf16.msra.mxu0 %v10268_v58  ;;  %v10349_v58 = vcombine.high %v5641_v50, %v5645_v49  ;;  %v10011_v0 = vcombine.high %v1705_v53, %v1709_v55  ;;  %v5617_v23 = vld [vmem:[#allocation23 + $0x240] sm:$0xff] }
 0x4e3   :  { %8671 = vmatprep.subr.bf16.mxu0 %v10261_v60  ;;  %v10018_v60 = vcombine.low %v1713_v44, %v1717_v45  ;;  %v5609_v44 = vld [vmem:[#allocation23 + $0x200] sm:$0xff] }
 0x4e4   :  { %4937 = vmatpush2.bf16.msra.mxu1 %v9802_v61  ;;  %v5633_v61 = vld [vmem:[#allocation23 + $0x2c0] sm:$0xff] }
 0x4e5   :  { %4938 = vmatprep.subr.bf16.mxu1 %v9795_v12  ;;  %v1697_v12 = vld [vmem:[#allocation20 + $0x948] sm:$0xff] }
 0x4e6   :  { %8672 = vmatpush1.bf16.msra.mxu0 %v10260_v5  ;;  %v10003_v14 = vcombine.high %v1697_v12, %v1701_v2  ;;  %v10002_v22 = vcombine.low %v1697_v12, %v1701_v2  ;;  %v5613_v45 = vld [vmem:[#allocation23 + $0x220] sm:$0xff] }
 0x4e7   :  { %8673 = vmatprep.subr.bf16.mxu0 %v10253_v6  ;;  %v10341_v6 = vcombine.high %v5633_v61, %v5637_v63  ;;  %v1677_v50 = vld [vmem:[#allocation20 + $0x8a8] sm:$0xff] }
 0x4e8   :  { %4939 = vmatpush2.bf16.msra.mxu1 %v9794_v51  ;;  %v10010_v51 = vcombine.low %v1705_v53, %v1709_v55  ;;  %v10317_v53 = vcombine.high %v5609_v44, %v5613_v45  ;;  %v1657_v12 = vld [vmem:[#allocation20 + $0x808] sm:$0xff] }
 0x4e9   :  { %4940 = vmatprep.subr.bf16.mxu1 %v9787_v13  ;;  %v1661_v2 = vld [vmem:[#allocation20 + $0x828] sm:$0xff] }
 0x4ea   :  { %8674 = vmatpush1.bf16.msra.mxu0 %v10252_v54  ;;  %v1693_v54 = vld [vmem:[#allocation20 + $0x928] sm:$0xff] }
 0x4eb   :  { %8675 = vmatprep.subr.bf16.mxu0 %v10373_v20  ;;  %v10340_v20 = vcombine.low %v5633_v61, %v5637_v63  ;;  %v9995_v19 = vcombine.high %v1689_v48, %v1693_v54  ;;  %v10316_v61 = vcombine.low %v5609_v44, %v5613_v45 }
 0x4ec   :  { %4941 = vmatpush2.bf16.msra.mxu1 %v9786_v21  ;;  %v10333_v21 = vcombine.high %v5625_v7, %v5629_v9 }
 0x4ed   :  { %4942 = vmatprep.subr.bf16.mxu1 %v9779_v26  ;;  %v5621_v26 = vld [vmem:[#allocation23 + $0x260] sm:$0xff] }
 0x4ee   :  { %8676 = vmatpush2.bf16.msra.mxu0 %v10372_v29  ;;  %v1681_v29 = vld [vmem:[#allocation20 + $0x8c8] sm:$0xff]  ;;  %v10325_v41 = vcombine.high %v5617_v23, %v5621_v26  ;;  %v10324_v49 = vcombine.low %v5617_v23, %v5621_v26 }
 0x4ef   :  { %8677 = vmatprep.subr.bf16.mxu0 %v10365_v30  ;;  %v1685_v30 = vld [vmem:[#allocation20 + $0x8e8] sm:$0xff] }
 0x4f0   :  { %4943 = vmatpush2.bf16.msra.mxu1 %v9778_v32  ;;  %v10332_v32 = vcombine.low %v5625_v7, %v5629_v9  ;;  %v9986_v55 = vcombine.low %v1681_v29, %v1685_v30  ;;  %v1777_v7 = vld [vmem:[#allocation20 + $0xbc8] sm:$0xff] }
 0x4f1   :  { %4944 = vmatprep.subr.bf16.mxu1 %v9771_v42  ;;  %v9994_v42 = vcombine.low %v1689_v48, %v1693_v54  ;;  %v1781_v9 = vld [vmem:[#allocation20 + $0xbe8] sm:$0xff] }
 0x4f2   :  { %8678 = vmatpush2.bf16.msra.mxu0 %v10364_v46  ;;  %v10083_v54 = vcombine.high %v1777_v7, %v1781_v9  ;;  %v10082_v23 = vcombine.low %v1777_v7, %v1781_v9 }
 0x4f3   :  { %8679 = vmatprep.subr.bf16.mxu0 %v10357_v47  ;;  %v9987_v47 = vcombine.high %v1681_v29, %v1685_v30  ;;  %v1765_v29 = vld [vmem:[#allocation20 + $0xb68] sm:$0xff] }
 0x4f4   :  { %4945 = vmatpush2.bf16.msra.mxu1 %v9770_v31  ;;  %v1673_v31 = vld [vmem:[#allocation20 + $0x888] sm:$0xff] }
 0x4f5   :  { %4996 = vmatprep.subr.bf16.mxu1 %v10019_v52  ;;  %v9978_v63 = vcombine.low %v1673_v31, %v1677_v50 }
 0x4f6   :  { %8680 = vmatpush2.bf16.msra.mxu0 %v10356_v56  ;;  %v9979_v56 = vcombine.high %v1673_v31, %v1677_v50 }
 0x4f7   :  { %4947 = vmatmul.mubr.bf16.vlgmr.msra.gmra.mxu1 %v12364_v18  ;;  %v12473_v5 = vpop.f32.mrf.mxu1  ;;  %8681 = vmatprep.subr.bf16.mxu0 %v10349_v58  ;;  %v1665_v58 = vld [vmem:[#allocation20 + $0x848] sm:$0xff] }
 0x4f8   :  { %4997 = vmatpush1.bf16.msra.mxu1 %v10018_v60  ;;  %5028 = vmatprep.mubr.bf16.mxu1 %v12368_v24  ;;  %v1669_v60 = vld [vmem:[#allocation20 + $0x868] sm:$0xff] }
 0x4f9   :  { %v11123_v13 = vpop.f32.mrf.mxu1  ;;  %4998 = vmatprep.subr.bf16.mxu1 %v10011_v0  ;;  %v9971_v0 = vcombine.high %v1665_v58, %v1669_v60 }
 0x4fa   :  { %8682 = vmatpush2.bf16.msra.mxu0 %v10348_v34  ;;  %v9970_v34 = vcombine.low %v1665_v58, %v1669_v60  ;;  %v1733_v58 = vld [vmem:[#allocation20 + $0xa68] sm:$0xff] }
 0x4fb   :  { %8683 = vmatprep.subr.bf16.mxu0 %v10341_v6 }
 0x4fc   :  { %4999 = vmatpush1.bf16.msra.mxu1 %v10010_v51  ;;  %v9963_v51 = vcombine.high %v1657_v12, %v1661_v2 }
 0x4fd   :  { %v12476_v28 = vpop.f32.mrf.mxu0  ;;  %5000 = vmatprep.subr.bf16.mxu1 %v10003_v14  ;;  %v9962_v14 = vcombine.low %v1657_v12, %v1661_v2 }
 0x4fe   :  { %8684 = vmatpush2.bf16.msra.mxu0 %v10340_v20  ;;  %v1769_v20 = vld [vmem:[#allocation20 + $0xb88] sm:$0xff] }
 0x4ff   :  { %v12478_v35 = vpop.f32.mrf.mxu0  ;;  %8685 = vmatprep.subr.bf16.mxu0 %v10333_v21  ;;  %v1773_v21 = vld [vmem:[#allocation20 + $0xba8] sm:$0xff] }
 0x500   :  { %5001 = vmatpush1.bf16.msra.mxu1 %v10002_v22  ;;  %v10075_v26 = vcombine.high %v1769_v20, %v1773_v21  ;;  %v10074_v30 = vcombine.low %v1769_v20, %v1773_v21  ;;  %v1921_v21 = vld [vmem:[#allocation20 + $0x1048] sm:$0xff] }
 0x501   :  { %v5239_v46 = vpop.f32.mrf.mxu0  ;;  %5002 = vmatprep.subr.bf16.mxu1 %v9995_v19  ;;  %v1761_v19 = vld [vmem:[#allocation20 + $0xb48] sm:$0xff] }
 0x502   :  { %8686 = vmatpush2.bf16.msra.mxu0 %v10332_v32  ;;  %v10067_v32 = vcombine.high %v1761_v19, %v1765_v29  ;;  %v10066_v44 = vcombine.low %v1761_v19, %v1765_v29  ;;  %v1745_v46 = vld [vmem:[#allocation20 + $0xac8] sm:$0xff] }
 0x503   :  { %v5240_v52 = vpop.f32.mrf.mxu0  ;;  %8687 = vmatprep.subr.bf16.mxu0 %v10325_v41  ;;  %v1753_v41 = vld [vmem:[#allocation20 + $0xb08] sm:$0xff] }
 0x504   :  { %5003 = vmatpush1.bf16.msra.mxu1 %v9994_v42  ;;  %v1757_v42 = vld [vmem:[#allocation20 + $0xb28] sm:$0xff] }
 0x505   :  { %5004 = vmatprep.subr.bf16.mxu1 %v9987_v47  ;;  %v10059_v45 = vcombine.high %v1753_v41, %v1757_v42  ;;  %v1749_v47 = vld [vmem:[#allocation20 + $0xae8] sm:$0xff]  ;;  %v10058_v31 = vcombine.low %v1753_v41, %v1757_v42 }
 0x506   :  { %8688 = vmatpush2.bf16.msra.mxu0 %v10324_v49  ;;  %v10051_v50 = vcombine.high %v1745_v46, %v1749_v47  ;;  %v1737_v49 = vld [vmem:[#allocation20 + $0xa88] sm:$0xff] }
 0x507   :  { %8689 = vmatprep.subr.bf16.mxu0 %v10317_v53  ;;  %v1741_v52 = vld [vmem:[#allocation20 + $0xaa8] sm:$0xff]  ;;  %v10050_v53 = vcombine.low %v1745_v46, %v1749_v47  ;;  %v1586_v46 = vld [vmem:[#allocation20 + $0x5d0] sm:$0xff] }
 0x508   :  { %5005 = vmatpush1.bf16.msra.mxu1 %v9986_v55  ;;  %v10043_v55 = vcombine.high %v1737_v49, %v1741_v52  ;;  %v10042_v60 = vcombine.low %v1737_v49, %v1741_v52  ;;  %v1590_v47 = vld [vmem:[#allocation20 + $0x5f0] sm:$0xff] }
 0x509   :  { %5006 = vmatprep.subr.bf16.mxu1 %v9979_v56  ;;  %v1729_v56 = vld [vmem:[#allocation20 + $0xa48] sm:$0xff]  ;;  %v1578_v49 = vld [vmem:[#allocation20 + $0x590] sm:$0xff] }
 0x50a   :  { %8690 = vmatpush2.bf16.msra.mxu0 %v10316_v61  ;;  %v10035_v61 = vcombine.high %v1729_v56, %v1733_v58  ;;  %v10034_v12 = vcombine.low %v1729_v56, %v1733_v58  ;;  %v1582_v52 = vld [vmem:[#allocation20 + $0x5b0] sm:$0xff] }
 0x50b   :  { %v1570_v56 = vld [vmem:[#allocation20 + $0x550] sm:$0xff] }
 0x50c   :  { %5007 = vmatpush1.bf16.msra.mxu1 %v9978_v63  ;;  %v1721_v63 = vld [vmem:[#allocation20 + $0xa08] sm:$0xff]  ;;  %v1574_v58 = vld [vmem:[#allocation20 + $0x570] sm:$0xff] }
 0x50d   :  { %v12480_v6 = vpop.f32.mrf.mxu0  ;;  %5008 = vmatprep.subr.bf16.mxu1 %v9971_v0  ;;  %v1725_v0 = vld [vmem:[#allocation20 + $0xa28] sm:$0xff] }
 0x50e   :  { %v10027_v2 = vcombine.high %v1721_v63, %v1725_v0  ;;  %v10026_v7 = vcombine.low %v1721_v63, %v1725_v0  ;;  %v1562_v63 = vld [vmem:[#allocation20 + $0x510] sm:$0xff] }
 0x50f   :  { %v12482_v13 = vpop.f32.mrf.mxu0  ;;  %v1566_v0 = vld [vmem:[#allocation20 + $0x530] sm:$0xff] }
 0x510   :  { %5009 = vmatpush1.bf16.msra.mxu1 %v9970_v34  ;;  %v1937_v34 = vld [vmem:[#allocation20 + $0x10c8] sm:$0xff] }
 0x511   :  { %v5321_v48 = vpop.f32.mrf.mxu0  ;;  %5010 = vmatprep.subr.bf16.mxu1 %v9963_v51  ;;  %v1941_v51 = vld [vmem:[#allocation20 + $0x10e8] sm:$0xff] }
 0x512   :  { %v10243_v9 = vcombine.high %v1937_v34, %v1941_v51  ;;  %v1933_v48 = vld [vmem:[#allocation20 + $0x10a8] sm:$0xff] }
 0x513   :  { %v5322_v22 = vpop.f32.mrf.mxu0 }
 0x514   :  { %5011 = vmatpush1.bf16.msra.mxu1 %v9962_v14  ;;  %v1929_v14 = vld [vmem:[#allocation20 + $0x1088] sm:$0xff] }
 0x515   :  { %5012 = vmatprep.subr.bf16.mxu1 %v10083_v54  ;;  %v10242_v54 = vcombine.low %v1937_v34, %v1941_v51  ;;  %v10235_v20 = vcombine.high %v1929_v14, %v1933_v48  ;;  %v1925_v22 = vld [vmem:[#allocation20 + $0x1068] sm:$0xff]  ;;  %v9869_v34 = vcombine.high %v1562_v63, %v1566_v0  ;;  %v1554_v51 = vld [vmem:[#allocation20 + $0x4d0] sm:$0xff] }
 0x516   :  { %v10227_v29 = vcombine.high %v1921_v21, %v1925_v22  ;;  %v10226_v42 = vcombine.low %v1921_v21, %v1925_v22 }
 0x518   :  { %5013 = vmatpush2.bf16.msra.mxu1 %v10082_v23 }
 0x519   :  { %5014 = vmatprep.subr.bf16.mxu1 %v10075_v26  ;;  %v10234_v26 = vcombine.low %v1929_v14, %v1933_v48  ;;  %v9868_v14 = vcombine.low %v1562_v63, %v1566_v0  ;;  %v1638_v63 = vld [vmem:[#allocation20 + $0x770] sm:$0xff] }
 0x51c   :  { %5015 = vmatpush2.bf16.msra.mxu1 %v10074_v30  ;;  %v1913_v30 = vld [vmem:[#allocation20 + $0x1008] sm:$0xff] }
 0x51d   :  { %5016 = vmatprep.subr.bf16.mxu1 %v10067_v32  ;;  %v1917_v32 = vld [vmem:[#allocation20 + $0x1028] sm:$0xff] }
 0x520   :  { %5017 = vmatpush2.bf16.msra.mxu1 %v10066_v44 }
 0x521   :  { %5018 = vmatprep.subr.bf16.mxu1 %v10059_v45  ;;  %v10219_v45 = vcombine.high %v1913_v30, %v1917_v32 }
 0x524   :  { %5019 = vmatpush2.bf16.msra.mxu1 %v10058_v31  ;;  %v10218_v31 = vcombine.low %v1913_v30, %v1917_v32  ;;  %v1542_v30 = vld [vmem:[#allocation20 + $0x470] sm:$0xff] }
 0x525   :  { %5020 = vmatprep.subr.bf16.mxu1 %v10051_v50  ;;  %v9893_v50 = vcombine.high %v1586_v46, %v1590_v47 }
 0x528   :  { %5021 = vmatpush2.bf16.msra.mxu1 %v10050_v53  ;;  %v9892_v53 = vcombine.low %v1586_v46, %v1590_v47  ;;  %v1650_v47 = vld [vmem:[#allocation20 + $0x7d0] sm:$0xff] }
 0x529   :  { %5022 = vmatprep.subr.bf16.mxu1 %v10043_v55  ;;  %v9885_v55 = vcombine.high %v1578_v49, %v1582_v52 }
 0x52c   :  { %5023 = vmatpush2.bf16.msra.mxu1 %v10042_v60  ;;  %v9884_v60 = vcombine.low %v1578_v49, %v1582_v52 }
 0x52d   :  { %5024 = vmatprep.subr.bf16.mxu1 %v10035_v61  ;;  %v9877_v61 = vcombine.high %v1570_v56, %v1574_v58 }
 0x530   :  { %5025 = vmatpush2.bf16.msra.mxu1 %v10034_v12  ;;  %v9876_v12 = vcombine.low %v1570_v56, %v1574_v58 }
 0x531   :  { %5026 = vmatprep.subr.bf16.mxu1 %v10027_v2 }
 0x534   :  { %5027 = vmatpush2.bf16.msra.mxu1 %v10026_v7  ;;  %v1558_v7 = vld [vmem:[#allocation20 + $0x4f0] sm:$0xff] }
 0x535   :  { %5086 = vmatprep.subr.bf16.mxu1 %v10243_v9  ;;  %v9860_v22 = vcombine.low %v1554_v51, %v1558_v7 }
 0x537   :  { %v12484_v23 = vpop.f32.mrf.mxu1  ;;  %5029 = vmatmul.mubr.bf16.vlgmr.msra.gmra.mxu1 %v12383_v38 }
 0x538   :  { %5087 = vmatpush1.bf16.msra.mxu1 %v10242_v54  ;;  %5110 = vmatprep.mubr.bf16.mxu1 %v11556_v43  ;;  %v1546_v54 = vld [vmem:[#allocation20 + $0x490] sm:$0xff] }
 0x539   :  { %v12488_v19 = vpop.f32.mrf.mxu1  ;;  %5088 = vmatprep.subr.bf16.mxu1 %v10235_v20  ;;  %v1550_v20 = vld [vmem:[#allocation20 + $0x4b0] sm:$0xff] }
 0x53a   :  { %v9852_v32 = vcombine.low %v1546_v54, %v1550_v20 }
 0x53b   :  { %v4788_v41 = vpop.f32.mrf.mxu1 }
 0x53c   :  { %5089 = vmatpush1.bf16.msra.mxu1 %v10234_v26  ;;  %v9853_v26 = vcombine.high %v1546_v54, %v1550_v20 }
 0x53d   :  { %v4789_v44 = vpop.f32.mrf.mxu1  ;;  %5090 = vmatprep.subr.bf16.mxu1 %v10227_v29  ;;  %v1538_v29 = vld [vmem:[#allocation20 + $0x450] sm:$0xff] }
 0x53e   :  { %v9845_v41 = vcombine.high %v1538_v29, %v1542_v30  ;;  %v1534_v44 = vld [vmem:[#allocation20 + $0x430] sm:$0xff] }
 0x540   :  { %5091 = vmatpush1.bf16.msra.mxu1 %v10226_v42  ;;  %v1530_v42 = vld [vmem:[#allocation20 + $0x410] sm:$0xff] }
 0x541   :  { %5092 = vmatprep.subr.bf16.mxu1 %v10219_v45  ;;  %v9844_v45 = vcombine.low %v1538_v29, %v1542_v30  ;;  %v9837_v46 = vcombine.high %v1530_v42, %v1534_v44  ;;  %v9836_v49 = vcombine.low %v1530_v42, %v1534_v44  ;;  %v1610_v44 = vld [vmem:[#allocation20 + $0x690] sm:$0xff] }
 0x544   :  { %5093 = vmatpush1.bf16.msra.mxu1 %v10218_v31  ;;  %v1654_v31 = vld [vmem:[#allocation20 + $0x7f0] sm:$0xff] }
 0x545   :  { %5160 = vmatprep.subr.bf16.mxu1 %v9893_v50  ;;  %v1946_v50 = vlaneseq  ;;  %v9957_v52 = vcombine.high %v1650_v47, %v1654_v31  ;;  %v9956_v58 = vcombine.low %v1650_v47, %v1654_v31 }
 0x547   :  { %10249 = vmatmul.mubr.msk.bf16.vlgmr.msra.gmra.mxu1 %vm762_vm3, %v12389_v57  ;;  %v12497_v56 = vshrl.u32 %v1946_v50, 7 }
 0x548   :  { %5161 = vmatpush1.bf16.msra.mxu1 %v9892_v53  ;;  %5192 = vmatprep.mubr.bf16.mxu1 %v12393_v59  ;;  %v9861_v59 = vcombine.high %v1554_v51, %v1558_v7  ;;  %v1642_v53 = vld [vmem:[#allocation20 + $0x790] sm:$0xff] }
 0x549   :  { %5162 = vmatprep.subr.bf16.mxu1 %v9885_v55  ;;  %v1646_v55 = vld [vmem:[#allocation20 + $0x7b0] sm:$0xff]  ;;  %v12500_v0 = vsub.s32 0, %v12497_v56  ;;  %v12505_v7 = vsub.s32 1, %v12497_v56 }
 0x54c   :  { %5163 = vmatpush1.bf16.msra.mxu1 %v9884_v60  ;;  %v9949_v60 = vcombine.high %v1642_v53, %v1646_v55 }
 0x54d   :  { %v12493_v2 = vpop.f32.mrf.mxu0  ;;  %5164 = vmatprep.subr.bf16.mxu1 %v9877_v61  ;;  %v1634_v61 = vld [vmem:[#allocation20 + $0x750] sm:$0xff] }
 0x54e   :  { %v9941_v51 = vcombine.high %v1634_v61, %v1638_v63  ;;  %v9940_v54 = vcombine.low %v1634_v61, %v1638_v63  ;;  %v1594_v61 = vld [vmem:[#allocation20 + $0x610] sm:$0xff] }
 0x54f   :  { %v12495_v9 = vpop.f32.mrf.mxu0  ;;  %v1598_v63 = vld [vmem:[#allocation20 + $0x630] sm:$0xff] }
 0x550   :  { %5165 = vmatpush1.bf16.msra.mxu1 %v9876_v12  ;;  %v9948_v12 = vcombine.low %v1642_v53, %v1646_v55 }
 0x551   :  { %v5403_v48 = vpop.f32.mrf.mxu0  ;;  %5166 = vmatprep.subr.bf16.mxu1 %v9869_v34  ;;  %v12502_v34 = vld [vmem:[#allocation21] sm:$0xff] }
 0x552   :  { %v1630_v48 = vld [vmem:[#allocation20 + $0x730] sm:$0xff] }
 0x553   :  { %v5404_v21 = vpop.f32.mrf.mxu0 }
 0x554   :  { %5167 = vmatpush1.bf16.msra.mxu1 %v9868_v14  ;;  %v1626_v14 = vld [vmem:[#allocation20 + $0x710] sm:$0xff]  ;;  %v1953_v21 = vrot.slane %v12502_v34, %v12505_v7 }
 0x555   :  { %5168 = vmatprep.subr.bf16.mxu1 %v9861_v59  ;;  %v1949_v59 = vrot.slane %v12502_v34, %v12500_v0  ;;  %v9933_v20 = vcombine.high %v1626_v14, %v1630_v48  ;;  %v9932_v30 = vcombine.low %v1626_v14, %v1630_v48 }
 0x557   :  { %v4744_v29 = vadd.f32 %v12411_v33, %v1949_v59  ;;  %v1606_v33 = vld [vmem:[#allocation20 + $0x670] sm:$0xff]  ;;  %v9901_v59 = vcombine.high %v1594_v61, %v1598_v63 }
 0x558   :  { %5169 = vmatpush1.bf16.msra.mxu1 %v9860_v22  ;;  %v1618_v22 = vld [vmem:[#allocation20 + $0x6d0] sm:$0xff] }
 0x559   :  { %5170 = vmatprep.subr.bf16.mxu1 %v9853_v26  ;;  %v1622_v26 = vld [vmem:[#allocation20 + $0x6f0] sm:$0xff]  ;;  %v4785_v42 = vadd.f32 %v12484_v23, %v4744_v29 }
 0x55a   :  { %v9924_v47 = vcombine.low %v1618_v22, %v1622_v26  ;;  %v1838_v29 = vld [vmem:[#allocation20 + $0xdb0] sm:$0xff] }
 0x55b   :  { %v4826_v50 = vadd.f32 %v12433_v1, %v4785_v42  ;;  %v1830_v42 = vld [vmem:[#allocation20 + $0xd70] sm:$0xff] }
 0x55c   :  { %5171 = vmatpush1.bf16.msra.mxu1 %v9852_v32  ;;  %v9925_v32 = vcombine.high %v1618_v22, %v1622_v26  ;;  %v9900_v22 = vcombine.low %v1594_v61, %v1598_v63  ;;  %v1794_v61 = vld [vmem:[#allocation20 + $0xc50] sm:$0xff] }
 0x55d   :  { %5172 = vmatprep.subr.bf16.mxu1 %v9845_v41  ;;  %v4746_v41 = vadd.f32 %v12413_v39, %v1953_v21  ;;  %v1798_v63 = vld [vmem:[#allocation20 + $0xc70] sm:$0xff] }
 0x560   :  { %5173 = vmatpush1.bf16.msra.mxu1 %v9844_v45  ;;  %v1614_v45 = vld [vmem:[#allocation20 + $0x6b0] sm:$0xff] }
 0x561   :  { %5174 = vmatprep.subr.bf16.mxu1 %v9837_v46  ;;  %v4787_v46 = vadd.f32 %v12488_v19, %v4746_v41  ;;  %v9917_v31 = vcombine.high %v1610_v44, %v1614_v45  ;;  %v9916_v39 = vcombine.low %v1610_v44, %v1614_v45  ;;  %v1826_v41 = vld [vmem:[#allocation20 + $0xd50] sm:$0xff] }
 0x562   :  { %v10133_v45 = vcombine.high %v1826_v41, %v1830_v42 }
 0x563   :  { %v4828_v55 = vadd.f32 %v12435_v4, %v4787_v46  ;;  %v1842_v4 = vld [vmem:[#allocation20 + $0xdd0] sm:$0xff] }
 0x564   :  { %5175 = vmatpush1.bf16.msra.mxu1 %v9836_v49  ;;  %v1602_v49 = vld [vmem:[#allocation20 + $0x650] sm:$0xff] }
 0x565   :  { %5176 = vmatprep.subr.bf16.mxu1 %v9957_v52  ;;  %v9909_v23 = vcombine.high %v1602_v49, %v1606_v33  ;;  %v9908_v1 = vcombine.low %v1602_v49, %v1606_v33  ;;  %v1818_v46 = vld [vmem:[#allocation20 + $0xd10] sm:$0xff] }
 0x566   :  { %v1810_v33 = vld [vmem:[#allocation20 + $0xcd0] sm:$0xff] }
 0x568   :  { %5177 = vmatpush2.bf16.msra.mxu1 %v9956_v58 }
 0x569   :  { %5178 = vmatprep.subr.bf16.mxu1 %v9949_v60 }
 0x56c   :  { %5179 = vmatpush2.bf16.msra.mxu1 %v9948_v12 }
 0x56d   :  { %5180 = vmatprep.subr.bf16.mxu1 %v9941_v51 }
 0x570   :  { %5181 = vmatpush2.bf16.msra.mxu1 %v9940_v54 }
 0x571   :  { %5182 = vmatprep.subr.bf16.mxu1 %v9933_v20  ;;  %v1846_v20 = vld [vmem:[#allocation20 + $0xdf0] sm:$0xff] }
 0x572   :  { %v10149_v26 = vcombine.high %v1842_v4, %v1846_v20 }
 0x574   :  { %5183 = vmatpush2.bf16.msra.mxu1 %v9932_v30  ;;  %v10148_v30 = vcombine.low %v1842_v4, %v1846_v20  ;;  %v1910_v4 = vld [vmem:[#allocation20 + $0xff0] sm:$0xff] }
 0x575   :  { %5184 = vmatprep.subr.bf16.mxu1 %v9925_v32 }
 0x577   :  { %v4866_v52 = vpop.f32.mrf.mxu1 }
 0x578   :  { %v4867_v53 = vadd.f32 %v4866_v52, %v4826_v50  ;;  %5185 = vmatpush2.bf16.msra.mxu1 %v9924_v47  ;;  %v1822_v47 = vld [vmem:[#allocation20 + $0xd30] sm:$0xff] }
 0x579   :  { %v4868_v58 = vpop.f32.mrf.mxu1  ;;  %5186 = vmatprep.subr.bf16.mxu1 %v9917_v31  ;;  %v10132_v31 = vcombine.low %v1826_v41, %v1830_v42  ;;  %v10125_v49 = vcombine.high %v1818_v46, %v1822_v47  ;;  %v1814_v52 = vld [vmem:[#allocation20 + $0xcf0] sm:$0xff] }
 0x57a   :  { %v4908_v60 = vadd.f32 %v12437_v25, %v4867_v53  ;;  %v4869_v19 = vadd.f32 %v4868_v58, %v4828_v55  ;;  %v1806_v58 = vld [vmem:[#allocation20 + $0xcb0] sm:$0xff] }
 0x57b   :  { %v4870_v12 = vpop.f32.mrf.mxu1  ;;  %v1894_v41 = vld [vmem:[#allocation20 + $0xf70] sm:$0xff] }
 0x57c   :  { %v4910_v51 = vadd.f32 %v12441_v27, %v4869_v19  ;;  %5187 = vmatpush2.bf16.msra.mxu1 %v9916_v39  ;;  %v5529_v14 = vmax.f32 %v4908_v60, 0.0  ;;  %v1834_v27 = vld [vmem:[#allocation20 + $0xd90] sm:$0xff]  ;;  %v10116_v60 = vcombine.low %v1810_v33, %v1814_v52 }
 0x57d   :  { %v4871_v48 = vpop.f32.mrf.mxu1  ;;  %5188 = vmatprep.subr.bf16.mxu1 %v9909_v23  ;;  %v10141_v32 = vcombine.high %v1834_v27, %v1838_v29  ;;  %v10140_v44 = vcombine.low %v1834_v27, %v1838_v29  ;;  %v1802_v39 = vld [vmem:[#allocation20 + $0xc90] sm:$0xff] }
 0x57e   :  { %v5530_v54 = vmax.f32 %v4910_v51, 0.0  ;;  %v12521_v25 = vpack.c.bf16 %v5529_v14, %v5529_v14  ;;  %v10109_v19 = vcombine.high %v1802_v39, %v1806_v58  ;;  %v10108_v12 = vcombine.low %v1802_v39, %v1806_v58  ;;  %v1790_v14 = vld [vmem:[#allocation20 + $0xc30] sm:$0xff] }
 0x57f   :  { %v10101_v51 = vcombine.high %v1794_v61, %v1798_v63  ;;  %v10100_v48 = vcombine.low %v1794_v61, %v1798_v63  ;;  %v1902_v27 = vld [vmem:[#allocation20 + $0xfb0] sm:$0xff] }
 0x580   :  { %v12519_v21 = vpack.c.bf16 %v5530_v54, %v5530_v54  ;;  %5189 = vmatpush2.bf16.msra.mxu1 %v9908_v1  ;;  %v1786_v1 = vld [vmem:[#allocation20 + $0xc10] sm:$0xff] }
 0x581   :  { %5190 = vmatprep.subr.bf16.mxu1 %v9901_v59  ;;  %v10093_v59 = vcombine.high %v1786_v1, %v1790_v14  ;;  %v1906_v54 = vld [vmem:[#allocation20 + $0xfd0] sm:$0xff]  ;;  %v10092_v20 = vcombine.low %v1786_v1, %v1790_v14 }
 0x582   :  { %8691 = vmatprep.mubr.bf16.mxu0 %v12519_v21  ;;  %v10212_v29 = vcombine.low %v1906_v54, %v1910_v4  ;;  %v1854_v1 = vld [vmem:[#allocation20 + $0xe30] sm:$0xff] }
 0x583   :  { %8692 = vmatmul.mubr.bf16.vlgmr.msra.gmra.mxu0 %v12521_v25 }
 0x584   :  { %5191 = vmatpush2.bf16.msra.mxu1 %v9900_v22  ;;  %v10213_v22 = vcombine.high %v1906_v54, %v1910_v4  ;;  %v1459_v4 = vld [vmem:[#allocation20 + $0x1d8] sm:$0xff] }
 0x585   :  { %5242 = vmatprep.subr.bf16.mxu1 %v10149_v26  ;;  %v1898_v26 = vld [vmem:[#allocation20 + $0xf90] sm:$0xff] }
 0x586   :  { %v10204_v42 = vcombine.low %v1898_v26, %v1902_v27 }
 0x587   :  { %5193 = vmatmul.mubr.bf16.vlgmr.msra.gmra.mxu1 %v12403_v36  ;;  %v10124_v36 = vcombine.low %v1818_v46, %v1822_v47  ;;  %v1886_v46 = vld [vmem:[#allocation20 + $0xf30] sm:$0xff] }
 0x588   :  { %5243 = vmatpush1.bf16.msra.mxu1 %v10148_v30  ;;  %5274 = vmatprep.mubr.bf16.mxu1 %v12407_v40  ;;  %v10117_v40 = vcombine.high %v1810_v33, %v1814_v52  ;;  %v10205_v30 = vcombine.high %v1898_v26, %v1902_v27  ;;  %v1878_v33 = vld [vmem:[#allocation20 + $0xef0] sm:$0xff]  ;;  %v1451_v27 = vld [vmem:[#allocation20 + $0x198] sm:$0xff] }
 0x589   :  { %5244 = vmatprep.subr.bf16.mxu1 %v10141_v32  ;;  %v1890_v32 = vld [vmem:[#allocation20 + $0xf50] sm:$0xff] }
 0x58a   :  { %v10196_v47 = vcombine.low %v1890_v32, %v1894_v41 }
 0x58c   :  { %5245 = vmatpush1.bf16.msra.mxu1 %v10140_v44  ;;  %v10197_v44 = vcombine.high %v1890_v32, %v1894_v41  ;;  %v1443_v41 = vld [vmem:[#allocation20 + $0x158] sm:$0xff] }
 0x58d   :  { %v12527_v50 = vpop.f32.mrf.mxu0  ;;  %5246 = vmatprep.subr.bf16.mxu1 %v10133_v45  ;;  %v1882_v45 = vld [vmem:[#allocation20 + $0xf10] sm:$0xff] }
 0x58e   :  { %v10188_v52 = vcombine.low %v1882_v45, %v1886_v46 }
 0x58f   :  { %v12529_v53 = vpop.f32.mrf.mxu0 }
 0x590   :  { %5247 = vmatpush1.bf16.msra.mxu1 %v10132_v31  ;;  %v10189_v31 = vcombine.high %v1882_v45, %v1886_v46  ;;  %v1435_v46 = vld [vmem:[#allocation20 + $0x118] sm:$0xff] }
 0x591   :  { %v5485_v55 = vpop.f32.mrf.mxu0  ;;  %5248 = vmatprep.subr.bf16.mxu1 %v10125_v49  ;;  %v1874_v49 = vld [vmem:[#allocation20 + $0xed0] sm:$0xff] }
 0x592   :  { %v1866_v55 = vld [vmem:[#allocation20 + $0xe90] sm:$0xff]  ;;  %v10180_v39 = vcombine.low %v1874_v49, %v1878_v33 }
 0x593   :  { %v5486_v23 = vpop.f32.mrf.mxu0 }
 0x594   :  { %5249 = vmatpush1.bf16.msra.mxu1 %v10124_v36  ;;  %v10181_v36 = vcombine.high %v1874_v49, %v1878_v33  ;;  %v1858_v23 = vld [vmem:[#allocation20 + $0xe50] sm:$0xff]  ;;  %v1427_v33 = vld [vmem:[#allocation20 + $0xd8] sm:$0xff] }
 0x595   :  { %5250 = vmatprep.subr.bf16.mxu1 %v10117_v40  ;;  %v1870_v40 = vld [vmem:[#allocation20 + $0xeb0] sm:$0xff] }
 0x596   :  { %v10173_v58 = vcombine.high %v1866_v55, %v1870_v40  ;;  %v10172_v61 = vcombine.low %v1866_v55, %v1870_v40  ;;  %v5861_v55 = vld [vmem:[#allocation23 + $0x9e0] sm:$0xff] }
 0x598   :  { %5251 = vmatpush1.bf16.msra.mxu1 %v10116_v60  ;;  %v1862_v60 = vld [vmem:[#allocation20 + $0xe70] sm:$0xff] }
 0x599   :  { %5252 = vmatprep.subr.bf16.mxu1 %v10109_v19 }
 0x59c   :  { %5253 = vmatpush1.bf16.msra.mxu1 %v10108_v12  ;;  %v10165_v12 = vcombine.high %v1858_v23, %v1862_v60 }
 0x59d   :  { %5254 = vmatprep.subr.bf16.mxu1 %v10101_v51  ;;  %v1850_v51 = vld [vmem:[#allocation20 + $0xe10] sm:$0xff] }
 0x59e   :  { %v10157_v54 = vcombine.high %v1850_v51, %v1854_v1 }
 0x5a0   :  { %5255 = vmatpush1.bf16.msra.mxu1 %v10100_v48  ;;  %v10164_v48 = vcombine.low %v1858_v23, %v1862_v60  ;;  %v1423_v23 = vld [vmem:[#allocation20 + $0xb8] sm:$0xff]  ;;  %v5849_v60 = vld [vmem:[#allocation23 + $0x980] sm:$0xff] }
 0x5a1   :  { %5256 = vmatprep.subr.bf16.mxu1 %v10093_v59 }
 0x5a4   :  { %5257 = vmatpush1.bf16.msra.mxu1 %v10092_v20  ;;  %v1463_v20 = vld [vmem:[#allocation20 + $0x1f8] sm:$0xff] }
 0x5a5   :  { %5258 = vmatprep.subr.bf16.mxu1 %v10213_v22  ;;  %v10156_v22 = vcombine.low %v1850_v51, %v1854_v1  ;;  %v9767_v26 = vcombine.high %v1459_v4, %v1463_v20 }
 0x5a8   :  { %5259 = vmatpush2.bf16.msra.mxu1 %v10212_v29  ;;  %v1455_v29 = vld [vmem:[#allocation20 + $0x1b8] sm:$0xff] }
 0x5a9   :  { %5260 = vmatprep.subr.bf16.mxu1 %v10205_v30  ;;  %v9766_v30 = vcombine.low %v1459_v4, %v1463_v20  ;;  %v9759_v32 = vcombine.high %v1451_v27, %v1455_v29  ;;  %v5845_v4 = vld [vmem:[#allocation23 + $0x960] sm:$0xff] }
 0x5ac   :  { %5261 = vmatpush2.bf16.msra.mxu1 %v10204_v42  ;;  %v1447_v42 = vld [vmem:[#allocation20 + $0x178] sm:$0xff] }
 0x5ad   :  { %5262 = vmatprep.subr.bf16.mxu1 %v10197_v44  ;;  %v9758_v44 = vcombine.low %v1451_v27, %v1455_v29  ;;  %v9751_v45 = vcombine.high %v1443_v41, %v1447_v42  ;;  %v1403_v29 = vld [vmem:[#allocation20 + $0x18] sm:$0xff] }
 0x5b0   :  { %5263 = vmatpush2.bf16.msra.mxu1 %v10196_v47  ;;  %v1439_v47 = vld [vmem:[#allocation20 + $0x138] sm:$0xff] }
 0x5b1   :  { %5264 = vmatprep.subr.bf16.mxu1 %v10189_v31  ;;  %v9750_v31 = vcombine.low %v1443_v41, %v1447_v42  ;;  %v9743_v49 = vcombine.high %v1435_v46, %v1439_v47  ;;  %v9742_v40 = vcombine.low %v1435_v46, %v1439_v47  ;;  %v5837_v41 = vld [vmem:[#allocation23 + $0x920] sm:$0xff]  ;;  %v1523_v47 = vld [vmem:[#allocation20 + $0x3d8] sm:$0xff] }
 0x5b4   :  { %5265 = vmatpush2.bf16.msra.mxu1 %v10188_v52  ;;  %v1431_v52 = vld [vmem:[#allocation20 + $0xf8] sm:$0xff] }
 0x5b5   :  { %5266 = vmatprep.subr.bf16.mxu1 %v10181_v36  ;;  %v5857_v36 = vld [vmem:[#allocation23 + $0x9c0] sm:$0xff] }
 0x5b7   :  { %v12531_v19 = vpop.f32.mrf.mxu1 }
 0x5b8   :  { %5267 = vmatpush2.bf16.msra.mxu1 %v10180_v39  ;;  %v10564_v39 = vcombine.low %v5857_v36, %v5861_v55 }
 0x5b9   :  { %v12533_v63 = vpop.f32.mrf.mxu1  ;;  %5268 = vmatprep.subr.bf16.mxu1 %v10173_v58  ;;  %v9735_v58 = vcombine.high %v1427_v33, %v1431_v52 }
 0x5bb   :  { %v4952_v14 = vpop.f32.mrf.mxu1 }
 0x5bc   :  { %5269 = vmatpush2.bf16.msra.mxu1 %v10172_v61  ;;  %v5853_v61 = vld [vmem:[#allocation23 + $0x9a0] sm:$0xff] }
 0x5bd   :  { %v4953_v59 = vpop.f32.mrf.mxu1  ;;  %5270 = vmatprep.subr.bf16.mxu1 %v10165_v12  ;;  %v9734_v12 = vcombine.low %v1427_v33, %v1431_v52  ;;  %v10556_v51 = vcombine.low %v5849_v60, %v5853_v61  ;;  %v10557_v1 = vcombine.high %v5849_v60, %v5853_v61  ;;  %v5829_v33 = vld [vmem:[#allocation23 + $0x8e0] sm:$0xff] }
 0x5be   :  { %v1415_v59 = vld [vmem:[#allocation20 + $0x78] sm:$0xff] }
 0x5c0   :  { %5271 = vmatpush2.bf16.msra.mxu1 %v10164_v48  ;;  %v1411_v48 = vld [vmem:[#allocation20 + $0x58] sm:$0xff] }
 0x5c1   :  { %5272 = vmatprep.subr.bf16.mxu1 %v10157_v54  ;;  %v5841_v54 = vld [vmem:[#allocation23 + $0x940] sm:$0xff]  ;;  %v9719_v27 = vcombine.high %v1411_v48, %v1415_v59  ;;  %v9718_v42 = vcombine.low %v1411_v48, %v1415_v59 }
 0x5c2   :  { %v5813_v48 = vld [vmem:[#allocation23 + $0x860] sm:$0xff] }
 0x5c4   :  { %5273 = vmatpush2.bf16.msra.mxu1 %v10156_v22  ;;  %v10548_v22 = vcombine.low %v5841_v54, %v5845_v4 }
 0x5c5   :  { %5324 = vmatprep.subr.bf16.mxu1 %v9767_v26  ;;  %v10549_v26 = vcombine.high %v5841_v54, %v5845_v4 }
 0x5c7   :  { %5275 = vmatmul.mubr.bf16.vlgmr.msra.gmra.mxu1 %v12429_v62  ;;  %v10565_v62 = vcombine.high %v5857_v36, %v5861_v55 }
 0x5c8   :  { %5325 = vmatpush1.bf16.msra.mxu1 %v9766_v30  ;;  %5356 = vmatprep.mubr.bf16.mxu1 %v12359_v10  ;;  %v1419_v10 = vld [vmem:[#allocation20 + $0x98] sm:$0xff] }
 0x5c9   :  { %5326 = vmatprep.subr.bf16.mxu1 %v9759_v32  ;;  %8741 = vmatprep.subr.bf16.mxu0 %v10565_v62  ;;  %v9727_v14 = vcombine.high %v1419_v10, %v1423_v23  ;;  %v9726_v20 = vcombine.low %v1419_v10, %v1423_v23  ;;  %v1407_v30 = vld [vmem:[#allocation20 + $0x38] sm:$0xff]  ;;  %v5833_v32 = vld [vmem:[#allocation23 + $0x900] sm:$0xff] }
 0x5ca   :  { %8742 = vmatpush1.bf16.msra.mxu0 %v10564_v39  ;;  %v9711_v46 = vcombine.high %v1403_v29, %v1407_v30  ;;  %v9710_v52 = vcombine.low %v1403_v29, %v1407_v30  ;;  %v1515_v39 = vld [vmem:[#allocation20 + $0x398] sm:$0xff]  ;;  %v5821_v10 = vld [vmem:[#allocation23 + $0x8a0] sm:$0xff] }
 0x5cb   :  { %8743 = vmatprep.subr.bf16.mxu0 %v10557_v1  ;;  %v1519_v62 = vld [vmem:[#allocation20 + $0x3b8] sm:$0xff]  ;;  %v5801_v29 = vld [vmem:[#allocation23 + $0x800] sm:$0xff] }
 0x5cc   :  { %5327 = vmatpush1.bf16.msra.mxu1 %v9758_v44  ;;  %v10540_v44 = vcombine.low %v5833_v32, %v5837_v41  ;;  %v1511_v1 = vld [vmem:[#allocation20 + $0x378] sm:$0xff]  ;;  %v9822_v59 = vcombine.low %v1515_v39, %v1519_v62  ;;  %v5805_v30 = vld [vmem:[#allocation23 + $0x820] sm:$0xff] }
 0x5cd   :  { %5328 = vmatprep.subr.bf16.mxu1 %v9751_v45  ;;  %v10541_v45 = vcombine.high %v5833_v32, %v5837_v41  ;;  %v12541_v32 = vsub.s32 3, %v12497_v56 }
 0x5ce   :  { %8744 = vmatpush1.bf16.msra.mxu0 %v10556_v51  ;;  %v1507_v51 = vld [vmem:[#allocation20 + $0x358] sm:$0xff] }
 0x5cf   :  { %8745 = vmatprep.subr.bf16.mxu0 %v10549_v26  ;;  %v1499_v26 = vld [vmem:[#allocation20 + $0x318] sm:$0xff]  ;;  %v9814_v41 = vcombine.low %v1507_v51, %v1511_v1 }
 0x5d0   :  { %5329 = vmatpush1.bf16.msra.mxu1 %v9750_v31  ;;  %v1527_v31 = vld [vmem:[#allocation20 + $0x3f8] sm:$0xff] }
 0x5d1   :  { %5330 = vmatprep.subr.bf16.mxu1 %v9743_v49  ;;  %v5825_v49 = vld [vmem:[#allocation23 + $0x8c0] sm:$0xff]  ;;  %v9830_v23 = vcombine.low %v1523_v47, %v1527_v31 }
 0x5d2   :  { %8746 = vmatpush1.bf16.msra.mxu0 %v10548_v22  ;;  %v10532_v36 = vcombine.low %v5825_v49, %v5829_v33  ;;  %v10533_v55 = vcombine.high %v5825_v49, %v5829_v33  ;;  %v12538_v22 = vsub.s32 2, %v12497_v56  ;;  %v5921_v49 = vld [vmem:[#allocation23 + $0xbc0] sm:$0xff] }
 0x5d3   :  { %8747 = vmatprep.subr.bf16.mxu0 %v10541_v45  ;;  %v5925_v33 = vld [vmem:[#allocation23 + $0xbe0] sm:$0xff] }
 0x5d4   :  { %5331 = vmatpush1.bf16.msra.mxu1 %v9742_v40  ;;  %v9831_v40 = vcombine.high %v1523_v47, %v1527_v31  ;;  %v1491_v47 = vld [vmem:[#allocation20 + $0x2d8] sm:$0xff] }
 0x5d5   :  { %5332 = vmatprep.subr.bf16.mxu1 %v9735_v58  ;;  %v5817_v58 = vld [vmem:[#allocation23 + $0x880] sm:$0xff]  ;;  %v1495_v31 = vld [vmem:[#allocation20 + $0x2f8] sm:$0xff] }
 0x5d6   :  { %8748 = vmatpush1.bf16.msra.mxu0 %v10540_v44  ;;  %v10524_v60 = vcombine.low %v5817_v58, %v5821_v10  ;;  %v10525_v61 = vcombine.high %v5817_v58, %v5821_v10  ;;  %v10509_v44 = vcombine.high %v5801_v29, %v5805_v30  ;;  %v1483_v58 = vld [vmem:[#allocation20 + $0x298] sm:$0xff] }
 0x5d7   :  { %8749 = vmatprep.subr.bf16.mxu0 %v10533_v55  ;;  %v10628_v55 = vcombine.low %v5921_v49, %v5925_v33  ;;  %v1487_v10 = vld [vmem:[#allocation20 + $0x2b8] sm:$0xff] }
 0x5d8   :  { %5333 = vmatpush1.bf16.msra.mxu1 %v9734_v12  ;;  %v9823_v12 = vcombine.high %v1515_v39, %v1519_v62  ;;  %v9799_v39 = vcombine.high %v1491_v47, %v1495_v31 }
 0x5d9   :  { %5334 = vmatprep.subr.bf16.mxu1 %v9727_v14  ;;  %v5809_v14 = vld [vmem:[#allocation23 + $0x840] sm:$0xff] }
 0x5da   :  { %8750 = vmatpush1.bf16.msra.mxu0 %v10532_v36  ;;  %v10516_v54 = vcombine.low %v5809_v14, %v5813_v48  ;;  %v10517_v4 = vcombine.high %v5809_v14, %v5813_v48  ;;  %v1475_v48 = vld [vmem:[#allocation20 + $0x258] sm:$0xff] }
 0x5db   :  { %8751 = vmatprep.subr.bf16.mxu0 %v10525_v61 }
 0x5dc   :  { %5335 = vmatpush1.bf16.msra.mxu1 %v9726_v20  ;;  %v9815_v20 = vcombine.high %v1507_v51, %v1511_v1  ;;  %v9791_v1 = vcombine.high %v1483_v58, %v1487_v10 }
 0x5dd   :  { %5336 = vmatprep.subr.bf16.mxu1 %v9719_v27  ;;  %v1503_v27 = vld [vmem:[#allocation20 + $0x338] sm:$0xff] }
 0x5de   :  { %8752 = vmatpush1.bf16.msra.mxu0 %v10524_v60  ;;  %v9807_v45 = vcombine.high %v1499_v26, %v1503_v27  ;;  %v9806_v36 = vcombine.low %v1499_v26, %v1503_v27  ;;  %v5917_v60 = vld [vmem:[#allocation23 + $0xba0] sm:$0xff] }
 0x5df   :  { %8753 = vmatprep.subr.bf16.mxu0 %v10517_v4  ;;  %v5905_v4 = vld [vmem:[#allocation23 + $0xb40] sm:$0xff] }
 0x5e0   :  { %5337 = vmatpush1.bf16.msra.mxu1 %v9718_v42  ;;  %v10508_v42 = vcombine.low %v5801_v29, %v5805_v30 }
 0x5e1   :  { %5338 = vmatprep.subr.bf16.mxu1 %v9711_v46  ;;  %v1957_v46 = vrot.slane %v12502_v34, %v12538_v22 }
 0x5e2   :  { %8754 = vmatpush1.bf16.msra.mxu0 %v10516_v54  ;;  %v9790_v54 = vcombine.low %v1483_v58, %v1487_v10 }
 0x5e3   :  { %8755 = vmatprep.subr.bf16.mxu0 %v10509_v44  ;;  %v4949_v62 = vadd.f32 %v12531_v19, %v1957_v46  ;;  %v1467_v44 = vld [vmem:[#allocation20 + $0x218] sm:$0xff]  ;;  %v5897_v46 = vld [vmem:[#allocation23 + $0xb00] sm:$0xff] }
 0x5e4   :  { %5339 = vmatpush1.bf16.msra.mxu1 %v9710_v52  ;;  %v1961_v52 = vrot.slane %v12502_v34, %v12541_v32 }
 0x5e5   :  { %5340 = vmatprep.subr.bf16.mxu1 %v9831_v40  ;;  %v10629_v40 = vcombine.high %v5921_v49, %v5925_v33  ;;  %v4990_v14 = vadd.f32 %v12448_v15, %v4949_v62  ;;  %v1471_v15 = vld [vmem:[#allocation20 + $0x238] sm:$0xff] }
 0x5e6   :  { %8756 = vmatpush1.bf16.msra.mxu0 %v10508_v42  ;;  %v4951_v61 = vadd.f32 %v12533_v63, %v1961_v52  ;;  %v9774_v62 = vcombine.low %v1467_v44, %v1471_v15 }
 0x5e7   :  { %8757 = vmatprep.subr.bf16.mxu0 %v10629_v40  ;;  %v5889_v40 = vld [vmem:[#allocation23 + $0xac0] sm:$0xff] }
 0x5e8   :  { %5341 = vmatpush2.bf16.msra.mxu1 %v9830_v23  ;;  %v5913_v23 = vld [vmem:[#allocation23 + $0xb80] sm:$0xff]  ;;  %v4992_v63 = vadd.f32 %v12452_v17, %v4951_v61  ;;  %v9775_v17 = vcombine.high %v1467_v44, %v1471_v15  ;;  %v1711_v61 = vld [vmem:[#allocation20 + $0x9b8] sm:$0xff] }
 0x5e9   :  { %5342 = vmatprep.subr.bf16.mxu1 %v9823_v12  ;;  %v9798_v12 = vcombine.low %v1491_v47, %v1495_v31  ;;  %v10620_v51 = vcombine.low %v5913_v23, %v5917_v60  ;;  %v10621_v34 = vcombine.high %v5913_v23, %v5917_v60  ;;  %v5901_v47 = vld [vmem:[#allocation23 + $0xb20] sm:$0xff]  ;;  %v1707_v60 = vld [vmem:[#allocation20 + $0x998] sm:$0xff] }
 0x5ea   :  { %8758 = vmatpush2.bf16.msra.mxu0 %v10628_v55  ;;  %v10604_v49 = vcombine.low %v5897_v46, %v5901_v47  ;;  %v10605_v33 = vcombine.high %v5897_v46, %v5901_v47  ;;  %v1719_v55 = vld [vmem:[#allocation20 + $0x9f8] sm:$0xff]  ;;  %v5865_v47 = vld [vmem:[#allocation23 + $0xa00] sm:$0xff] }
 0x5eb   :  { %8759 = vmatprep.subr.bf16.mxu0 %v10621_v34 }
 0x5ec   :  { %5343 = vmatpush2.bf16.msra.mxu1 %v9822_v59  ;;  %v1479_v59 = vld [vmem:[#allocation20 + $0x278] sm:$0xff] }
 0x5ed   :  { %5344 = vmatprep.subr.bf16.mxu1 %v9815_v20  ;;  %v5909_v20 = vld [vmem:[#allocation23 + $0xb60] sm:$0xff]  ;;  %v9782_v31 = vcombine.low %v1475_v48, %v1479_v59 }
 0x5ee   :  { %8760 = vmatpush2.bf16.msra.mxu0 %v10620_v51  ;;  %v10612_v27 = vcombine.low %v5905_v4, %v5909_v20  ;;  %v10613_v29 = vcombine.high %v5905_v4, %v5909_v20  ;;  %v5885_v51 = vld [vmem:[#allocation23 + $0xaa0] sm:$0xff]  ;;  %v10014_v20 = vcombine.low %v1707_v60, %v1711_v61 }
 0x5f0   :  { %5345 = vmatpush2.bf16.msra.mxu1 %v9814_v41  ;;  %v9783_v41 = vcombine.high %v1475_v48, %v1479_v59  ;;  %8761 = vmatprep.subr.bf16.mxu0 %v10613_v29  ;;  %v10015_v48 = vcombine.high %v1707_v60, %v1711_v61 }
 0x5f1   :  { %5346 = vmatprep.subr.bf16.mxu1 %v9807_v45 }
 0x5f2   :  { %8762 = vmatpush2.bf16.msra.mxu0 %v10612_v27  ;;  %v5877_v27 = vld [vmem:[#allocation23 + $0xa60] sm:$0xff] }
 0x5f3   :  { %8763 = vmatprep.subr.bf16.mxu0 %v10605_v33 }
 0x5f4   :  { %5347 = vmatpush2.bf16.msra.mxu1 %v9806_v36  ;;  %v1715_v36 = vld [vmem:[#allocation20 + $0x9d8] sm:$0xff] }
 0x5f5   :  { %5348 = vmatprep.subr.bf16.mxu1 %v9799_v39  ;;  %v5893_v39 = vld [vmem:[#allocation23 + $0xae0] sm:$0xff]  ;;  %v10023_v23 = vcombine.high %v1715_v36, %v1719_v55  ;;  %v10022_v34 = vcombine.low %v1715_v36, %v1719_v55  ;;  %v12559_v36 = vld [vmem:[#allocation23 + $0x1c8] sm:$0xff] }
 0x5f6   :  { %8764 = vmatpush2.bf16.msra.mxu0 %v10604_v49  ;;  %v10596_v58 = vcombine.low %v5889_v40, %v5893_v39  ;;  %v10597_v10 = vcombine.high %v5889_v40, %v5893_v39  ;;  %v12561_v55 = vld [vmem:[#allocation23 + $0x1e8] sm:$0xff] }
 0x5f7   :  { %v5030_v19 = vpop.f32.mrf.mxu1  ;;  %v10311_v39 = vcombine.high %v12559_v36, %v12561_v55 }
 0x5f8   :  { %v5031_v26 = vadd.f32 %v5030_v19, %v4990_v14  ;;  %5349 = vmatpush2.bf16.msra.mxu1 %v9798_v12  ;;  %8765 = vmatprep.subr.bf16.mxu0 %v10597_v10  ;;  %v5881_v12 = vld [vmem:[#allocation23 + $0xa80] sm:$0xff]  ;;  %v1699_v19 = vld [vmem:[#allocation20 + $0x958] sm:$0xff] }
 0x5f9   :  { %v5032_v30 = vpop.f32.mrf.mxu1  ;;  %5350 = vmatprep.subr.bf16.mxu1 %v9791_v1  ;;  %v10588_v1 = vcombine.low %v5881_v12, %v5885_v51  ;;  %v10589_v14 = vcombine.high %v5881_v12, %v5885_v51  ;;  %v1675_v10 = vld [vmem:[#allocation20 + $0x898] sm:$0xff] }
 0x5fa   :  { %v5033_v42 = vadd.f32 %v5032_v30, %v4992_v63  ;;  %8766 = vmatpush2.bf16.msra.mxu0 %v10596_v58  ;;  %v5072_v59 = vadd.f32 %v12459_v8, %v5031_v26  ;;  %v5873_v63 = vld [vmem:[#allocation23 + $0xa40] sm:$0xff]  ;;  %v10310_v58 = vcombine.low %v12559_v36, %v12561_v55  ;;  %v1667_v12 = vld [vmem:[#allocation20 + $0x858] sm:$0xff] }
 0x5fb   :  { %v5034_v45 = vpop.f32.mrf.mxu1  ;;  %8767 = vmatprep.subr.bf16.mxu0 %v10589_v14  ;;  %v10580_v26 = vcombine.low %v5873_v63, %v5877_v27  ;;  %v1671_v51 = vld [vmem:[#allocation20 + $0x878] sm:$0xff] }
 0x5fc   :  { %5351 = vmatpush2.bf16.msra.mxu1 %v9790_v54  ;;  %v1703_v54 = vld [vmem:[#allocation20 + $0x978] sm:$0xff]  ;;  %v5074_v30 = vadd.f32 %v12461_v37, %v5033_v42 }
 0x5fd   :  { %v5035_v52 = vpop.f32.mrf.mxu1  ;;  %5352 = vmatprep.subr.bf16.mxu1 %v9783_v41  ;;  %v10581_v41 = vcombine.high %v5873_v63, %v5877_v27  ;;  %v10007_v8 = vcombine.high %v1699_v19, %v1703_v54  ;;  %v1691_v45 = vld [vmem:[#allocation20 + $0x918] sm:$0xff]  ;;  %v10006_v49 = vcombine.low %v1699_v19, %v1703_v54 }
 0x5fe   :  { %8768 = vmatpush2.bf16.msra.mxu0 %v10588_v1  ;;  %v1683_v52 = vld [vmem:[#allocation20 + $0x8d8] sm:$0xff]  ;;  %v9975_v1 = vcombine.high %v1667_v12, %v1671_v51 }
 0x5ff   :  { %8769 = vmatprep.subr.bf16.mxu0 %v10581_v41  ;;  %v1659_v14 = vld [vmem:[#allocation20 + $0x818] sm:$0xff] }
 0x600   :  { %5353 = vmatpush2.bf16.msra.mxu1 %v9782_v31  ;;  %v5869_v31 = vld [vmem:[#allocation23 + $0xa20] sm:$0xff]  ;;  %v1779_v54 = vld [vmem:[#allocation20 + $0xbd8] sm:$0xff] }
 0x601   :  { %5354 = vmatprep.subr.bf16.mxu1 %v9775_v17  ;;  %v10573_v33 = vcombine.high %v5865_v47, %v5869_v31  ;;  %v10572_v42 = vcombine.low %v5865_v47, %v5869_v31  ;;  %v1687_v17 = vld [vmem:[#allocation20 + $0x8f8] sm:$0xff] }
 0x602   :  { %8770 = vmatpush2.bf16.msra.mxu0 %v10580_v26  ;;  %v9990_v60 = vcombine.low %v1683_v52, %v1687_v17  ;;  %v1771_v27 = vld [vmem:[#allocation20 + $0xb98] sm:$0xff] }
 0x603   :  { %8771 = vmatprep.subr.bf16.mxu0 %v10573_v33  ;;  %v1767_v26 = vld [vmem:[#allocation20 + $0xb78] sm:$0xff] }
 0x604   :  { %5355 = vmatpush2.bf16.msra.mxu1 %v9774_v62  ;;  %v9991_v62 = vcombine.high %v1683_v52, %v1687_v17  ;;  %v1759_v47 = vld [vmem:[#allocation20 + $0xb38] sm:$0xff] }
 0x605   :  { %5406 = vmatprep.subr.bf16.mxu1 %v10023_v23  ;;  %v1679_v23 = vld [vmem:[#allocation20 + $0x8b8] sm:$0xff] }
 0x606   :  { %8772 = vmatpush2.bf16.msra.mxu0 %v10572_v42  ;;  %v9983_v61 = vcombine.high %v1675_v10, %v1679_v23  ;;  %v1747_v33 = vld [vmem:[#allocation20 + $0xad8] sm:$0xff] }
 0x607   :  { %v5112_v4 = vpop.f32.mrf.mxu1  ;;  %5357 = vmatmul.mubr.bf16.vlgmr.msra.gmra.mxu1 %v12364_v18  ;;  %v1695_v18 = vld [vmem:[#allocation20 + $0x938] sm:$0xff]  ;;  %8823 = vmatprep.subr.bf16.mxu0 %v10311_v39 }
 0x608   :  { %v12553_v29 = vadd.f32 %v5112_v4, %v5072_v59  ;;  %5407 = vmatpush1.bf16.msra.mxu1 %v10022_v34  ;;  %5438 = vmatprep.mubr.bf16.mxu1 %v12368_v24  ;;  %v9999_v37 = vcombine.high %v1691_v45, %v1695_v18  ;;  %v9998_v40 = vcombine.low %v1691_v45, %v1695_v18  ;;  %v1783_v4 = vld [vmem:[#allocation20 + $0xbf8] sm:$0xff] }
 0x609   :  { %v5114_v44 = vpop.f32.mrf.mxu1  ;;  %5408 = vmatprep.subr.bf16.mxu1 %v10015_v48  ;;  %v9982_v34 = vcombine.low %v1675_v10, %v1679_v23  ;;  %v1663_v48 = vld [vmem:[#allocation20 + $0x838] sm:$0xff]  ;;  %v9974_v59 = vcombine.low %v1667_v12, %v1671_v51  ;;  %v10087_v63 = vcombine.high %v1779_v54, %v1783_v4  ;;  %v10086_v41 = vcombine.low %v1779_v54, %v1783_v4 }
 0x60a   :  { %v12557_v15 = vadd.f32 %v5114_v44, %v5074_v30  ;;  %v9967_v19 = vcombine.high %v1659_v14, %v1663_v48  ;;  %v1775_v30 = vld [vmem:[#allocation20 + $0xbb8] sm:$0xff] }
 0x60b   :  { %v5116_v46 = vpop.f32.mrf.mxu1  ;;  %v10079_v44 = vcombine.high %v1771_v27, %v1775_v30  ;;  %v10078_v45 = vcombine.low %v1771_v27, %v1775_v30  ;;  %v1739_v52 = vld [vmem:[#allocation20 + $0xa98] sm:$0xff] }
 0x60c   :  { %5409 = vmatpush1.bf16.msra.mxu1 %v10014_v20  ;;  %v9966_v20 = vcombine.low %v1659_v14, %v1663_v48  ;;  %v1755_v46 = vld [vmem:[#allocation20 + $0xb18] sm:$0xff] }
 0x60d   :  { %v5117_v24 = vpop.f32.mrf.mxu1  ;;  %5410 = vmatprep.subr.bf16.mxu1 %v10007_v8  ;;  %v1763_v8 = vld [vmem:[#allocation20 + $0xb58] sm:$0xff] }
 0x60e   :  { %v10071_v18 = vcombine.high %v1763_v8, %v1767_v26  ;;  %v10070_v31 = vcombine.low %v1763_v8, %v1767_v26  ;;  %v1751_v24 = vld [vmem:[#allocation20 + $0xaf8] sm:$0xff] }
 0x60f   :  { %v10055_v42 = vcombine.high %v1747_v33, %v1751_v24  ;;  %v1743_v17 = vld [vmem:[#allocation20 + $0xab8] sm:$0xff] }
 0x610   :  { %5411 = vmatpush1.bf16.msra.mxu1 %v10006_v49  ;;  %v10063_v49 = vcombine.high %v1755_v46, %v1759_v47  ;;  %v10047_v39 = vcombine.high %v1739_v52, %v1743_v17  ;;  %v1735_v10 = vld [vmem:[#allocation20 + $0xa78] sm:$0xff]  ;;  %v10046_v23 = vcombine.low %v1739_v52, %v1743_v17 }
 0x611   :  { %5412 = vmatprep.subr.bf16.mxu1 %v9999_v37  ;;  %v10062_v37 = vcombine.low %v1755_v46, %v1759_v47  ;;  %v1727_v12 = vld [vmem:[#allocation20 + $0xa38] sm:$0xff] }
 0x612   :  { %v1943_v14 = vld [vmem:[#allocation20 + $0x10f8] sm:$0xff] }
 0x613   :  { %v1935_v54 = vld [vmem:[#allocation20 + $0x10b8] sm:$0xff] }
 0x614   :  { %5413 = vmatpush1.bf16.msra.mxu1 %v9998_v40  ;;  %v10054_v40 = vcombine.low %v1747_v33, %v1751_v24  ;;  %v1923_v30 = vld [vmem:[#allocation20 + $0x1058] sm:$0xff] }
 0x615   :  { %5414 = vmatprep.subr.bf16.mxu1 %v9991_v62  ;;  %v1731_v62 = vld [vmem:[#allocation20 + $0xa58] sm:$0xff] }
 0x616   :  { %v10038_v51 = vcombine.low %v1731_v62, %v1735_v10  ;;  %v1915_v47 = vld [vmem:[#allocation20 + $0x1018] sm:$0xff] }
 0x618   :  { %5415 = vmatpush1.bf16.msra.mxu1 %v9990_v60  ;;  %v10039_v60 = vcombine.high %v1731_v62, %v1735_v10 }
 0x619   :  { %5416 = vmatprep.subr.bf16.mxu1 %v9983_v61  ;;  %v1723_v61 = vld [vmem:[#allocation20 + $0xa18] sm:$0xff] }
 0x61a   :  { %v10030_v48 = vcombine.low %v1723_v61, %v1727_v12 }
 0x61c   :  { %5417 = vmatpush1.bf16.msra.mxu1 %v9982_v34  ;;  %v10031_v34 = vcombine.high %v1723_v61, %v1727_v12  ;;  %v5717_v61 = vld [vmem:[#allocation23 + $0x560] sm:$0xff] }
 0x61d   :  { %5418 = vmatprep.subr.bf16.mxu1 %v9975_v1  ;;  %v1939_v1 = vld [vmem:[#allocation20 + $0x10d8] sm:$0xff] }
 0x620   :  { %5419 = vmatpush1.bf16.msra.mxu1 %v9974_v59  ;;  %v10247_v59 = vcombine.high %v1939_v1, %v1943_v14 }
 0x621   :  { %5420 = vmatprep.subr.bf16.mxu1 %v9967_v19  ;;  %v1931_v19 = vld [vmem:[#allocation20 + $0x1098] sm:$0xff] }
 0x622   :  { %v10239_v27 = vcombine.high %v1931_v19, %v1935_v54  ;;  %v10238_v26 = vcombine.low %v1931_v19, %v1935_v54 }
 0x624   :  { %5421 = vmatpush1.bf16.msra.mxu1 %v9966_v20  ;;  %v10246_v20 = vcombine.low %v1939_v1, %v1943_v14 }
 0x625   :  { %5422 = vmatprep.subr.bf16.mxu1 %v10087_v63 }
 0x628   :  { %5423 = vmatpush2.bf16.msra.mxu1 %v10086_v41  ;;  %v1927_v41 = vld [vmem:[#allocation20 + $0x1078] sm:$0xff] }
 0x629   :  { %5424 = vmatprep.subr.bf16.mxu1 %v10079_v44  ;;  %v10231_v46 = vcombine.high %v1923_v30, %v1927_v41  ;;  %v10230_v33 = vcombine.low %v1923_v30, %v1927_v41  ;;  %v5681_v41 = vld [vmem:[#allocation23 + $0x440] sm:$0xff] }
 0x62c   :  { %5425 = vmatpush2.bf16.msra.mxu1 %v10078_v45 }
 0x62d   :  { %5426 = vmatprep.subr.bf16.mxu1 %v10071_v18 }
 0x630   :  { %5427 = vmatpush2.bf16.msra.mxu1 %v10070_v31  ;;  %v1919_v31 = vld [vmem:[#allocation20 + $0x1038] sm:$0xff] }
 0x631   :  { %5428 = vmatprep.subr.bf16.mxu1 %v10063_v49  ;;  %v10222_v52 = vcombine.low %v1915_v47, %v1919_v31 }
 0x634   :  { %5429 = vmatpush2.bf16.msra.mxu1 %v10062_v37  ;;  %v10223_v37 = vcombine.high %v1915_v47, %v1919_v31  ;;  %v5677_v47 = vld [vmem:[#allocation23 + $0x420] sm:$0xff] }
 0x635   :  { %5430 = vmatprep.subr.bf16.mxu1 %v10055_v42  ;;  %v5729_v42 = vld [vmem:[#allocation23 + $0x5c0] sm:$0xff] }
 0x638   :  { %5431 = vmatpush2.bf16.msra.mxu1 %v10054_v40  ;;  %v5721_v40 = vld [vmem:[#allocation23 + $0x580] sm:$0xff] }
 0x639   :  { %5432 = vmatprep.subr.bf16.mxu1 %v10047_v39  ;;  %v5725_v39 = vld [vmem:[#allocation23 + $0x5a0] sm:$0xff] }
 0x63a   :  { %v10429_v10 = vcombine.high %v5721_v40, %v5725_v39  ;;  %v10428_v12 = vcombine.low %v5721_v40, %v5725_v39  ;;  %v5777_v40 = vld [vmem:[#allocation23 + $0x740] sm:$0xff] }
 0x63b   :  { %v5781_v39 = vld [vmem:[#allocation23 + $0x760] sm:$0xff] }
 0x63c   :  { %5433 = vmatpush2.bf16.msra.mxu1 %v10046_v23 }
 0x63d   :  { %5434 = vmatprep.subr.bf16.mxu1 %v10039_v60  ;;  %v5713_v60 = vld [vmem:[#allocation23 + $0x540] sm:$0xff] }
 0x63e   :  { %v10420_v1 = vcombine.low %v5713_v60, %v5717_v61 }
 0x640   :  { %5435 = vmatpush2.bf16.msra.mxu1 %v10038_v51  ;;  %v10421_v51 = vcombine.high %v5713_v60, %v5717_v61  ;;  %v10485_v60 = vcombine.high %v5777_v40, %v5781_v39  ;;  %v12587_v61 = vsub.s32 5, %v12497_v56 }
 0x641   :  { %5436 = vmatprep.subr.bf16.mxu1 %v10031_v34  ;;  %v5709_v34 = vld [vmem:[#allocation23 + $0x520] sm:$0xff] }
 0x643   :  { %v12567_v4 = vpop.f32.mrf.mxu0 }
 0x644   :  { %5437 = vmatpush2.bf16.msra.mxu1 %v10030_v48  ;;  %v5697_v48 = vld [vmem:[#allocation23 + $0x4c0] sm:$0xff] }
 0x645   :  { %v12569_v63 = vpop.f32.mrf.mxu0  ;;  %5496 = vmatprep.subr.bf16.mxu1 %v10247_v59  ;;  %v5701_v59 = vld [vmem:[#allocation23 + $0x4e0] sm:$0xff] }
 0x646   :  { %v10405_v54 = vcombine.high %v5697_v48, %v5701_v59 }
 0x647   :  { %v12571_v44 = vpop.f32.mrf.mxu1  ;;  %5439 = vmatmul.mubr.bf16.vlgmr.msra.gmra.mxu1 %v12383_v38  ;;  %v8697_v8 = vpop.f32.mrf.mxu0  ;;  %v5733_v38 = vld [vmem:[#allocation23 + $0x5e0] sm:$0xff] }
 0x648   :  { %5497 = vmatpush1.bf16.msra.mxu1 %v10246_v20  ;;  %5520 = vmatprep.mubr.bf16.mxu1 %v11556_v43  ;;  %v10437_v17 = vcombine.high %v5729_v42, %v5733_v38  ;;  %v5532_v43 = vmax.f32 %v12557_v15, 0.0  ;;  %v10436_v62 = vcombine.low %v5729_v42, %v5733_v38  ;;  %v5705_v15 = vld [vmem:[#allocation23 + $0x500] sm:$0xff] }
 0x649   :  { %v12575_v45 = vpop.f32.mrf.mxu1  ;;  %v8698_v18 = vpop.f32.mrf.mxu0  ;;  %5498 = vmatprep.subr.bf16.mxu1 %v10239_v27  ;;  %v10413_v14 = vcombine.high %v5705_v15, %v5709_v34  ;;  %v10412_v19 = vcombine.low %v5705_v15, %v5709_v34  ;;  %v5689_v20 = vld [vmem:[#allocation23 + $0x480] sm:$0xff]  ;;  %v10404_v27 = vcombine.low %v5697_v48, %v5701_v59  ;;  %v12589_v15 = vld [vmem:[#allocation21] sm:$0xff] }
 0x64a   :  { %v12578_v23 = vpack.c.bf16 %v5532_v43, %v5532_v43  ;;  %v5685_v8 = vld [vmem:[#allocation23 + $0x460] sm:$0xff]  ;;  %v1969_v48 = vrot.slane %v12589_v15, %v12587_v61 }
 0x64b   :  { %v5198_v49 = vpop.f32.mrf.mxu1  ;;  %v10389_v18 = vcombine.high %v5681_v41, %v5685_v8  ;;  %v10388_v31 = vcombine.low %v5681_v41, %v5685_v8  ;;  %v5785_v38 = vld [vmem:[#allocation23 + $0x780] sm:$0xff] }
 0x64c   :  { %5499 = vmatpush1.bf16.msra.mxu1 %v10238_v26  ;;  %v5761_v59 = vld [vmem:[#allocation23 + $0x6c0] sm:$0xff] }
 0x64d   :  { %v5199_v24 = vpop.f32.mrf.mxu1  ;;  %5500 = vmatprep.subr.bf16.mxu1 %v10231_v46  ;;  %v5673_v46 = vld [vmem:[#allocation23 + $0x400] sm:$0xff] }
 0x64e   :  { %v10381_v49 = vcombine.high %v5673_v46, %v5677_v47  ;;  %v5797_v24 = vld [vmem:[#allocation23 + $0x7e0] sm:$0xff] }
 0x64f   :  { %v5753_v41 = vld [vmem:[#allocation23 + $0x680] sm:$0xff] }
 0x650   :  { %5501 = vmatpush1.bf16.msra.mxu1 %v10230_v33  ;;  %v5793_v33 = vld [vmem:[#allocation23 + $0x7c0] sm:$0xff] }
 0x651   :  { %5502 = vmatprep.subr.bf16.mxu1 %v10223_v37  ;;  %v10380_v37 = vcombine.low %v5673_v46, %v5677_v47  ;;  %v10501_v42 = vcombine.high %v5793_v33, %v5797_v24  ;;  %v5757_v8 = vld [vmem:[#allocation23 + $0x6a0] sm:$0xff] }
 0x652   :  { %v10461_v46 = vcombine.high %v5753_v41, %v5757_v8 }
 0x654   :  { %5503 = vmatpush1.bf16.msra.mxu1 %v10222_v52  ;;  %v5789_v52 = vld [vmem:[#allocation23 + $0x7a0] sm:$0xff] }
 0x655   :  { %8700 = vmatprep.subr.bf16.mxu1 %v10437_v17  ;;  %v10500_v17 = vcombine.low %v5793_v33, %v5797_v24  ;;  %v10493_v43 = vcombine.high %v5785_v38, %v5789_v52 }
 0x657   :  { %10251 = vmatmul.mubr.msk.bf16.vlgmr.msra.gmra.mxu1 %vm762_vm3, %v12389_v57  ;;  %v5693_v57 = vld [vmem:[#allocation23 + $0x4a0] sm:$0xff] }
 0x658   :  { %8701 = vmatpush1.bf16.msra.mxu1 %v10436_v62  ;;  %8732 = vmatprep.mubr.bf16.mxu1 %v12578_v23  ;;  %v10397_v30 = vcombine.high %v5689_v20, %v5693_v57  ;;  %v10396_v26 = vcombine.low %v5689_v20, %v5693_v57  ;;  %v12584_v62 = vsub.s32 4, %v12497_v56 }
 0x659   :  { %8702 = vmatprep.subr.bf16.mxu1 %v10429_v10  ;;  %v10492_v10 = vcombine.low %v5785_v38, %v5789_v52  ;;  %v5737_v38 = vld [vmem:[#allocation23 + $0x600] sm:$0xff] }
 0x65a   :  { %v1965_v34 = vrot.slane %v12589_v15, %v12584_v62  ;;  %v5741_v52 = vld [vmem:[#allocation23 + $0x620] sm:$0xff] }
 0x65c   :  { %8703 = vmatpush1.bf16.msra.mxu1 %v10428_v12  ;;  %v5769_v12 = vld [vmem:[#allocation23 + $0x700] sm:$0xff] }
 0x65d   :  { %8704 = vmatprep.subr.bf16.mxu1 %v10421_v51  ;;  %v5773_v51 = vld [vmem:[#allocation23 + $0x720] sm:$0xff] }
 0x65e   :  { %v10476_v20 = vcombine.low %v5769_v12, %v5773_v51 }
 0x660   :  { %8705 = vmatpush1.bf16.msra.mxu1 %v10420_v1  ;;  %v10484_v1 = vcombine.low %v5777_v40, %v5781_v39 }
 0x661   :  { %8706 = vmatprep.subr.bf16.mxu1 %v10413_v14  ;;  %v10477_v14 = vcombine.high %v5769_v12, %v5773_v51  ;;  %v5598_v12 = vld [vmem:[#allocation23 + $0x1a8] sm:$0xff]  ;;  %v5985_v51 = vld [vmem:[#allocation23 + $0xdc0] sm:$0xff] }
 0x664   :  { %8707 = vmatpush1.bf16.msra.mxu1 %v10412_v19  ;;  %v5765_v19 = vld [vmem:[#allocation23 + $0x6e0] sm:$0xff] }
 0x665   :  { %8708 = vmatprep.subr.bf16.mxu1 %v10405_v54  ;;  %v5154_v54 = vadd.f32 %v12467_v11, %v1965_v34  ;;  %v10469_v57 = vcombine.high %v5761_v59, %v5765_v19  ;;  %v5749_v11 = vld [vmem:[#allocation23 + $0x660] sm:$0xff] }
 0x666   :  { %v5989_v34 = vld [vmem:[#allocation23 + $0xde0] sm:$0xff] }
 0x668   :  { %8709 = vmatpush1.bf16.msra.mxu1 %v10404_v27  ;;  %v5156_v27 = vadd.f32 %v12469_v16, %v1969_v48  ;;  %v10460_v16 = vcombine.low %v5753_v41, %v5757_v8  ;;  %v5578_v8 = vld [vmem:[#allocation23 + $0x108] sm:$0xff] }
 0x669   :  { %8710 = vmatprep.subr.bf16.mxu1 %v10397_v30  ;;  %v5195_v30 = vadd.f32 %v12571_v44, %v5154_v54  ;;  %v10693_v54 = vcombine.high %v5985_v51, %v5989_v34 }
 0x66b   :  { %v5236_v47 = vadd.f32 %v12476_v28, %v5195_v30 }
 0x66c   :  { %8711 = vmatpush1.bf16.msra.mxu1 %v10396_v26  ;;  %v5197_v26 = vadd.f32 %v12575_v45, %v5156_v27 }
 0x66d   :  { %8712 = vmatprep.subr.bf16.mxu1 %v10389_v18  ;;  %v10468_v18 = vcombine.low %v5761_v59, %v5765_v19  ;;  %v5586_v59 = vld [vmem:[#allocation23 + $0x148] sm:$0xff] }
 0x66e   :  { %v5238_v24 = vadd.f32 %v12478_v35, %v5197_v26  ;;  %v5594_v35 = vld [vmem:[#allocation23 + $0x188] sm:$0xff] }
 0x66f   :  { %v5590_v19 = vld [vmem:[#allocation23 + $0x168] sm:$0xff]  ;;  %v10302_v27 = vcombine.low %v5594_v35, %v5598_v12 }
 0x670   :  { %8713 = vmatpush1.bf16.msra.mxu1 %v10388_v31  ;;  %v5745_v31 = vld [vmem:[#allocation23 + $0x640] sm:$0xff]  ;;  %v10295_v41 = vcombine.high %v5586_v59, %v5590_v19  ;;  %v10294_v36 = vcombine.low %v5586_v59, %v5590_v19  ;;  %v5546_v19 = vld [vmem:[#allocation23 + $0x8] sm:$0xff] }
 0x671   :  { %8714 = vmatprep.subr.bf16.mxu1 %v10381_v49  ;;  %v10453_v44 = vcombine.high %v5745_v31, %v5749_v11  ;;  %v10452_v28 = vcombine.low %v5745_v31, %v5749_v11  ;;  %v5570_v31 = vld [vmem:[#allocation23 + $0xc8] sm:$0xff] }
 0x674   :  { %8715 = vmatpush1.bf16.msra.mxu1 %v10380_v37 }
 0x675   :  { %8716 = vmatprep.subr.bf16.mxu1 %v10501_v42 }
 0x678   :  { %8717 = vmatpush2.bf16.msra.mxu1 %v10500_v17 }
 0x679   :  { %8718 = vmatprep.subr.bf16.mxu1 %v10493_v43 }
 0x67c   :  { %8719 = vmatpush2.bf16.msra.mxu1 %v10492_v10  ;;  %v10445_v10 = vcombine.high %v5737_v38, %v5741_v52 }
 0x67d   :  { %8720 = vmatprep.subr.bf16.mxu1 %v10485_v60 }
 0x680   :  { %8721 = vmatpush2.bf16.msra.mxu1 %v10484_v1 }
 0x681   :  { %8722 = vmatprep.subr.bf16.mxu1 %v10477_v14  ;;  %v5531_v14 = vmax.f32 %v12553_v29, 0.0  ;;  %v10692_v29 = vcombine.low %v5985_v51, %v5989_v34  ;;  %v5558_v51 = vld [vmem:[#allocation23 + $0x68] sm:$0xff]  ;;  %v5945_v34 = vld [vmem:[#allocation23 + $0xc80] sm:$0xff] }
 0x683   :  { %v12613_v30 = vpack.c.bf16 %v5531_v14, %v5531_v14 }
 0x684   :  { %8723 = vmatpush2.bf16.msra.mxu1 %v10476_v20  ;;  %v5977_v20 = vld [vmem:[#allocation23 + $0xd80] sm:$0xff] }
 0x685   :  { %8724 = vmatprep.subr.bf16.mxu1 %v10469_v57  ;;  %v5981_v57 = vld [vmem:[#allocation23 + $0xda0] sm:$0xff] }
 0x686   :  { %v10685_v26 = vcombine.high %v5977_v20, %v5981_v57  ;;  %v10684_v55 = vcombine.low %v5977_v20, %v5981_v57  ;;  %v5550_v20 = vld [vmem:[#allocation23 + $0x28] sm:$0xff]  ;;  %v5937_v57 = vld [vmem:[#allocation23 + $0xc40] sm:$0xff] }
 0x687   :  { %v5276_v49 = vpop.f32.mrf.mxu1 }
 0x688   :  { %v5277_v33 = vadd.f32 %v5276_v49, %v5236_v47  ;;  %8725 = vmatpush2.bf16.msra.mxu1 %v10468_v18  ;;  %v5582_v18 = vld [vmem:[#allocation23 + $0x128] sm:$0xff]  ;;  %v5973_v47 = vld [vmem:[#allocation23 + $0xd60] sm:$0xff] }
 0x689   :  { %v5278_v37 = vpop.f32.mrf.mxu1  ;;  %8726 = vmatprep.subr.bf16.mxu1 %v10461_v46  ;;  %v5969_v46 = vld [vmem:[#allocation23 + $0xd40] sm:$0xff]  ;;  %v5574_v49 = vld [vmem:[#allocation23 + $0xe8] sm:$0xff] }
 0x68a   :  { %v5318_v42 = vadd.f32 %v12480_v6, %v5277_v33  ;;  %v5279_v45 = vadd.f32 %v5278_v37, %v5238_v24  ;;  %v10444_v6 = vcombine.low %v5737_v38, %v5741_v52  ;;  %v10677_v11 = vcombine.high %v5969_v46, %v5973_v47  ;;  %v5961_v33 = vld [vmem:[#allocation23 + $0xd00] sm:$0xff] }
 0x68b   :  { %v5280_v17 = vpop.f32.mrf.mxu1  ;;  %v5965_v24 = vld [vmem:[#allocation23 + $0xd20] sm:$0xff]  ;;  %v10676_v37 = vcombine.low %v5969_v46, %v5973_v47  ;;  %v5670_v46 = vld [vmem:[#allocation23 + $0x3e8] sm:$0xff] }
 0x68c   :  { %v5320_v43 = vadd.f32 %v12482_v13, %v5279_v45  ;;  %8727 = vmatpush2.bf16.msra.mxu1 %v10460_v16  ;;  %v5533_v40 = vmax.f32 %v5318_v42, 0.0  ;;  %v10303_v13 = vcombine.high %v5594_v35, %v5598_v12  ;;  %v10286_v16 = vcombine.low %v5578_v8, %v5582_v18  ;;  %v5562_v42 = vld [vmem:[#allocation23 + $0x88] sm:$0xff]  ;;  %v5953_v52 = vld [vmem:[#allocation23 + $0xcc0] sm:$0xff] }
 0x68d   :  { %v5281_v39 = vpop.f32.mrf.mxu1  ;;  %8728 = vmatprep.subr.bf16.mxu1 %v10453_v44  ;;  %v10279_v44 = vcombine.high %v5570_v31, %v5574_v49  ;;  %v5566_v45 = vld [vmem:[#allocation23 + $0xa8] sm:$0xff]  ;;  %v10669_v38 = vcombine.high %v5961_v33, %v5965_v24  ;;  %v5957_v17 = vld [vmem:[#allocation23 + $0xce0] sm:$0xff] }
 0x68e   :  { %v5534_v60 = vmax.f32 %v5320_v43, 0.0  ;;  %v12606_v48 = vpack.c.bf16 %v5533_v40, %v5533_v40  ;;  %v12617_v43 = vld [vmem:[#allocation23 + $0x5c8] sm:$0xff]  ;;  %v10278_v40 = vcombine.low %v5570_v31, %v5574_v49  ;;  %v10668_v39 = vcombine.low %v5961_v33, %v5965_v24  ;;  %v5929_v47 = vld [vmem:[#allocation23 + $0xc00] sm:$0xff] }
 0x68f   :  { %v5554_v35 = vld [vmem:[#allocation23 + $0x48] sm:$0xff]  ;;  %v10661_v12 = vcombine.high %v5953_v52, %v5957_v17  ;;  %v10270_v14 = vcombine.low %v5562_v42, %v5566_v45  ;;  %v6049_v24 = vld [vmem:[#allocation23 + $0xfc0] sm:$0xff] }
 0x690   :  { %v12603_v1 = vpack.c.bf16 %v5534_v60, %v5534_v60  ;;  %8729 = vmatpush2.bf16.msra.mxu1 %v10452_v28  ;;  %v12619_v28 = vld [vmem:[#allocation23 + $0x5e8] sm:$0xff]  ;;  %v10271_v60 = vcombine.high %v5562_v42, %v5566_v45  ;;  %v10263_v59 = vcombine.high %v5554_v35, %v5558_v51 }
 0x691   :  { %8730 = vmatprep.subr.bf16.mxu1 %v10445_v10  ;;  %v10438_v10 = vcombine.low %v12617_v43, %v12619_v28  ;;  %v5662_v33 = vld [vmem:[#allocation23 + $0x3a8] sm:$0xff] }
 0x692   :  { %8773 = vmatprep.mubr.bf16.mxu0 %v12603_v1  ;;  %v5650_v45 = vld [vmem:[#allocation23 + $0x348] sm:$0xff] }
 0x693   :  { %8774 = vmatmul.mubr.bf16.vlgmr.msra.gmra.mxu0 %v12606_v48 }
 0x694   :  { %8824 = vmatpush1.bf16.msra.mxu0 %v10310_v58  ;;  %8731 = vmatpush2.bf16.msra.mxu1 %v10444_v6  ;;  %v10287_v58 = vcombine.high %v5578_v8, %v5582_v18  ;;  %v5949_v6 = vld [vmem:[#allocation23 + $0xca0] sm:$0xff]  ;;  %v10255_v8 = vcombine.high %v5546_v19, %v5550_v20 }
 0x695   :  { %8855 = vmatprep.mubr.bf16.mxu0 %v12519_v21  ;;  %8825 = vmatprep.subr.bf16.mxu0 %v10303_v13  ;;  %v10660_v13 = vcombine.low %v5953_v52, %v5957_v17  ;;  %v5654_v52 = vld [vmem:[#allocation23 + $0x368] sm:$0xff]  ;;  %v6041_v17 = vld [vmem:[#allocation23 + $0xf80] sm:$0xff] }
 0x696   :  { %8782 = vmatprep.subr.bf16.mxu1 %v10693_v54  ;;  %v10653_v54 = vcombine.high %v5945_v34, %v5949_v6 }
 0x697   :  { %8733 = vmatmul.mubr.bf16.vlgmr.msra.gmra.mxu1 %v12613_v30 }
 0x698   :  { %8826 = vmatpush1.bf16.msra.mxu0 %v10302_v27  ;;  %8783 = vmatpush1.bf16.msra.mxu1 %v10692_v29  ;;  %v5941_v27 = vld [vmem:[#allocation23 + $0xc60] sm:$0xff]  ;;  %v10262_v29 = vcombine.low %v5554_v35, %v5558_v51  ;;  %v10359_v35 = vcombine.high %v5650_v45, %v5654_v52 }
 0x699   :  { %8827 = vmatprep.subr.bf16.mxu0 %v10295_v41  ;;  %8784 = vmatprep.subr.bf16.mxu1 %v10685_v26  ;;  %v10652_v41 = vcombine.low %v5945_v34, %v5949_v6  ;;  %v5666_v26 = vld [vmem:[#allocation23 + $0x3c8] sm:$0xff]  ;;  %v10645_v18 = vcombine.high %v5937_v57, %v5941_v27  ;;  %v6033_v6 = vld [vmem:[#allocation23 + $0xf40] sm:$0xff] }
 0x69a   :  { %v10375_v31 = vcombine.high %v5666_v26, %v5670_v46  ;;  %v5646_v34 = vld [vmem:[#allocation23 + $0x328] sm:$0xff] }
 0x69c   :  { %8828 = vmatpush1.bf16.msra.mxu0 %v10294_v36  ;;  %8785 = vmatpush1.bf16.msra.mxu1 %v10684_v55  ;;  %v5933_v36 = vld [vmem:[#allocation23 + $0xc20] sm:$0xff]  ;;  %v10254_v55 = vcombine.low %v5546_v19, %v5550_v20 }
 0x69d   :  { %8829 = vmatprep.subr.bf16.mxu0 %v10287_v58  ;;  %8786 = vmatprep.subr.bf16.mxu1 %v10677_v11  ;;  %v10644_v58 = vcombine.low %v5937_v57, %v5941_v27  ;;  %v5658_v11 = vld [vmem:[#allocation23 + $0x388] sm:$0xff]  ;;  %v10637_v49 = vcombine.high %v5929_v47, %v5933_v36  ;;  %v6025_v27 = vld [vmem:[#allocation23 + $0xf00] sm:$0xff] }
 0x69e   :  { %v10367_v42 = vcombine.high %v5658_v11, %v5662_v33  ;;  %v5638_v57 = vld [vmem:[#allocation23 + $0x2e8] sm:$0xff] }
 0x6a0   :  { %8830 = vmatpush1.bf16.msra.mxu0 %v10286_v16  ;;  %8787 = vmatpush1.bf16.msra.mxu1 %v10676_v37  ;;  %v6053_v16 = vld [vmem:[#allocation23 + $0xfe0] sm:$0xff]  ;;  %v10374_v37 = vcombine.low %v5666_v26, %v5670_v46 }
 0x6a1   :  { %8831 = vmatprep.subr.bf16.mxu0 %v10279_v44  ;;  %8788 = vmatprep.subr.bf16.mxu1 %v10669_v38  ;;  %v10636_v44 = vcombine.low %v5929_v47, %v5933_v36  ;;  %v10757_v38 = vcombine.high %v6049_v24, %v6053_v16  ;;  %v5630_v47 = vld [vmem:[#allocation23 + $0x2a8] sm:$0xff]  ;;  %v6017_v36 = vld [vmem:[#allocation23 + $0xec0] sm:$0xff] }
 0x6a4   :  { %8832 = vmatpush1.bf16.msra.mxu0 %v10278_v40  ;;  %8789 = vmatpush1.bf16.msra.mxu1 %v10668_v39  ;;  %v6045_v40 = vld [vmem:[#allocation23 + $0xfa0] sm:$0xff]  ;;  %v10366_v39 = vcombine.low %v5658_v11, %v5662_v33 }
 0x6a5   :  { %8833 = vmatprep.subr.bf16.mxu0 %v10271_v60  ;;  %8790 = vmatprep.subr.bf16.mxu1 %v10661_v12  ;;  %v10756_v60 = vcombine.low %v6049_v24, %v6053_v16  ;;  %v5642_v12 = vld [vmem:[#allocation23 + $0x308] sm:$0xff]  ;;  %v10749_v51 = vcombine.high %v6041_v17, %v6045_v40  ;;  %v6009_v16 = vld [vmem:[#allocation23 + $0xe80] sm:$0xff] }
 0x6a6   :  { %v10351_v19 = vcombine.high %v5642_v12, %v5646_v34  ;;  %v5622_v24 = vld [vmem:[#allocation23 + $0x268] sm:$0xff] }
 0x6a8   :  { %8834 = vmatpush1.bf16.msra.mxu0 %v10270_v14  ;;  %8791 = vmatpush1.bf16.msra.mxu1 %v10660_v13  ;;  %v6037_v14 = vld [vmem:[#allocation23 + $0xf60] sm:$0xff]  ;;  %v10358_v13 = vcombine.low %v5650_v45, %v5654_v52 }
 0x6a9   :  { %8835 = vmatprep.subr.bf16.mxu0 %v10263_v59  ;;  %8792 = vmatprep.subr.bf16.mxu1 %v10653_v54  ;;  %v10748_v59 = vcombine.low %v6041_v17, %v6045_v40  ;;  %v5634_v54 = vld [vmem:[#allocation23 + $0x2c8] sm:$0xff]  ;;  %v10741_v20 = vcombine.high %v6033_v6, %v6037_v14  ;;  %v6001_v40 = vld [vmem:[#allocation23 + $0xe40] sm:$0xff] }
 0x6aa   :  { %v10343_v26 = vcombine.high %v5634_v54, %v5638_v57  ;;  %v5614_v17 = vld [vmem:[#allocation23 + $0x228] sm:$0xff] }
 0x6ac   :  { %8836 = vmatpush1.bf16.msra.mxu0 %v10262_v29  ;;  %8793 = vmatpush1.bf16.msra.mxu1 %v10652_v41  ;;  %v6029_v29 = vld [vmem:[#allocation23 + $0xf20] sm:$0xff]  ;;  %v10350_v41 = vcombine.low %v5642_v12, %v5646_v34 }
 0x6ad   :  { %8837 = vmatprep.subr.bf16.mxu0 %v10255_v8  ;;  %8794 = vmatprep.subr.bf16.mxu1 %v10645_v18  ;;  %v10740_v8 = vcombine.low %v6033_v6, %v6037_v14  ;;  %v5626_v18 = vld [vmem:[#allocation23 + $0x288] sm:$0xff]  ;;  %v10733_v46 = vcombine.high %v6025_v27, %v6029_v29 }
 0x6ae   :  { %v10335_v11 = vcombine.high %v5626_v18, %v5630_v47  ;;  %v5858_v6 = vld [vmem:[#allocation23 + $0x9c8] sm:$0xff] }
 0x6b0   :  { %8838 = vmatpush1.bf16.msra.mxu0 %v10254_v55  ;;  %8795 = vmatpush1.bf16.msra.mxu1 %v10644_v58  ;;  %v6021_v55 = vld [vmem:[#allocation23 + $0xee0] sm:$0xff]  ;;  %v10342_v58 = vcombine.low %v5634_v54, %v5638_v57 }
 0x6b1   :  { %8839 = vmatprep.subr.bf16.mxu0 %v10375_v31  ;;  %8796 = vmatprep.subr.bf16.mxu1 %v10637_v49  ;;  %v10732_v31 = vcombine.low %v6025_v27, %v6029_v29  ;;  %v5618_v49 = vld [vmem:[#allocation23 + $0x248] sm:$0xff]  ;;  %v10725_v33 = vcombine.high %v6017_v36, %v6021_v55 }
 0x6b2   :  { %v10327_v45 = vcombine.high %v5618_v49, %v5622_v24 }
 0x6b4   :  { %8840 = vmatpush2.bf16.msra.mxu0 %v10374_v37  ;;  %8797 = vmatpush1.bf16.msra.mxu1 %v10636_v44  ;;  %v6013_v37 = vld [vmem:[#allocation23 + $0xea0] sm:$0xff]  ;;  %v10334_v44 = vcombine.low %v5626_v18, %v5630_v47 }
 0x6b5   :  { %8841 = vmatprep.subr.bf16.mxu0 %v10367_v42  ;;  %8798 = vmatprep.subr.bf16.mxu1 %v10757_v38  ;;  %v10724_v42 = vcombine.low %v6017_v36, %v6021_v55  ;;  %v5610_v38 = vld [vmem:[#allocation23 + $0x208] sm:$0xff]  ;;  %v10717_v52 = vcombine.high %v6009_v16, %v6013_v37  ;;  %v10716_v12 = vcombine.low %v6009_v16, %v6013_v37 }
 0x6b6   :  { %v10319_v34 = vcombine.high %v5610_v38, %v5614_v17  ;;  %v5842_v36 = vld [vmem:[#allocation23 + $0x948] sm:$0xff] }
 0x6b7   :  { %v5846_v55 = vld [vmem:[#allocation23 + $0x968] sm:$0xff] }
 0x6b8   :  { %8842 = vmatpush2.bf16.msra.mxu0 %v10366_v39  ;;  %8799 = vmatpush2.bf16.msra.mxu1 %v10756_v60  ;;  %v6005_v39 = vld [vmem:[#allocation23 + $0xe60] sm:$0xff]  ;;  %v5826_v37 = vld [vmem:[#allocation23 + $0x8c8] sm:$0xff] }
 0x6b9   :  { %8843 = vmatprep.subr.bf16.mxu0 %v10359_v35  ;;  %8800 = vmatprep.subr.bf16.mxu1 %v10749_v51  ;;  %v10326_v35 = vcombine.low %v5618_v49, %v5622_v24  ;;  %v10709_v14 = vcombine.high %v6001_v40, %v6005_v39  ;;  %v10708_v57 = vcombine.low %v6001_v40, %v6005_v39  ;;  %v5834_v49 = vld [vmem:[#allocation23 + $0x908] sm:$0xff] }
 0x6ba   :  { %v10550_v24 = vcombine.low %v5842_v36, %v5846_v55  ;;  %v5810_v39 = vld [vmem:[#allocation23 + $0x848] sm:$0xff] }
 0x6bc   :  { %8844 = vmatpush2.bf16.msra.mxu0 %v10358_v13  ;;  %8801 = vmatpush2.bf16.msra.mxu1 %v10748_v59  ;;  %v5862_v13 = vld [vmem:[#allocation23 + $0x9e8] sm:$0xff]  ;;  %v5993_v59 = vld [vmem:[#allocation23 + $0xe00] sm:$0xff] }
 0x6bd   :  { %8845 = vmatprep.subr.bf16.mxu0 %v10351_v19  ;;  %8802 = vmatprep.subr.bf16.mxu1 %v10741_v20  ;;  %v5997_v19 = vld [vmem:[#allocation23 + $0xe20] sm:$0xff]  ;;  %v10318_v20 = vcombine.low %v5610_v38, %v5614_v17  ;;  %v10567_v29 = vcombine.high %v5858_v6, %v5862_v13  ;;  %v10566_v18 = vcombine.low %v5858_v6, %v5862_v13  ;;  %v5818_v38 = vld [vmem:[#allocation23 + $0x888] sm:$0xff] }
 0x6be   :  { %v10700_v47 = vcombine.low %v5993_v59, %v5997_v19  ;;  %v5802_v6 = vld [vmem:[#allocation23 + $0x808] sm:$0xff] }
 0x6c0   :  { %8846 = vmatpush2.bf16.msra.mxu0 %v10350_v41  ;;  %8803 = vmatpush2.bf16.msra.mxu1 %v10740_v8  ;;  %v10701_v41 = vcombine.high %v5993_v59, %v5997_v19  ;;  %v5850_v8 = vld [vmem:[#allocation23 + $0x988] sm:$0xff] }
 0x6c1   :  { %8847 = vmatprep.subr.bf16.mxu0 %v10343_v26  ;;  %8804 = vmatprep.subr.bf16.mxu1 %v10733_v46  ;;  %v5854_v26 = vld [vmem:[#allocation23 + $0x9a8] sm:$0xff] }
 0x6c2   :  { %v10559_v46 = vcombine.high %v5850_v8, %v5854_v26  ;;  %v5922_v19 = vld [vmem:[#allocation23 + $0xbc8] sm:$0xff] }
 0x6c4   :  { %8848 = vmatpush2.bf16.msra.mxu0 %v10342_v58  ;;  %8805 = vmatpush2.bf16.msra.mxu1 %v10732_v31  ;;  %v10439_v58 = vcombine.high %v12617_v43, %v12619_v28  ;;  %v10558_v31 = vcombine.low %v5850_v8, %v5854_v26  ;;  %v5906_v26 = vld [vmem:[#allocation23 + $0xb48] sm:$0xff] }
 0x6c5   :  { %8849 = vmatprep.subr.bf16.mxu0 %v10335_v11  ;;  %8806 = vmatprep.subr.bf16.mxu1 %v10725_v33  ;;  %v10551_v11 = vcombine.high %v5842_v36, %v5846_v55  ;;  %v5838_v33 = vld [vmem:[#allocation23 + $0x928] sm:$0xff] }
 0x6c6   :  { %v10543_v16 = vcombine.high %v5834_v49, %v5838_v33  ;;  %v5898_v36 = vld [vmem:[#allocation23 + $0xb08] sm:$0xff] }
 0x6c7   :  { %v12623_v60 = vpop.f32.mrf.mxu1  ;;  %v5902_v55 = vld [vmem:[#allocation23 + $0xb28] sm:$0xff] }
 0x6c8   :  { %8850 = vmatpush2.bf16.msra.mxu0 %v10334_v44  ;;  %8807 = vmatpush2.bf16.msra.mxu1 %v10724_v42  ;;  %v5830_v44 = vld [vmem:[#allocation23 + $0x8e8] sm:$0xff]  ;;  %v10542_v42 = vcombine.low %v5834_v49, %v5838_v33  ;;  %v10606_v33 = vcombine.low %v5898_v36, %v5902_v55 }
 0x6c9   :  { %v12625_v51 = vpop.f32.mrf.mxu1  ;;  %8851 = vmatprep.subr.bf16.mxu0 %v10327_v45  ;;  %8808 = vmatprep.subr.bf16.mxu1 %v10717_v52  ;;  %v10535_v45 = vcombine.high %v5826_v37, %v5830_v44  ;;  %v5822_v52 = vld [vmem:[#allocation23 + $0x8a8] sm:$0xff]  ;;  %v10534_v17 = vcombine.low %v5826_v37, %v5830_v44 }
 0x6ca   :  { %v10527_v40 = vcombine.high %v5818_v38, %v5822_v52  ;;  %v5894_v49 = vld [vmem:[#allocation23 + $0xae8] sm:$0xff] }
 0x6cb   :  { %v5362_v54 = vpop.f32.mrf.mxu1  ;;  %v5886_v37 = vld [vmem:[#allocation23 + $0xaa8] sm:$0xff] }
 0x6cc   :  { %8852 = vmatpush2.bf16.msra.mxu0 %v10326_v35  ;;  %8809 = vmatpush2.bf16.msra.mxu1 %v10716_v12  ;;  %v5814_v35 = vld [vmem:[#allocation23 + $0x868] sm:$0xff]  ;;  %v10526_v12 = vcombine.low %v5818_v38, %v5822_v52  ;;  %v12632_v52 = vsub.s32 6, %v12497_v56 }
 0x6cd   :  { %v5363_v27 = vpop.f32.mrf.mxu1  ;;  %8853 = vmatprep.subr.bf16.mxu0 %v10319_v34  ;;  %8810 = vmatprep.subr.bf16.mxu1 %v10709_v14  ;;  %v10519_v34 = vcombine.high %v5810_v39, %v5814_v35  ;;  %v5806_v14 = vld [vmem:[#allocation23 + $0x828] sm:$0xff]  ;;  %v10518_v13 = vcombine.low %v5810_v39, %v5814_v35  ;;  %v12635_v39 = vsub.s32 7, %v12497_v56 }
 0x6ce   :  { %v10511_v59 = vcombine.high %v5802_v6, %v5806_v14  ;;  %v5926_v54 = vld [vmem:[#allocation23 + $0xbe8] sm:$0xff] }
 0x6cf   :  { %v5914_v27 = vld [vmem:[#allocation23 + $0xb88] sm:$0xff] }
 0x6d0   :  { %8854 = vmatpush2.bf16.msra.mxu0 %v10318_v20  ;;  %8811 = vmatpush2.bf16.msra.mxu1 %v10708_v57  ;;  %v10510_v20 = vcombine.low %v5802_v6, %v5806_v14  ;;  %v10631_v57 = vcombine.high %v5922_v19, %v5926_v54  ;;  %v5878_v38 = vld [vmem:[#allocation23 + $0xa68] sm:$0xff]  ;;  %v1973_v6 = vrot.slane %v12589_v15, %v12632_v52 }
 0x6d1   :  { %8905 = vmatprep.subr.bf16.mxu0 %v10567_v29  ;;  %8812 = vmatprep.subr.bf16.mxu1 %v10701_v41  ;;  %v5918_v29 = vld [vmem:[#allocation23 + $0xba8] sm:$0xff]  ;;  %v10630_v41 = vcombine.low %v5922_v19, %v5926_v54  ;;  %v1977_v19 = vrot.slane %v12589_v15, %v12635_v39  ;;  %v5603_v54 = vld [vmem:[#allocation23 + $0x1d0] sm:$0xff] }
 0x6d2   :  { %v10623_v8 = vcombine.high %v5914_v27, %v5918_v29  ;;  %v5866_v35 = vld [vmem:[#allocation23 + $0xa08] sm:$0xff]  ;;  %v5359_v56 = vadd.f32 %v12623_v60, %v1973_v6  ;;  %v5591_v60 = vld [vmem:[#allocation23 + $0x170] sm:$0xff] }
 0x6d3   :  { %8856 = vmatmul.mubr.bf16.vlgmr.msra.gmra.mxu0 %v12521_v25  ;;  %v5726_v6 = vld [vmem:[#allocation23 + $0x5a8] sm:$0xff] }
 0x6d4   :  { %8906 = vmatpush1.bf16.msra.mxu0 %v10566_v18  ;;  %8937 = vmatprep.mubr.bf16.mxu0 %v12603_v1  ;;  %v5910_v18 = vld [vmem:[#allocation23 + $0xb68] sm:$0xff] }
 0x6d5   :  { %8907 = vmatprep.subr.bf16.mxu0 %v10559_v46  ;;  %8813 = vmatpush2.bf16.msra.mxu1 %v10700_v47  ;;  %v10622_v46 = vcombine.low %v5914_v27, %v5918_v29  ;;  %v10615_v47 = vcombine.high %v5906_v26, %v5910_v18 }
 0x6d6   :  { %8864 = vmatprep.subr.bf16.mxu1 %v10439_v58  ;;  %v10614_v58 = vcombine.low %v5906_v26, %v5910_v18  ;;  %v5595_v26 = vld [vmem:[#allocation23 + $0x190] sm:$0xff] }
 0x6d7   :  { %v5599_v18 = vld [vmem:[#allocation23 + $0x1b0] sm:$0xff] }
 0x6d8   :  { %8908 = vmatpush1.bf16.msra.mxu0 %v10558_v31  ;;  %v10607_v31 = vcombine.high %v5898_v36, %v5902_v55  ;;  %v10305_v15 = vcombine.high %v5595_v26, %v5599_v18 }
 0x6d9   :  { %8909 = vmatprep.subr.bf16.mxu0 %v10551_v11  ;;  %v5890_v11 = vld [vmem:[#allocation23 + $0xac8] sm:$0xff] }
 0x6da   :  { %v10598_v44 = vcombine.low %v5890_v11, %v5894_v49 }
 0x6dc   :  { %8910 = vmatpush1.bf16.msra.mxu0 %v10550_v24  ;;  %v10599_v24 = vcombine.high %v5890_v11, %v5894_v49  ;;  %v5579_v49 = vld [vmem:[#allocation23 + $0x110] sm:$0xff] }
 0x6dd   :  { %8911 = vmatprep.subr.bf16.mxu0 %v10543_v16  ;;  %v5882_v16 = vld [vmem:[#allocation23 + $0xa88] sm:$0xff] }
 0x6e0   :  { %8912 = vmatpush1.bf16.msra.mxu0 %v10542_v42  ;;  %v10591_v42 = vcombine.high %v5882_v16, %v5886_v37 }
 0x6e1   :  { %8913 = vmatprep.subr.bf16.mxu0 %v10535_v45  ;;  %v5874_v45 = vld [vmem:[#allocation23 + $0xa48] sm:$0xff] }
 0x6e2   :  { %v10582_v14 = vcombine.low %v5874_v45, %v5878_v38 }
 0x6e4   :  { %8914 = vmatpush1.bf16.msra.mxu0 %v10534_v17  ;;  %v10590_v17 = vcombine.low %v5882_v16, %v5886_v37 }
 0x6e5   :  { %8915 = vmatprep.subr.bf16.mxu0 %v10527_v40  ;;  %v10583_v40 = vcombine.high %v5874_v45, %v5878_v38  ;;  %v5571_v38 = vld [vmem:[#allocation23 + $0xd0] sm:$0xff] }
 0x6e8   :  { %8916 = vmatpush1.bf16.msra.mxu0 %v10526_v12  ;;  %v5870_v12 = vld [vmem:[#allocation23 + $0xa28] sm:$0xff] }
 0x6e9   :  { %8917 = vmatprep.subr.bf16.mxu0 %v10519_v34  ;;  %v10574_v27 = vcombine.low %v5866_v35, %v5870_v12 }
 0x6ec   :  { %8918 = vmatpush1.bf16.msra.mxu0 %v10518_v13 }
 0x6ed   :  { %8919 = vmatprep.subr.bf16.mxu0 %v10511_v59  ;;  %v10575_v59 = vcombine.high %v5866_v35, %v5870_v12 }
 0x6f0   :  { %8920 = vmatpush1.bf16.msra.mxu0 %v10510_v20  ;;  %v5607_v20 = vld [vmem:[#allocation23 + $0x1f0] sm:$0xff] }
 0x6f1   :  { %8921 = vmatprep.subr.bf16.mxu0 %v10631_v57 }
 0x6f4   :  { %8922 = vmatpush2.bf16.msra.mxu0 %v10630_v41  ;;  %v10313_v41 = vcombine.high %v5603_v54, %v5607_v20 }
 0x6f5   :  { %8923 = vmatprep.subr.bf16.mxu0 %v10623_v8  ;;  %v5361_v8 = vadd.f32 %v12625_v51, %v1977_v19  ;;  %v10304_v51 = vcombine.low %v5595_v26, %v5599_v18  ;;  %v5567_v19 = vld [vmem:[#allocation23 + $0xb0] sm:$0xff] }
 0x6f6   :  { %v5559_v26 = vld [vmem:[#allocation23 + $0x70] sm:$0xff] }
 0x6f7   :  { %v5402_v55 = vadd.f32 %v12495_v9, %v5361_v8  ;;  %v5555_v8 = vld [vmem:[#allocation23 + $0x50] sm:$0xff] }
 0x6f8   :  { %8924 = vmatpush2.bf16.msra.mxu0 %v10622_v46  ;;  %v5400_v46 = vadd.f32 %v12493_v2, %v5359_v56  ;;  %v5714_v56 = vld [vmem:[#allocation23 + $0x548] sm:$0xff]  ;;  %v10264_v28 = vcombine.low %v5555_v8, %v5559_v26 }
 0x6f9   :  { %8925 = vmatprep.subr.bf16.mxu0 %v10615_v47  ;;  %v10312_v47 = vcombine.low %v5603_v54, %v5607_v20 }
 0x6fc   :  { %8926 = vmatpush2.bf16.msra.mxu0 %v10614_v58  ;;  %v5587_v58 = vld [vmem:[#allocation23 + $0x150] sm:$0xff] }
 0x6fd   :  { %8927 = vmatprep.subr.bf16.mxu0 %v10607_v31  ;;  %v10297_v11 = vcombine.high %v5587_v58, %v5591_v60  ;;  %v10296_v37 = vcombine.low %v5587_v58, %v5591_v60  ;;  %v5547_v58 = vld [vmem:[#allocation23 + $0x10] sm:$0xff] }
 0x6fe   :  { %v5551_v60 = vld [vmem:[#allocation23 + $0x30] sm:$0xff] }
 0x700   :  { %8928 = vmatpush2.bf16.msra.mxu0 %v10606_v33  ;;  %v5583_v33 = vld [vmem:[#allocation23 + $0x130] sm:$0xff] }
 0x701   :  { %8929 = vmatprep.subr.bf16.mxu0 %v10599_v24 }
 0x704   :  { %8930 = vmatpush2.bf16.msra.mxu0 %v10598_v44 }
 0x705   :  { %8931 = vmatprep.subr.bf16.mxu0 %v10591_v42  ;;  %v10289_v42 = vcombine.high %v5579_v49, %v5583_v33 }
 0x707   :  { %v5440_v34 = vpop.f32.mrf.mxu1 }
 0x708   :  { %8932 = vmatpush2.bf16.msra.mxu0 %v10590_v17  ;;  %v5441_v36 = vadd.f32 %v5440_v34, %v5400_v46  ;;  %v5575_v17 = vld [vmem:[#allocation23 + $0xf0] sm:$0xff]  ;;  %v10288_v34 = vcombine.low %v5579_v49, %v5583_v33 }
 0x709   :  { %v5442_v13 = vpop.f32.mrf.mxu1  ;;  %8933 = vmatprep.subr.bf16.mxu0 %v10583_v40  ;;  %v5671_v49 = vld [vmem:[#allocation23 + $0x3f0] sm:$0xff] }
 0x70a   :  { %v5443_v31 = vadd.f32 %v5442_v13, %v5402_v55  ;;  %v5482_v2 = vadd.f32 %v12527_v50, %v5441_v36  ;;  %v5722_v50 = vld [vmem:[#allocation23 + $0x588] sm:$0xff]  ;;  %v10281_v13 = vcombine.high %v5571_v38, %v5575_v17  ;;  %v10265_v36 = vcombine.high %v5555_v8, %v5559_v26 }
 0x70b   :  { %v5444_v57 = vpop.f32.mrf.mxu1  ;;  %v10431_v20 = vcombine.high %v5722_v50, %v5726_v6  ;;  %v5794_v8 = vld [vmem:[#allocation23 + $0x7c8] sm:$0xff] }
 0x70c   :  { %8934 = vmatpush2.bf16.msra.mxu0 %v10582_v14  ;;  %v5484_v9 = vadd.f32 %v12529_v53, %v5443_v31  ;;  %v5563_v53 = vld [vmem:[#allocation23 + $0x90] sm:$0xff]  ;;  %v10280_v57 = vcombine.low %v5571_v38, %v5575_v17  ;;  %v5702_v31 = vld [vmem:[#allocation23 + $0x4e8] sm:$0xff] }
 0x70d   :  { %v5445_v29 = vpop.f32.mrf.mxu1  ;;  %8935 = vmatprep.subr.bf16.mxu0 %v10575_v59  ;;  %v10272_v46 = vcombine.low %v5563_v53, %v5567_v19  ;;  %v5798_v26 = vld [vmem:[#allocation23 + $0x7e8] sm:$0xff] }
 0x70e   :  { %v10273_v29 = vcombine.high %v5563_v53, %v5567_v19  ;;  %v5674_v53 = vld [vmem:[#allocation23 + $0x408] sm:$0xff] }
 0x70f   :  { %v5678_v19 = vld [vmem:[#allocation23 + $0x428] sm:$0xff] }
 0x710   :  { %8936 = vmatpush2.bf16.msra.mxu0 %v10574_v27  ;;  %v5718_v27 = vld [vmem:[#allocation23 + $0x568] sm:$0xff] }
 0x711   :  { %8987 = vmatprep.subr.bf16.mxu0 %v10313_v41  ;;  %v10430_v41 = vcombine.low %v5722_v50, %v5726_v6  ;;  %v10423_v18 = vcombine.high %v5714_v56, %v5718_v27  ;;  %v10422_v55 = vcombine.low %v5714_v56, %v5718_v27  ;;  %v5651_v50 = vld [vmem:[#allocation23 + $0x350] sm:$0xff] }
 0x712   :  { %v5655_v6 = vld [vmem:[#allocation23 + $0x370] sm:$0xff] }
 0x713   :  { %8938 = vmatmul.mubr.bf16.vlgmr.msra.gmra.mxu0 %v12606_v48  ;;  %v5643_v56 = vld [vmem:[#allocation23 + $0x310] sm:$0xff] }
 0x714   :  { %8988 = vmatpush1.bf16.msra.mxu0 %v10312_v47  ;;  %9019 = vmatprep.mubr.bf16.mxu0 %v12519_v21  ;;  %v5706_v47 = vld [vmem:[#allocation23 + $0x508] sm:$0xff]  ;;  %v5647_v27 = vld [vmem:[#allocation23 + $0x330] sm:$0xff] }
 0x715   :  { %8989 = vmatprep.subr.bf16.mxu0 %v10305_v15  ;;  %v5710_v15 = vld [vmem:[#allocation23 + $0x528] sm:$0xff] }
 0x716   :  { %v10415_v43 = vcombine.high %v5706_v47, %v5710_v15 }
 0x717   :  { %v5522_v24 = vpop.f32.mrf.mxu1 }
 0x718   :  { %v5523_v16 = vadd.f32 %v5522_v24, %v5482_v2  ;;  %8990 = vmatpush1.bf16.msra.mxu0 %v10304_v51  ;;  %v10257_v51 = vcombine.high %v5547_v58, %v5551_v60  ;;  %v5667_v2 = vld [vmem:[#allocation23 + $0x3d0] sm:$0xff]  ;;  %v10256_v24 = vcombine.low %v5547_v58, %v5551_v60  ;;  %v5786_v58 = vld [vmem:[#allocation23 + $0x788] sm:$0xff] }
 0x719   :  { %v5524_v44 = vpop.f32.mrf.mxu1  ;;  %8991 = vmatprep.subr.bf16.mxu0 %v10297_v11  ;;  %v10414_v11 = vcombine.low %v5706_v47, %v5710_v15  ;;  %v10376_v17 = vcombine.low %v5667_v2, %v5671_v49  ;;  %v5635_v47 = vld [vmem:[#allocation23 + $0x2d0] sm:$0xff]  ;;  %v5790_v60 = vld [vmem:[#allocation23 + $0x7a8] sm:$0xff] }
 0x71a   :  { %v5525_v45 = vadd.f32 %v5524_v44, %v5484_v9  ;;  %v5535_v40 = vmax.f32 %v5523_v16, 0.0  ;;  %v5690_v16 = vld [vmem:[#allocation23 + $0x488] sm:$0xff]  ;;  %v5639_v15 = vld [vmem:[#allocation23 + $0x2f0] sm:$0xff] }
 0x71b   :  { %v5526_v35 = vpop.f32.mrf.mxu1  ;;  %v5694_v9 = vld [vmem:[#allocation23 + $0x4a8] sm:$0xff] }
 0x71c   :  { %v5536_v12 = vmax.f32 %v5525_v45, 0.0  ;;  %8992 = vmatpush1.bf16.msra.mxu0 %v10296_v37  ;;  %v12651_v54 = vpack.c.bf16 %v5535_v40, %v5535_v40  ;;  %v10377_v37 = vcombine.high %v5667_v2, %v5671_v49  ;;  %v5663_v45 = vld [vmem:[#allocation23 + $0x3b0] sm:$0xff]  ;;  %v10399_v38 = vcombine.high %v5690_v16, %v5694_v9  ;;  %v5682_v40 = vld [vmem:[#allocation23 + $0x448] sm:$0xff] }
 0x71d   :  { %v5527_v14 = vpop.f32.mrf.mxu1  ;;  %8993 = vmatprep.subr.bf16.mxu0 %v10289_v42  ;;  %v5659_v42 = vld [vmem:[#allocation23 + $0x390] sm:$0xff]  ;;  %v5686_v35 = vld [vmem:[#allocation23 + $0x468] sm:$0xff] }
 0x71e   :  { %v12649_v59 = vpack.c.bf16 %v5536_v12, %v5536_v12  ;;  %v10369_v12 = vcombine.high %v5659_v42, %v5663_v45  ;;  %v10391_v14 = vcombine.high %v5682_v40, %v5686_v35  ;;  %v5778_v2 = vld [vmem:[#allocation23 + $0x748] sm:$0xff] }
 0x71f   :  { %v5782_v49 = vld [vmem:[#allocation23 + $0x768] sm:$0xff] }
 0x720   :  { %8994 = vmatpush1.bf16.msra.mxu0 %v10288_v34  ;;  %8814 = vmatprep.mubr.bf16.mxu1 %v12649_v59  ;;  %v10398_v34 = vcombine.low %v5690_v16, %v5694_v9  ;;  %v5619_v16 = vld [vmem:[#allocation23 + $0x250] sm:$0xff] }
 0x721   :  { %8815 = vmatmul.mubr.bf16.vlgmr.msra.gmra.mxu1 %v12651_v54  ;;  %8995 = vmatprep.subr.bf16.mxu0 %v10281_v13  ;;  %v10368_v13 = vcombine.low %v5659_v42, %v5663_v45  ;;  %v5623_v9 = vld [vmem:[#allocation23 + $0x270] sm:$0xff]  ;;  %v5770_v42 = vld [vmem:[#allocation23 + $0x708] sm:$0xff] }
 0x722   :  { %8865 = vmatpush1.bf16.msra.mxu1 %v10438_v10  ;;  %8896 = vmatprep.mubr.bf16.mxu1 %v12578_v23  ;;  %v5698_v10 = vld [vmem:[#allocation23 + $0x4c8] sm:$0xff] }
 0x723   :  { %8866 = vmatprep.subr.bf16.mxu1 %v10431_v20  ;;  %v10407_v33 = vcombine.high %v5698_v10, %v5702_v31  ;;  %v10406_v44 = vcombine.low %v5698_v10, %v5702_v31  ;;  %v10361_v20 = vcombine.high %v5651_v50, %v5655_v6  ;;  %v5627_v10 = vld [vmem:[#allocation23 + $0x290] sm:$0xff]  ;;  %v5774_v45 = vld [vmem:[#allocation23 + $0x728] sm:$0xff] }
 0x724   :  { %8996 = vmatpush1.bf16.msra.mxu0 %v10280_v57  ;;  %v10390_v57 = vcombine.low %v5682_v40, %v5686_v35  ;;  %v5631_v31 = vld [vmem:[#allocation23 + $0x2b0] sm:$0xff] }
 0x725   :  { %8997 = vmatprep.subr.bf16.mxu0 %v10273_v29  ;;  %v10383_v29 = vcombine.high %v5674_v53, %v5678_v19  ;;  %v5611_v40 = vld [vmem:[#allocation23 + $0x210] sm:$0xff] }
 0x726   :  { %8867 = vmatpush1.bf16.msra.mxu1 %v10430_v41  ;;  %v10360_v41 = vcombine.low %v5651_v50, %v5655_v6  ;;  %v5615_v35 = vld [vmem:[#allocation23 + $0x230] sm:$0xff]  ;;  %v5762_v50 = vld [vmem:[#allocation23 + $0x6c8] sm:$0xff] }
 0x727   :  { %8868 = vmatprep.subr.bf16.mxu1 %v10423_v18  ;;  %v10353_v18 = vcombine.high %v5643_v56, %v5647_v27  ;;  %v5766_v6 = vld [vmem:[#allocation23 + $0x6e8] sm:$0xff] }
 0x728   :  { %8998 = vmatpush1.bf16.msra.mxu0 %v10272_v46  ;;  %v10382_v46 = vcombine.low %v5674_v53, %v5678_v19  ;;  %v5859_v53 = vld [vmem:[#allocation23 + $0x9d0] sm:$0xff] }
 0x729   :  { %8999 = vmatprep.subr.bf16.mxu0 %v10265_v36  ;;  %v10503_v36 = vcombine.high %v5794_v8, %v5798_v26  ;;  %v5863_v19 = vld [vmem:[#allocation23 + $0x9f0] sm:$0xff] }
 0x72a   :  { %8869 = vmatpush1.bf16.msra.mxu1 %v10422_v55  ;;  %v10352_v55 = vcombine.low %v5643_v56, %v5647_v27  ;;  %v5754_v56 = vld [vmem:[#allocation23 + $0x688] sm:$0xff] }
 0x72b   :  { %8870 = vmatprep.subr.bf16.mxu1 %v10415_v43  ;;  %v10345_v43 = vcombine.high %v5635_v47, %v5639_v15  ;;  %v5758_v27 = vld [vmem:[#allocation23 + $0x6a8] sm:$0xff] }
 0x72c   :  { %9000 = vmatpush1.bf16.msra.mxu0 %v10264_v28  ;;  %v10502_v28 = vcombine.low %v5794_v8, %v5798_v26  ;;  %v5851_v8 = vld [vmem:[#allocation23 + $0x990] sm:$0xff] }
 0x72d   :  { %9001 = vmatprep.subr.bf16.mxu0 %v10257_v51  ;;  %v10495_v51 = vcombine.high %v5786_v58, %v5790_v60  ;;  %v5855_v26 = vld [vmem:[#allocation23 + $0x9b0] sm:$0xff] }
 0x72e   :  { %8871 = vmatpush1.bf16.msra.mxu1 %v10414_v11  ;;  %v10344_v11 = vcombine.low %v5635_v47, %v5639_v15  ;;  %v10568_v47 = vcombine.low %v5859_v53, %v5863_v19  ;;  %v5746_v15 = vld [vmem:[#allocation23 + $0x648] sm:$0xff] }
 0x72f   :  { %8872 = vmatprep.subr.bf16.mxu1 %v10407_v33  ;;  %v10337_v33 = vcombine.high %v5627_v10, %v5631_v31 }
 0x730   :  { %9002 = vmatpush1.bf16.msra.mxu0 %v10256_v24  ;;  %v10494_v24 = vcombine.low %v5786_v58, %v5790_v60  ;;  %v10462_v60 = vcombine.low %v5754_v56, %v5758_v27 }
 0x731   :  { %9003 = vmatprep.subr.bf16.mxu0 %v10377_v37  ;;  %v10487_v37 = vcombine.high %v5778_v2, %v5782_v49 }
 0x732   :  { %8873 = vmatpush1.bf16.msra.mxu1 %v10406_v44  ;;  %v10336_v44 = vcombine.low %v5627_v10, %v5631_v31 }
 0x733   :  { %8874 = vmatprep.subr.bf16.mxu1 %v10399_v38  ;;  %v10329_v38 = vcombine.high %v5619_v16, %v5623_v9 }
 0x734   :  { %9004 = vmatpush2.bf16.msra.mxu0 %v10376_v17  ;;  %v10486_v17 = vcombine.low %v5778_v2, %v5782_v49  ;;  %v5738_v2 = vld [vmem:[#allocation23 + $0x608] sm:$0xff] }
 0x735   :  { %9005 = vmatprep.subr.bf16.mxu0 %v10369_v12  ;;  %v10479_v12 = vcombine.high %v5770_v42, %v5774_v45  ;;  %v5742_v49 = vld [vmem:[#allocation23 + $0x628] sm:$0xff] }
 0x736   :  { %8875 = vmatpush1.bf16.msra.mxu1 %v10398_v34  ;;  %v10328_v34 = vcombine.low %v5619_v16, %v5623_v9 }
 0x737   :  { %8876 = vmatprep.subr.bf16.mxu1 %v10391_v14  ;;  %v10321_v14 = vcombine.high %v5611_v40, %v5615_v35 }
 0x738   :  { %9006 = vmatpush2.bf16.msra.mxu0 %v10368_v13  ;;  %v10478_v13 = vcombine.low %v5770_v42, %v5774_v45 }
 0x739   :  { %9007 = vmatprep.subr.bf16.mxu0 %v10361_v20  ;;  %v10471_v20 = vcombine.high %v5762_v50, %v5766_v6 }
 0x73a   :  { %8877 = vmatpush1.bf16.msra.mxu1 %v10390_v57  ;;  %v10320_v57 = vcombine.low %v5611_v40, %v5615_v35 }
 0x73b   :  { %8878 = vmatprep.subr.bf16.mxu1 %v10383_v29  ;;  %v10569_v29 = vcombine.high %v5859_v53, %v5863_v19  ;;  %v5827_v53 = vld [vmem:[#allocation23 + $0x8d0] sm:$0xff] }
 0x73c   :  { %9008 = vmatpush2.bf16.msra.mxu0 %v10360_v41  ;;  %v10470_v41 = vcombine.low %v5762_v50, %v5766_v6  ;;  %v5831_v19 = vld [vmem:[#allocation23 + $0x8f0] sm:$0xff] }
 0x73d   :  { %9009 = vmatprep.subr.bf16.mxu0 %v10353_v18  ;;  %v6057_v18 = vld [vmem:[#allocation24] sm:$0xff] }
 0x73e   :  { %8879 = vmatpush1.bf16.msra.mxu1 %v10382_v46  ;;  %v10463_v46 = vcombine.high %v5754_v56, %v5758_v27  ;;  %v6062_v58 = vrot.slane %v6057_v18, %v12500_v0  ;;  %v5978_v27 = vld [vmem:[#allocation23 + $0xd88] sm:$0xff] }
 0x73f   :  { %8880 = vmatprep.subr.bf16.mxu1 %v10503_v36  ;;  %v5750_v36 = vld [vmem:[#allocation23 + $0x668] sm:$0xff] }
 0x740   :  { %9010 = vmatpush2.bf16.msra.mxu0 %v10352_v55  ;;  %v10561_v55 = vcombine.high %v5851_v8, %v5855_v26  ;;  %v10455_v31 = vcombine.high %v5746_v15, %v5750_v36  ;;  %v8694_v16 = vadd.f32 %v12567_v4, %v6062_v58  ;;  %v10454_v9 = vcombine.low %v5746_v15, %v5750_v36  ;;  %v5974_v58 = vld [vmem:[#allocation23 + $0xd68] sm:$0xff] }
 0x741   :  { %9011 = vmatprep.subr.bf16.mxu0 %v10345_v43  ;;  %v5843_v43 = vld [vmem:[#allocation23 + $0x950] sm:$0xff]  ;;  %v10536_v36 = vcombine.low %v5827_v53, %v5831_v19 }
 0x742   :  { %8881 = vmatpush2.bf16.msra.mxu1 %v10502_v28  ;;  %v5847_v28 = vld [vmem:[#allocation23 + $0x970] sm:$0xff] }
 0x743   :  { %8882 = vmatprep.subr.bf16.mxu1 %v10495_v51  ;;  %v6066_v51 = vrot.slane %v6057_v18, %v12505_v7  ;;  %v10552_v35 = vcombine.low %v5843_v43, %v5847_v28 }
 0x744   :  { %9012 = vmatpush2.bf16.msra.mxu0 %v10344_v11  ;;  %v10560_v11 = vcombine.low %v5851_v8, %v5855_v26  ;;  %v10537_v26 = vcombine.high %v5827_v53, %v5831_v19 }
 0x745   :  { %9013 = vmatprep.subr.bf16.mxu0 %v10337_v33 }
 0x746   :  { %8883 = vmatpush2.bf16.msra.mxu1 %v10494_v24  ;;  %v10553_v24 = vcombine.high %v5843_v43, %v5847_v28  ;;  %v5811_v28 = vld [vmem:[#allocation23 + $0x850] sm:$0xff] }
 0x747   :  { %8884 = vmatprep.subr.bf16.mxu1 %v10487_v37  ;;  %v5835_v37 = vld [vmem:[#allocation23 + $0x910] sm:$0xff] }
 0x748   :  { %9014 = vmatpush2.bf16.msra.mxu0 %v10336_v44  ;;  %v5839_v44 = vld [vmem:[#allocation23 + $0x930] sm:$0xff] }
 0x749   :  { %9015 = vmatprep.subr.bf16.mxu0 %v10329_v38  ;;  %v10447_v38 = vcombine.high %v5738_v2, %v5742_v49 }
 0x74a   :  { %8885 = vmatpush2.bf16.msra.mxu1 %v10486_v17  ;;  %v8696_v17 = vadd.f32 %v12569_v63, %v6066_v51  ;;  %v10544_v63 = vcombine.low %v5835_v37, %v5839_v44 }
 0x74b   :  { %8886 = vmatprep.subr.bf16.mxu1 %v10479_v12  ;;  %v5986_v12 = vld [vmem:[#allocation23 + $0xdc8] sm:$0xff] }
 0x74c   :  { %9016 = vmatpush2.bf16.msra.mxu0 %v10328_v34  ;;  %v5990_v34 = vld [vmem:[#allocation23 + $0xde8] sm:$0xff] }
 0x74d   :  { %9017 = vmatprep.subr.bf16.mxu0 %v10321_v14  ;;  %v10545_v14 = vcombine.high %v5835_v37, %v5839_v44  ;;  %v10695_v56 = vcombine.high %v5986_v12, %v5990_v34  ;;  %v10694_v18 = vcombine.low %v5986_v12, %v5990_v34  ;;  %v5954_v44 = vld [vmem:[#allocation23 + $0xcc8] sm:$0xff] }
 0x74e   :  { %8887 = vmatpush2.bf16.msra.mxu1 %v10478_v13  ;;  %v10446_v13 = vcombine.low %v5738_v2, %v5742_v49  ;;  %v5966_v2 = vld [vmem:[#allocation23 + $0xd28] sm:$0xff] }
 0x74f   :  { %8888 = vmatprep.subr.bf16.mxu1 %v10471_v20  ;;  %v5946_v34 = vld [vmem:[#allocation23 + $0xc88] sm:$0xff] }
 0x750   :  { %9018 = vmatpush2.bf16.msra.mxu0 %v10320_v57 }
 0x751   :  { %9069 = vmatprep.subr.bf16.mxu0 %v10569_v29  ;;  %v5982_v29 = vld [vmem:[#allocation23 + $0xda8] sm:$0xff] }
 0x752   :  { %8889 = vmatpush2.bf16.msra.mxu1 %v10470_v41  ;;  %v10687_v15 = vcombine.high %v5978_v27, %v5982_v29  ;;  %v10686_v43 = vcombine.low %v5978_v27, %v5982_v29  ;;  %v5907_v29 = vld [vmem:[#allocation23 + $0xb50] sm:$0xff] }
 0x753   :  { %9020 = vmatmul.mubr.bf16.vlgmr.msra.gmra.mxu0 %v12521_v25  ;;  %v8775_v10 = vpop.f32.mrf.mxu0  ;;  %8890 = vmatprep.subr.bf16.mxu1 %v10463_v46  ;;  %v5819_v46 = vld [vmem:[#allocation23 + $0x890] sm:$0xff] }
 0x754   :  { %9070 = vmatpush1.bf16.msra.mxu0 %v10568_v47  ;;  %9101 = vmatprep.mubr.bf16.mxu0 %v12603_v1  ;;  %v5823_v47 = vld [vmem:[#allocation23 + $0x8b0] sm:$0xff] }
 0x755   :  { %v8777_v33 = vpop.f32.mrf.mxu0  ;;  %9071 = vmatprep.subr.bf16.mxu0 %v10561_v55  ;;  %v5970_v55 = vld [vmem:[#allocation23 + $0xd48] sm:$0xff]  ;;  %v10528_v51 = vcombine.low %v5819_v46, %v5823_v47 }
 0x756   :  { %8891 = vmatpush2.bf16.msra.mxu1 %v10462_v60  ;;  %v10529_v60 = vcombine.high %v5819_v46, %v5823_v47  ;;  %v5930_v46 = vld [vmem:[#allocation23 + $0xc08] sm:$0xff] }
 0x757   :  { %v8734_v42 = vpop.f32.mrf.mxu1  ;;  %v8779_v45 = vpop.f32.mrf.mxu0  ;;  %8892 = vmatprep.subr.bf16.mxu1 %v10455_v31  ;;  %v10679_v31 = vcombine.high %v5970_v55, %v5974_v58  ;;  %v5934_v47 = vld [vmem:[#allocation23 + $0xc28] sm:$0xff] }
 0x758   :  { %v8735_v40 = vadd.f32 %v8734_v42, %v8694_v16  ;;  %9072 = vmatpush1.bf16.msra.mxu0 %v10560_v11  ;;  %v5962_v11 = vld [vmem:[#allocation23 + $0xd08] sm:$0xff]  ;;  %v5807_v16 = vld [vmem:[#allocation23 + $0x830] sm:$0xff] }
 0x759   :  { %v8736_v50 = vpop.f32.mrf.mxu1  ;;  %v8780_v6 = vpop.f32.mrf.mxu0  ;;  %9073 = vmatprep.subr.bf16.mxu0 %v10553_v24  ;;  %v5803_v24 = vld [vmem:[#allocation23 + $0x810] sm:$0xff]  ;;  %v5958_v42 = vld [vmem:[#allocation23 + $0xce8] sm:$0xff] }
 0x75a   :  { %v8737_v4 = vadd.f32 %v8736_v50, %v8696_v17  ;;  %8893 = vmatpush2.bf16.msra.mxu1 %v10454_v9  ;;  %v12665_v20 = vadd.f32 %v8775_v10, %v8735_v40  ;;  %v5815_v10 = vld [vmem:[#allocation23 + $0x870] sm:$0xff]  ;;  %v10671_v9 = vcombine.high %v5962_v11, %v5966_v2  ;;  %v10513_v45 = vcombine.high %v5803_v24, %v5807_v16  ;;  %v5950_v50 = vld [vmem:[#allocation23 + $0xca8] sm:$0xff] }
 0x75b   :  { %v8738_v57 = vpop.f32.mrf.mxu1  ;;  %8894 = vmatprep.subr.bf16.mxu1 %v10447_v38  ;;  %v10521_v49 = vcombine.high %v5811_v28, %v5815_v10  ;;  %v10520_v37 = vcombine.low %v5811_v28, %v5815_v10  ;;  %v10670_v38 = vcombine.low %v5962_v11, %v5966_v2  ;;  %v5923_v17 = vld [vmem:[#allocation23 + $0xbd0] sm:$0xff]  ;;  %v10512_v12 = vcombine.low %v5803_v24, %v5807_v16  ;;  %v6050_v28 = vld [vmem:[#allocation23 + $0xfc8] sm:$0xff] }
 0x75c   :  { %9074 = vmatpush1.bf16.msra.mxu0 %v10552_v35  ;;  %v12667_v41 = vadd.f32 %v8777_v33, %v8737_v4  ;;  %v10678_v33 = vcombine.low %v5970_v55, %v5974_v58  ;;  %v5927_v40 = vld [vmem:[#allocation23 + $0xbf0] sm:$0xff]  ;;  %v10663_v35 = vcombine.high %v5954_v44, %v5958_v42  ;;  %v10655_v53 = vcombine.high %v5946_v34, %v5950_v50  ;;  %v5938_v57 = vld [vmem:[#allocation23 + $0xc48] sm:$0xff] }
 0x75d   :  { %v8739_v8 = vpop.f32.mrf.mxu1  ;;  %9075 = vmatprep.subr.bf16.mxu0 %v10545_v14  ;;  %v10633_v6 = vcombine.high %v5923_v17, %v5927_v40  ;;  %v10662_v14 = vcombine.low %v5954_v44, %v5958_v42  ;;  %v5915_v4 = vld [vmem:[#allocation23 + $0xb90] sm:$0xff]  ;;  %v10632_v19 = vcombine.low %v5923_v17, %v5927_v40  ;;  %v10654_v27 = vcombine.low %v5946_v34, %v5950_v50  ;;  %v6054_v10 = vld [vmem:[#allocation23 + $0xfe8] sm:$0xff] }
 0x75e   :  { %8895 = vmatpush2.bf16.msra.mxu1 %v10446_v13  ;;  %v5919_v13 = vld [vmem:[#allocation23 + $0xbb0] sm:$0xff]  ;;  %v6042_v24 = vld [vmem:[#allocation23 + $0xf88] sm:$0xff] }
 0x75f   :  { %8946 = vmatprep.subr.bf16.mxu1 %v10695_v56  ;;  %v5942_v56 = vld [vmem:[#allocation23 + $0xc68] sm:$0xff]  ;;  %v5911_v8 = vld [vmem:[#allocation23 + $0xb70] sm:$0xff] }
 0x760   :  { %9076 = vmatpush1.bf16.msra.mxu0 %v10544_v63  ;;  %v10625_v63 = vcombine.high %v5915_v4, %v5919_v13  ;;  %v5899_v55 = vld [vmem:[#allocation23 + $0xb10] sm:$0xff]  ;;  %v6046_v16 = vld [vmem:[#allocation23 + $0xfa8] sm:$0xff] }
 0x761   :  { %8897 = vmatmul.mubr.bf16.vlgmr.msra.gmra.mxu1 %v12613_v30  ;;  %9077 = vmatprep.subr.bf16.mxu0 %v10537_v26  ;;  %v10647_v26 = vcombine.high %v5938_v57, %v5942_v56  ;;  %v5903_v58 = vld [vmem:[#allocation23 + $0xb30] sm:$0xff]  ;;  %v6034_v17 = vld [vmem:[#allocation23 + $0xf48] sm:$0xff] }
 0x762   :  { %8947 = vmatpush1.bf16.msra.mxu1 %v10694_v18  ;;  %8978 = vmatprep.mubr.bf16.mxu1 %v12649_v59  ;;  %v10624_v18 = vcombine.low %v5915_v4, %v5919_v13  ;;  %v5891_v11 = vld [vmem:[#allocation23 + $0xad0] sm:$0xff]  ;;  %v6038_v40 = vld [vmem:[#allocation23 + $0xf68] sm:$0xff] }
 0x763   :  { %8948 = vmatprep.subr.bf16.mxu1 %v10687_v15  ;;  %v10617_v15 = vcombine.high %v5907_v29, %v5911_v8  ;;  %v5895_v2 = vld [vmem:[#allocation23 + $0xaf0] sm:$0xff]  ;;  %v6026_v4 = vld [vmem:[#allocation23 + $0xf08] sm:$0xff] }
 0x764   :  { %9078 = vmatpush1.bf16.msra.mxu0 %v10536_v36  ;;  %v10646_v36 = vcombine.low %v5938_v57, %v5942_v56  ;;  %v5883_v44 = vld [vmem:[#allocation23 + $0xa90] sm:$0xff]  ;;  %v6030_v13 = vld [vmem:[#allocation23 + $0xf28] sm:$0xff] }
 0x765   :  { %9079 = vmatprep.subr.bf16.mxu0 %v10529_v60  ;;  %v10639_v60 = vcombine.high %v5930_v46, %v5934_v47  ;;  %v5887_v42 = vld [vmem:[#allocation23 + $0xab0] sm:$0xff] }
 0x766   :  { %8949 = vmatpush1.bf16.msra.mxu1 %v10686_v43  ;;  %v10616_v43 = vcombine.low %v5907_v29, %v5911_v8  ;;  %v5875_v34 = vld [vmem:[#allocation23 + $0xa50] sm:$0xff]  ;;  %v6018_v29 = vld [vmem:[#allocation23 + $0xec8] sm:$0xff] }
 0x767   :  { %8950 = vmatprep.subr.bf16.mxu1 %v10679_v31  ;;  %v10609_v31 = vcombine.high %v5899_v55, %v5903_v58  ;;  %v5879_v50 = vld [vmem:[#allocation23 + $0xa70] sm:$0xff]  ;;  %v6022_v8 = vld [vmem:[#allocation23 + $0xee8] sm:$0xff] }
 0x768   :  { %9080 = vmatpush1.bf16.msra.mxu0 %v10528_v51  ;;  %v10638_v51 = vcombine.low %v5930_v46, %v5934_v47  ;;  %v5867_v57 = vld [vmem:[#allocation23 + $0xa10] sm:$0xff]  ;;  %v5604_v46 = vld [vmem:[#allocation23 + $0x1d8] sm:$0xff] }
 0x769   :  { %9081 = vmatprep.subr.bf16.mxu0 %v10521_v49  ;;  %v10759_v49 = vcombine.high %v6050_v28, %v6054_v10  ;;  %v5871_v56 = vld [vmem:[#allocation23 + $0xa30] sm:$0xff]  ;;  %v5608_v47 = vld [vmem:[#allocation23 + $0x1f8] sm:$0xff] }
 0x76a   :  { %8951 = vmatpush1.bf16.msra.mxu1 %v10678_v33  ;;  %v10608_v33 = vcombine.low %v5899_v55, %v5903_v58  ;;  %v6010_v55 = vld [vmem:[#allocation23 + $0xe88] sm:$0xff] }
 0x76b   :  { %8952 = vmatprep.subr.bf16.mxu1 %v10671_v9  ;;  %v10601_v9 = vcombine.high %v5891_v11, %v5895_v2  ;;  %v6014_v58 = vld [vmem:[#allocation23 + $0xea8] sm:$0xff] }
 0x76c   :  { %9082 = vmatpush1.bf16.msra.mxu0 %v10520_v37  ;;  %v10758_v37 = vcombine.low %v6050_v28, %v6054_v10  ;;  %v5596_v28 = vld [vmem:[#allocation23 + $0x198] sm:$0xff] }
 0x76d   :  { %9083 = vmatprep.subr.bf16.mxu0 %v10513_v45  ;;  %v10751_v45 = vcombine.high %v6042_v24, %v6046_v16  ;;  %v5600_v10 = vld [vmem:[#allocation23 + $0x1b8] sm:$0xff] }
 0x76e   :  { %8953 = vmatpush1.bf16.msra.mxu1 %v10670_v38  ;;  %v10600_v38 = vcombine.low %v5891_v11, %v5895_v2  ;;  %v6002_v11 = vld [vmem:[#allocation23 + $0xe48] sm:$0xff] }
 0x76f   :  { %8954 = vmatprep.subr.bf16.mxu1 %v10663_v35  ;;  %v10593_v35 = vcombine.high %v5883_v44, %v5887_v42  ;;  %v6006_v2 = vld [vmem:[#allocation23 + $0xe68] sm:$0xff] }
 0x770   :  { %9084 = vmatpush1.bf16.msra.mxu0 %v10512_v12  ;;  %v10750_v12 = vcombine.low %v6042_v24, %v6046_v16  ;;  %v5588_v24 = vld [vmem:[#allocation23 + $0x158] sm:$0xff] }
 0x771   :  { %9085 = vmatprep.subr.bf16.mxu0 %v10633_v6  ;;  %v10743_v6 = vcombine.high %v6034_v17, %v6038_v40  ;;  %v5592_v16 = vld [vmem:[#allocation23 + $0x178] sm:$0xff] }
 0x772   :  { %8955 = vmatpush1.bf16.msra.mxu1 %v10662_v14  ;;  %v10592_v14 = vcombine.low %v5883_v44, %v5887_v42  ;;  %v10306_v44 = vcombine.low %v5596_v28, %v5600_v10  ;;  %v5994_v42 = vld [vmem:[#allocation23 + $0xe08] sm:$0xff] }
 0x773   :  { %8956 = vmatprep.subr.bf16.mxu1 %v10655_v53  ;;  %v10585_v53 = vcombine.high %v5875_v34, %v5879_v50 }
 0x774   :  { %9086 = vmatpush2.bf16.msra.mxu0 %v10632_v19  ;;  %v10742_v19 = vcombine.low %v6034_v17, %v6038_v40  ;;  %v10299_v17 = vcombine.high %v5588_v24, %v5592_v16  ;;  %v10710_v40 = vcombine.low %v6002_v11, %v6006_v2 }
 0x775   :  { %9087 = vmatprep.subr.bf16.mxu0 %v10625_v63  ;;  %v10735_v63 = vcombine.high %v6026_v4, %v6030_v13 }
 0x776   :  { %8957 = vmatpush1.bf16.msra.mxu1 %v10654_v27  ;;  %v10584_v27 = vcombine.low %v5875_v34, %v5879_v50 }
 0x777   :  { %8958 = vmatprep.subr.bf16.mxu1 %v10647_v26  ;;  %v10577_v26 = vcombine.high %v5867_v57, %v5871_v56 }
 0x778   :  { %9088 = vmatpush2.bf16.msra.mxu0 %v10624_v18  ;;  %v10734_v18 = vcombine.low %v6026_v4, %v6030_v13  ;;  %v5735_v4 = vld [vmem:[#allocation23 + $0x5f0] sm:$0xff] }
 0x779   :  { %9089 = vmatprep.subr.bf16.mxu0 %v10617_v15  ;;  %v10727_v15 = vcombine.high %v6018_v29, %v6022_v8 }
 0x77a   :  { %8959 = vmatpush1.bf16.msra.mxu1 %v10646_v36  ;;  %v10576_v36 = vcombine.low %v5867_v57, %v5871_v56  ;;  %v5576_v57 = vld [vmem:[#allocation23 + $0xf8] sm:$0xff] }
 0x77b   :  { %8960 = vmatprep.subr.bf16.mxu1 %v10639_v60  ;;  %v10315_v60 = vcombine.high %v5604_v46, %v5608_v47 }
 0x77c   :  { %9090 = vmatpush2.bf16.msra.mxu0 %v10616_v43  ;;  %v10726_v43 = vcombine.low %v6018_v29, %v6022_v8  ;;  %v5727_v29 = vld [vmem:[#allocation23 + $0x5b0] sm:$0xff] }
 0x77d   :  { %9091 = vmatprep.subr.bf16.mxu0 %v10609_v31  ;;  %v10719_v31 = vcombine.high %v6010_v55, %v6014_v58 }
 0x77e   :  { %8961 = vmatpush1.bf16.msra.mxu1 %v10638_v51  ;;  %v10314_v51 = vcombine.low %v5604_v46, %v5608_v47  ;;  %v5568_v46 = vld [vmem:[#allocation23 + $0xb8] sm:$0xff] }
 0x77f   :  { %8962 = vmatprep.subr.bf16.mxu1 %v10759_v49  ;;  %v10307_v49 = vcombine.high %v5596_v28, %v5600_v10  ;;  %v5560_v28 = vld [vmem:[#allocation23 + $0x78] sm:$0xff] }
 0x780   :  { %9092 = vmatpush2.bf16.msra.mxu0 %v10608_v33  ;;  %v10718_v33 = vcombine.low %v6010_v55, %v6014_v58  ;;  %v5719_v55 = vld [vmem:[#allocation23 + $0x570] sm:$0xff] }
 0x781   :  { %9093 = vmatprep.subr.bf16.mxu0 %v10601_v9 }
 0x782   :  { %8963 = vmatpush2.bf16.msra.mxu1 %v10758_v37  ;;  %v10711_v37 = vcombine.high %v6002_v11, %v6006_v2  ;;  %v5711_v11 = vld [vmem:[#allocation23 + $0x530] sm:$0xff] }
 0x783   :  { %8964 = vmatprep.subr.bf16.mxu1 %v10751_v45  ;;  %v5998_v45 = vld [vmem:[#allocation23 + $0xe28] sm:$0xff] }
 0x784   :  { %9094 = vmatpush2.bf16.msra.mxu0 %v10600_v38  ;;  %v10703_v50 = vcombine.high %v5994_v42, %v5998_v45 }
 0x785   :  { %9095 = vmatprep.subr.bf16.mxu0 %v10593_v35  ;;  %v5580_v35 = vld [vmem:[#allocation23 + $0x118] sm:$0xff] }
 0x786   :  { %8965 = vmatpush2.bf16.msra.mxu1 %v10750_v12  ;;  %v5584_v12 = vld [vmem:[#allocation23 + $0x138] sm:$0xff] }
 0x787   :  { %8966 = vmatprep.subr.bf16.mxu1 %v10743_v6  ;;  %v10298_v6 = vcombine.low %v5588_v24, %v5592_v16  ;;  %v5552_v24 = vld [vmem:[#allocation23 + $0x38] sm:$0xff] }
 0x788   :  { %9096 = vmatpush2.bf16.msra.mxu0 %v10592_v14  ;;  %v5731_v14 = vld [vmem:[#allocation23 + $0x5d0] sm:$0xff] }
 0x789   :  { %9097 = vmatprep.subr.bf16.mxu0 %v10585_v53  ;;  %v10702_v53 = vcombine.low %v5994_v42, %v5998_v45  ;;  %v10441_v56 = vcombine.high %v5731_v14, %v5735_v4  ;;  %v5703_v42 = vld [vmem:[#allocation23 + $0x4f0] sm:$0xff] }
 0x78a   :  { %8967 = vmatpush2.bf16.msra.mxu1 %v10742_v19  ;;  %v5572_v19 = vld [vmem:[#allocation23 + $0xd8] sm:$0xff] }
 0x78b   :  { %8968 = vmatprep.subr.bf16.mxu1 %v10735_v63  ;;  %v10290_v63 = vcombine.low %v5580_v35, %v5584_v12  ;;  %v10283_v8 = vcombine.high %v5572_v19, %v5576_v57 }
 0x78c   :  { %9098 = vmatpush2.bf16.msra.mxu0 %v10584_v27  ;;  %v5723_v27 = vld [vmem:[#allocation23 + $0x590] sm:$0xff] }
 0x78d   :  { %9099 = vmatprep.subr.bf16.mxu0 %v10577_v26  ;;  %v10440_v26 = vcombine.low %v5731_v14, %v5735_v4  ;;  %v10433_v47 = vcombine.high %v5723_v27, %v5727_v29 }
 0x78e   :  { %8969 = vmatpush2.bf16.msra.mxu1 %v10734_v18  ;;  %v5564_v18 = vld [vmem:[#allocation23 + $0x98] sm:$0xff] }
 0x78f   :  { %8970 = vmatprep.subr.bf16.mxu1 %v10727_v15  ;;  %v10282_v15 = vcombine.low %v5572_v19, %v5576_v57  ;;  %v10275_v58 = vcombine.high %v5564_v18, %v5568_v46  ;;  %v5683_v57 = vld [vmem:[#allocation23 + $0x450] sm:$0xff] }
 0x790   :  { %9100 = vmatpush2.bf16.msra.mxu0 %v10576_v36  ;;  %v5715_v36 = vld [vmem:[#allocation23 + $0x550] sm:$0xff] }
 0x791   :  { %9151 = vmatprep.subr.bf16.mxu0 %v10315_v60  ;;  %v10432_v60 = vcombine.low %v5723_v27, %v5727_v29  ;;  %v10425_v10 = vcombine.high %v5715_v36, %v5719_v55  ;;  %v5652_v29 = vld [vmem:[#allocation23 + $0x358] sm:$0xff] }
 0x792   :  { %8971 = vmatpush2.bf16.msra.mxu1 %v10726_v43  ;;  %v5556_v43 = vld [vmem:[#allocation23 + $0x58] sm:$0xff] }
 0x793   :  { %v12671_v9 = vpop.f32.mrf.mxu0  ;;  %9102 = vmatmul.mubr.bf16.vlgmr.msra.gmra.mxu0 %v12606_v48  ;;  %8972 = vmatprep.subr.bf16.mxu1 %v10719_v31  ;;  %v10274_v31 = vcombine.low %v5564_v18, %v5568_v46  ;;  %v10267_v2 = vcombine.high %v5556_v43, %v5560_v28  ;;  %v5675_v46 = vld [vmem:[#allocation23 + $0x410] sm:$0xff] }
 0x794   :  { %9152 = vmatpush1.bf16.msra.mxu0 %v10314_v51  ;;  %9183 = vmatprep.mubr.bf16.mxu0 %v12519_v21  ;;  %v10291_v21 = vcombine.high %v5580_v35, %v5584_v12  ;;  %v5707_v51 = vld [vmem:[#allocation23 + $0x510] sm:$0xff]  ;;  %v5672_v35 = vld [vmem:[#allocation23 + $0x3f8] sm:$0xff] }
 0x795   :  { %v12675_v38 = vpop.f32.mrf.mxu0  ;;  %9153 = vmatprep.subr.bf16.mxu0 %v10307_v49  ;;  %v10424_v49 = vcombine.low %v5715_v36, %v5719_v55  ;;  %v10417_v16 = vcombine.high %v5707_v51, %v5711_v11  ;;  %v5644_v55 = vld [vmem:[#allocation23 + $0x318] sm:$0xff] }
 0x796   :  { %8973 = vmatpush2.bf16.msra.mxu1 %v10718_v33  ;;  %v5548_v33 = vld [vmem:[#allocation23 + $0x18] sm:$0xff] }
 0x797   :  { %v8861_v34 = vpop.f32.mrf.mxu0  ;;  %8974 = vmatprep.subr.bf16.mxu1 %v10711_v37  ;;  %v10266_v37 = vcombine.low %v5556_v43, %v5560_v28  ;;  %v10259_v45 = vcombine.high %v5548_v33, %v5552_v24  ;;  %v5795_v28 = vld [vmem:[#allocation23 + $0x7d0] sm:$0xff] }
 0x798   :  { %9154 = vmatpush1.bf16.msra.mxu0 %v10306_v44  ;;  %v5699_v44 = vld [vmem:[#allocation23 + $0x4d0] sm:$0xff]  ;;  %v10258_v34 = vcombine.low %v5548_v33, %v5552_v24 }
 0x799   :  { %v8862_v13 = vpop.f32.mrf.mxu0  ;;  %9155 = vmatprep.subr.bf16.mxu0 %v10299_v17  ;;  %v10416_v17 = vcombine.low %v5707_v51, %v5711_v11  ;;  %v10409_v12 = vcombine.high %v5699_v44, %v5703_v42  ;;  %v10408_v4 = vcombine.low %v5699_v44, %v5703_v42  ;;  %v5636_v11 = vld [vmem:[#allocation23 + $0x2d8] sm:$0xff]  ;;  %v5787_v24 = vld [vmem:[#allocation23 + $0x790] sm:$0xff] }
 0x79a   :  { %8975 = vmatpush2.bf16.msra.mxu1 %v10710_v40  ;;  %v5668_v40 = vld [vmem:[#allocation23 + $0x3d8] sm:$0xff] }
 0x79b   :  { %8976 = vmatprep.subr.bf16.mxu1 %v10703_v50  ;;  %v5691_v50 = vld [vmem:[#allocation23 + $0x490] sm:$0xff]  ;;  %v10379_v14 = vcombine.high %v5668_v40, %v5672_v35  ;;  %v5660_v13 = vld [vmem:[#allocation23 + $0x398] sm:$0xff]  ;;  %v10378_v19 = vcombine.low %v5668_v40, %v5672_v35 }
 0x79c   :  { %9156 = vmatpush1.bf16.msra.mxu0 %v10298_v6  ;;  %v5695_v6 = vld [vmem:[#allocation23 + $0x4b0] sm:$0xff]  ;;  %v5628_v42 = vld [vmem:[#allocation23 + $0x298] sm:$0xff] }
 0x79d   :  { %9157 = vmatprep.subr.bf16.mxu0 %v10291_v21  ;;  %v5664_v21 = vld [vmem:[#allocation23 + $0x3b8] sm:$0xff]  ;;  %v10400_v27 = vcombine.low %v5691_v50, %v5695_v6  ;;  %v5779_v35 = vld [vmem:[#allocation23 + $0x750] sm:$0xff] }
 0x79e   :  { %8977 = vmatpush2.bf16.msra.mxu1 %v10702_v53  ;;  %v10401_v53 = vcombine.high %v5691_v50, %v5695_v6  ;;  %v10370_v18 = vcombine.low %v5660_v13, %v5664_v21  ;;  %v5620_v6 = vld [vmem:[#allocation23 + $0x258] sm:$0xff] }
 0x79f   :  { %9028 = vmatprep.subr.bf16.mxu1 %v10441_v56  ;;  %v5687_v56 = vld [vmem:[#allocation23 + $0x470] sm:$0xff] }
 0x7a0   :  { %9158 = vmatpush1.bf16.msra.mxu0 %v10290_v63  ;;  %v10371_v63 = vcombine.high %v5660_v13, %v5664_v21  ;;  %v10392_v36 = vcombine.low %v5683_v57, %v5687_v56  ;;  %v5771_v21 = vld [vmem:[#allocation23 + $0x710] sm:$0xff] }
 0x7a1   :  { %8979 = vmatmul.mubr.bf16.vlgmr.msra.gmra.mxu1 %v12651_v54  ;;  %9159 = vmatprep.subr.bf16.mxu0 %v10283_v8  ;;  %v5656_v8 = vld [vmem:[#allocation23 + $0x378] sm:$0xff] }
 0x7a2   :  { %9029 = vmatpush1.bf16.msra.mxu1 %v10440_v26  ;;  %9060 = vmatprep.mubr.bf16.mxu1 %v12578_v23  ;;  %v10393_v26 = vcombine.high %v5683_v57, %v5687_v56  ;;  %v10362_v43 = vcombine.low %v5652_v29, %v5656_v8  ;;  %v5612_v56 = vld [vmem:[#allocation23 + $0x218] sm:$0xff] }
 0x7a3   :  { %9030 = vmatprep.subr.bf16.mxu1 %v10433_v47  ;;  %v5679_v47 = vld [vmem:[#allocation23 + $0x430] sm:$0xff] }
 0x7a4   :  { %9160 = vmatpush1.bf16.msra.mxu0 %v10282_v15  ;;  %v10363_v15 = vcombine.high %v5652_v29, %v5656_v8  ;;  %v10384_v51 = vcombine.low %v5675_v46, %v5679_v47  ;;  %v5763_v8 = vld [vmem:[#allocation23 + $0x6d0] sm:$0xff] }
 0x7a5   :  { %9161 = vmatprep.subr.bf16.mxu0 %v10275_v58  ;;  %v5648_v58 = vld [vmem:[#allocation23 + $0x338] sm:$0xff] }
 0x7a6   :  { %9031 = vmatpush1.bf16.msra.mxu1 %v10432_v60  ;;  %v10385_v60 = vcombine.high %v5675_v46, %v5679_v47  ;;  %v10354_v33 = vcombine.low %v5644_v55, %v5648_v58  ;;  %v5860_v47 = vld [vmem:[#allocation23 + $0x9d8] sm:$0xff] }
 0x7a7   :  { %9032 = vmatprep.subr.bf16.mxu1 %v10425_v10  ;;  %v5799_v10 = vld [vmem:[#allocation23 + $0x7f0] sm:$0xff] }
 0x7a8   :  { %9162 = vmatpush1.bf16.msra.mxu0 %v10274_v31  ;;  %v10355_v31 = vcombine.high %v5644_v55, %v5648_v58  ;;  %v10504_v44 = vcombine.low %v5795_v28, %v5799_v10  ;;  %v5755_v58 = vld [vmem:[#allocation23 + $0x690] sm:$0xff] }
 0x7a9   :  { %9163 = vmatprep.subr.bf16.mxu0 %v10267_v2  ;;  %v5640_v2 = vld [vmem:[#allocation23 + $0x2f8] sm:$0xff] }
 0x7aa   :  { %9033 = vmatpush1.bf16.msra.mxu1 %v10424_v49  ;;  %v10505_v49 = vcombine.high %v5795_v28, %v5799_v10  ;;  %v10346_v40 = vcombine.low %v5636_v11, %v5640_v2  ;;  %v5852_v10 = vld [vmem:[#allocation23 + $0x998] sm:$0xff] }
 0x7ab   :  { %9034 = vmatprep.subr.bf16.mxu1 %v10417_v16  ;;  %v5791_v16 = vld [vmem:[#allocation23 + $0x7b0] sm:$0xff] }
 0x7ac   :  { %9164 = vmatpush1.bf16.msra.mxu0 %v10266_v37  ;;  %v10347_v37 = vcombine.high %v5636_v11, %v5640_v2  ;;  %v10496_v50 = vcombine.low %v5787_v24, %v5791_v16  ;;  %v5747_v2 = vld [vmem:[#allocation23 + $0x650] sm:$0xff] }
 0x7ad   :  { %9165 = vmatprep.subr.bf16.mxu0 %v10259_v45  ;;  %v5632_v45 = vld [vmem:[#allocation23 + $0x2b8] sm:$0xff] }
 0x7ae   :  { %9035 = vmatpush1.bf16.msra.mxu1 %v10416_v17  ;;  %v10497_v17 = vcombine.high %v5787_v24, %v5791_v16  ;;  %v10338_v13 = vcombine.low %v5628_v42, %v5632_v45  ;;  %v5844_v16 = vld [vmem:[#allocation23 + $0x958] sm:$0xff] }
 0x7af   :  { %9036 = vmatprep.subr.bf16.mxu1 %v10409_v12  ;;  %v5783_v12 = vld [vmem:[#allocation23 + $0x770] sm:$0xff] }
 0x7b0   :  { %9166 = vmatpush1.bf16.msra.mxu0 %v10258_v34  ;;  %v10339_v34 = vcombine.high %v5628_v42, %v5632_v45  ;;  %v10488_v57 = vcombine.low %v5779_v35, %v5783_v12 }
 0x7b1   :  { %9167 = vmatprep.subr.bf16.mxu0 %v10379_v14  ;;  %v5624_v14 = vld [vmem:[#allocation23 + $0x278] sm:$0xff] }
 0x7b2   :  { %9037 = vmatpush1.bf16.msra.mxu1 %v10408_v4  ;;  %v10489_v4 = vcombine.high %v5779_v35, %v5783_v12  ;;  %v10330_v29 = vcombine.low %v5620_v6, %v5624_v14 }
 0x7b3   :  { %9038 = vmatprep.subr.bf16.mxu1 %v10401_v53  ;;  %v5775_v53 = vld [vmem:[#allocation23 + $0x730] sm:$0xff] }
 0x7b4   :  { %9168 = vmatpush2.bf16.msra.mxu0 %v10378_v19  ;;  %v10331_v19 = vcombine.high %v5620_v6, %v5624_v14  ;;  %v10480_v46 = vcombine.low %v5771_v21, %v5775_v53  ;;  %v5840_v6 = vld [vmem:[#allocation23 + $0x938] sm:$0xff] }
 0x7b5   :  { %9169 = vmatprep.subr.bf16.mxu0 %v10371_v63  ;;  %v5616_v63 = vld [vmem:[#allocation23 + $0x238] sm:$0xff] }
 0x7b6   :  { %9039 = vmatpush1.bf16.msra.mxu1 %v10400_v27  ;;  %v10481_v27 = vcombine.high %v5771_v21, %v5775_v53  ;;  %v10322_v55 = vcombine.low %v5612_v56, %v5616_v63  ;;  %v5991_v21 = vld [vmem:[#allocation23 + $0xdf0] sm:$0xff] }
 0x7b7   :  { %9040 = vmatprep.subr.bf16.mxu1 %v10393_v26  ;;  %v5767_v26 = vld [vmem:[#allocation23 + $0x6f0] sm:$0xff] }
 0x7b8   :  { %9170 = vmatpush2.bf16.msra.mxu0 %v10370_v18  ;;  %v10323_v18 = vcombine.high %v5612_v56, %v5616_v63  ;;  %v10472_v28 = vcombine.low %v5763_v8, %v5767_v26  ;;  %v5832_v56 = vld [vmem:[#allocation23 + $0x8f8] sm:$0xff] }
 0x7b9   :  { %9171 = vmatprep.subr.bf16.mxu0 %v10363_v15  ;;  %v5864_v15 = vld [vmem:[#allocation23 + $0x9f8] sm:$0xff] }
 0x7ba   :  { %9041 = vmatpush1.bf16.msra.mxu1 %v10392_v36  ;;  %v10473_v36 = vcombine.high %v5763_v8, %v5767_v26  ;;  %v10570_v11 = vcombine.low %v5860_v47, %v5864_v15  ;;  %v5983_v8 = vld [vmem:[#allocation23 + $0xdb0] sm:$0xff] }
 0x7bb   :  { %9042 = vmatprep.subr.bf16.mxu1 %v10385_v60  ;;  %v5759_v60 = vld [vmem:[#allocation23 + $0x6b0] sm:$0xff] }
 0x7bc   :  { %9172 = vmatpush2.bf16.msra.mxu0 %v10362_v43  ;;  %v10571_v43 = vcombine.high %v5860_v47, %v5864_v15  ;;  %v10464_v24 = vcombine.low %v5755_v58, %v5759_v60  ;;  %v5824_v47 = vld [vmem:[#allocation23 + $0x8b8] sm:$0xff] }
 0x7bd   :  { %9173 = vmatprep.subr.bf16.mxu0 %v10355_v31  ;;  %v5856_v31 = vld [vmem:[#allocation23 + $0x9b8] sm:$0xff] }
 0x7be   :  { %9043 = vmatpush1.bf16.msra.mxu1 %v10384_v51  ;;  %v10465_v51 = vcombine.high %v5755_v58, %v5759_v60  ;;  %v10562_v45 = vcombine.low %v5852_v10, %v5856_v31  ;;  %v5971_v58 = vld [vmem:[#allocation23 + $0xd50] sm:$0xff] }
 0x7bf   :  { %9044 = vmatprep.subr.bf16.mxu1 %v10505_v49  ;;  %v5751_v49 = vld [vmem:[#allocation23 + $0x670] sm:$0xff] }
 0x7c0   :  { %9174 = vmatpush2.bf16.msra.mxu0 %v10354_v33  ;;  %v10563_v33 = vcombine.high %v5852_v10, %v5856_v31  ;;  %v10457_v42 = vcombine.high %v5747_v2, %v5751_v49  ;;  %v5975_v60 = vld [vmem:[#allocation23 + $0xd70] sm:$0xff] }
 0x7c1   :  { %9175 = vmatprep.subr.bf16.mxu0 %v10347_v37  ;;  %v5848_v37 = vld [vmem:[#allocation23 + $0x978] sm:$0xff] }
 0x7c2   :  { %9045 = vmatpush2.bf16.msra.mxu1 %v10504_v44  ;;  %v10555_v12 = vcombine.high %v5844_v16, %v5848_v37 }
 0x7c3   :  { %9046 = vmatprep.subr.bf16.mxu1 %v10497_v17  ;;  %v5739_v17 = vld [vmem:[#allocation23 + $0x610] sm:$0xff] }
 0x7c4   :  { %9176 = vmatpush2.bf16.msra.mxu0 %v10346_v40  ;;  %v5743_v40 = vld [vmem:[#allocation23 + $0x630] sm:$0xff] }
 0x7c5   :  { %9177 = vmatprep.subr.bf16.mxu0 %v10339_v34  ;;  %v10456_v34 = vcombine.low %v5747_v2, %v5751_v49 }
 0x7c6   :  { %9047 = vmatpush2.bf16.msra.mxu1 %v10496_v50  ;;  %v5836_v50 = vld [vmem:[#allocation23 + $0x918] sm:$0xff] }
 0x7c7   :  { %9048 = vmatprep.subr.bf16.mxu1 %v10489_v4  ;;  %v10449_v4 = vcombine.high %v5739_v17, %v5743_v40 }
 0x7c8   :  { %9178 = vmatpush2.bf16.msra.mxu0 %v10338_v13  ;;  %v5987_v13 = vld [vmem:[#allocation23 + $0xdd0] sm:$0xff] }
 0x7c9   :  { %9179 = vmatprep.subr.bf16.mxu0 %v10331_v19  ;;  %v10448_v19 = vcombine.low %v5739_v17, %v5743_v40  ;;  %v10697_v63 = vcombine.high %v5987_v13, %v5991_v21 }
 0x7ca   :  { %9049 = vmatpush2.bf16.msra.mxu1 %v10488_v57  ;;  %v5828_v57 = vld [vmem:[#allocation23 + $0x8d8] sm:$0xff] }
 0x7cb   :  { %9050 = vmatprep.subr.bf16.mxu1 %v10481_v27  ;;  %v10546_v27 = vcombine.low %v5836_v50, %v5840_v6  ;;  %v10539_v26 = vcombine.high %v5828_v57, %v5832_v56 }
 0x7cc   :  { %9180 = vmatpush2.bf16.msra.mxu0 %v10330_v29  ;;  %v5979_v29 = vld [vmem:[#allocation23 + $0xd90] sm:$0xff] }
 0x7cd   :  { %9181 = vmatprep.subr.bf16.mxu0 %v10323_v18  ;;  %v10696_v18 = vcombine.low %v5987_v13, %v5991_v21  ;;  %v10689_v15 = vcombine.high %v5979_v29, %v5983_v8  ;;  %v10688_v31 = vcombine.low %v5979_v29, %v5983_v8  ;;  %v5959_v13 = vld [vmem:[#allocation23 + $0xcf0] sm:$0xff] }
 0x7ce   :  { %9051 = vmatpush2.bf16.msra.mxu1 %v10480_v46  ;;  %v5820_v46 = vld [vmem:[#allocation23 + $0x898] sm:$0xff]  ;;  %v5951_v29 = vld [vmem:[#allocation23 + $0xcb0] sm:$0xff] }
 0x7cf   :  { %9052 = vmatprep.subr.bf16.mxu1 %v10473_v36  ;;  %v12685_v36 = vld [vmem:[#allocation26] sm:$0xff] }
 0x7d0   :  { %9182 = vmatpush2.bf16.msra.mxu0 %v10322_v55  ;;  %v10538_v55 = vcombine.low %v5828_v57, %v5832_v56  ;;  %v9328_v2 = vrot.slane %v12685_v36, %v12500_v0  ;;  %v5804_v0 = vld [vmem:[#allocation23 + $0x818] sm:$0xff] }
 0x7d1   :  { %9233 = vmatprep.subr.bf16.mxu0 %v10571_v43  ;;  %v5928_v57 = vld [vmem:[#allocation23 + $0xbf8] sm:$0xff] }
 0x7d2   :  { %9053 = vmatpush2.bf16.msra.mxu1 %v10472_v28  ;;  %v10531_v28 = vcombine.high %v5820_v46, %v5824_v47 }
 0x7d3   :  { %v12679_v44 = vpop.f32.mrf.mxu0  ;;  %9184 = vmatmul.mubr.bf16.vlgmr.msra.gmra.mxu0 %v12521_v25  ;;  %9054 = vmatprep.subr.bf16.mxu1 %v10465_v51  ;;  %v10554_v25 = vcombine.low %v5844_v16, %v5848_v37  ;;  %v5812_v51 = vld [vmem:[#allocation23 + $0x858] sm:$0xff]  ;;  %v9332_v37 = vrot.slane %v12685_v36, %v12505_v7  ;;  %v5955_v7 = vld [vmem:[#allocation23 + $0xcd0] sm:$0xff] }
 0x7d4   :  { %9234 = vmatpush1.bf16.msra.mxu0 %v10570_v11  ;;  %9265 = vmatprep.mubr.bf16.mxu0 %v12603_v1  ;;  %v10547_v1 = vcombine.high %v5836_v50, %v5840_v6  ;;  %v5816_v11 = vld [vmem:[#allocation23 + $0x878] sm:$0xff]  ;;  %v10665_v56 = vcombine.high %v5955_v7, %v5959_v13 }
 0x7d5   :  { %v12683_v35 = vpop.f32.mrf.mxu0  ;;  %9235 = vmatprep.subr.bf16.mxu0 %v10563_v33  ;;  %v10681_v33 = vcombine.high %v5971_v58, %v5975_v60  ;;  %v10523_v40 = vcombine.high %v5812_v51, %v5816_v11  ;;  %v5808_v50 = vld [vmem:[#allocation23 + $0x838] sm:$0xff] }
 0x7d6   :  { %9055 = vmatpush2.bf16.msra.mxu1 %v10464_v24  ;;  %v10515_v21 = vcombine.high %v5804_v0, %v5808_v50 }
 0x7d7   :  { %v8943_v14 = vpop.f32.mrf.mxu0  ;;  %9056 = vmatprep.subr.bf16.mxu1 %v10457_v42  ;;  %v5963_v42 = vld [vmem:[#allocation23 + $0xd10] sm:$0xff] }
 0x7d8   :  { %9236 = vmatpush1.bf16.msra.mxu0 %v10562_v45  ;;  %v5967_v45 = vld [vmem:[#allocation23 + $0xd30] sm:$0xff] }
 0x7d9   :  { %v8944_v53 = vpop.f32.mrf.mxu0  ;;  %9237 = vmatprep.subr.bf16.mxu0 %v10555_v12  ;;  %v10673_v14 = vcombine.high %v5963_v42, %v5967_v45 }
 0x7da   :  { %9057 = vmatpush2.bf16.msra.mxu1 %v10456_v34  ;;  %v10680_v34 = vcombine.low %v5971_v58, %v5975_v60  ;;  %v5943_v58 = vld [vmem:[#allocation23 + $0xc70] sm:$0xff] }
 0x7db   :  { %9058 = vmatprep.subr.bf16.mxu1 %v10449_v4 }
 0x7dc   :  { %9238 = vmatpush1.bf16.msra.mxu0 %v10554_v25  ;;  %v10522_v25 = vcombine.low %v5812_v51, %v5816_v11  ;;  %v5931_v11 = vld [vmem:[#allocation23 + $0xc10] sm:$0xff] }
 0x7dd   :  { %9239 = vmatprep.subr.bf16.mxu0 %v10547_v1  ;;  %v10672_v1 = vcombine.low %v5963_v42, %v5967_v45  ;;  %v6051_v42 = vld [vmem:[#allocation23 + $0xfd0] sm:$0xff] }
 0x7de   :  { %9059 = vmatpush2.bf16.msra.mxu1 %v10448_v19  ;;  %v5924_v19 = vld [vmem:[#allocation23 + $0xbd8] sm:$0xff]  ;;  %v6055_v45 = vld [vmem:[#allocation23 + $0xff0] sm:$0xff] }
 0x7df   :  { %9110 = vmatprep.subr.bf16.mxu1 %v10697_v63  ;;  %v10514_v63 = vcombine.low %v5804_v0, %v5808_v50  ;;  %v10635_v8 = vcombine.high %v5924_v19, %v5928_v57  ;;  %v10761_v0 = vcombine.high %v6051_v42, %v6055_v45 }
 0x7e0   :  { %9240 = vmatpush1.bf16.msra.mxu0 %v10546_v27  ;;  %v5947_v27 = vld [vmem:[#allocation23 + $0xc90] sm:$0xff] }
 0x7e1   :  { %9061 = vmatmul.mubr.bf16.vlgmr.msra.gmra.mxu1 %v12613_v30  ;;  %v8816_v43 = vpop.f32.mrf.mxu1  ;;  %9241 = vmatprep.subr.bf16.mxu0 %v10539_v26  ;;  %v10664_v26 = vcombine.low %v5955_v7, %v5959_v13  ;;  %v5888_v7 = vld [vmem:[#allocation23 + $0xab8] sm:$0xff] }
 0x7e2   :  { %v8817_v10 = vadd.f32 %v8816_v43, %v12665_v20  ;;  %9111 = vmatpush1.bf16.msra.mxu1 %v10696_v18  ;;  %9142 = vmatprep.mubr.bf16.mxu1 %v12649_v59  ;;  %v10530_v20 = vcombine.low %v5820_v46, %v5824_v47  ;;  %v5916_v18 = vld [vmem:[#allocation23 + $0xb98] sm:$0xff]  ;;  %v10657_v47 = vcombine.high %v5947_v27, %v5951_v29 }
 0x7e3   :  { %v8818_v49 = vpop.f32.mrf.mxu1  ;;  %9112 = vmatprep.subr.bf16.mxu1 %v10689_v15  ;;  %v5920_v46 = vld [vmem:[#allocation23 + $0xbb8] sm:$0xff]  ;;  %v10634_v15 = vcombine.low %v5924_v19, %v5928_v57  ;;  %v10656_v43 = vcombine.low %v5947_v27, %v5951_v29  ;;  %v6039_v19 = vld [vmem:[#allocation23 + $0xf70] sm:$0xff] }
 0x7e4   :  { %v9315_v24 = vmax.f32 %v8817_v10, 0.0  ;;  %v8819_v16 = vadd.f32 %v8818_v49, %v12667_v41  ;;  %9242 = vmatpush1.bf16.msra.mxu0 %v10538_v55  ;;  %v5939_v55 = vld [vmem:[#allocation23 + $0xc50] sm:$0xff]  ;;  %v10627_v60 = vcombine.high %v5916_v18, %v5920_v46  ;;  %v5912_v10 = vld [vmem:[#allocation23 + $0xb78] sm:$0xff]  ;;  %v10626_v51 = vcombine.low %v5916_v18, %v5920_v46 }
 0x7e5   :  { %v8820_v17 = vpop.f32.mrf.mxu1  ;;  %9243 = vmatprep.subr.bf16.mxu0 %v10531_v28  ;;  %v5908_v28 = vld [vmem:[#allocation23 + $0xb58] sm:$0xff]  ;;  %v6031_v18 = vld [vmem:[#allocation23 + $0xf30] sm:$0xff] }
 0x7e6   :  { %v9316_v12 = vmax.f32 %v8819_v16, 0.0  ;;  %9113 = vmatpush1.bf16.msra.mxu1 %v10688_v31  ;;  %v9365_v4 = vmul.f32 %v9328_v2, %v9315_v24  ;;  %v10649_v31 = vcombine.high %v5939_v55, %v5943_v58  ;;  %v5935_v2 = vld [vmem:[#allocation23 + $0xc30] sm:$0xff]  ;;  %v10619_v49 = vcombine.high %v5908_v28, %v5912_v10  ;;  %v5900_v24 = vld [vmem:[#allocation23 + $0xb18] sm:$0xff] }
 0x7e7   :  { %v8821_v6 = vpop.f32.mrf.mxu1  ;;  %9114 = vmatprep.subr.bf16.mxu1 %v10681_v33  ;;  %v10648_v33 = vcombine.low %v5939_v55, %v5943_v58  ;;  %v5904_v16 = vld [vmem:[#allocation23 + $0xb38] sm:$0xff] }
 0x7e8   :  { %v9366_v41 = vmul.f32 %v9332_v37, %v9316_v12  ;;  %9244 = vmatpush1.bf16.msra.mxu0 %v10530_v20  ;;  %v10641_v37 = vcombine.high %v5931_v11, %v5935_v2  ;;  %v10618_v20 = vcombine.low %v5908_v28, %v5912_v10  ;;  %v10611_v17 = vcombine.high %v5900_v24, %v5904_v16  ;;  %v5892_v12 = vld [vmem:[#allocation23 + $0xad8] sm:$0xff]  ;;  %v6043_v6 = vld [vmem:[#allocation23 + $0xf90] sm:$0xff] }
 0x7e9   :  { %9245 = vmatprep.subr.bf16.mxu0 %v10523_v40  ;;  %v10640_v40 = vcombine.low %v5931_v11, %v5935_v2  ;;  %v10610_v50 = vcombine.low %v5900_v24, %v5904_v16  ;;  %v5880_v27 = vld [vmem:[#allocation23 + $0xa78] sm:$0xff]  ;;  %v6023_v28 = vld [vmem:[#allocation23 + $0xef0] sm:$0xff] }
 0x7ea   :  { %v12695_v53 = vadd.f32 %v9366_v41, %v9365_v4  ;;  %9115 = vmatpush1.bf16.msra.mxu1 %v10680_v34  ;;  %v5896_v34 = vld [vmem:[#allocation23 + $0xaf8] sm:$0xff]  ;;  %v10760_v41 = vcombine.low %v6051_v42, %v6055_v45  ;;  %v6011_v2 = vld [vmem:[#allocation23 + $0xe90] sm:$0xff] }
 0x7eb   :  { %9116 = vmatprep.subr.bf16.mxu1 %v10673_v14  ;;  %v6047_v14 = vld [vmem:[#allocation23 + $0xfb0] sm:$0xff]  ;;  %v10603_v4 = vcombine.high %v5892_v12, %v5896_v34  ;;  %v5872_v55 = vld [vmem:[#allocation23 + $0xa38] sm:$0xff] }
 0x7ec   :  { %9246 = vmatpush1.bf16.msra.mxu0 %v10522_v25  ;;  %v5884_v25 = vld [vmem:[#allocation23 + $0xa98] sm:$0xff]  ;;  %v10753_v13 = vcombine.high %v6043_v6, %v6047_v14  ;;  %v6003_v16 = vld [vmem:[#allocation23 + $0xe50] sm:$0xff] }
 0x7ed   :  { %9247 = vmatprep.subr.bf16.mxu0 %v10515_v21  ;;  %v10602_v21 = vcombine.low %v5892_v12, %v5896_v34  ;;  %v10595_v57 = vcombine.high %v5884_v25, %v5888_v7  ;;  %v5995_v12 = vld [vmem:[#allocation23 + $0xe10] sm:$0xff] }
 0x7ee   :  { %9117 = vmatpush1.bf16.msra.mxu1 %v10672_v1  ;;  %v6035_v1 = vld [vmem:[#allocation23 + $0xf50] sm:$0xff] }
 0x7ef   :  { %9118 = vmatprep.subr.bf16.mxu1 %v10665_v56  ;;  %v10752_v56 = vcombine.low %v6043_v6, %v6047_v14  ;;  %v10745_v29 = vcombine.high %v6035_v1, %v6039_v19  ;;  %v5999_v34 = vld [vmem:[#allocation23 + $0xe30] sm:$0xff] }
 0x7f0   :  { %9248 = vmatpush1.bf16.msra.mxu0 %v10514_v63  ;;  %v5876_v63 = vld [vmem:[#allocation23 + $0xa58] sm:$0xff]  ;;  %v10705_v14 = vcombine.high %v5995_v12, %v5999_v34 }
 0x7f1   :  { %9249 = vmatprep.subr.bf16.mxu0 %v10635_v8  ;;  %v10594_v8 = vcombine.low %v5884_v25, %v5888_v7  ;;  %v10587_v46 = vcombine.high %v5876_v63, %v5880_v27  ;;  %v5736_v25 = vld [vmem:[#allocation23 + $0x5f8] sm:$0xff] }
 0x7f2   :  { %9119 = vmatpush1.bf16.msra.mxu1 %v10664_v26  ;;  %v6027_v26 = vld [vmem:[#allocation23 + $0xf10] sm:$0xff] }
 0x7f3   :  { %9120 = vmatprep.subr.bf16.mxu1 %v10657_v47  ;;  %v10744_v47 = vcombine.low %v6035_v1, %v6039_v19  ;;  %v10737_v58 = vcombine.high %v6027_v26, %v6031_v18  ;;  %v12717_v1 = vld [vmem:[#allocation24] sm:$0xff] }
 0x7f4   :  { %9250 = vmatpush2.bf16.msra.mxu0 %v10634_v15  ;;  %v5868_v15 = vld [vmem:[#allocation23 + $0xa18] sm:$0xff]  ;;  %v6070_v19 = vrot.slane %v12717_v1, %v12538_v22 }
 0x7f5   :  { %9251 = vmatprep.subr.bf16.mxu0 %v10627_v60  ;;  %v10586_v60 = vcombine.low %v5876_v63, %v5880_v27  ;;  %v10579_v10 = vcombine.high %v5868_v15, %v5872_v55  ;;  %v10578_v11 = vcombine.low %v5868_v15, %v5872_v55  ;;  %v6074_v63 = vrot.slane %v12717_v1, %v12541_v32 }
 0x7f6   :  { %9121 = vmatpush1.bf16.msra.mxu1 %v10656_v43  ;;  %v6019_v43 = vld [vmem:[#allocation23 + $0xed0] sm:$0xff] }
 0x7f7   :  { %9122 = vmatprep.subr.bf16.mxu1 %v10649_v31  ;;  %v10736_v31 = vcombine.low %v6027_v26, %v6031_v18  ;;  %v5716_v26 = vld [vmem:[#allocation23 + $0x558] sm:$0xff] }
 0x7f8   :  { %9252 = vmatpush2.bf16.msra.mxu0 %v10626_v51  ;;  %v10729_v51 = vcombine.high %v6019_v43, %v6023_v28  ;;  %v5720_v18 = vld [vmem:[#allocation23 + $0x578] sm:$0xff] }
 0x7f9   :  { %9253 = vmatprep.subr.bf16.mxu0 %v10619_v49  ;;  %v6015_v49 = vld [vmem:[#allocation23 + $0xeb0] sm:$0xff] }
 0x7fa   :  { %9123 = vmatpush1.bf16.msra.mxu1 %v10648_v33  ;;  %v10728_v33 = vcombine.low %v6019_v43, %v6023_v28  ;;  %v10721_v24 = vcombine.high %v6011_v2, %v6015_v49  ;;  %v10720_v42 = vcombine.low %v6011_v2, %v6015_v49  ;;  %v5708_v28 = vld [vmem:[#allocation23 + $0x518] sm:$0xff] }
 0x7fb   :  { %9124 = vmatprep.subr.bf16.mxu1 %v10641_v37  ;;  %v6007_v37 = vld [vmem:[#allocation23 + $0xe70] sm:$0xff]  ;;  %v5704_v2 = vld [vmem:[#allocation23 + $0x4f8] sm:$0xff] }
 0x7fc   :  { %9254 = vmatpush2.bf16.msra.mxu0 %v10618_v20  ;;  %v9399_v20 = vld [vmem:[%s12819_s21 + $0x10] sm:$0xff] }
 0x7fd   :  { %9255 = vmatprep.subr.bf16.mxu0 %v10611_v17  ;;  %v9398_v17 = vld [vmem:[%s12819_s21 + $0x8] sm:$0xff] }
 0x7fe   :  { %9125 = vmatpush1.bf16.msra.mxu1 %v10640_v40  ;;  %v10713_v40 = vcombine.high %v6003_v16, %v6007_v37 }
 0x7ff   :  { %9126 = vmatprep.subr.bf16.mxu1 %v10761_v0 }
 0x800   :  { %9256 = vmatpush2.bf16.msra.mxu0 %v10610_v50  ;;  %v10712_v50 = vcombine.low %v6003_v16, %v6007_v37 }
 0x801   :  { %9257 = vmatprep.subr.bf16.mxu0 %v10603_v4  ;;  %v9396_v4 = vld [vmem:[#allocation27] sm:$0x3] }
 0x802   :  { %9127 = vmatpush2.bf16.msra.mxu1 %v10760_v41  ;;  %v5732_v41 = vld [vmem:[#allocation23 + $0x5d8] sm:$0xff] }
 0x803   :  { %9128 = vmatprep.subr.bf16.mxu1 %v10753_v13  ;;  %v10704_v13 = vcombine.low %v5995_v12, %v5999_v34  ;;  %v10442_v27 = vcombine.low %v5732_v41, %v5736_v25  ;;  %v5676_v12 = vld [vmem:[#allocation23 + $0x418] sm:$0xff] }
 0x804   :  { %9258 = vmatpush2.bf16.msra.mxu0 %v10602_v21  ;;  %v10443_v21 = vcombine.high %v5732_v41, %v5736_v25  ;;  %v5680_v34 = vld [vmem:[#allocation23 + $0x438] sm:$0xff] }
 0x805   :  { %9259 = vmatprep.subr.bf16.mxu0 %v10595_v57  ;;  %v5724_v57 = vld [vmem:[#allocation23 + $0x598] sm:$0xff] }
 0x806   :  { %9129 = vmatpush2.bf16.msra.mxu1 %v10752_v56  ;;  %v5728_v56 = vld [vmem:[#allocation23 + $0x5b8] sm:$0xff] }
 0x807   :  { %9130 = vmatprep.subr.bf16.mxu1 %v10745_v29  ;;  %v10435_v29 = vcombine.high %v5724_v57, %v5728_v56  ;;  %v10434_v55 = vcombine.low %v5724_v57, %v5728_v56  ;;  %v5788_v25 = vld [vmem:[#allocation23 + $0x798] sm:$0xff] }
 0x808   :  { %9260 = vmatpush2.bf16.msra.mxu0 %v10594_v8  ;;  %v8858_v8 = vadd.f32 %v12671_v9, %v6070_v19  ;;  %v5712_v9 = vld [vmem:[#allocation23 + $0x538] sm:$0xff] }
 0x809   :  { %9261 = vmatprep.subr.bf16.mxu0 %v10587_v46  ;;  %v10418_v49 = vcombine.low %v5708_v28, %v5712_v9  ;;  %v5780_v19 = vld [vmem:[#allocation23 + $0x758] sm:$0xff] }
 0x80a   :  { %9131 = vmatpush2.bf16.msra.mxu1 %v10744_v47  ;;  %v8860_v47 = vadd.f32 %v12675_v38, %v6074_v63  ;;  %v5700_v38 = vld [vmem:[#allocation23 + $0x4d8] sm:$0xff] }
 0x80b   :  { %9132 = vmatprep.subr.bf16.mxu1 %v10737_v58  ;;  %v10410_v16 = vcombine.low %v5700_v38, %v5704_v2  ;;  %v5784_v57 = vld [vmem:[#allocation23 + $0x778] sm:$0xff] }
 0x80c   :  { %9262 = vmatpush2.bf16.msra.mxu0 %v10586_v60  ;;  %v10427_v60 = vcombine.high %v5716_v26, %v5720_v18  ;;  %v10491_v63 = vcombine.high %v5780_v19, %v5784_v57 }
 0x80d   :  { %9263 = vmatprep.subr.bf16.mxu0 %v10579_v10 }
 0x80e   :  { %9133 = vmatpush2.bf16.msra.mxu1 %v10736_v31  ;;  %v10426_v31 = vcombine.low %v5716_v26, %v5720_v18  ;;  %v5764_v18 = vld [vmem:[#allocation23 + $0x6d8] sm:$0xff] }
 0x80f   :  { %9134 = vmatprep.subr.bf16.mxu1 %v10729_v51 }
 0x810   :  { %9264 = vmatpush2.bf16.msra.mxu0 %v10578_v11  ;;  %v10419_v11 = vcombine.high %v5708_v28, %v5712_v9 }
 0x811   :  { %11124 = vmatprep.subr.mxu0 %v11554_v3 }
 0x812   :  { %9135 = vmatpush2.bf16.msra.mxu1 %v10728_v33  ;;  %v5692_v33 = vld [vmem:[#allocation23 + $0x498] sm:$0xff] }
 0x813   :  { %v12701_v45 = vpop.f32.mrf.mxu0  ;;  %9266 = vmatmul.mubr.bf16.vlgmr.msra.gmra.mxu0 %v12606_v48  ;;  %9136 = vmatprep.subr.bf16.mxu1 %v10721_v24  ;;  %v9397_v48 = vld [vmem:[%s12819_s21] sm:$0xff]  ;;  %v5696_v24 = vld [vmem:[#allocation23 + $0x4b8] sm:$0xff] }
 0x814   :  { %11125 = vmatpush3.msra.mxu0 %v9399_v20  ;;  %11130 = vmatprep.mubr.msk.f32.mxu0 %vm11555_vm0, %v11554_v3  ;;  %v10403_v37 = vcombine.high %v5692_v33, %v5696_v24  ;;  %v5684_v20 = vld [vmem:[#allocation23 + $0x458] sm:$0xff] }
 0x815   :  { %v12709_v0 = vpop.f32.mrf.mxu0  ;;  %11126 = vmatprep.subr.mxu0 %v11554_v3 }
 0x816   :  { %9137 = vmatpush2.bf16.msra.mxu1 %v10720_v42  ;;  %11127 = vmatpush3.msra.mxu0 %v9398_v17  ;;  %v5688_v42 = vld [vmem:[#allocation23 + $0x478] sm:$0xff]  ;;  %v10402_v17 = vcombine.low %v5692_v33, %v5696_v24 }
 0x817   :  { %v9025_v6 = vpop.f32.mrf.mxu0  ;;  %9138 = vmatprep.subr.bf16.mxu1 %v10713_v40  ;;  %11128 = vmatprep.subr.mxu0 %v11554_v3  ;;  %v10395_v40 = vcombine.high %v5684_v20, %v5688_v42 }
 0x818   :  { %11129 = vmatpush3.msra.mxu0 %v9397_v48  ;;  %v10394_v48 = vcombine.low %v5684_v20, %v5688_v42  ;;  %v5796_v6 = vld [vmem:[#allocation23 + $0x7d8] sm:$0xff] }
 0x819   :  { %v9026_v7 = vpop.f32.mrf.mxu0  ;;  %11140 = vmatprep.subr.mxu0 %v11554_v3  ;;  %v5992_v20 = vld [vmem:[#allocation23 + $0xdf8] sm:$0xff] }
 0x81a   :  { %9139 = vmatpush2.bf16.msra.mxu1 %v10712_v50  ;;  %v10387_v50 = vcombine.high %v5676_v12, %v5680_v34  ;;  %v5792_v7 = vld [vmem:[#allocation23 + $0x7b8] sm:$0xff] }
 0x81b   :  { %11131 = vmatmul.mubr.msk.f32.vlgmr.msra.gmra.mxu0 %vm9407_vm11, %v9396_v4  ;;  %9140 = vmatprep.subr.bf16.mxu1 %v10705_v14  ;;  %v5800_v14 = vld [vmem:[#allocation23 + $0x7f8] sm:$0xff]  ;;  %v10386_v4 = vcombine.low %v5676_v12, %v5680_v34  ;;  %v10498_v56 = vcombine.low %v5788_v25, %v5792_v7 }
 0x81c   :  { %11142 = vmatprep.mubr.msk.f32.mxu0 %vm11555_vm0, %v11554_v3  ;;  %v10507_v41 = vcombine.high %v5796_v6, %v5800_v14  ;;  %v5980_v12 = vld [vmem:[#allocation23 + $0xd98] sm:$0xff] }
 0x81d   :  { %v5984_v34 = vld [vmem:[#allocation23 + $0xdb8] sm:$0xff] }
 0x81e   :  { %9141 = vmatpush2.bf16.msra.mxu1 %v10704_v13  ;;  %v10506_v13 = vcombine.low %v5796_v6, %v5800_v14  ;;  %v5972_v14 = vld [vmem:[#allocation23 + $0xd58] sm:$0xff] }
 0x81f   :  { %9192 = vmatprep.subr.bf16.mxu1 %v10443_v21  ;;  %v10499_v21 = vcombine.high %v5788_v25, %v5792_v7  ;;  %v9336_v25 = vrot.slane %v12685_v36, %v12538_v22  ;;  %v5968_v22 = vld [vmem:[#allocation23 + $0xd38] sm:$0xff] }
 0x821   :  { %v8898_v46 = vpop.f32.mrf.mxu1  ;;  %9143 = vmatmul.mubr.bf16.vlgmr.msra.gmra.mxu1 %v12651_v54 }
 0x822   :  { %v12728_v15 = vadd.f32 %v8898_v46, %v8858_v8  ;;  %9193 = vmatpush1.bf16.msra.mxu1 %v10442_v27  ;;  %9224 = vmatprep.mubr.bf16.mxu1 %v12578_v23  ;;  %v10411_v23 = vcombine.high %v5700_v38, %v5704_v2  ;;  %v5772_v27 = vld [vmem:[#allocation23 + $0x718] sm:$0xff]  ;;  %v10490_v8 = vcombine.low %v5780_v19, %v5784_v57 }
 0x823   :  { %v8900_v58 = vpop.f32.mrf.mxu1  ;;  %9194 = vmatprep.subr.bf16.mxu1 %v10435_v29  ;;  %v5776_v29 = vld [vmem:[#allocation23 + $0x738] sm:$0xff] }
 0x824   :  { %v12731_v43 = vadd.f32 %v8900_v58, %v8860_v47  ;;  %v10483_v26 = vcombine.high %v5772_v27, %v5776_v29  ;;  %v5768_v46 = vld [vmem:[#allocation23 + $0x6f8] sm:$0xff]  ;;  %v10482_v47 = vcombine.low %v5772_v27, %v5776_v29  ;;  %v8940_v6 = vadd.f32 %v12679_v44, %v12728_v15 }
 0x825   :  { %v8902_v10 = vpop.f32.mrf.mxu1  ;;  %v5756_v58 = vld [vmem:[#allocation23 + $0x698] sm:$0xff]  ;;  %v10474_v28 = vcombine.low %v5764_v18, %v5768_v46 }
 0x826   :  { %9195 = vmatpush1.bf16.msra.mxu1 %v10434_v55  ;;  %v10475_v55 = vcombine.high %v5764_v18, %v5768_v46  ;;  %v5748_v10 = vld [vmem:[#allocation23 + $0x658] sm:$0xff] }
 0x827   :  { %v8903_v51 = vpop.f32.mrf.mxu1  ;;  %9196 = vmatprep.subr.bf16.mxu1 %v10427_v60  ;;  %v5760_v60 = vld [vmem:[#allocation23 + $0x6b8] sm:$0xff] }
 0x828   :  { %v10467_v9 = vcombine.high %v5756_v58, %v5760_v60  ;;  %v10466_v51 = vcombine.low %v5756_v58, %v5760_v60  ;;  %v5740_v2 = vld [vmem:[#allocation23 + $0x618] sm:$0xff] }
 0x829   :  { %v5956_v18 = vld [vmem:[#allocation23 + $0xcd8] sm:$0xff] }
 0x82a   :  { %9197 = vmatpush1.bf16.msra.mxu1 %v10426_v31  ;;  %v5752_v31 = vld [vmem:[#allocation23 + $0x678] sm:$0xff] }
 0x82b   :  { %9198 = vmatprep.subr.bf16.mxu1 %v10419_v11  ;;  %v10459_v38 = vcombine.high %v5748_v10, %v5752_v31  ;;  %v10458_v33 = vcombine.low %v5748_v10, %v5752_v31  ;;  %v5960_v46 = vld [vmem:[#allocation23 + $0xcf8] sm:$0xff] }
 0x82c   :  { %v5948_v58 = vld [vmem:[#allocation23 + $0xc98] sm:$0xff] }
 0x82d   :  { %v5952_v60 = vld [vmem:[#allocation23 + $0xcb8] sm:$0xff] }
 0x82e   :  { %9199 = vmatpush1.bf16.msra.mxu1 %v10418_v49  ;;  %v5744_v49 = vld [vmem:[#allocation23 + $0x638] sm:$0xff] }
 0x82f   :  { %9200 = vmatprep.subr.bf16.mxu1 %v10411_v23  ;;  %v5940_v10 = vld [vmem:[#allocation23 + $0xc58] sm:$0xff] }
 0x830   :  { %v5944_v31 = vld [vmem:[#allocation23 + $0xc78] sm:$0xff] }
 0x832   :  { %9201 = vmatpush1.bf16.msra.mxu1 %v10410_v16  ;;  %v10451_v16 = vcombine.high %v5740_v2, %v5744_v49 }
 0x833   :  { %9202 = vmatprep.subr.bf16.mxu1 %v10403_v37  ;;  %v5988_v37 = vld [vmem:[#allocation23 + $0xdd8] sm:$0xff] }
 0x836   :  { %9203 = vmatpush1.bf16.msra.mxu1 %v10402_v17  ;;  %v10450_v17 = vcombine.low %v5740_v2, %v5744_v49  ;;  %v5936_v2 = vld [vmem:[#allocation23 + $0xc38] sm:$0xff]  ;;  %v10650_v49 = vcombine.low %v5940_v10, %v5944_v31 }
 0x837   :  { %9204 = vmatprep.subr.bf16.mxu1 %v10395_v40  ;;  %v10699_v40 = vcombine.high %v5988_v37, %v5992_v20 }
 0x83a   :  { %9205 = vmatpush1.bf16.msra.mxu1 %v10394_v48  ;;  %v10698_v48 = vcombine.low %v5988_v37, %v5992_v20 }
 0x83b   :  { %9206 = vmatprep.subr.bf16.mxu1 %v10387_v50  ;;  %v10691_v50 = vcombine.high %v5980_v12, %v5984_v34 }
 0x83e   :  { %9207 = vmatpush1.bf16.msra.mxu1 %v10386_v4  ;;  %v5976_v4 = vld [vmem:[#allocation23 + $0xd78] sm:$0xff] }
 0x83f   :  { %9208 = vmatprep.subr.bf16.mxu1 %v10507_v41  ;;  %v10683_v57 = vcombine.high %v5972_v14, %v5976_v4 }
 0x842   :  { %9209 = vmatpush2.bf16.msra.mxu1 %v10506_v13  ;;  %v8942_v13 = vadd.f32 %v12683_v35, %v12731_v43 }
 0x843   :  { %9210 = vmatprep.subr.bf16.mxu1 %v10499_v21  ;;  %v10690_v21 = vcombine.low %v5980_v12, %v5984_v34  ;;  %v6036_v34 = vld [vmem:[#allocation23 + $0xf58] sm:$0xff] }
 0x846   :  { %9211 = vmatpush2.bf16.msra.mxu1 %v10498_v56  ;;  %v9340_v56 = vrot.slane %v12685_v36, %v12541_v32  ;;  %v10667_v32 = vcombine.high %v5956_v18, %v5960_v46 }
 0x847   :  { %9212 = vmatprep.subr.bf16.mxu1 %v10491_v63  ;;  %v5964_v63 = vld [vmem:[#allocation23 + $0xd18] sm:$0xff] }
 0x84a   :  { %9213 = vmatpush2.bf16.msra.mxu1 %v10490_v8  ;;  %v10682_v8 = vcombine.low %v5972_v14, %v5976_v4  ;;  %v6028_v14 = vld [vmem:[#allocation23 + $0xf18] sm:$0xff] }
 0x84b   :  { %9214 = vmatprep.subr.bf16.mxu1 %v10483_v26  ;;  %v10675_v26 = vcombine.high %v5964_v63, %v5968_v22  ;;  %v6032_v4 = vld [vmem:[#allocation23 + $0xf38] sm:$0xff] }
 0x84e   :  { %9215 = vmatpush2.bf16.msra.mxu1 %v10482_v47 }
 0x84f   :  { %9216 = vmatprep.subr.bf16.mxu1 %v10475_v55  ;;  %v10674_v55 = vcombine.low %v5964_v63, %v5968_v22  ;;  %v6004_v63 = vld [vmem:[#allocation23 + $0xe58] sm:$0xff] }
 0x850   :  { %v6008_v22 = vld [vmem:[#allocation23 + $0xe78] sm:$0xff] }
 0x852   :  { %9217 = vmatpush2.bf16.msra.mxu1 %v10474_v28  ;;  %v10666_v28 = vcombine.low %v5956_v18, %v5960_v46 }
 0x853   :  { %v12733_v11 = vpop.f32.mrf.mxu0  ;;  %9218 = vmatprep.subr.bf16.mxu1 %v10467_v9  ;;  %v10659_v9 = vcombine.high %v5948_v58, %v5952_v60 }
 0x855   :  { %v12735_v23 = vpop.f32.mrf.mxu0 }
 0x856   :  { %9219 = vmatpush2.bf16.msra.mxu1 %v10466_v51  ;;  %v10658_v51 = vcombine.low %v5948_v58, %v5952_v60  ;;  %v6082_v58 = vrot.slane %v12717_v1, %v12587_v61  ;;  %v9483_v60 = vld [vmem:[%s12821_s23 + $0x8] sm:$0x3] }
 0x857   :  { %v9107_v24 = vpop.f32.mrf.mxu0  ;;  %9220 = vmatprep.subr.bf16.mxu1 %v10459_v38  ;;  %v5932_v38 = vld [vmem:[#allocation23 + $0xc18] sm:$0xff] }
 0x858   :  { %v6052_v24 = vld [vmem:[#allocation23 + $0xfd8] sm:$0xff]  ;;  %v10642_v37 = vcombine.low %v5932_v38, %v5936_v2 }
 0x859   :  { %v9108_v42 = vpop.f32.mrf.mxu0 }
 0x85a   :  { %9221 = vmatpush2.bf16.msra.mxu1 %v10458_v33  ;;  %v10643_v33 = vcombine.high %v5932_v38, %v5936_v2  ;;  %v6044_v42 = vld [vmem:[#allocation23 + $0xf98] sm:$0xff] }
 0x85b   :  { %9222 = vmatprep.subr.bf16.mxu1 %v10451_v16  ;;  %v6056_v16 = vld [vmem:[#allocation23 + $0xff8] sm:$0xff] }
 0x85c   :  { %v10763_v20 = vcombine.high %v6052_v24, %v6056_v16 }
 0x85e   :  { %9223 = vmatpush2.bf16.msra.mxu1 %v10450_v17  ;;  %v6048_v17 = vld [vmem:[#allocation23 + $0xfb8] sm:$0xff] }
 0x85f   :  { %9274 = vmatprep.subr.bf16.mxu1 %v10699_v40  ;;  %v10762_v40 = vcombine.low %v6052_v24, %v6056_v16  ;;  %v10755_v12 = vcombine.high %v6044_v42, %v6048_v17  ;;  %v10765_v16 = vld [vmem:[#allocation29] ss:$0 sm:$0xff] }
 0x861   :  { %v8980_v41 = vpop.f32.mrf.mxu1  ;;  %9225 = vmatmul.mubr.bf16.vlgmr.msra.gmra.mxu1 %v12613_v30 }
 0x862   :  { %v8981_v7 = vadd.f32 %v8980_v41, %v8940_v6  ;;  %9275 = vmatpush1.bf16.msra.mxu1 %v10698_v48  ;;  %9306 = vmatprep.mubr.bf16.mxu1 %v12649_v59  ;;  %v6040_v48 = vld [vmem:[#allocation23 + $0xf78] sm:$0xff] }
 0x863   :  { %v8982_v19 = vpop.f32.mrf.mxu1  ;;  %9276 = vmatprep.subr.bf16.mxu1 %v10691_v50  ;;  %v10754_v50 = vcombine.low %v6044_v42, %v6048_v17  ;;  %v10747_v6 = vcombine.high %v6036_v34, %v6040_v48  ;;  %v10746_v41 = vcombine.low %v6036_v34, %v6040_v48 }
 0x864   :  { %v9317_v44 = vmax.f32 %v8981_v7, 0.0  ;;  %v8983_v15 = vadd.f32 %v8982_v19, %v8942_v13  ;;  %v6020_v7 = vld [vmem:[#allocation23 + $0xed8] sm:$0xff] }
 0x865   :  { %v8984_v27 = vpop.f32.mrf.mxu1  ;;  %v6024_v13 = vld [vmem:[#allocation23 + $0xef8] sm:$0xff] }
 0x866   :  { %v9367_v30 = vmul.f32 %v9336_v25, %v9317_v44  ;;  %v9318_v29 = vmax.f32 %v8983_v15, 0.0  ;;  %9277 = vmatpush1.bf16.msra.mxu1 %v10690_v21  ;;  %v10739_v25 = vcombine.high %v6028_v14, %v6032_v4  ;;  %v10738_v21 = vcombine.low %v6028_v14, %v6032_v4  ;;  %v6016_v44 = vld [vmem:[#allocation23 + $0xeb8] sm:$0xff] }
 0x867   :  { %v8985_v59 = vpop.f32.mrf.mxu1  ;;  %9278 = vmatprep.subr.bf16.mxu1 %v10683_v57  ;;  %v10731_v19 = vcombine.high %v6020_v7, %v6024_v13  ;;  %v6012_v57 = vld [vmem:[#allocation23 + $0xe98] sm:$0xff]  ;;  %v10730_v15 = vcombine.low %v6020_v7, %v6024_v13  ;;  %v9348_v14 = vrot.slane %v12685_v36, %v12587_v61  ;;  %v6086_v61 = vrot.slane %v12717_v1, %v12632_v52 }
 0x868   :  { %v9374_v35 = vadd.f32 %v12695_v53, %v9367_v30  ;;  %v9368_v43 = vmul.f32 %v9340_v56, %v9318_v29  ;;  %v10651_v53 = vcombine.high %v5940_v10, %v5944_v31  ;;  %v10723_v56 = vcombine.high %v6012_v57, %v6016_v44  ;;  %v6000_v59 = vld [vmem:[#allocation23 + $0xe38] sm:$0xff]  ;;  %v9482_v10 = vld [vmem:[%s12821_s23] sm:$0xff] }
 0x869   :  { %v10722_v27 = vcombine.low %v6012_v57, %v6016_v44  ;;  %v10715_v29 = vcombine.high %v6004_v63, %v6008_v22  ;;  %v9024_v31 = vadd.f32 %v12709_v0, %v6082_v58 }
 0x86a   :  { %v12748_v47 = vadd.f32 %v9374_v35, %v9368_v43  ;;  %9279 = vmatpush1.bf16.msra.mxu1 %v10682_v8  ;;  %v5996_v8 = vld [vmem:[#allocation23 + $0xe18] sm:$0xff]  ;;  %v10714_v35 = vcombine.low %v6004_v63, %v6008_v22 }
 0x86b   :  { %9280 = vmatprep.subr.bf16.mxu1 %v10675_v26  ;;  %v10707_v18 = vcombine.high %v5996_v8, %v6000_v59 }
 0x86e   :  { %9281 = vmatpush1.bf16.msra.mxu1 %v10674_v55  ;;  %v10706_v55 = vcombine.low %v5996_v8, %v6000_v59  ;;  %v9352_v59 = vrot.slane %v12685_v36, %v12632_v52  ;;  %v10767_v52 = vld [vmem:[#allocation30] ss:$0 sm:$0xff] }
 0x86f   :  { %9282 = vmatprep.subr.bf16.mxu1 %v10667_v32  ;;  %v6078_v32 = vrot.slane %v12717_v1, %v12584_v62 }
 0x872   :  { %9283 = vmatpush1.bf16.msra.mxu1 %v10666_v28  ;;  %v9022_v28 = vadd.f32 %v12701_v45, %v6078_v32 }
 0x873   :  { %9284 = vmatprep.subr.bf16.mxu1 %v10659_v9 }
 0x876   :  { %9285 = vmatpush1.bf16.msra.mxu1 %v10658_v51 }
 0x877   :  { %9286 = vmatprep.subr.bf16.mxu1 %v10651_v53 }
 0x87a   :  { %9287 = vmatpush1.bf16.msra.mxu1 %v10650_v49 }
 0x87b   :  { %9288 = vmatprep.subr.bf16.mxu1 %v10643_v33 }
 0x87e   :  { %9289 = vmatpush1.bf16.msra.mxu1 %v10642_v37 }
 0x87f   :  { %9290 = vmatprep.subr.bf16.mxu1 %v10763_v20 }
 0x882   :  { %9291 = vmatpush2.bf16.msra.mxu1 %v10762_v40 }
 0x883   :  { %9292 = vmatprep.subr.bf16.mxu1 %v10755_v12 }
 0x886   :  { %9293 = vmatpush2.bf16.msra.mxu1 %v10754_v50 }
 0x887   :  { %9294 = vmatprep.subr.bf16.mxu1 %v10747_v6 }
 0x88a   :  { %9295 = vmatpush2.bf16.msra.mxu1 %v10746_v41 }
 0x88b   :  { %9296 = vmatprep.subr.bf16.mxu1 %v10739_v25 }
 0x88e   :  { %9297 = vmatpush2.bf16.msra.mxu1 %v10738_v21 }
 0x88f   :  { %9298 = vmatprep.subr.bf16.mxu1 %v10731_v19 }
 0x892   :  { %9299 = vmatpush2.bf16.msra.mxu1 %v10730_v15  ;;  %v6090_v15 = vrot.slane %v12717_v1, %v12635_v39 }
 0x893   :  { %v12750_v30 = vpop.f32.mrf.mxu0  ;;  %9300 = vmatprep.subr.bf16.mxu1 %v10723_v56 }
 0x895   :  { %v12752_v26 = vpop.f32.mrf.mxu0 }
 0x896   :  { %9301 = vmatpush2.bf16.msra.mxu1 %v10722_v27  ;;  %v9188_v56 = vadd.f32 %v12752_v26, %v6090_v15 }
 0x897   :  { %v9189_v43 = vpop.f32.mrf.mxu0  ;;  %9302 = vmatprep.subr.bf16.mxu1 %v10715_v29 }
 0x899   :  { %v9190_v46 = vpop.f32.mrf.mxu0 }
 0x89a   :  { %9303 = vmatpush2.bf16.msra.mxu1 %v10714_v35 }
 0x89b   :  { %9304 = vmatprep.subr.bf16.mxu1 %v10707_v18 }
 0x89e   :  { %9305 = vmatpush2.bf16.msra.mxu1 %v10706_v55  ;;  %v9356_v55 = vrot.slane %v12685_v36, %v12635_v39  ;;  %v10764_v39 = vld [vmem:[#allocation4] ss:$0 sm:$0xff] }
 0x89f   :  { %11133 = vmatprep.subr.mxu1 %v11554_v3 }
 0x8a1   :  { %v9062_v9 = vpop.f32.mrf.mxu1  ;;  %9307 = vmatmul.mubr.bf16.vlgmr.msra.gmra.mxu1 %v12651_v54 }
 0x8a2   :  { %v9063_v51 = vadd.f32 %v9062_v9, %v9022_v28  ;;  %11134 = vmatpush3.msk.msra.mxu1 %vm1224_vm6, %v9483_v60  ;;  %11137 = vmatprep.mubr.msk.f32.mxu1 %vm11555_vm0, %v11554_v3  ;;  %v9701_v9 = vld [vmem:[#allocation3] ss:$0 sm:$0xff] }
 0x8a3   :  { %v9064_v53 = vpop.f32.mrf.mxu1  ;;  %11135 = vmatprep.subr.mxu1 %v11554_v3  ;;  %v9344_v3 = vrot.slane %v12685_v36, %v12584_v62  ;;  %v9568_v62 = vld [vmem:[%s12823_s25] sm:$0x1f]  ;;  %s11557_s25 = smov 34  }
 0x8a4   :  { %v9065_v38 = vadd.f32 %v9064_v53, %v9024_v31  ;;  %11136 = vmatpush3.msra.mxu1 %v9482_v10  ;;  %v9104_v17 = vadd.f32 %v12733_v11, %v9063_v51  ;;  %11141 = vmatpush3.msk.msra.mxu0 %vm1311_vm9, %v9568_v62  ;;  %v1382_v10 = vadd.f32 %v9701_v9, %v12473_v5 }
 0x8a5   :  { %v9066_v45 = vpop.f32.mrf.mxu1 }
 0x8a6   :  { %v9106_v34 = vadd.f32 %v12735_v23, %v9065_v38 }
 0x8a7   :  { %v9067_v2 = vpop.f32.mrf.mxu1 }
 0x8d3   :  { %v9267_v54 = vpop.f32.mrf.mxu0 }
 0x8d5   :  { %v9269_v49 = vpop.f32.mrf.mxu0 }
 0x8d7   :  { %v9271_v33 = vpop.f32.mrf.mxu0 }
 0x8d9   :  { %v9272_v24 = vpop.f32.mrf.mxu0 }
 0x8db   :  { %v9477_v37 = vpop.f32.mrf.mxu0 }
 0x8dc   :  { %v9478_v0 = vadd.f32 %v10765_v16, %v9477_v37 }
 0x8dd   :  { %v11132_v20 = vpop.f32.mrf.mxu0 }
 0x8de   :  { %v9481_v42 = vmax.f32 %v9478_v0, 0.0 }
 0x8e0   :  { %11138 = vmatmul.mubr.msk.f32.vlgmr.msra.gmra.mxu1 %vm1220_vm8, %v9481_v42 }
 0x8e1   :  { %v9144_v40 = vpop.f32.mrf.mxu1 }
 0x8e2   :  { %v9145_v12 = vadd.f32 %v9144_v40, %v9104_v17 }
 0x8e3   :  { %v9146_v48 = vpop.f32.mrf.mxu1 }
 0x8e4   :  { %v9319_v50 = vmax.f32 %v9145_v12, 0.0  ;;  %v9147_v6 = vadd.f32 %v9146_v48, %v9106_v34 }
 0x8e5   :  { %v9148_v4 = vpop.f32.mrf.mxu1 }
 0x8e6   :  { %v9369_v41 = vmul.f32 %v9344_v3, %v9319_v50  ;;  %v9320_v25 = vmax.f32 %v9147_v6, 0.0 }
 0x8e7   :  { %v9149_v7 = vpop.f32.mrf.mxu1 }
 0x8e8   :  { %v9376_v13 = vadd.f32 %v12748_v47, %v9369_v41  ;;  %v9370_v11 = vmul.f32 %v9348_v14, %v9320_v25  ;;  %v9186_v47 = vadd.f32 %v12750_v30, %v6086_v61 }
 0x8ea   :  { %v9377_v21 = vadd.f32 %v9376_v13, %v9370_v11 }
 0x921   :  { %v9226_v19 = vpop.f32.mrf.mxu1 }
 0x922   :  { %v9227_v63 = vadd.f32 %v9226_v19, %v9186_v47 }
 0x923   :  { %v9228_v57 = vpop.f32.mrf.mxu1 }
 0x924   :  { %v9229_v22 = vadd.f32 %v9228_v57, %v9188_v56  ;;  %v9268_v27 = vadd.f32 %v9267_v54, %v9227_v63  ;;  %v10770_v54 = vld [vmem:[#allocation5] ss:$0 sm:$0xff] }
 0x925   :  { %v9230_v23 = vpop.f32.mrf.mxu1 }
 0x926   :  { %v9270_v35 = vadd.f32 %v9269_v49, %v9229_v22 }
 0x927   :  { %v9231_v44 = vpop.f32.mrf.mxu1 }
 0x961   :  { %v9308_v29 = vpop.f32.mrf.mxu1 }
 0x962   :  { %v9309_v8 = vadd.f32 %v9308_v29, %v9268_v27 }
 0x963   :  { %v9310_v43 = vpop.f32.mrf.mxu1 }
 0x964   :  { %v9321_v18 = vmax.f32 %v9309_v8, 0.0  ;;  %v9311_v46 = vadd.f32 %v9310_v43, %v9270_v35 }
 0x965   :  { %v9312_v1 = vpop.f32.mrf.mxu1 }
 0x966   :  { %v9371_v32 = vmul.f32 %v9352_v59, %v9321_v18  ;;  %v9322_v30 = vmax.f32 %v9311_v46, 0.0 }
 0x967   :  { %v9313_v58 = vpop.f32.mrf.mxu1 }
 0x968   :  { %v9372_v26 = vmul.f32 %v9356_v55, %v9322_v30  ;;  %v9378_v60 = vadd.f32 %v9377_v21, %v9371_v32 }
 0x96a   :  { %v9379_v28 = vadd.f32 %v9378_v60, %v9372_v26 }
 0x96c   :  { %9380 = vadd.xlane.f32.xlu0 %v9379_v28 }
 0x982   :  { %1386 = vrot.lane.b32.xlu0 %v1382_v10, %s11557_s25 }
 0x9a0   :  { %v9563_v31 = vpop.f32.mrf.mxu1 }
 0x9a1   :  { %v9564_v51 = vadd.f32 %v10767_v52, %v9563_v31 }
 0x9a2   :  { %v11139_v53 = vpop.f32.mrf.mxu1 }
 0x9a3   :  { %v9567_v38 = vmax.f32 %v9564_v51, 0.0 }
 0x9a5   :  { %11143 = vmatmul.mubr.msk.f32.vlgmr.msra.gmra.mxu0 %vm1307_vm10, %v9567_v38 }
 0x9f5   :  { %v9381_v36 = vpop.xlane.xlu0 %9380 }
 0x9f6   :  { %v9389_v45 = vadd.f32 %v10764_v39, %v9381_v36 }
 0x9f8   :  { %9391 = vrot.lane.b32.xlu1 %v9389_v45, %s11558_s16 }
 0x9f9   :  { %v1387_v2 = vpop.permute.xlu0 %1386 }
 0x9fa   :  { %1390 = vst.msk [vmem:[#allocation32] sm:$0x3] %vm1389_vm12, %v1387_v2 }
 0xa65   :  { %v9648_v49 = vpop.f32.mrf.mxu0 }
 0xa66   :  { %v9649_v5 = vadd.f32 %v10770_v54, %v9648_v49 }
 0xa67   :  { %v11144_v33 = vpop.f32.mrf.mxu0 }
 0xa68   :  { %9653 = vrot.lane.b32.xlu1 %v9649_v5, %s11559_s3 }
 0xa6a   :  { %v9392_v24 = vpop.permute.xlu1 %9391 }
 0xa6b   :  { %9395 = vst.msk [vmem:[#allocation32] sm:$0x3] %vm9394_vm13, %v9392_v24 }
 0xada   :  { %v9654_v16 = vpop.permute.xlu1 %9653 }
 0xadb   :  { %9657 = vst.msk [vmem:[#allocation32] sm:$0x3] %vm9656_vm14, %v9654_v16 }
 0xadc   :  { %11505 = shalt.err (!%p11502_p0)
}
 0xadd   :  { %9667 = dma.vmem_to_hbm [thread:$0]  %s9665_s4, 32, %s12824_s27, [#allocation8]  }
 0xade   :  { %11532 = dma.done.wait [#allocation8], 32  }
 0xadf   :  { %11533 = vsyncadd [#allocation8], 4294967264 }
 0xae0   :  { %9671 = vsyncpa [#allocation7], 1 }
 0xae1   :  { %9672 = vsyncpa [#allocation10], 1 }
 0xae2   :  { %9673 = vsyncpa [#allocation13], 1 }
 0xae3   :  { %9674 = vsyncpa [#allocation16], 1 }
 0xae4   :  { %9675 = vsyncpa [#allocation19], 1 }
 0xae5   :  { %9676 = vsyncpa [#allocation22], 1 }
 0xae6   :  { %9677 = vsyncpa [#allocation25], 1 }
 0xae7   :  { %9678 = vsyncpa [#allocation28], 1 }
 0xae8   :  { %9679 = vsyncpa [#allocation31], 1 }
 0xae9   :  { %9680 = vsyncpa [#allocation8], 1 }

</bundles_post_ra>
